<compile_context>
chip_gen: v7x
topology: tpu7x:2x2x1
jax: 0.10.0
libtpu: 0.0.40
codegen_flags: <defaults>
</compile_context>

<pallas_src>
import jax
import jax.numpy as jnp
from jax.experimental import pallas as pl
from jax.experimental.pallas import tpu as pltpu


def cnn_block_kernel(x_ref, w_ref, b_ref, o_ref, acc_ref):
    # x_ref : (1, 1, 4, THp+1, Wpp+1, Cin) bf16  -- 4 spatial-parity planes (+1 halo row/col)
    # w_ref : (9, Cin, Coutp)              bf16  -- tap-major (kh*3+kw) conv weights
    # b_ref : (1, Coutp)                   f32
    # o_ref : (1, THp, Wpp, Coutp)         f32   -- pooled NHWC output tile
    # acc_ref: (4, THp*Wpp, Coutp)         f32   -- per-pool-position accumulators
    _, thp, wpp, coutp = o_ref.shape
    cin = x_ref.shape[-1]

    for q in range(4):                              # 2x2 pool position (dy, dx)
        dy, dx = divmod(q, 2)
        for t in range(9):                          # 3x3 conv tap (kh, kw)
            kh, kw = divmod(t, 3)
            py, ry = (dy + kh) % 2, (dy + kh) // 2  # parity plane / plane-row offset
            px, rx = (dx + kw) % 2, (dx + kw) // 2
            tap = x_ref[0, 0, 2 * py + px, pl.ds(ry, thp), pl.ds(rx, wpp), :]
            lhs = tap.reshape(thp * wpp, cin)       # layout-free: wpp % 8 == 0
            d = jnp.dot(lhs, w_ref[t], preferred_element_type=jnp.float32)
            if t == 0:
                acc_ref[q] = d
            else:
                acc_ref[q] += d

    m = jnp.max(acc_ref[...], axis=0)               # 2x2 max-pool: element-aligned VPU max
    out = jnp.maximum(m + b_ref[...], 0.0)          # bias + ReLU once, after the max (exact)
    o_ref[0] = out.reshape(thp, wpp, coutp).astype(o_ref.dtype)


def _round_up(v, m):
    return -(-v // m) * m


def _vmem_limit_bytes():
    # Per-generation VMEM budgeting: ~40 MiB on v7x (64 MiB/TC), ~80 MiB on
    # v5e/v6e (128 MiB).  Falls back to the v7x-safe value if the query fails.
    try:
        cap = pltpu.get_tpu_info().vmem_capacity_bytes
    except Exception:
        cap = 64 * 1024 * 1024
    if not cap or cap <= 0:
        cap = 64 * 1024 * 1024
    return min(int(cap * 0.625), 80 * 1024 * 1024)


def cnn_block_forward(x_nchw, w_oihw, bias):
    N, Cin, H, W = x_nchw.shape
    Cout = w_oihw.shape[0]
    assert H % 2 == 0 and W % 2 == 0, "MaxPool2d(2,2,stride=2) needs even H and W"
    Hp, Wp = H // 2, W // 2

    # ---- layout / padding choices --------------------------------------------
    Wpp = _round_up(Wp, 8)                      # pooled width, sublane aligned
    # Lane-dense (128) output only when Cout is big enough to amortise it.
    Coutp = _round_up(Cout, 128) if Cout >= 64 else _round_up(Cout, 8)

    # ---- adaptive pooled-row tile from a per-generation VMEM budget ----------
    vmem_limit = _vmem_limit_bytes()
    budget = int(vmem_limit * 0.6)
    in_row = 4 * _round_up(Wpp + 1, 8) * _round_up(Cin, 128) * 2          # bf16, VMEM-padded
    out_row = _round_up(Wpp, 8) * _round_up(Coutp, 128) * 4
    acc_row = 4 * Wpp * _round_up(Coutp, 128) * 4
    w_bytes = (2 * 9 * _round_up(Cin, 8) * _round_up(Coutp, 128) * 2
               + 2 * 8 * _round_up(Coutp, 128) * 4)
    per_row = 2 * in_row + 2 * out_row + acc_row                          # dbl-buffered in/out
    THp = max(1, min(Hp, (budget - w_bytes - 2 * in_row) // per_row))
    R = -(-Hp // THp)                            # number of pooled-row tiles
    THp = -(-Hp // R)                            # re-balance; pad Hp by <= R-1 rows
    Hp_pad = R * THp

    # ---- activation: NCHW -> NHWC, halo pad, parity split, per-tile halo -----
    x = jnp.transpose(x_nchw, (0, 2, 3, 1))                               # (N,H,W,Cin)
    x = jnp.pad(x, ((0, 0),
                    (1, 2 * (Hp_pad - Hp) + 1),
                    (1, 2 * (Wpp - Wp) + 1),
                    (0, 0)))                                              # (N,2Hp_pad+2,2Wpp+2,Cin)
    planes = x.reshape(N, Hp_pad + 1, 2, Wpp + 1, 2, Cin)
    planes = planes.transpose(0, 2, 4, 1, 3, 5)                           # (N,2,2,Hp_pad+1,Wpp+1,Cin)
    planes = planes.reshape(N, 4, Hp_pad + 1, Wpp + 1, Cin)
    if R == 1:
        slab = planes[:, None]
    else:
        slab = jnp.stack(
            [planes[:, :, r * THp:r * THp + THp + 1] for r in range(R)], axis=1)
    slab = slab.astype(jnp.bfloat16)                                      # (N,R,4,THp+1,Wpp+1,Cin)

    # ---- weights / bias -------------------------------------------------------
    # (Cout,Cin,3,3) -> (kh,kw,Cin,Cout) -> (9,Cin,Cout): matches in-kernel tap order.
    w = jnp.transpose(w_oihw, (2, 3, 1, 0)).reshape(9, Cin, Cout)
    b = bias
    if Coutp != Cout:
        w = jnp.pad(w, ((0, 0), (0, 0), (0, Coutp - Cout)))
        b = jnp.pad(b, (0, Coutp - Cout))
    w = w.astype(jnp.bfloat16)
    b = b.reshape(1, Coutp).astype(jnp.float32)

    # ---- grid: larger parallel axis first (megacore balance on v7x) ----------
    if R >= N:
        grid = (R, N)
        x_map = lambda r, n: (n, r, 0, 0, 0, 0)
        o_map = lambda r, n: (n, r, 0, 0)
    else:
        grid = (N, R)
        x_map = lambda n, r: (n, r, 0, 0, 0, 0)
        o_map = lambda n, r: (n, r, 0, 0)

    out = pl.pallas_call(
        cnn_block_kernel,
        out_shape=jax.ShapeDtypeStruct((N, Hp_pad, Wpp, Coutp), jnp.float32),
        grid=grid,
        in_specs=[
            pl.BlockSpec((1, 1, 4, THp + 1, Wpp + 1, Cin), x_map),
            pl.BlockSpec((9, Cin, Coutp), lambda i, j: (0, 0, 0)),
            pl.BlockSpec((1, Coutp), lambda i, j: (0, 0)),
        ],
        out_specs=pl.BlockSpec((1, THp, Wpp, Coutp), o_map),
        scratch_shapes=[pltpu.VMEM((4, THp * Wpp, Coutp), jnp.float32)],
        compiler_params=pltpu.CompilerParams(
            dimension_semantics=("parallel", "parallel"),
            vmem_limit_bytes=vmem_limit,
        ),
    )(slab, w, b)

    # Back to the PyTorch contract: NCHW (N, Cout, H//2, W//2).
    out = out[:, :Hp, :Wp, :Cout]
    return jnp.transpose(out, (0, 3, 1, 2))


if __name__ == "__main__":
    N, Cin, Cout, H, W = 2, 4, 8, 16, 16

    key = jax.random.PRNGKey(0)
    kx, kw, kb = jax.random.split(key, 3)
    x = jax.random.normal(kx, (N, Cin, H, W), jnp.float32)

    # deterministic, PyTorch-default-like (kaiming-uniform) init
    fan_in = Cin * 3 * 3
    bound = 1.0 / (fan_in ** 0.5)
    w = jax.random.uniform(kw, (Cout, Cin, 3, 3), jnp.float32, -bound, bound)
    b = jax.random.uniform(kb, (Cout,), jnp.float32, -bound, bound)

    y = cnn_block_forward(x, w, b)
    y = jax.block_until_ready(y)

    # pure-JAX reference of the PyTorch forward pass (f32)
    y_conv = jax.lax.conv_general_dilated(
        x, w, window_strides=(1, 1), padding=((1, 1), (1, 1)),
        dimension_numbers=("NCHW", "OIHW", "NCHW"))
    y_conv = jnp.maximum(y_conv + b[None, :, None, None], 0.0)
    y_ref = jax.lax.reduce_window(y_conv, -jnp.inf, jax.lax.max,
                                  (1, 1, 2, 2), (1, 1, 2, 2), "VALID")

    assert y.shape == (N, Cout, H // 2, W // 2), y.shape
    # bf16 inputs with f32 accumulation -> loosened tolerance
    assert jnp.allclose(y, y_ref, atol=3e-2, rtol=3e-2), \
        float(jnp.max(jnp.abs(y - y_ref)))
    print("KERNEL_OK")
</pallas_src>

<mosaic_0001>
module attributes {stable_mosaic.version = 11 : i64} {
  func.func @cnn_block_kernel(%arg0: i32, %arg1: i32, %arg2: memref<1x1x4x9x9x4xbf16, #tpu.memory_space<vmem>>, %arg3: memref<9x4x8xbf16, #tpu.memory_space<vmem>>, %arg4: memref<1x8xf32, #tpu.memory_space<vmem>>, %arg5: memref<1x8x8x8xf32, #tpu.memory_space<vmem>>, %arg6: memref<4x64x8xf32, #tpu.memory_space<vmem>>) attributes {dimension_semantics = [#tpu.dimension_semantics<parallel>, #tpu.dimension_semantics<parallel>], iteration_bounds = array<i64: 2, 1>, scalar_prefetch = 0 : i64, scratch_operands = 1 : i64, tpu.core_type = #tpu.core_type<tc>, window_params = [{transform_indices = @transform_0, window_bounds = array<i64: 1, 1, 4, 9, 9, 4>}, {pipeline_mode = #tpu.pipeline_mode<synchronous>, transform_indices = @transform_1, window_bounds = array<i64: 9, 4, 8>}, {pipeline_mode = #tpu.pipeline_mode<synchronous>, transform_indices = @transform_2, window_bounds = array<i64: 1, 8>}, {transform_indices = @transform_3, window_bounds = array<i64: 1, 8, 8, 8>}]} {
    %c0 = arith.constant 0 : index
    %c0_0 = arith.constant 0 : index
    %c0_1 = arith.constant 0 : index
    %c0_2 = arith.constant 0 : index
    %c0_3 = arith.constant 0 : index
    %c0_4 = arith.constant 0 : index
    %0 = vector.load %arg2[%c0, %c0_0, %c0_1, %c0_2, %c0_3, %c0_4] : memref<1x1x4x9x9x4xbf16, #tpu.memory_space<vmem>>, vector<1x1x1x8x8x4xbf16>
    %1 = vector.shape_cast %0 : vector<1x1x1x8x8x4xbf16> to vector<8x8x4xbf16>
    %2 = vector.shape_cast %1 : vector<8x8x4xbf16> to vector<64x4xbf16>
    %c0_5 = arith.constant 0 : index
    %c0_6 = arith.constant 0 : index
    %c0_7 = arith.constant 0 : index
    %3 = vector.load %arg3[%c0_5, %c0_6, %c0_7] : memref<9x4x8xbf16, #tpu.memory_space<vmem>>, vector<1x4x8xbf16>
    %4 = vector.shape_cast %3 : vector<1x4x8xbf16> to vector<4x8xbf16>
    %cst = arith.constant dense<0.000000e+00> : vector<64x8xf32>
    %5 = tpu.matmul %2, %4, %cst {dimension_numbers = #tpu.dot_dimension_numbers<[1], [0], [0], [1], [0, 0, 1, 1], [], []>} : vector<64x4xbf16>, vector<4x8xbf16>, vector<64x8xf32> -> vector<64x8xf32>
    %c0_8 = arith.constant 0 : index
    %c0_9 = arith.constant 0 : index
    %c0_10 = arith.constant 0 : index
    %6 = vector.load %arg6[%c0_8, %c0_9, %c0_10] : memref<4x64x8xf32, #tpu.memory_space<vmem>>, vector<1x64x8xf32>
    %7 = vector.shape_cast %6 : vector<1x64x8xf32> to vector<64x8xf32>
    %8 = vector.shape_cast %5 : vector<64x8xf32> to vector<1x64x8xf32>
    tpu.vector_store %arg6[%c0_8, %c0_9, %c0_10], %8 {strides = array<i32>} : memref<4x64x8xf32, #tpu.memory_space<vmem>>, vector<1x64x8xf32>,
    %c0_11 = arith.constant 0 : index
    %c0_12 = arith.constant 0 : index
    %c1 = arith.constant 1 : index
    %c0_13 = arith.constant 0 : index
    %c0_14 = arith.constant 0 : index
    %c0_15 = arith.constant 0 : index
    %9 = vector.load %arg2[%c0_11, %c0_12, %c1, %c0_13, %c0_14, %c0_15] : memref<1x1x4x9x9x4xbf16, #tpu.memory_space<vmem>>, vector<1x1x1x8x8x4xbf16>
    %10 = vector.shape_cast %9 : vector<1x1x1x8x8x4xbf16> to vector<8x8x4xbf16>
    %11 = vector.shape_cast %10 : vector<8x8x4xbf16> to vector<64x4xbf16>
    %c1_16 = arith.constant 1 : index
    %c0_17 = arith.constant 0 : index
    %c0_18 = arith.constant 0 : index
    %12 = vector.load %arg3[%c1_16, %c0_17, %c0_18] : memref<9x4x8xbf16, #tpu.memory_space<vmem>>, vector<1x4x8xbf16>
    %13 = vector.shape_cast %12 : vector<1x4x8xbf16> to vector<4x8xbf16>
    %cst_19 = arith.constant dense<0.000000e+00> : vector<64x8xf32>
    %14 = tpu.matmul %11, %13, %cst_19 {dimension_numbers = #tpu.dot_dimension_numbers<[1], [0], [0], [1], [0, 0, 1, 1], [], []>} : vector<64x4xbf16>, vector<4x8xbf16>, vector<64x8xf32> -> vector<64x8xf32>
    %c0_20 = arith.constant 0 : index
    %c0_21 = arith.constant 0 : index
    %c0_22 = arith.constant 0 : index
    %15 = vector.load %arg6[%c0_20, %c0_21, %c0_22] : memref<4x64x8xf32, #tpu.memory_space<vmem>>, vector<1x64x8xf32>
    %16 = vector.shape_cast %15 : vector<1x64x8xf32> to vector<64x8xf32>
    %17 = arith.addf %16, %14 : vector<64x8xf32>
    %c0_23 = arith.constant 0 : index
    %c0_24 = arith.constant 0 : index
    %c0_25 = arith.constant 0 : index
    %18 = vector.load %arg6[%c0_23, %c0_24, %c0_25] : memref<4x64x8xf32, #tpu.memory_space<vmem>>, vector<1x64x8xf32>
    %19 = vector.shape_cast %18 : vector<1x64x8xf32> to vector<64x8xf32>
    %20 = vector.shape_cast %17 : vector<64x8xf32> to vector<1x64x8xf32>
    tpu.vector_store %arg6[%c0_23, %c0_24, %c0_25], %20 {strides = array<i32>} : memref<4x64x8xf32, #tpu.memory_space<vmem>>, vector<1x64x8xf32>,
    %c0_26 = arith.constant 0 : index
    %c0_27 = arith.constant 0 : index
    %c0_28 = arith.constant 0 : index
    %c0_29 = arith.constant 0 : index
    %c1_30 = arith.constant 1 : index
    %c0_31 = arith.constant 0 : index
    %21 = vector.load %arg2[%c0_26, %c0_27, %c0_28, %c0_29, %c1_30, %c0_31] : memref<1x1x4x9x9x4xbf16, #tpu.memory_space<vmem>>, vector<1x1x1x8x8x4xbf16>
    %22 = vector.shape_cast %21 : vector<1x1x1x8x8x4xbf16> to vector<8x8x4xbf16>
    %23 = vector.shape_cast %22 : vector<8x8x4xbf16> to vector<64x4xbf16>
    %c2 = arith.constant 2 : index
    %c0_32 = arith.constant 0 : index
    %c0_33 = arith.constant 0 : index
    %24 = vector.load %arg3[%c2, %c0_32, %c0_33] : memref<9x4x8xbf16, #tpu.memory_space<vmem>>, vector<1x4x8xbf16>
    %25 = vector.shape_cast %24 : vector<1x4x8xbf16> to vector<4x8xbf16>
    %cst_34 = arith.constant dense<0.000000e+00> : vector<64x8xf32>
    %26 = tpu.matmul %23, %25, %cst_34 {dimension_numbers = #tpu.dot_dimension_numbers<[1], [0], [0], [1], [0, 0, 1, 1], [], []>} : vector<64x4xbf16>, vector<4x8xbf16>, vector<64x8xf32> -> vector<64x8xf32>
    %c0_35 = arith.constant 0 : index
    %c0_36 = arith.constant 0 : index
    %c0_37 = arith.constant 0 : index
    %27 = vector.load %arg6[%c0_35, %c0_36, %c0_37] : memref<4x64x8xf32, #tpu.memory_space<vmem>>, vector<1x64x8xf32>
    %28 = vector.shape_cast %27 : vector<1x64x8xf32> to vector<64x8xf32>
    %29 = arith.addf %28, %26 : vector<64x8xf32>
    %c0_38 = arith.constant 0 : index
    %c0_39 = arith.constant 0 : index
    %c0_40 = arith.constant 0 : index
    %30 = vector.load %arg6[%c0_38, %c0_39, %c0_40] : memref<4x64x8xf32, #tpu.memory_space<vmem>>, vector<1x64x8xf32>
    %31 = vector.shape_cast %30 : vector<1x64x8xf32> to vector<64x8xf32>
    %32 = vector.shape_cast %29 : vector<64x8xf32> to vector<1x64x8xf32>
    tpu.vector_store %arg6[%c0_38, %c0_39, %c0_40], %32 {strides = array<i32>} : memref<4x64x8xf32, #tpu.memory_space<vmem>>, vector<1x64x8xf32>,
    %c0_41 = arith.constant 0 : index
    %c0_42 = arith.constant 0 : index
    %c2_43 = arith.constant 2 : index
    %c0_44 = arith.constant 0 : index
    %c0_45 = arith.constant 0 : index
    %c0_46 = arith.constant 0 : index
    %33 = vector.load %arg2[%c0_41, %c0_42, %c2_43, %c0_44, %c0_45, %c0_46] : memref<1x1x4x9x9x4xbf16, #tpu.memory_space<vmem>>, vector<1x1x1x8x8x4xbf16>
    %34 = vector.shape_cast %33 : vector<1x1x1x8x8x4xbf16> to vector<8x8x4xbf16>
    %35 = vector.shape_cast %34 : vector<8x8x4xbf16> to vector<64x4xbf16>
    %c3 = arith.constant 3 : index
    %c0_47 = arith.constant 0 : index
    %c0_48 = arith.constant 0 : index
    %36 = vector.load %arg3[%c3, %c0_47, %c0_48] : memref<9x4x8xbf16, #tpu.memory_space<vmem>>, vector<1x4x8xbf16>
    %37 = vector.shape_cast %36 : vector<1x4x8xbf16> to vector<4x8xbf16>
    %cst_49 = arith.constant dense<0.000000e+00> : vector<64x8xf32>
    %38 = tpu.matmul %35, %37, %cst_49 {dimension_numbers = #tpu.dot_dimension_numbers<[1], [0], [0], [1], [0, 0, 1, 1], [], []>} : vector<64x4xbf16>, vector<4x8xbf16>, vector<64x8xf32> -> vector<64x8xf32>
    %c0_50 = arith.constant 0 : index
    %c0_51 = arith.constant 0 : index
    %c0_52 = arith.constant 0 : index
    %39 = vector.load %arg6[%c0_50, %c0_51, %c0_52] : memref<4x64x8xf32, #tpu.memory_space<vmem>>, vector<1x64x8xf32>
    %40 = vector.shape_cast %39 : vector<1x64x8xf32> to vector<64x8xf32>
    %41 = arith.addf %40, %38 : vector<64x8xf32>
    %c0_53 = arith.constant 0 : index
    %c0_54 = arith.constant 0 : index
    %c0_55 = arith.constant 0 : index
    %42 = vector.load %arg6[%c0_53, %c0_54, %c0_55] : memref<4x64x8xf32, #tpu.memory_space<vmem>>, vector<1x64x8xf32>
    %43 = vector.shape_cast %42 : vector<1x64x8xf32> to vector<64x8xf32>
    %44 = vector.shape_cast %41 : vector<64x8xf32> to vector<1x64x8xf32>
    tpu.vector_store %arg6[%c0_53, %c0_54, %c0_55], %44 {strides = array<i32>} : memref<4x64x8xf32, #tpu.memory_space<vmem>>, vector<1x64x8xf32>,
    %c0_56 = arith.constant 0 : index
    %c0_57 = arith.constant 0 : index
    %c3_58 = arith.constant 3 : index
    %c0_59 = arith.constant 0 : index
    %c0_60 = arith.constant 0 : index
    %c0_61 = arith.constant 0 : index
    %45 = vector.load %arg2[%c0_56, %c0_57, %c3_58, %c0_59, %c0_60, %c0_61] : memref<1x1x4x9x9x4xbf16, #tpu.memory_space<vmem>>, vector<1x1x1x8x8x4xbf16>
    %46 = vector.shape_cast %45 : vector<1x1x1x8x8x4xbf16> to vector<8x8x4xbf16>
    %47 = vector.shape_cast %46 : vector<8x8x4xbf16> to vector<64x4xbf16>
    %c4 = arith.constant 4 : index
    %c0_62 = arith.constant 0 : index
    %c0_63 = arith.constant 0 : index
    %48 = vector.load %arg3[%c4, %c0_62, %c0_63] : memref<9x4x8xbf16, #tpu.memory_space<vmem>>, vector<1x4x8xbf16>
    %49 = vector.shape_cast %48 : vector<1x4x8xbf16> to vector<4x8xbf16>
    %cst_64 = arith.constant dense<0.000000e+00> : vector<64x8xf32>
    %50 = tpu.matmul %47, %49, %cst_64 {dimension_numbers = #tpu.dot_dimension_numbers<[1], [0], [0], [1], [0, 0, 1, 1], [], []>} : vector<64x4xbf16>, vector<4x8xbf16>, vector<64x8xf32> -> vector<64x8xf32>
    %c0_65 = arith.constant 0 : index
    %c0_66 = arith.constant 0 : index
    %c0_67 = arith.constant 0 : index
    %51 = vector.load %arg6[%c0_65, %c0_66, %c0_67] : memref<4x64x8xf32, #tpu.memory_space<vmem>>, vector<1x64x8xf32>
    %52 = vector.shape_cast %51 : vector<1x64x8xf32> to vector<64x8xf32>
    %53 = arith.addf %52, %50 : vector<64x8xf32>
    %c0_68 = arith.constant 0 : index
    %c0_69 = arith.constant 0 : index
    %c0_70 = arith.constant 0 : index
    %54 = vector.load %arg6[%c0_68, %c0_69, %c0_70] : memref<4x64x8xf32, #tpu.memory_space<vmem>>, vector<1x64x8xf32>
    %55 = vector.shape_cast %54 : vector<1x64x8xf32> to vector<64x8xf32>
    %56 = vector.shape_cast %53 : vector<64x8xf32> to vector<1x64x8xf32>
    tpu.vector_store %arg6[%c0_68, %c0_69, %c0_70], %56 {strides = array<i32>} : memref<4x64x8xf32, #tpu.memory_space<vmem>>, vector<1x64x8xf32>,
    %c0_71 = arith.constant 0 : index
    %c0_72 = arith.constant 0 : index
    %c2_73 = arith.constant 2 : index
    %c0_74 = arith.constant 0 : index
    %c1_75 = arith.constant 1 : index
    %c0_76 = arith.constant 0 : index
    %57 = vector.load %arg2[%c0_71, %c0_72, %c2_73, %c0_74, %c1_75, %c0_76] : memref<1x1x4x9x9x4xbf16, #tpu.memory_space<vmem>>, vector<1x1x1x8x8x4xbf16>
    %58 = vector.shape_cast %57 : vector<1x1x1x8x8x4xbf16> to vector<8x8x4xbf16>
    %59 = vector.shape_cast %58 : vector<8x8x4xbf16> to vector<64x4xbf16>
    %c5 = arith.constant 5 : index
    %c0_77 = arith.constant 0 : index
    %c0_78 = arith.constant 0 : index
    %60 = vector.load %arg3[%c5, %c0_77, %c0_78] : memref<9x4x8xbf16, #tpu.memory_space<vmem>>, vector<1x4x8xbf16>
    %61 = vector.shape_cast %60 : vector<1x4x8xbf16> to vector<4x8xbf16>
    %cst_79 = arith.constant dense<0.000000e+00> : vector<64x8xf32>
    %62 = tpu.matmul %59, %61, %cst_79 {dimension_numbers = #tpu.dot_dimension_numbers<[1], [0], [0], [1], [0, 0, 1, 1], [], []>} : vector<64x4xbf16>, vector<4x8xbf16>, vector<64x8xf32> -> vector<64x8xf32>
    %c0_80 = arith.constant 0 : index
    %c0_81 = arith.constant 0 : index
    %c0_82 = arith.constant 0 : index
    %63 = vector.load %arg6[%c0_80, %c0_81, %c0_82] : memref<4x64x8xf32, #tpu.memory_space<vmem>>, vector<1x64x8xf32>
    %64 = vector.shape_cast %63 : vector<1x64x8xf32> to vector<64x8xf32>
    %65 = arith.addf %64, %62 : vector<64x8xf32>
    %c0_83 = arith.constant 0 : index
    %c0_84 = arith.constant 0 : index
    %c0_85 = arith.constant 0 : index
    %66 = vector.load %arg6[%c0_83, %c0_84, %c0_85] : memref<4x64x8xf32, #tpu.memory_space<vmem>>, vector<1x64x8xf32>
    %67 = vector.shape_cast %66 : vector<1x64x8xf32> to vector<64x8xf32>
    %68 = vector.shape_cast %65 : vector<64x8xf32> to vector<1x64x8xf32>
    tpu.vector_store %arg6[%c0_83, %c0_84, %c0_85], %68 {strides = array<i32>} : memref<4x64x8xf32, #tpu.memory_space<vmem>>, vector<1x64x8xf32>,
    %c0_86 = arith.constant 0 : index
    %c0_87 = arith.constant 0 : index
    %c0_88 = arith.constant 0 : index
    %c1_89 = arith.constant 1 : index
    %c0_90 = arith.constant 0 : index
    %c0_91 = arith.constant 0 : index
    %69 = vector.load %arg2[%c0_86, %c0_87, %c0_88, %c1_89, %c0_90, %c0_91] : memref<1x1x4x9x9x4xbf16, #tpu.memory_space<vmem>>, vector<1x1x1x8x8x4xbf16>
    %70 = vector.shape_cast %69 : vector<1x1x1x8x8x4xbf16> to vector<8x8x4xbf16>
    %71 = vector.shape_cast %70 : vector<8x8x4xbf16> to vector<64x4xbf16>
    %c6 = arith.constant 6 : index
    %c0_92 = arith.constant 0 : index
    %c0_93 = arith.constant 0 : index
    %72 = vector.load %arg3[%c6, %c0_92, %c0_93] : memref<9x4x8xbf16, #tpu.memory_space<vmem>>, vector<1x4x8xbf16>
    %73 = vector.shape_cast %72 : vector<1x4x8xbf16> to vector<4x8xbf16>
    %cst_94 = arith.constant dense<0.000000e+00> : vector<64x8xf32>
    %74 = tpu.matmul %71, %73, %cst_94 {dimension_numbers = #tpu.dot_dimension_numbers<[1], [0], [0], [1], [0, 0, 1, 1], [], []>} : vector<64x4xbf16>, vector<4x8xbf16>, vector<64x8xf32> -> vector<64x8xf32>
    %c0_95 = arith.constant 0 : index
    %c0_96 = arith.constant 0 : index
    %c0_97 = arith.constant 0 : index
    %75 = vector.load %arg6[%c0_95, %c0_96, %c0_97] : memref<4x64x8xf32, #tpu.memory_space<vmem>>, vector<1x64x8xf32>
    %76 = vector.shape_cast %75 : vector<1x64x8xf32> to vector<64x8xf32>
    %77 = arith.addf %76, %74 : vector<64x8xf32>
    %c0_98 = arith.constant 0 : index
    %c0_99 = arith.constant 0 : index
    %c0_100 = arith.constant 0 : index
    %78 = vector.load %arg6[%c0_98, %c0_99, %c0_100] : memref<4x64x8xf32, #tpu.memory_space<vmem>>, vector<1x64x8xf32>
    %79 = vector.shape_cast %78 : vector<1x64x8xf32> to vector<64x8xf32>
    %80 = vector.shape_cast %77 : vector<64x8xf32> to vector<1x64x8xf32>
    tpu.vector_store %arg6[%c0_98, %c0_99, %c0_100], %80 {strides = array<i32>} : memref<4x64x8xf32, #tpu.memory_space<vmem>>, vector<1x64x8xf32>,
    %c0_101 = arith.constant 0 : index
    %c0_102 = arith.constant 0 : index
    %c1_103 = arith.constant 1 : index
    %c1_104 = arith.constant 1 : index
    %c0_105 = arith.constant 0 : index
    %c0_106 = arith.constant 0 : index
    %81 = vector.load %arg2[%c0_101, %c0_102, %c1_103, %c1_104, %c0_105, %c0_106] : memref<1x1x4x9x9x4xbf16, #tpu.memory_space<vmem>>, vector<1x1x1x8x8x4xbf16>
    %82 = vector.shape_cast %81 : vector<1x1x1x8x8x4xbf16> to vector<8x8x4xbf16>
    %83 = vector.shape_cast %82 : vector<8x8x4xbf16> to vector<64x4xbf16>
    %c7 = arith.constant 7 : index
    %c0_107 = arith.constant 0 : index
    %c0_108 = arith.constant 0 : index
    %84 = vector.load %arg3[%c7, %c0_107, %c0_108] : memref<9x4x8xbf16, #tpu.memory_space<vmem>>, vector<1x4x8xbf16>
    %85 = vector.shape_cast %84 : vector<1x4x8xbf16> to vector<4x8xbf16>
    %cst_109 = arith.constant dense<0.000000e+00> : vector<64x8xf32>
    %86 = tpu.matmul %83, %85, %cst_109 {dimension_numbers = #tpu.dot_dimension_numbers<[1], [0], [0], [1], [0, 0, 1, 1], [], []>} : vector<64x4xbf16>, vector<4x8xbf16>, vector<64x8xf32> -> vector<64x8xf32>
    %c0_110 = arith.constant 0 : index
    %c0_111 = arith.constant 0 : index
    %c0_112 = arith.constant 0 : index
    %87 = vector.load %arg6[%c0_110, %c0_111, %c0_112] : memref<4x64x8xf32, #tpu.memory_space<vmem>>, vector<1x64x8xf32>
    %88 = vector.shape_cast %87 : vector<1x64x8xf32> to vector<64x8xf32>
    %89 = arith.addf %88, %86 : vector<64x8xf32>
    %c0_113 = arith.constant 0 : index
    %c0_114 = arith.constant 0 : index
    %c0_115 = arith.constant 0 : index
    %90 = vector.load %arg6[%c0_113, %c0_114, %c0_115] : memref<4x64x8xf32, #tpu.memory_space<vmem>>, vector<1x64x8xf32>
    %91 = vector.shape_cast %90 : vector<1x64x8xf32> to vector<64x8xf32>
    %92 = vector.shape_cast %89 : vector<64x8xf32> to vector<1x64x8xf32>
    tpu.vector_store %arg6[%c0_113, %c0_114, %c0_115], %92 {strides = array<i32>} : memref<4x64x8xf32, #tpu.memory_space<vmem>>, vector<1x64x8xf32>,
    %c0_116 = arith.constant 0 : index
    %c0_117 = arith.constant 0 : index
    %c0_118 = arith.constant 0 : index
    %c1_119 = arith.constant 1 : index
    %c1_120 = arith.constant 1 : index
    %c0_121 = arith.constant 0 : index
    %93 = vector.load %arg2[%c0_116, %c0_117, %c0_118, %c1_119, %c1_120, %c0_121] : memref<1x1x4x9x9x4xbf16, #tpu.memory_space<vmem>>, vector<1x1x1x8x8x4xbf16>
    %94 = vector.shape_cast %93 : vector<1x1x1x8x8x4xbf16> to vector<8x8x4xbf16>
    %95 = vector.shape_cast %94 : vector<8x8x4xbf16> to vector<64x4xbf16>
    %c8 = arith.constant 8 : index
    %c0_122 = arith.constant 0 : index
    %c0_123 = arith.constant 0 : index
    %96 = vector.load %arg3[%c8, %c0_122, %c0_123] : memref<9x4x8xbf16, #tpu.memory_space<vmem>>, vector<1x4x8xbf16>
    %97 = vector.shape_cast %96 : vector<1x4x8xbf16> to vector<4x8xbf16>
    %cst_124 = arith.constant dense<0.000000e+00> : vector<64x8xf32>
    %98 = tpu.matmul %95, %97, %cst_124 {dimension_numbers = #tpu.dot_dimension_numbers<[1], [0], [0], [1], [0, 0, 1, 1], [], []>} : vector<64x4xbf16>, vector<4x8xbf16>, vector<64x8xf32> -> vector<64x8xf32>
    %c0_125 = arith.constant 0 : index
    %c0_126 = arith.constant 0 : index
    %c0_127 = arith.constant 0 : index
    %99 = vector.load %arg6[%c0_125, %c0_126, %c0_127] : memref<4x64x8xf32, #tpu.memory_space<vmem>>, vector<1x64x8xf32>
    %100 = vector.shape_cast %99 : vector<1x64x8xf32> to vector<64x8xf32>
    %101 = arith.addf %100, %98 : vector<64x8xf32>
    %c0_128 = arith.constant 0 : index
    %c0_129 = arith.constant 0 : index
    %c0_130 = arith.constant 0 : index
    %102 = vector.load %arg6[%c0_128, %c0_129, %c0_130] : memref<4x64x8xf32, #tpu.memory_space<vmem>>, vector<1x64x8xf32>
    %103 = vector.shape_cast %102 : vector<1x64x8xf32> to vector<64x8xf32>
    %104 = vector.shape_cast %101 : vector<64x8xf32> to vector<1x64x8xf32>
    tpu.vector_store %arg6[%c0_128, %c0_129, %c0_130], %104 {strides = array<i32>} : memref<4x64x8xf32, #tpu.memory_space<vmem>>, vector<1x64x8xf32>,
    %c0_131 = arith.constant 0 : index
    %c0_132 = arith.constant 0 : index
    %c1_133 = arith.constant 1 : index
    %c0_134 = arith.constant 0 : index
    %c0_135 = arith.constant 0 : index
    %c0_136 = arith.constant 0 : index
    %105 = vector.load %arg2[%c0_131, %c0_132, %c1_133, %c0_134, %c0_135, %c0_136] : memref<1x1x4x9x9x4xbf16, #tpu.memory_space<vmem>>, vector<1x1x1x8x8x4xbf16>
    %106 = vector.shape_cast %105 : vector<1x1x1x8x8x4xbf16> to vector<8x8x4xbf16>
    %107 = vector.shape_cast %106 : vector<8x8x4xbf16> to vector<64x4xbf16>
    %c0_137 = arith.constant 0 : index
    %c0_138 = arith.constant 0 : index
    %c0_139 = arith.constant 0 : index
    %108 = vector.load %arg3[%c0_137, %c0_138, %c0_139] : memref<9x4x8xbf16, #tpu.memory_space<vmem>>, vector<1x4x8xbf16>
    %109 = vector.shape_cast %108 : vector<1x4x8xbf16> to vector<4x8xbf16>
    %cst_140 = arith.constant dense<0.000000e+00> : vector<64x8xf32>
    %110 = tpu.matmul %107, %109, %cst_140 {dimension_numbers = #tpu.dot_dimension_numbers<[1], [0], [0], [1], [0, 0, 1, 1], [], []>} : vector<64x4xbf16>, vector<4x8xbf16>, vector<64x8xf32> -> vector<64x8xf32>
    %c1_141 = arith.constant 1 : index
    %c0_142 = arith.constant 0 : index
    %c0_143 = arith.constant 0 : index
    %111 = vector.load %arg6[%c1_141, %c0_142, %c0_143] : memref<4x64x8xf32, #tpu.memory_space<vmem>>, vector<1x64x8xf32>
    %112 = vector.shape_cast %111 : vector<1x64x8xf32> to vector<64x8xf32>
    %113 = vector.shape_cast %110 : vector<64x8xf32> to vector<1x64x8xf32>
    tpu.vector_store %arg6[%c1_141, %c0_142, %c0_143], %113 {strides = array<i32>} : memref<4x64x8xf32, #tpu.memory_space<vmem>>, vector<1x64x8xf32>,
    %c0_144 = arith.constant 0 : index
    %c0_145 = arith.constant 0 : index
    %c0_146 = arith.constant 0 : index
    %c0_147 = arith.constant 0 : index
    %c1_148 = arith.constant 1 : index
    %c0_149 = arith.constant 0 : index
    %114 = vector.load %arg2[%c0_144, %c0_145, %c0_146, %c0_147, %c1_148, %c0_149] : memref<1x1x4x9x9x4xbf16, #tpu.memory_space<vmem>>, vector<1x1x1x8x8x4xbf16>
    %115 = vector.shape_cast %114 : vector<1x1x1x8x8x4xbf16> to vector<8x8x4xbf16>
    %116 = vector.shape_cast %115 : vector<8x8x4xbf16> to vector<64x4xbf16>
    %c1_150 = arith.constant 1 : index
    %c0_151 = arith.constant 0 : index
    %c0_152 = arith.constant 0 : index
    %117 = vector.load %arg3[%c1_150, %c0_151, %c0_152] : memref<9x4x8xbf16, #tpu.memory_space<vmem>>, vector<1x4x8xbf16>
    %118 = vector.shape_cast %117 : vector<1x4x8xbf16> to vector<4x8xbf16>
    %cst_153 = arith.constant dense<0.000000e+00> : vector<64x8xf32>
    %119 = tpu.matmul %116, %118, %cst_153 {dimension_numbers = #tpu.dot_dimension_numbers<[1], [0], [0], [1], [0, 0, 1, 1], [], []>} : vector<64x4xbf16>, vector<4x8xbf16>, vector<64x8xf32> -> vector<64x8xf32>
    %c1_154 = arith.constant 1 : index
    %c0_155 = arith.constant 0 : index
    %c0_156 = arith.constant 0 : index
    %120 = vector.load %arg6[%c1_154, %c0_155, %c0_156] : memref<4x64x8xf32, #tpu.memory_space<vmem>>, vector<1x64x8xf32>
    %121 = vector.shape_cast %120 : vector<1x64x8xf32> to vector<64x8xf32>
    %122 = arith.addf %121, %119 : vector<64x8xf32>
    %c1_157 = arith.constant 1 : index
    %c0_158 = arith.constant 0 : index
    %c0_159 = arith.constant 0 : index
    %123 = vector.load %arg6[%c1_157, %c0_158, %c0_159] : memref<4x64x8xf32, #tpu.memory_space<vmem>>, vector<1x64x8xf32>
    %124 = vector.shape_cast %123 : vector<1x64x8xf32> to vector<64x8xf32>
    %125 = vector.shape_cast %122 : vector<64x8xf32> to vector<1x64x8xf32>
    tpu.vector_store %arg6[%c1_157, %c0_158, %c0_159], %125 {strides = array<i32>} : memref<4x64x8xf32, #tpu.memory_space<vmem>>, vector<1x64x8xf32>,
    %c0_160 = arith.constant 0 : index
    %c0_161 = arith.constant 0 : index
    %c1_162 = arith.constant 1 : index
    %c0_163 = arith.constant 0 : index
    %c1_164 = arith.constant 1 : index
    %c0_165 = arith.constant 0 : index
    %126 = vector.load %arg2[%c0_160, %c0_161, %c1_162, %c0_163, %c1_164, %c0_165] : memref<1x1x4x9x9x4xbf16, #tpu.memory_space<vmem>>, vector<1x1x1x8x8x4xbf16>
    %127 = vector.shape_cast %126 : vector<1x1x1x8x8x4xbf16> to vector<8x8x4xbf16>
    %128 = vector.shape_cast %127 : vector<8x8x4xbf16> to vector<64x4xbf16>
    %c2_166 = arith.constant 2 : index
    %c0_167 = arith.constant 0 : index
    %c0_168 = arith.constant 0 : index
    %129 = vector.load %arg3[%c2_166, %c0_167, %c0_168] : memref<9x4x8xbf16, #tpu.memory_space<vmem>>, vector<1x4x8xbf16>
    %130 = vector.shape_cast %129 : vector<1x4x8xbf16> to vector<4x8xbf16>
    %cst_169 = arith.constant dense<0.000000e+00> : vector<64x8xf32>
    %131 = tpu.matmul %128, %130, %cst_169 {dimension_numbers = #tpu.dot_dimension_numbers<[1], [0], [0], [1], [0, 0, 1, 1], [], []>} : vector<64x4xbf16>, vector<4x8xbf16>, vector<64x8xf32> -> vector<64x8xf32>
    %c1_170 = arith.constant 1 : index
    %c0_171 = arith.constant 0 : index
    %c0_172 = arith.constant 0 : index
    %132 = vector.load %arg6[%c1_170, %c0_171, %c0_172] : memref<4x64x8xf32, #tpu.memory_space<vmem>>, vector<1x64x8xf32>
    %133 = vector.shape_cast %132 : vector<1x64x8xf32> to vector<64x8xf32>
    %134 = arith.addf %133, %131 : vector<64x8xf32>
    %c1_173 = arith.constant 1 : index
    %c0_174 = arith.constant 0 : index
    %c0_175 = arith.constant 0 : index
    %135 = vector.load %arg6[%c1_173, %c0_174, %c0_175] : memref<4x64x8xf32, #tpu.memory_space<vmem>>, vector<1x64x8xf32>
    %136 = vector.shape_cast %135 : vector<1x64x8xf32> to vector<64x8xf32>
    %137 = vector.shape_cast %134 : vector<64x8xf32> to vector<1x64x8xf32>
    tpu.vector_store %arg6[%c1_173, %c0_174, %c0_175], %137 {strides = array<i32>} : memref<4x64x8xf32, #tpu.memory_space<vmem>>, vector<1x64x8xf32>,
    %c0_176 = arith.constant 0 : index
    %c0_177 = arith.constant 0 : index
    %c3_178 = arith.constant 3 : index
    %c0_179 = arith.constant 0 : index
    %c0_180 = arith.constant 0 : index
    %c0_181 = arith.constant 0 : index
    %138 = vector.load %arg2[%c0_176, %c0_177, %c3_178, %c0_179, %c0_180, %c0_181] : memref<1x1x4x9x9x4xbf16, #tpu.memory_space<vmem>>, vector<1x1x1x8x8x4xbf16>
    %139 = vector.shape_cast %138 : vector<1x1x1x8x8x4xbf16> to vector<8x8x4xbf16>
    %140 = vector.shape_cast %139 : vector<8x8x4xbf16> to vector<64x4xbf16>
    %c3_182 = arith.constant 3 : index
    %c0_183 = arith.constant 0 : index
    %c0_184 = arith.constant 0 : index
    %141 = vector.load %arg3[%c3_182, %c0_183, %c0_184] : memref<9x4x8xbf16, #tpu.memory_space<vmem>>, vector<1x4x8xbf16>
    %142 = vector.shape_cast %141 : vector<1x4x8xbf16> to vector<4x8xbf16>
    %cst_185 = arith.constant dense<0.000000e+00> : vector<64x8xf32>
    %143 = tpu.matmul %140, %142, %cst_185 {dimension_numbers = #tpu.dot_dimension_numbers<[1], [0], [0], [1], [0, 0, 1, 1], [], []>} : vector<64x4xbf16>, vector<4x8xbf16>, vector<64x8xf32> -> vector<64x8xf32>
    %c1_186 = arith.constant 1 : index
    %c0_187 = arith.constant 0 : index
    %c0_188 = arith.constant 0 : index
    %144 = vector.load %arg6[%c1_186, %c0_187, %c0_188] : memref<4x64x8xf32, #tpu.memory_space<vmem>>, vector<1x64x8xf32>
    %145 = vector.shape_cast %144 : vector<1x64x8xf32> to vector<64x8xf32>
    %146 = arith.addf %145, %143 : vector<64x8xf32>
    %c1_189 = arith.constant 1 : index
    %c0_190 = arith.constant 0 : index
    %c0_191 = arith.constant 0 : index
    %147 = vector.load %arg6[%c1_189, %c0_190, %c0_191] : memref<4x64x8xf32, #tpu.memory_space<vmem>>, vector<1x64x8xf32>
    %148 = vector.shape_cast %147 : vector<1x64x8xf32> to vector<64x8xf32>
    %149 = vector.shape_cast %146 : vector<64x8xf32> to vector<1x64x8xf32>
    tpu.vector_store %arg6[%c1_189, %c0_190, %c0_191], %149 {strides = array<i32>} : memref<4x64x8xf32, #tpu.memory_space<vmem>>, vector<1x64x8xf32>,
    %c0_192 = arith.constant 0 : index
    %c0_193 = arith.constant 0 : index
    %c2_194 = arith.constant 2 : index
    %c0_195 = arith.constant 0 : index
    %c1_196 = arith.constant 1 : index
    %c0_197 = arith.constant 0 : index
    %150 = vector.load %arg2[%c0_192, %c0_193, %c2_194, %c0_195, %c1_196, %c0_197] : memref<1x1x4x9x9x4xbf16, #tpu.memory_space<vmem>>, vector<1x1x1x8x8x4xbf16>
    %151 = vector.shape_cast %150 : vector<1x1x1x8x8x4xbf16> to vector<8x8x4xbf16>
    %152 = vector.shape_cast %151 : vector<8x8x4xbf16> to vector<64x4xbf16>
    %c4_198 = arith.constant 4 : index
    %c0_199 = arith.constant 0 : index
    %c0_200 = arith.constant 0 : index
    %153 = vector.load %arg3[%c4_198, %c0_199, %c0_200] : memref<9x4x8xbf16, #tpu.memory_space<vmem>>, vector<1x4x8xbf16>
    %154 = vector.shape_cast %153 : vector<1x4x8xbf16> to vector<4x8xbf16>
    %cst_201 = arith.constant dense<0.000000e+00> : vector<64x8xf32>
    %155 = tpu.matmul %152, %154, %cst_201 {dimension_numbers = #tpu.dot_dimension_numbers<[1], [0], [0], [1], [0, 0, 1, 1], [], []>} : vector<64x4xbf16>, vector<4x8xbf16>, vector<64x8xf32> -> vector<64x8xf32>
    %c1_202 = arith.constant 1 : index
    %c0_203 = arith.constant 0 : index
    %c0_204 = arith.constant 0 : index
    %156 = vector.load %arg6[%c1_202, %c0_203, %c0_204] : memref<4x64x8xf32, #tpu.memory_space<vmem>>, vector<1x64x8xf32>
    %157 = vector.shape_cast %156 : vector<1x64x8xf32> to vector<64x8xf32>
    %158 = arith.addf %157, %155 : vector<64x8xf32>
    %c1_205 = arith.constant 1 : index
    %c0_206 = arith.constant 0 : index
    %c0_207 = arith.constant 0 : index
    %159 = vector.load %arg6[%c1_205, %c0_206, %c0_207] : memref<4x64x8xf32, #tpu.memory_space<vmem>>, vector<1x64x8xf32>
    %160 = vector.shape_cast %159 : vector<1x64x8xf32> to vector<64x8xf32>
    %161 = vector.shape_cast %158 : vector<64x8xf32> to vector<1x64x8xf32>
    tpu.vector_store %arg6[%c1_205, %c0_206, %c0_207], %161 {strides = array<i32>} : memref<4x64x8xf32, #tpu.memory_space<vmem>>, vector<1x64x8xf32>,
    %c0_208 = arith.constant 0 : index
    %c0_209 = arith.constant 0 : index
    %c3_210 = arith.constant 3 : index
    %c0_211 = arith.constant 0 : index
    %c1_212 = arith.constant 1 : index
    %c0_213 = arith.constant 0 : index
    %162 = vector.load %arg2[%c0_208, %c0_209, %c3_210, %c0_211, %c1_212, %c0_213] : memref<1x1x4x9x9x4xbf16, #tpu.memory_space<vmem>>, vector<1x1x1x8x8x4xbf16>
    %163 = vector.shape_cast %162 : vector<1x1x1x8x8x4xbf16> to vector<8x8x4xbf16>
    %164 = vector.shape_cast %163 : vector<8x8x4xbf16> to vector<64x4xbf16>
    %c5_214 = arith.constant 5 : index
    %c0_215 = arith.constant 0 : index
    %c0_216 = arith.constant 0 : index
    %165 = vector.load %arg3[%c5_214, %c0_215, %c0_216] : memref<9x4x8xbf16, #tpu.memory_space<vmem>>, vector<1x4x8xbf16>
    %166 = vector.shape_cast %165 : vector<1x4x8xbf16> to vector<4x8xbf16>
    %cst_217 = arith.constant dense<0.000000e+00> : vector<64x8xf32>
    %167 = tpu.matmul %164, %166, %cst_217 {dimension_numbers = #tpu.dot_dimension_numbers<[1], [0], [0], [1], [0, 0, 1, 1], [], []>} : vector<64x4xbf16>, vector<4x8xbf16>, vector<64x8xf32> -> vector<64x8xf32>
    %c1_218 = arith.constant 1 : index
    %c0_219 = arith.constant 0 : index
    %c0_220 = arith.constant 0 : index
    %168 = vector.load %arg6[%c1_218, %c0_219, %c0_220] : memref<4x64x8xf32, #tpu.memory_space<vmem>>, vector<1x64x8xf32>
    %169 = vector.shape_cast %168 : vector<1x64x8xf32> to vector<64x8xf32>
    %170 = arith.addf %169, %167 : vector<64x8xf32>
    %c1_221 = arith.constant 1 : index
    %c0_222 = arith.constant 0 : index
    %c0_223 = arith.constant 0 : index
    %171 = vector.load %arg6[%c1_221, %c0_222, %c0_223] : memref<4x64x8xf32, #tpu.memory_space<vmem>>, vector<1x64x8xf32>
    %172 = vector.shape_cast %171 : vector<1x64x8xf32> to vector<64x8xf32>
    %173 = vector.shape_cast %170 : vector<64x8xf32> to vector<1x64x8xf32>
    tpu.vector_store %arg6[%c1_221, %c0_222, %c0_223], %173 {strides = array<i32>} : memref<4x64x8xf32, #tpu.memory_space<vmem>>, vector<1x64x8xf32>,
    %c0_224 = arith.constant 0 : index
    %c0_225 = arith.constant 0 : index
    %c1_226 = arith.constant 1 : index
    %c1_227 = arith.constant 1 : index
    %c0_228 = arith.constant 0 : index
    %c0_229 = arith.constant 0 : index
    %174 = vector.load %arg2[%c0_224, %c0_225, %c1_226, %c1_227, %c0_228, %c0_229] : memref<1x1x4x9x9x4xbf16, #tpu.memory_space<vmem>>, vector<1x1x1x8x8x4xbf16>
    %175 = vector.shape_cast %174 : vector<1x1x1x8x8x4xbf16> to vector<8x8x4xbf16>
    %176 = vector.shape_cast %175 : vector<8x8x4xbf16> to vector<64x4xbf16>
    %c6_230 = arith.constant 6 : index
    %c0_231 = arith.constant 0 : index
    %c0_232 = arith.constant 0 : index
    %177 = vector.load %arg3[%c6_230, %c0_231, %c0_232] : memref<9x4x8xbf16, #tpu.memory_space<vmem>>, vector<1x4x8xbf16>
    %178 = vector.shape_cast %177 : vector<1x4x8xbf16> to vector<4x8xbf16>
    %cst_233 = arith.constant dense<0.000000e+00> : vector<64x8xf32>
    %179 = tpu.matmul %176, %178, %cst_233 {dimension_numbers = #tpu.dot_dimension_numbers<[1], [0], [0], [1], [0, 0, 1, 1], [], []>} : vector<64x4xbf16>, vector<4x8xbf16>, vector<64x8xf32> -> vector<64x8xf32>
    %c1_234 = arith.constant 1 : index
    %c0_235 = arith.constant 0 : index
    %c0_236 = arith.constant 0 : index
    %180 = vector.load %arg6[%c1_234, %c0_235, %c0_236] : memref<4x64x8xf32, #tpu.memory_space<vmem>>, vector<1x64x8xf32>
    %181 = vector.shape_cast %180 : vector<1x64x8xf32> to vector<64x8xf32>
    %182 = arith.addf %181, %179 : vector<64x8xf32>
    %c1_237 = arith.constant 1 : index
    %c0_238 = arith.constant 0 : index
    %c0_239 = arith.constant 0 : index
    %183 = vector.load %arg6[%c1_237, %c0_238, %c0_239] : memref<4x64x8xf32, #tpu.memory_space<vmem>>, vector<1x64x8xf32>
    %184 = vector.shape_cast %183 : vector<1x64x8xf32> to vector<64x8xf32>
    %185 = vector.shape_cast %182 : vector<64x8xf32> to vector<1x64x8xf32>
    tpu.vector_store %arg6[%c1_237, %c0_238, %c0_239], %185 {strides = array<i32>} : memref<4x64x8xf32, #tpu.memory_space<vmem>>, vector<1x64x8xf32>,
    %c0_240 = arith.constant 0 : index
    %c0_241 = arith.constant 0 : index
    %c0_242 = arith.constant 0 : index
    %c1_243 = arith.constant 1 : index
    %c1_244 = arith.constant 1 : index
    %c0_245 = arith.constant 0 : index
    %186 = vector.load %arg2[%c0_240, %c0_241, %c0_242, %c1_243, %c1_244, %c0_245] : memref<1x1x4x9x9x4xbf16, #tpu.memory_space<vmem>>, vector<1x1x1x8x8x4xbf16>
    %187 = vector.shape_cast %186 : vector<1x1x1x8x8x4xbf16> to vector<8x8x4xbf16>
    %188 = vector.shape_cast %187 : vector<8x8x4xbf16> to vector<64x4xbf16>
    %c7_246 = arith.constant 7 : index
    %c0_247 = arith.constant 0 : index
    %c0_248 = arith.constant 0 : index
    %189 = vector.load %arg3[%c7_246, %c0_247, %c0_248] : memref<9x4x8xbf16, #tpu.memory_space<vmem>>, vector<1x4x8xbf16>
    %190 = vector.shape_cast %189 : vector<1x4x8xbf16> to vector<4x8xbf16>
    %cst_249 = arith.constant dense<0.000000e+00> : vector<64x8xf32>
    %191 = tpu.matmul %188, %190, %cst_249 {dimension_numbers = #tpu.dot_dimension_numbers<[1], [0], [0], [1], [0, 0, 1, 1], [], []>} : vector<64x4xbf16>, vector<4x8xbf16>, vector<64x8xf32> -> vector<64x8xf32>
    %c1_250 = arith.constant 1 : index
    %c0_251 = arith.constant 0 : index
    %c0_252 = arith.constant 0 : index
    %192 = vector.load %arg6[%c1_250, %c0_251, %c0_252] : memref<4x64x8xf32, #tpu.memory_space<vmem>>, vector<1x64x8xf32>
    %193 = vector.shape_cast %192 : vector<1x64x8xf32> to vector<64x8xf32>
    %194 = arith.addf %193, %191 : vector<64x8xf32>
    %c1_253 = arith.constant 1 : index
    %c0_254 = arith.constant 0 : index
    %c0_255 = arith.constant 0 : index
    %195 = vector.load %arg6[%c1_253, %c0_254, %c0_255] : memref<4x64x8xf32, #tpu.memory_space<vmem>>, vector<1x64x8xf32>
    %196 = vector.shape_cast %195 : vector<1x64x8xf32> to vector<64x8xf32>
    %197 = vector.shape_cast %194 : vector<64x8xf32> to vector<1x64x8xf32>
    tpu.vector_store %arg6[%c1_253, %c0_254, %c0_255], %197 {strides = array<i32>} : memref<4x64x8xf32, #tpu.memory_space<vmem>>, vector<1x64x8xf32>,
    %c0_256 = arith.constant 0 : index
    %c0_257 = arith.constant 0 : index
    %c1_258 = arith.constant 1 : index
    %c1_259 = arith.constant 1 : index
    %c1_260 = arith.constant 1 : index
    %c0_261 = arith.constant 0 : index
    %198 = vector.load %arg2[%c0_256, %c0_257, %c1_258, %c1_259, %c1_260, %c0_261] : memref<1x1x4x9x9x4xbf16, #tpu.memory_space<vmem>>, vector<1x1x1x8x8x4xbf16>
    %199 = vector.shape_cast %198 : vector<1x1x1x8x8x4xbf16> to vector<8x8x4xbf16>
    %200 = vector.shape_cast %199 : vector<8x8x4xbf16> to vector<64x4xbf16>
    %c8_262 = arith.constant 8 : index
    %c0_263 = arith.constant 0 : index
    %c0_264 = arith.constant 0 : index
    %201 = vector.load %arg3[%c8_262, %c0_263, %c0_264] : memref<9x4x8xbf16, #tpu.memory_space<vmem>>, vector<1x4x8xbf16>
    %202 = vector.shape_cast %201 : vector<1x4x8xbf16> to vector<4x8xbf16>
    %cst_265 = arith.constant dense<0.000000e+00> : vector<64x8xf32>
    %203 = tpu.matmul %200, %202, %cst_265 {dimension_numbers = #tpu.dot_dimension_numbers<[1], [0], [0], [1], [0, 0, 1, 1], [], []>} : vector<64x4xbf16>, vector<4x8xbf16>, vector<64x8xf32> -> vector<64x8xf32>
    %c1_266 = arith.constant 1 : index
    %c0_267 = arith.constant 0 : index
    %c0_268 = arith.constant 0 : index
    %204 = vector.load %arg6[%c1_266, %c0_267, %c0_268] : memref<4x64x8xf32, #tpu.memory_space<vmem>>, vector<1x64x8xf32>
    %205 = vector.shape_cast %204 : vector<1x64x8xf32> to vector<64x8xf32>
    %206 = arith.addf %205, %203 : vector<64x8xf32>
    %c1_269 = arith.constant 1 : index
    %c0_270 = arith.constant 0 : index
    %c0_271 = arith.constant 0 : index
    %207 = vector.load %arg6[%c1_269, %c0_270, %c0_271] : memref<4x64x8xf32, #tpu.memory_space<vmem>>, vector<1x64x8xf32>
    %208 = vector.shape_cast %207 : vector<1x64x8xf32> to vector<64x8xf32>
    %209 = vector.shape_cast %206 : vector<64x8xf32> to vector<1x64x8xf32>
    tpu.vector_store %arg6[%c1_269, %c0_270, %c0_271], %209 {strides = array<i32>} : memref<4x64x8xf32, #tpu.memory_space<vmem>>, vector<1x64x8xf32>,
    %c0_272 = arith.constant 0 : index
    %c0_273 = arith.constant 0 : index
    %c2_274 = arith.constant 2 : index
    %c0_275 = arith.constant 0 : index
    %c0_276 = arith.constant 0 : index
    %c0_277 = arith.constant 0 : index
    %210 = vector.load %arg2[%c0_272, %c0_273, %c2_274, %c0_275, %c0_276, %c0_277] : memref<1x1x4x9x9x4xbf16, #tpu.memory_space<vmem>>, vector<1x1x1x8x8x4xbf16>
    %211 = vector.shape_cast %210 : vector<1x1x1x8x8x4xbf16> to vector<8x8x4xbf16>
    %212 = vector.shape_cast %211 : vector<8x8x4xbf16> to vector<64x4xbf16>
    %c0_278 = arith.constant 0 : index
    %c0_279 = arith.constant 0 : index
    %c0_280 = arith.constant 0 : index
    %213 = vector.load %arg3[%c0_278, %c0_279, %c0_280] : memref<9x4x8xbf16, #tpu.memory_space<vmem>>, vector<1x4x8xbf16>
    %214 = vector.shape_cast %213 : vector<1x4x8xbf16> to vector<4x8xbf16>
    %cst_281 = arith.constant dense<0.000000e+00> : vector<64x8xf32>
    %215 = tpu.matmul %212, %214, %cst_281 {dimension_numbers = #tpu.dot_dimension_numbers<[1], [0], [0], [1], [0, 0, 1, 1], [], []>} : vector<64x4xbf16>, vector<4x8xbf16>, vector<64x8xf32> -> vector<64x8xf32>
    %c2_282 = arith.constant 2 : index
    %c0_283 = arith.constant 0 : index
    %c0_284 = arith.constant 0 : index
    %216 = vector.load %arg6[%c2_282, %c0_283, %c0_284] : memref<4x64x8xf32, #tpu.memory_space<vmem>>, vector<1x64x8xf32>
    %217 = vector.shape_cast %216 : vector<1x64x8xf32> to vector<64x8xf32>
    %218 = vector.shape_cast %215 : vector<64x8xf32> to vector<1x64x8xf32>
    tpu.vector_store %arg6[%c2_282, %c0_283, %c0_284], %218 {strides = array<i32>} : memref<4x64x8xf32, #tpu.memory_space<vmem>>, vector<1x64x8xf32>,
    %c0_285 = arith.constant 0 : index
    %c0_286 = arith.constant 0 : index
    %c3_287 = arith.constant 3 : index
    %c0_288 = arith.constant 0 : index
    %c0_289 = arith.constant 0 : index
    %c0_290 = arith.constant 0 : index
    %219 = vector.load %arg2[%c0_285, %c0_286, %c3_287, %c0_288, %c0_289, %c0_290] : memref<1x1x4x9x9x4xbf16, #tpu.memory_space<vmem>>, vector<1x1x1x8x8x4xbf16>
    %220 = vector.shape_cast %219 : vector<1x1x1x8x8x4xbf16> to vector<8x8x4xbf16>
    %221 = vector.shape_cast %220 : vector<8x8x4xbf16> to vector<64x4xbf16>
    %c1_291 = arith.constant 1 : index
    %c0_292 = arith.constant 0 : index
    %c0_293 = arith.constant 0 : index
    %222 = vector.load %arg3[%c1_291, %c0_292, %c0_293] : memref<9x4x8xbf16, #tpu.memory_space<vmem>>, vector<1x4x8xbf16>
    %223 = vector.shape_cast %222 : vector<1x4x8xbf16> to vector<4x8xbf16>
    %cst_294 = arith.constant dense<0.000000e+00> : vector<64x8xf32>
    %224 = tpu.matmul %221, %223, %cst_294 {dimension_numbers = #tpu.dot_dimension_numbers<[1], [0], [0], [1], [0, 0, 1, 1], [], []>} : vector<64x4xbf16>, vector<4x8xbf16>, vector<64x8xf32> -> vector<64x8xf32>
    %c2_295 = arith.constant 2 : index
    %c0_296 = arith.constant 0 : index
    %c0_297 = arith.constant 0 : index
    %225 = vector.load %arg6[%c2_295, %c0_296, %c0_297] : memref<4x64x8xf32, #tpu.memory_space<vmem>>, vector<1x64x8xf32>
    %226 = vector.shape_cast %225 : vector<1x64x8xf32> to vector<64x8xf32>
    %227 = arith.addf %226, %224 : vector<64x8xf32>
    %c2_298 = arith.constant 2 : index
    %c0_299 = arith.constant 0 : index
    %c0_300 = arith.constant 0 : index
    %228 = vector.load %arg6[%c2_298, %c0_299, %c0_300] : memref<4x64x8xf32, #tpu.memory_space<vmem>>, vector<1x64x8xf32>
    %229 = vector.shape_cast %228 : vector<1x64x8xf32> to vector<64x8xf32>
    %230 = vector.shape_cast %227 : vector<64x8xf32> to vector<1x64x8xf32>
    tpu.vector_store %arg6[%c2_298, %c0_299, %c0_300], %230 {strides = array<i32>} : memref<4x64x8xf32, #tpu.memory_space<vmem>>, vector<1x64x8xf32>,
    %c0_301 = arith.constant 0 : index
    %c0_302 = arith.constant 0 : index
    %c2_303 = arith.constant 2 : index
    %c0_304 = arith.constant 0 : index
    %c1_305 = arith.constant 1 : index
    %c0_306 = arith.constant 0 : index
    %231 = vector.load %arg2[%c0_301, %c0_302, %c2_303, %c0_304, %c1_305, %c0_306] : memref<1x1x4x9x9x4xbf16, #tpu.memory_space<vmem>>, vector<1x1x1x8x8x4xbf16>
    %232 = vector.shape_cast %231 : vector<1x1x1x8x8x4xbf16> to vector<8x8x4xbf16>
    %233 = vector.shape_cast %232 : vector<8x8x4xbf16> to vector<64x4xbf16>
    %c2_307 = arith.constant 2 : index
    %c0_308 = arith.constant 0 : index
    %c0_309 = arith.constant 0 : index
    %234 = vector.load %arg3[%c2_307, %c0_308, %c0_309] : memref<9x4x8xbf16, #tpu.memory_space<vmem>>, vector<1x4x8xbf16>
    %235 = vector.shape_cast %234 : vector<1x4x8xbf16> to vector<4x8xbf16>
    %cst_310 = arith.constant dense<0.000000e+00> : vector<64x8xf32>
    %236 = tpu.matmul %233, %235, %cst_310 {dimension_numbers = #tpu.dot_dimension_numbers<[1], [0], [0], [1], [0, 0, 1, 1], [], []>} : vector<64x4xbf16>, vector<4x8xbf16>, vector<64x8xf32> -> vector<64x8xf32>
    %c2_311 = arith.constant 2 : index
    %c0_312 = arith.constant 0 : index
    %c0_313 = arith.constant 0 : index
    %237 = vector.load %arg6[%c2_311, %c0_312, %c0_313] : memref<4x64x8xf32, #tpu.memory_space<vmem>>, vector<1x64x8xf32>
    %238 = vector.shape_cast %237 : vector<1x64x8xf32> to vector<64x8xf32>
    %239 = arith.addf %238, %236 : vector<64x8xf32>
    %c2_314 = arith.constant 2 : index
    %c0_315 = arith.constant 0 : index
    %c0_316 = arith.constant 0 : index
    %240 = vector.load %arg6[%c2_314, %c0_315, %c0_316] : memref<4x64x8xf32, #tpu.memory_space<vmem>>, vector<1x64x8xf32>
    %241 = vector.shape_cast %240 : vector<1x64x8xf32> to vector<64x8xf32>
    %242 = vector.shape_cast %239 : vector<64x8xf32> to vector<1x64x8xf32>
    tpu.vector_store %arg6[%c2_314, %c0_315, %c0_316], %242 {strides = array<i32>} : memref<4x64x8xf32, #tpu.memory_space<vmem>>, vector<1x64x8xf32>,
    %c0_317 = arith.constant 0 : index
    %c0_318 = arith.constant 0 : index
    %c0_319 = arith.constant 0 : index
    %c1_320 = arith.constant 1 : index
    %c0_321 = arith.constant 0 : index
    %c0_322 = arith.constant 0 : index
    %243 = vector.load %arg2[%c0_317, %c0_318, %c0_319, %c1_320, %c0_321, %c0_322] : memref<1x1x4x9x9x4xbf16, #tpu.memory_space<vmem>>, vector<1x1x1x8x8x4xbf16>
    %244 = vector.shape_cast %243 : vector<1x1x1x8x8x4xbf16> to vector<8x8x4xbf16>
    %245 = vector.shape_cast %244 : vector<8x8x4xbf16> to vector<64x4xbf16>
    %c3_323 = arith.constant 3 : index
    %c0_324 = arith.constant 0 : index
    %c0_325 = arith.constant 0 : index
    %246 = vector.load %arg3[%c3_323, %c0_324, %c0_325] : memref<9x4x8xbf16, #tpu.memory_space<vmem>>, vector<1x4x8xbf16>
    %247 = vector.shape_cast %246 : vector<1x4x8xbf16> to vector<4x8xbf16>
    %cst_326 = arith.constant dense<0.000000e+00> : vector<64x8xf32>
    %248 = tpu.matmul %245, %247, %cst_326 {dimension_numbers = #tpu.dot_dimension_numbers<[1], [0], [0], [1], [0, 0, 1, 1], [], []>} : vector<64x4xbf16>, vector<4x8xbf16>, vector<64x8xf32> -> vector<64x8xf32>
    %c2_327 = arith.constant 2 : index
    %c0_328 = arith.constant 0 : index
    %c0_329 = arith.constant 0 : index
    %249 = vector.load %arg6[%c2_327, %c0_328, %c0_329] : memref<4x64x8xf32, #tpu.memory_space<vmem>>, vector<1x64x8xf32>
    %250 = vector.shape_cast %249 : vector<1x64x8xf32> to vector<64x8xf32>
    %251 = arith.addf %250, %248 : vector<64x8xf32>
    %c2_330 = arith.constant 2 : index
    %c0_331 = arith.constant 0 : index
    %c0_332 = arith.constant 0 : index
    %252 = vector.load %arg6[%c2_330, %c0_331, %c0_332] : memref<4x64x8xf32, #tpu.memory_space<vmem>>, vector<1x64x8xf32>
    %253 = vector.shape_cast %252 : vector<1x64x8xf32> to vector<64x8xf32>
    %254 = vector.shape_cast %251 : vector<64x8xf32> to vector<1x64x8xf32>
    tpu.vector_store %arg6[%c2_330, %c0_331, %c0_332], %254 {strides = array<i32>} : memref<4x64x8xf32, #tpu.memory_space<vmem>>, vector<1x64x8xf32>,
    %c0_333 = arith.constant 0 : index
    %c0_334 = arith.constant 0 : index
    %c1_335 = arith.constant 1 : index
    %c1_336 = arith.constant 1 : index
    %c0_337 = arith.constant 0 : index
    %c0_338 = arith.constant 0 : index
    %255 = vector.load %arg2[%c0_333, %c0_334, %c1_335, %c1_336, %c0_337, %c0_338] : memref<1x1x4x9x9x4xbf16, #tpu.memory_space<vmem>>, vector<1x1x1x8x8x4xbf16>
    %256 = vector.shape_cast %255 : vector<1x1x1x8x8x4xbf16> to vector<8x8x4xbf16>
    %257 = vector.shape_cast %256 : vector<8x8x4xbf16> to vector<64x4xbf16>
    %c4_339 = arith.constant 4 : index
    %c0_340 = arith.constant 0 : index
    %c0_341 = arith.constant 0 : index
    %258 = vector.load %arg3[%c4_339, %c0_340, %c0_341] : memref<9x4x8xbf16, #tpu.memory_space<vmem>>, vector<1x4x8xbf16>
    %259 = vector.shape_cast %258 : vector<1x4x8xbf16> to vector<4x8xbf16>
    %cst_342 = arith.constant dense<0.000000e+00> : vector<64x8xf32>
    %260 = tpu.matmul %257, %259, %cst_342 {dimension_numbers = #tpu.dot_dimension_numbers<[1], [0], [0], [1], [0, 0, 1, 1], [], []>} : vector<64x4xbf16>, vector<4x8xbf16>, vector<64x8xf32> -> vector<64x8xf32>
    %c2_343 = arith.constant 2 : index
    %c0_344 = arith.constant 0 : index
    %c0_345 = arith.constant 0 : index
    %261 = vector.load %arg6[%c2_343, %c0_344, %c0_345] : memref<4x64x8xf32, #tpu.memory_space<vmem>>, vector<1x64x8xf32>
    %262 = vector.shape_cast %261 : vector<1x64x8xf32> to vector<64x8xf32>
    %263 = arith.addf %262, %260 : vector<64x8xf32>
    %c2_346 = arith.constant 2 : index
    %c0_347 = arith.constant 0 : index
    %c0_348 = arith.constant 0 : index
    %264 = vector.load %arg6[%c2_346, %c0_347, %c0_348] : memref<4x64x8xf32, #tpu.memory_space<vmem>>, vector<1x64x8xf32>
    %265 = vector.shape_cast %264 : vector<1x64x8xf32> to vector<64x8xf32>
    %266 = vector.shape_cast %263 : vector<64x8xf32> to vector<1x64x8xf32>
    tpu.vector_store %arg6[%c2_346, %c0_347, %c0_348], %266 {strides = array<i32>} : memref<4x64x8xf32, #tpu.memory_space<vmem>>, vector<1x64x8xf32>,
    %c0_349 = arith.constant 0 : index
    %c0_350 = arith.constant 0 : index
    %c0_351 = arith.constant 0 : index
    %c1_352 = arith.constant 1 : index
    %c1_353 = arith.constant 1 : index
    %c0_354 = arith.constant 0 : index
    %267 = vector.load %arg2[%c0_349, %c0_350, %c0_351, %c1_352, %c1_353, %c0_354] : memref<1x1x4x9x9x4xbf16, #tpu.memory_space<vmem>>, vector<1x1x1x8x8x4xbf16>
    %268 = vector.shape_cast %267 : vector<1x1x1x8x8x4xbf16> to vector<8x8x4xbf16>
    %269 = vector.shape_cast %268 : vector<8x8x4xbf16> to vector<64x4xbf16>
    %c5_355 = arith.constant 5 : index
    %c0_356 = arith.constant 0 : index
    %c0_357 = arith.constant 0 : index
    %270 = vector.load %arg3[%c5_355, %c0_356, %c0_357] : memref<9x4x8xbf16, #tpu.memory_space<vmem>>, vector<1x4x8xbf16>
    %271 = vector.shape_cast %270 : vector<1x4x8xbf16> to vector<4x8xbf16>
    %cst_358 = arith.constant dense<0.000000e+00> : vector<64x8xf32>
    %272 = tpu.matmul %269, %271, %cst_358 {dimension_numbers = #tpu.dot_dimension_numbers<[1], [0], [0], [1], [0, 0, 1, 1], [], []>} : vector<64x4xbf16>, vector<4x8xbf16>, vector<64x8xf32> -> vector<64x8xf32>
    %c2_359 = arith.constant 2 : index
    %c0_360 = arith.constant 0 : index
    %c0_361 = arith.constant 0 : index
    %273 = vector.load %arg6[%c2_359, %c0_360, %c0_361] : memref<4x64x8xf32, #tpu.memory_space<vmem>>, vector<1x64x8xf32>
    %274 = vector.shape_cast %273 : vector<1x64x8xf32> to vector<64x8xf32>
    %275 = arith.addf %274, %272 : vector<64x8xf32>
    %c2_362 = arith.constant 2 : index
    %c0_363 = arith.constant 0 : index
    %c0_364 = arith.constant 0 : index
    %276 = vector.load %arg6[%c2_362, %c0_363, %c0_364] : memref<4x64x8xf32, #tpu.memory_space<vmem>>, vector<1x64x8xf32>
    %277 = vector.shape_cast %276 : vector<1x64x8xf32> to vector<64x8xf32>
    %278 = vector.shape_cast %275 : vector<64x8xf32> to vector<1x64x8xf32>
    tpu.vector_store %arg6[%c2_362, %c0_363, %c0_364], %278 {strides = array<i32>} : memref<4x64x8xf32, #tpu.memory_space<vmem>>, vector<1x64x8xf32>,
    %c0_365 = arith.constant 0 : index
    %c0_366 = arith.constant 0 : index
    %c2_367 = arith.constant 2 : index
    %c1_368 = arith.constant 1 : index
    %c0_369 = arith.constant 0 : index
    %c0_370 = arith.constant 0 : index
    %279 = vector.load %arg2[%c0_365, %c0_366, %c2_367, %c1_368, %c0_369, %c0_370] : memref<1x1x4x9x9x4xbf16, #tpu.memory_space<vmem>>, vector<1x1x1x8x8x4xbf16>
    %280 = vector.shape_cast %279 : vector<1x1x1x8x8x4xbf16> to vector<8x8x4xbf16>
    %281 = vector.shape_cast %280 : vector<8x8x4xbf16> to vector<64x4xbf16>
    %c6_371 = arith.constant 6 : index
    %c0_372 = arith.constant 0 : index
    %c0_373 = arith.constant 0 : index
    %282 = vector.load %arg3[%c6_371, %c0_372, %c0_373] : memref<9x4x8xbf16, #tpu.memory_space<vmem>>, vector<1x4x8xbf16>
    %283 = vector.shape_cast %282 : vector<1x4x8xbf16> to vector<4x8xbf16>
    %cst_374 = arith.constant dense<0.000000e+00> : vector<64x8xf32>
    %284 = tpu.matmul %281, %283, %cst_374 {dimension_numbers = #tpu.dot_dimension_numbers<[1], [0], [0], [1], [0, 0, 1, 1], [], []>} : vector<64x4xbf16>, vector<4x8xbf16>, vector<64x8xf32> -> vector<64x8xf32>
    %c2_375 = arith.constant 2 : index
    %c0_376 = arith.constant 0 : index
    %c0_377 = arith.constant 0 : index
    %285 = vector.load %arg6[%c2_375, %c0_376, %c0_377] : memref<4x64x8xf32, #tpu.memory_space<vmem>>, vector<1x64x8xf32>
    %286 = vector.shape_cast %285 : vector<1x64x8xf32> to vector<64x8xf32>
    %287 = arith.addf %286, %284 : vector<64x8xf32>
    %c2_378 = arith.constant 2 : index
    %c0_379 = arith.constant 0 : index
    %c0_380 = arith.constant 0 : index
    %288 = vector.load %arg6[%c2_378, %c0_379, %c0_380] : memref<4x64x8xf32, #tpu.memory_space<vmem>>, vector<1x64x8xf32>
    %289 = vector.shape_cast %288 : vector<1x64x8xf32> to vector<64x8xf32>
    %290 = vector.shape_cast %287 : vector<64x8xf32> to vector<1x64x8xf32>
    tpu.vector_store %arg6[%c2_378, %c0_379, %c0_380], %290 {strides = array<i32>} : memref<4x64x8xf32, #tpu.memory_space<vmem>>, vector<1x64x8xf32>,
    %c0_381 = arith.constant 0 : index
    %c0_382 = arith.constant 0 : index
    %c3_383 = arith.constant 3 : index
    %c1_384 = arith.constant 1 : index
    %c0_385 = arith.constant 0 : index
    %c0_386 = arith.constant 0 : index
    %291 = vector.load %arg2[%c0_381, %c0_382, %c3_383, %c1_384, %c0_385, %c0_386] : memref<1x1x4x9x9x4xbf16, #tpu.memory_space<vmem>>, vector<1x1x1x8x8x4xbf16>
    %292 = vector.shape_cast %291 : vector<1x1x1x8x8x4xbf16> to vector<8x8x4xbf16>
    %293 = vector.shape_cast %292 : vector<8x8x4xbf16> to vector<64x4xbf16>
    %c7_387 = arith.constant 7 : index
    %c0_388 = arith.constant 0 : index
    %c0_389 = arith.constant 0 : index
    %294 = vector.load %arg3[%c7_387, %c0_388, %c0_389] : memref<9x4x8xbf16, #tpu.memory_space<vmem>>, vector<1x4x8xbf16>
    %295 = vector.shape_cast %294 : vector<1x4x8xbf16> to vector<4x8xbf16>
    %cst_390 = arith.constant dense<0.000000e+00> : vector<64x8xf32>
    %296 = tpu.matmul %293, %295, %cst_390 {dimension_numbers = #tpu.dot_dimension_numbers<[1], [0], [0], [1], [0, 0, 1, 1], [], []>} : vector<64x4xbf16>, vector<4x8xbf16>, vector<64x8xf32> -> vector<64x8xf32>
    %c2_391 = arith.constant 2 : index
    %c0_392 = arith.constant 0 : index
    %c0_393 = arith.constant 0 : index
    %297 = vector.load %arg6[%c2_391, %c0_392, %c0_393] : memref<4x64x8xf32, #tpu.memory_space<vmem>>, vector<1x64x8xf32>
    %298 = vector.shape_cast %297 : vector<1x64x8xf32> to vector<64x8xf32>
    %299 = arith.addf %298, %296 : vector<64x8xf32>
    %c2_394 = arith.constant 2 : index
    %c0_395 = arith.constant 0 : index
    %c0_396 = arith.constant 0 : index
    %300 = vector.load %arg6[%c2_394, %c0_395, %c0_396] : memref<4x64x8xf32, #tpu.memory_space<vmem>>, vector<1x64x8xf32>
    %301 = vector.shape_cast %300 : vector<1x64x8xf32> to vector<64x8xf32>
    %302 = vector.shape_cast %299 : vector<64x8xf32> to vector<1x64x8xf32>
    tpu.vector_store %arg6[%c2_394, %c0_395, %c0_396], %302 {strides = array<i32>} : memref<4x64x8xf32, #tpu.memory_space<vmem>>, vector<1x64x8xf32>,
    %c0_397 = arith.constant 0 : index
    %c0_398 = arith.constant 0 : index
    %c2_399 = arith.constant 2 : index
    %c1_400 = arith.constant 1 : index
    %c1_401 = arith.constant 1 : index
    %c0_402 = arith.constant 0 : index
    %303 = vector.load %arg2[%c0_397, %c0_398, %c2_399, %c1_400, %c1_401, %c0_402] : memref<1x1x4x9x9x4xbf16, #tpu.memory_space<vmem>>, vector<1x1x1x8x8x4xbf16>
    %304 = vector.shape_cast %303 : vector<1x1x1x8x8x4xbf16> to vector<8x8x4xbf16>
    %305 = vector.shape_cast %304 : vector<8x8x4xbf16> to vector<64x4xbf16>
    %c8_403 = arith.constant 8 : index
    %c0_404 = arith.constant 0 : index
    %c0_405 = arith.constant 0 : index
    %306 = vector.load %arg3[%c8_403, %c0_404, %c0_405] : memref<9x4x8xbf16, #tpu.memory_space<vmem>>, vector<1x4x8xbf16>
    %307 = vector.shape_cast %306 : vector<1x4x8xbf16> to vector<4x8xbf16>
    %cst_406 = arith.constant dense<0.000000e+00> : vector<64x8xf32>
    %308 = tpu.matmul %305, %307, %cst_406 {dimension_numbers = #tpu.dot_dimension_numbers<[1], [0], [0], [1], [0, 0, 1, 1], [], []>} : vector<64x4xbf16>, vector<4x8xbf16>, vector<64x8xf32> -> vector<64x8xf32>
    %c2_407 = arith.constant 2 : index
    %c0_408 = arith.constant 0 : index
    %c0_409 = arith.constant 0 : index
    %309 = vector.load %arg6[%c2_407, %c0_408, %c0_409] : memref<4x64x8xf32, #tpu.memory_space<vmem>>, vector<1x64x8xf32>
    %310 = vector.shape_cast %309 : vector<1x64x8xf32> to vector<64x8xf32>
    %311 = arith.addf %310, %308 : vector<64x8xf32>
    %c2_410 = arith.constant 2 : index
    %c0_411 = arith.constant 0 : index
    %c0_412 = arith.constant 0 : index
    %312 = vector.load %arg6[%c2_410, %c0_411, %c0_412] : memref<4x64x8xf32, #tpu.memory_space<vmem>>, vector<1x64x8xf32>
    %313 = vector.shape_cast %312 : vector<1x64x8xf32> to vector<64x8xf32>
    %314 = vector.shape_cast %311 : vector<64x8xf32> to vector<1x64x8xf32>
    tpu.vector_store %arg6[%c2_410, %c0_411, %c0_412], %314 {strides = array<i32>} : memref<4x64x8xf32, #tpu.memory_space<vmem>>, vector<1x64x8xf32>,
    %c0_413 = arith.constant 0 : index
    %c0_414 = arith.constant 0 : index
    %c3_415 = arith.constant 3 : index
    %c0_416 = arith.constant 0 : index
    %c0_417 = arith.constant 0 : index
    %c0_418 = arith.constant 0 : index
    %315 = vector.load %arg2[%c0_413, %c0_414, %c3_415, %c0_416, %c0_417, %c0_418] : memref<1x1x4x9x9x4xbf16, #tpu.memory_space<vmem>>, vector<1x1x1x8x8x4xbf16>
    %316 = vector.shape_cast %315 : vector<1x1x1x8x8x4xbf16> to vector<8x8x4xbf16>
    %317 = vector.shape_cast %316 : vector<8x8x4xbf16> to vector<64x4xbf16>
    %c0_419 = arith.constant 0 : index
    %c0_420 = arith.constant 0 : index
    %c0_421 = arith.constant 0 : index
    %318 = vector.load %arg3[%c0_419, %c0_420, %c0_421] : memref<9x4x8xbf16, #tpu.memory_space<vmem>>, vector<1x4x8xbf16>
    %319 = vector.shape_cast %318 : vector<1x4x8xbf16> to vector<4x8xbf16>
    %cst_422 = arith.constant dense<0.000000e+00> : vector<64x8xf32>
    %320 = tpu.matmul %317, %319, %cst_422 {dimension_numbers = #tpu.dot_dimension_numbers<[1], [0], [0], [1], [0, 0, 1, 1], [], []>} : vector<64x4xbf16>, vector<4x8xbf16>, vector<64x8xf32> -> vector<64x8xf32>
    %c3_423 = arith.constant 3 : index
    %c0_424 = arith.constant 0 : index
    %c0_425 = arith.constant 0 : index
    %321 = vector.load %arg6[%c3_423, %c0_424, %c0_425] : memref<4x64x8xf32, #tpu.memory_space<vmem>>, vector<1x64x8xf32>
    %322 = vector.shape_cast %321 : vector<1x64x8xf32> to vector<64x8xf32>
    %323 = vector.shape_cast %320 : vector<64x8xf32> to vector<1x64x8xf32>
    tpu.vector_store %arg6[%c3_423, %c0_424, %c0_425], %323 {strides = array<i32>} : memref<4x64x8xf32, #tpu.memory_space<vmem>>, vector<1x64x8xf32>,
    %c0_426 = arith.constant 0 : index
    %c0_427 = arith.constant 0 : index
    %c2_428 = arith.constant 2 : index
    %c0_429 = arith.constant 0 : index
    %c1_430 = arith.constant 1 : index
    %c0_431 = arith.constant 0 : index
    %324 = vector.load %arg2[%c0_426, %c0_427, %c2_428, %c0_429, %c1_430, %c0_431] : memref<1x1x4x9x9x4xbf16, #tpu.memory_space<vmem>>, vector<1x1x1x8x8x4xbf16>
    %325 = vector.shape_cast %324 : vector<1x1x1x8x8x4xbf16> to vector<8x8x4xbf16>
    %326 = vector.shape_cast %325 : vector<8x8x4xbf16> to vector<64x4xbf16>
    %c1_432 = arith.constant 1 : index
    %c0_433 = arith.constant 0 : index
    %c0_434 = arith.constant 0 : index
    %327 = vector.load %arg3[%c1_432, %c0_433, %c0_434] : memref<9x4x8xbf16, #tpu.memory_space<vmem>>, vector<1x4x8xbf16>
    %328 = vector.shape_cast %327 : vector<1x4x8xbf16> to vector<4x8xbf16>
    %cst_435 = arith.constant dense<0.000000e+00> : vector<64x8xf32>
    %329 = tpu.matmul %326, %328, %cst_435 {dimension_numbers = #tpu.dot_dimension_numbers<[1], [0], [0], [1], [0, 0, 1, 1], [], []>} : vector<64x4xbf16>, vector<4x8xbf16>, vector<64x8xf32> -> vector<64x8xf32>
    %c3_436 = arith.constant 3 : index
    %c0_437 = arith.constant 0 : index
    %c0_438 = arith.constant 0 : index
    %330 = vector.load %arg6[%c3_436, %c0_437, %c0_438] : memref<4x64x8xf32, #tpu.memory_space<vmem>>, vector<1x64x8xf32>
    %331 = vector.shape_cast %330 : vector<1x64x8xf32> to vector<64x8xf32>
    %332 = arith.addf %331, %329 : vector<64x8xf32>
    %c3_439 = arith.constant 3 : index
    %c0_440 = arith.constant 0 : index
    %c0_441 = arith.constant 0 : index
    %333 = vector.load %arg6[%c3_439, %c0_440, %c0_441] : memref<4x64x8xf32, #tpu.memory_space<vmem>>, vector<1x64x8xf32>
    %334 = vector.shape_cast %333 : vector<1x64x8xf32> to vector<64x8xf32>
    %335 = vector.shape_cast %332 : vector<64x8xf32> to vector<1x64x8xf32>
    tpu.vector_store %arg6[%c3_439, %c0_440, %c0_441], %335 {strides = array<i32>} : memref<4x64x8xf32, #tpu.memory_space<vmem>>, vector<1x64x8xf32>,
    %c0_442 = arith.constant 0 : index
    %c0_443 = arith.constant 0 : index
    %c3_444 = arith.constant 3 : index
    %c0_445 = arith.constant 0 : index
    %c1_446 = arith.constant 1 : index
    %c0_447 = arith.constant 0 : index
    %336 = vector.load %arg2[%c0_442, %c0_443, %c3_444, %c0_445, %c1_446, %c0_447] : memref<1x1x4x9x9x4xbf16, #tpu.memory_space<vmem>>, vector<1x1x1x8x8x4xbf16>
    %337 = vector.shape_cast %336 : vector<1x1x1x8x8x4xbf16> to vector<8x8x4xbf16>
    %338 = vector.shape_cast %337 : vector<8x8x4xbf16> to vector<64x4xbf16>
    %c2_448 = arith.constant 2 : index
    %c0_449 = arith.constant 0 : index
    %c0_450 = arith.constant 0 : index
    %339 = vector.load %arg3[%c2_448, %c0_449, %c0_450] : memref<9x4x8xbf16, #tpu.memory_space<vmem>>, vector<1x4x8xbf16>
    %340 = vector.shape_cast %339 : vector<1x4x8xbf16> to vector<4x8xbf16>
    %cst_451 = arith.constant dense<0.000000e+00> : vector<64x8xf32>
    %341 = tpu.matmul %338, %340, %cst_451 {dimension_numbers = #tpu.dot_dimension_numbers<[1], [0], [0], [1], [0, 0, 1, 1], [], []>} : vector<64x4xbf16>, vector<4x8xbf16>, vector<64x8xf32> -> vector<64x8xf32>
    %c3_452 = arith.constant 3 : index
    %c0_453 = arith.constant 0 : index
    %c0_454 = arith.constant 0 : index
    %342 = vector.load %arg6[%c3_452, %c0_453, %c0_454] : memref<4x64x8xf32, #tpu.memory_space<vmem>>, vector<1x64x8xf32>
    %343 = vector.shape_cast %342 : vector<1x64x8xf32> to vector<64x8xf32>
    %344 = arith.addf %343, %341 : vector<64x8xf32>
    %c3_455 = arith.constant 3 : index
    %c0_456 = arith.constant 0 : index
    %c0_457 = arith.constant 0 : index
    %345 = vector.load %arg6[%c3_455, %c0_456, %c0_457] : memref<4x64x8xf32, #tpu.memory_space<vmem>>, vector<1x64x8xf32>
    %346 = vector.shape_cast %345 : vector<1x64x8xf32> to vector<64x8xf32>
    %347 = vector.shape_cast %344 : vector<64x8xf32> to vector<1x64x8xf32>
    tpu.vector_store %arg6[%c3_455, %c0_456, %c0_457], %347 {strides = array<i32>} : memref<4x64x8xf32, #tpu.memory_space<vmem>>, vector<1x64x8xf32>,
    %c0_458 = arith.constant 0 : index
    %c0_459 = arith.constant 0 : index
    %c1_460 = arith.constant 1 : index
    %c1_461 = arith.constant 1 : index
    %c0_462 = arith.constant 0 : index
    %c0_463 = arith.constant 0 : index
    %348 = vector.load %arg2[%c0_458, %c0_459, %c1_460, %c1_461, %c0_462, %c0_463] : memref<1x1x4x9x9x4xbf16, #tpu.memory_space<vmem>>, vector<1x1x1x8x8x4xbf16>
    %349 = vector.shape_cast %348 : vector<1x1x1x8x8x4xbf16> to vector<8x8x4xbf16>
    %350 = vector.shape_cast %349 : vector<8x8x4xbf16> to vector<64x4xbf16>
    %c3_464 = arith.constant 3 : index
    %c0_465 = arith.constant 0 : index
    %c0_466 = arith.constant 0 : index
    %351 = vector.load %arg3[%c3_464, %c0_465, %c0_466] : memref<9x4x8xbf16, #tpu.memory_space<vmem>>, vector<1x4x8xbf16>
    %352 = vector.shape_cast %351 : vector<1x4x8xbf16> to vector<4x8xbf16>
    %cst_467 = arith.constant dense<0.000000e+00> : vector<64x8xf32>
    %353 = tpu.matmul %350, %352, %cst_467 {dimension_numbers = #tpu.dot_dimension_numbers<[1], [0], [0], [1], [0, 0, 1, 1], [], []>} : vector<64x4xbf16>, vector<4x8xbf16>, vector<64x8xf32> -> vector<64x8xf32>
    %c3_468 = arith.constant 3 : index
    %c0_469 = arith.constant 0 : index
    %c0_470 = arith.constant 0 : index
    %354 = vector.load %arg6[%c3_468, %c0_469, %c0_470] : memref<4x64x8xf32, #tpu.memory_space<vmem>>, vector<1x64x8xf32>
    %355 = vector.shape_cast %354 : vector<1x64x8xf32> to vector<64x8xf32>
    %356 = arith.addf %355, %353 : vector<64x8xf32>
    %c3_471 = arith.constant 3 : index
    %c0_472 = arith.constant 0 : index
    %c0_473 = arith.constant 0 : index
    %357 = vector.load %arg6[%c3_471, %c0_472, %c0_473] : memref<4x64x8xf32, #tpu.memory_space<vmem>>, vector<1x64x8xf32>
    %358 = vector.shape_cast %357 : vector<1x64x8xf32> to vector<64x8xf32>
    %359 = vector.shape_cast %356 : vector<64x8xf32> to vector<1x64x8xf32>
    tpu.vector_store %arg6[%c3_471, %c0_472, %c0_473], %359 {strides = array<i32>} : memref<4x64x8xf32, #tpu.memory_space<vmem>>, vector<1x64x8xf32>,
    %c0_474 = arith.constant 0 : index
    %c0_475 = arith.constant 0 : index
    %c0_476 = arith.constant 0 : index
    %c1_477 = arith.constant 1 : index
    %c1_478 = arith.constant 1 : index
    %c0_479 = arith.constant 0 : index
    %360 = vector.load %arg2[%c0_474, %c0_475, %c0_476, %c1_477, %c1_478, %c0_479] : memref<1x1x4x9x9x4xbf16, #tpu.memory_space<vmem>>, vector<1x1x1x8x8x4xbf16>
    %361 = vector.shape_cast %360 : vector<1x1x1x8x8x4xbf16> to vector<8x8x4xbf16>
    %362 = vector.shape_cast %361 : vector<8x8x4xbf16> to vector<64x4xbf16>
    %c4_480 = arith.constant 4 : index
    %c0_481 = arith.constant 0 : index
    %c0_482 = arith.constant 0 : index
    %363 = vector.load %arg3[%c4_480, %c0_481, %c0_482] : memref<9x4x8xbf16, #tpu.memory_space<vmem>>, vector<1x4x8xbf16>
    %364 = vector.shape_cast %363 : vector<1x4x8xbf16> to vector<4x8xbf16>
    %cst_483 = arith.constant dense<0.000000e+00> : vector<64x8xf32>
    %365 = tpu.matmul %362, %364, %cst_483 {dimension_numbers = #tpu.dot_dimension_numbers<[1], [0], [0], [1], [0, 0, 1, 1], [], []>} : vector<64x4xbf16>, vector<4x8xbf16>, vector<64x8xf32> -> vector<64x8xf32>
    %c3_484 = arith.constant 3 : index
    %c0_485 = arith.constant 0 : index
    %c0_486 = arith.constant 0 : index
    %366 = vector.load %arg6[%c3_484, %c0_485, %c0_486] : memref<4x64x8xf32, #tpu.memory_space<vmem>>, vector<1x64x8xf32>
    %367 = vector.shape_cast %366 : vector<1x64x8xf32> to vector<64x8xf32>
    %368 = arith.addf %367, %365 : vector<64x8xf32>
    %c3_487 = arith.constant 3 : index
    %c0_488 = arith.constant 0 : index
    %c0_489 = arith.constant 0 : index
    %369 = vector.load %arg6[%c3_487, %c0_488, %c0_489] : memref<4x64x8xf32, #tpu.memory_space<vmem>>, vector<1x64x8xf32>
    %370 = vector.shape_cast %369 : vector<1x64x8xf32> to vector<64x8xf32>
    %371 = vector.shape_cast %368 : vector<64x8xf32> to vector<1x64x8xf32>
    tpu.vector_store %arg6[%c3_487, %c0_488, %c0_489], %371 {strides = array<i32>} : memref<4x64x8xf32, #tpu.memory_space<vmem>>, vector<1x64x8xf32>,
    %c0_490 = arith.constant 0 : index
    %c0_491 = arith.constant 0 : index
    %c1_492 = arith.constant 1 : index
    %c1_493 = arith.constant 1 : index
    %c1_494 = arith.constant 1 : index
    %c0_495 = arith.constant 0 : index
    %372 = vector.load %arg2[%c0_490, %c0_491, %c1_492, %c1_493, %c1_494, %c0_495] : memref<1x1x4x9x9x4xbf16, #tpu.memory_space<vmem>>, vector<1x1x1x8x8x4xbf16>
    %373 = vector.shape_cast %372 : vector<1x1x1x8x8x4xbf16> to vector<8x8x4xbf16>
    %374 = vector.shape_cast %373 : vector<8x8x4xbf16> to vector<64x4xbf16>
    %c5_496 = arith.constant 5 : index
    %c0_497 = arith.constant 0 : index
    %c0_498 = arith.constant 0 : index
    %375 = vector.load %arg3[%c5_496, %c0_497, %c0_498] : memref<9x4x8xbf16, #tpu.memory_space<vmem>>, vector<1x4x8xbf16>
    %376 = vector.shape_cast %375 : vector<1x4x8xbf16> to vector<4x8xbf16>
    %cst_499 = arith.constant dense<0.000000e+00> : vector<64x8xf32>
    %377 = tpu.matmul %374, %376, %cst_499 {dimension_numbers = #tpu.dot_dimension_numbers<[1], [0], [0], [1], [0, 0, 1, 1], [], []>} : vector<64x4xbf16>, vector<4x8xbf16>, vector<64x8xf32> -> vector<64x8xf32>
    %c3_500 = arith.constant 3 : index
    %c0_501 = arith.constant 0 : index
    %c0_502 = arith.constant 0 : index
    %378 = vector.load %arg6[%c3_500, %c0_501, %c0_502] : memref<4x64x8xf32, #tpu.memory_space<vmem>>, vector<1x64x8xf32>
    %379 = vector.shape_cast %378 : vector<1x64x8xf32> to vector<64x8xf32>
    %380 = arith.addf %379, %377 : vector<64x8xf32>
    %c3_503 = arith.constant 3 : index
    %c0_504 = arith.constant 0 : index
    %c0_505 = arith.constant 0 : index
    %381 = vector.load %arg6[%c3_503, %c0_504, %c0_505] : memref<4x64x8xf32, #tpu.memory_space<vmem>>, vector<1x64x8xf32>
    %382 = vector.shape_cast %381 : vector<1x64x8xf32> to vector<64x8xf32>
    %383 = vector.shape_cast %380 : vector<64x8xf32> to vector<1x64x8xf32>
    tpu.vector_store %arg6[%c3_503, %c0_504, %c0_505], %383 {strides = array<i32>} : memref<4x64x8xf32, #tpu.memory_space<vmem>>, vector<1x64x8xf32>,
    %c0_506 = arith.constant 0 : index
    %c0_507 = arith.constant 0 : index
    %c3_508 = arith.constant 3 : index
    %c1_509 = arith.constant 1 : index
    %c0_510 = arith.constant 0 : index
    %c0_511 = arith.constant 0 : index
    %384 = vector.load %arg2[%c0_506, %c0_507, %c3_508, %c1_509, %c0_510, %c0_511] : memref<1x1x4x9x9x4xbf16, #tpu.memory_space<vmem>>, vector<1x1x1x8x8x4xbf16>
    %385 = vector.shape_cast %384 : vector<1x1x1x8x8x4xbf16> to vector<8x8x4xbf16>
    %386 = vector.shape_cast %385 : vector<8x8x4xbf16> to vector<64x4xbf16>
    %c6_512 = arith.constant 6 : index
    %c0_513 = arith.constant 0 : index
    %c0_514 = arith.constant 0 : index
    %387 = vector.load %arg3[%c6_512, %c0_513, %c0_514] : memref<9x4x8xbf16, #tpu.memory_space<vmem>>, vector<1x4x8xbf16>
    %388 = vector.shape_cast %387 : vector<1x4x8xbf16> to vector<4x8xbf16>
    %cst_515 = arith.constant dense<0.000000e+00> : vector<64x8xf32>
    %389 = tpu.matmul %386, %388, %cst_515 {dimension_numbers = #tpu.dot_dimension_numbers<[1], [0], [0], [1], [0, 0, 1, 1], [], []>} : vector<64x4xbf16>, vector<4x8xbf16>, vector<64x8xf32> -> vector<64x8xf32>
    %c3_516 = arith.constant 3 : index
    %c0_517 = arith.constant 0 : index
    %c0_518 = arith.constant 0 : index
    %390 = vector.load %arg6[%c3_516, %c0_517, %c0_518] : memref<4x64x8xf32, #tpu.memory_space<vmem>>, vector<1x64x8xf32>
    %391 = vector.shape_cast %390 : vector<1x64x8xf32> to vector<64x8xf32>
    %392 = arith.addf %391, %389 : vector<64x8xf32>
    %c3_519 = arith.constant 3 : index
    %c0_520 = arith.constant 0 : index
    %c0_521 = arith.constant 0 : index
    %393 = vector.load %arg6[%c3_519, %c0_520, %c0_521] : memref<4x64x8xf32, #tpu.memory_space<vmem>>, vector<1x64x8xf32>
    %394 = vector.shape_cast %393 : vector<1x64x8xf32> to vector<64x8xf32>
    %395 = vector.shape_cast %392 : vector<64x8xf32> to vector<1x64x8xf32>
    tpu.vector_store %arg6[%c3_519, %c0_520, %c0_521], %395 {strides = array<i32>} : memref<4x64x8xf32, #tpu.memory_space<vmem>>, vector<1x64x8xf32>,
    %c0_522 = arith.constant 0 : index
    %c0_523 = arith.constant 0 : index
    %c2_524 = arith.constant 2 : index
    %c1_525 = arith.constant 1 : index
    %c1_526 = arith.constant 1 : index
    %c0_527 = arith.constant 0 : index
    %396 = vector.load %arg2[%c0_522, %c0_523, %c2_524, %c1_525, %c1_526, %c0_527] : memref<1x1x4x9x9x4xbf16, #tpu.memory_space<vmem>>, vector<1x1x1x8x8x4xbf16>
    %397 = vector.shape_cast %396 : vector<1x1x1x8x8x4xbf16> to vector<8x8x4xbf16>
    %398 = vector.shape_cast %397 : vector<8x8x4xbf16> to vector<64x4xbf16>
    %c7_528 = arith.constant 7 : index
    %c0_529 = arith.constant 0 : index
    %c0_530 = arith.constant 0 : index
    %399 = vector.load %arg3[%c7_528, %c0_529, %c0_530] : memref<9x4x8xbf16, #tpu.memory_space<vmem>>, vector<1x4x8xbf16>
    %400 = vector.shape_cast %399 : vector<1x4x8xbf16> to vector<4x8xbf16>
    %cst_531 = arith.constant dense<0.000000e+00> : vector<64x8xf32>
    %401 = tpu.matmul %398, %400, %cst_531 {dimension_numbers = #tpu.dot_dimension_numbers<[1], [0], [0], [1], [0, 0, 1, 1], [], []>} : vector<64x4xbf16>, vector<4x8xbf16>, vector<64x8xf32> -> vector<64x8xf32>
    %c3_532 = arith.constant 3 : index
    %c0_533 = arith.constant 0 : index
    %c0_534 = arith.constant 0 : index
    %402 = vector.load %arg6[%c3_532, %c0_533, %c0_534] : memref<4x64x8xf32, #tpu.memory_space<vmem>>, vector<1x64x8xf32>
    %403 = vector.shape_cast %402 : vector<1x64x8xf32> to vector<64x8xf32>
    %404 = arith.addf %403, %401 : vector<64x8xf32>
    %c3_535 = arith.constant 3 : index
    %c0_536 = arith.constant 0 : index
    %c0_537 = arith.constant 0 : index
    %405 = vector.load %arg6[%c3_535, %c0_536, %c0_537] : memref<4x64x8xf32, #tpu.memory_space<vmem>>, vector<1x64x8xf32>
    %406 = vector.shape_cast %405 : vector<1x64x8xf32> to vector<64x8xf32>
    %407 = vector.shape_cast %404 : vector<64x8xf32> to vector<1x64x8xf32>
    tpu.vector_store %arg6[%c3_535, %c0_536, %c0_537], %407 {strides = array<i32>} : memref<4x64x8xf32, #tpu.memory_space<vmem>>, vector<1x64x8xf32>,
    %c0_538 = arith.constant 0 : index
    %c0_539 = arith.constant 0 : index
    %c3_540 = arith.constant 3 : index
    %c1_541 = arith.constant 1 : index
    %c1_542 = arith.constant 1 : index
    %c0_543 = arith.constant 0 : index
    %408 = vector.load %arg2[%c0_538, %c0_539, %c3_540, %c1_541, %c1_542, %c0_543] : memref<1x1x4x9x9x4xbf16, #tpu.memory_space<vmem>>, vector<1x1x1x8x8x4xbf16>
    %409 = vector.shape_cast %408 : vector<1x1x1x8x8x4xbf16> to vector<8x8x4xbf16>
    %410 = vector.shape_cast %409 : vector<8x8x4xbf16> to vector<64x4xbf16>
    %c8_544 = arith.constant 8 : index
    %c0_545 = arith.constant 0 : index
    %c0_546 = arith.constant 0 : index
    %411 = vector.load %arg3[%c8_544, %c0_545, %c0_546] : memref<9x4x8xbf16, #tpu.memory_space<vmem>>, vector<1x4x8xbf16>
    %412 = vector.shape_cast %411 : vector<1x4x8xbf16> to vector<4x8xbf16>
    %cst_547 = arith.constant dense<0.000000e+00> : vector<64x8xf32>
    %413 = tpu.matmul %410, %412, %cst_547 {dimension_numbers = #tpu.dot_dimension_numbers<[1], [0], [0], [1], [0, 0, 1, 1], [], []>} : vector<64x4xbf16>, vector<4x8xbf16>, vector<64x8xf32> -> vector<64x8xf32>
    %c3_548 = arith.constant 3 : index
    %c0_549 = arith.constant 0 : index
    %c0_550 = arith.constant 0 : index
    %414 = vector.load %arg6[%c3_548, %c0_549, %c0_550] : memref<4x64x8xf32, #tpu.memory_space<vmem>>, vector<1x64x8xf32>
    %415 = vector.shape_cast %414 : vector<1x64x8xf32> to vector<64x8xf32>
    %416 = arith.addf %415, %413 : vector<64x8xf32>
    %c3_551 = arith.constant 3 : index
    %c0_552 = arith.constant 0 : index
    %c0_553 = arith.constant 0 : index
    %417 = vector.load %arg6[%c3_551, %c0_552, %c0_553] : memref<4x64x8xf32, #tpu.memory_space<vmem>>, vector<1x64x8xf32>
    %418 = vector.shape_cast %417 : vector<1x64x8xf32> to vector<64x8xf32>
    %419 = vector.shape_cast %416 : vector<64x8xf32> to vector<1x64x8xf32>
    tpu.vector_store %arg6[%c3_551, %c0_552, %c0_553], %419 {strides = array<i32>} : memref<4x64x8xf32, #tpu.memory_space<vmem>>, vector<1x64x8xf32>,
    %c0_554 = arith.constant 0 : index
    %c0_555 = arith.constant 0 : index
    %c0_556 = arith.constant 0 : index
    %420 = vector.load %arg6[%c0_554, %c0_555, %c0_556] : memref<4x64x8xf32, #tpu.memory_space<vmem>>, vector<4x64x8xf32>
    %cst_557 = arith.constant dense<0xFF800000> : vector<64x8xf32>
    %421 = vector.multi_reduction <maximumf>, %420, %cst_557 [0] : vector<4x64x8xf32> to vector<64x8xf32>
    %c0_558 = arith.constant 0 : index
    %c0_559 = arith.constant 0 : index
    %422 = vector.load %arg4[%c0_558, %c0_559] : memref<1x8xf32, #tpu.memory_space<vmem>>, vector<1x8xf32>
    %423 = vector.broadcast %422 : vector<1x8xf32> to vector<64x8xf32>
    %424 = arith.addf %421, %423 : vector<64x8xf32>
    %cst_560 = arith.constant 0.000000e+00 : f32
    %425 = vector.broadcast %cst_560 : f32 to vector<64x8xf32>
    %426 = arith.maximumf %424, %425 : vector<64x8xf32>
    %427 = vector.shape_cast %426 : vector<64x8xf32> to vector<8x8x8xf32>
    %c0_561 = arith.constant 0 : index
    %c0_562 = arith.constant 0 : index
    %c0_563 = arith.constant 0 : index
    %c0_564 = arith.constant 0 : index
    %428 = vector.load %arg5[%c0_561, %c0_562, %c0_563, %c0_564] : memref<1x8x8x8xf32, #tpu.memory_space<vmem>>, vector<1x8x8x8xf32>
    %429 = vector.shape_cast %428 : vector<1x8x8x8xf32> to vector<8x8x8xf32>
    %430 = vector.shape_cast %427 : vector<8x8x8xf32> to vector<1x8x8x8xf32>
    tpu.vector_store %arg5[%c0_561, %c0_562, %c0_563, %c0_564], %430 {strides = array<i32>} : memref<1x8x8x8xf32, #tpu.memory_space<vmem>>, vector<1x8x8x8xf32>,
    return
  }
  func.func @transform_0(%arg0: i32, %arg1: i32) -> (i32, i32, i32, i32, i32, i32) {
    %c0_i32 = arith.constant 0 : i32
    %c0_i32_0 = arith.constant 0 : i32
    %c0_i32_1 = arith.constant 0 : i32
    %c0_i32_2 = arith.constant 0 : i32
    %c0_i32_3 = arith.constant 0 : i32
    return %arg0, %arg1, %c0_i32, %c0_i32_0, %c0_i32_1, %c0_i32_2 : i32, i32, i32, i32, i32, i32
  }
  func.func @transform_1(%arg0: i32, %arg1: i32) -> (i32, i32, i32) {
    %c0_i32 = arith.constant 0 : i32
    %c0_i32_0 = arith.constant 0 : i32
    %c0_i32_1 = arith.constant 0 : i32
    %c0_i32_2 = arith.constant 0 : i32
    return %c0_i32, %c0_i32_0, %c0_i32_1 : i32, i32, i32
  }
  func.func @transform_2(%arg0: i32, %arg1: i32) -> (i32, i32) {
    %c0_i32 = arith.constant 0 : i32
    %c0_i32_0 = arith.constant 0 : i32
    %c0_i32_1 = arith.constant 0 : i32
    return %c0_i32, %c0_i32_0 : i32, i32
  }
  func.func @transform_3(%arg0: i32, %arg1: i32) -> (i32, i32, i32, i32) {
    %c0_i32 = arith.constant 0 : i32
    %c0_i32_0 = arith.constant 0 : i32
    %c0_i32_1 = arith.constant 0 : i32
    return %arg0, %arg1, %c0_i32, %c0_i32_0 : i32, i32, i32, i32
  }
}

</mosaic_0001>

<bundles_post_ra>
// kernel: tpu_custom_call.1
= control target key start
LH: loop header
LB: loop body
LE: loop exit
PB: predicated region body
PF: predicated region fallthrough
CT: control target
= control target key end

     0   :  { %8 = vsyncpa [#allocation4], 0  ;;  %s10615_s0 = inlined_call_operand.vmem [shape: bf16[2,1,4,9,9,4], index: 0, kind: input, shape index: {}]   ;;  %s10616_s1 = inlined_call_operand.vmem [shape: bf16[9,4,8], index: 1, kind: input, shape index: {}]   ;;  %s10617_s2 = inlined_call_operand.vmem [shape: f32[1,8], index: 2, kind: input, shape index: {}]   ;;  %s10618_s3 = inlined_call_operand.hbm [shape: f32[2,8,8,8], index: 3, kind: output, shape index: {}]  }
   0x1   :  { %10 = vsyncpa [#allocation4 + $0x1], 0  ;;  %s8715_s12 = smov 0   ;;  %s8717_s13 = smov 0  }
   0x2   :  { %s8719_s14 = smov 0   ;;  %s8721_s15 = smov 0  }
   0x3   :  { %s8723_s16 = smov 0   ;;  %s8725_s17 = smov 0  }
   0x4 LB: > { %s7180_s18 = sadd.s32 4294967295, %s8690_s17   ;;  %s7181_s19 = sadd.s32 4294967294, %s8690_s17   ;;  %s8690_s17 = sphi %s8725_s17, %s16_s17   ;;  %s8686_s16 = sphi %s8723_s16, %s10627_s16   ;;  %s8682_s15 = sphi %s8721_s15, %s10626_s15   ;;  %s8678_s14 = sphi %s8719_s14, %s10625_s14   ;;  %s8674_s13 = sphi %s8717_s13, %s10624_s13   ;;  %s8670_s12 = sphi %s8715_s12, %s10623_s12  }
   0x5   : > { %s28_s20 = sadd.s32 1, %s8686_s16  ;;  %s107_s21 = sadd.s32 1, %s8678_s14 }
   0x6   : > { %p30_p0 = scmp.ge.s32.totalorder %s28_s20, 2  ;;  %p117_p1 = scmp.ne.s32.totalorder %s8678_s14, %s8674_s13 }
   0x7   : > { %p118_p2 = scmp.eq.s32.totalorder %s7180_s18, 1  ;;  %p123_p3 = scmp.ne.s32.totalorder %s8674_s13, %s8670_s12 }
   0x8   : > { %s10629_s20 = smov (%p30_p0, %s28_s20), 0  ;;  %p124_p5 = scmp.eq.s32.totalorder %s7181_s19, 1 }
   0x9   : > { %p8755_p4 = por %p118_p2, %p117_p1  ;;  %s102_s23 = ssub.s32 %s8686_s16, %s10629_s20 }
   0xa   : > { %p7184_p6 = scmp.ge.s32.totalorder %s8690_s17, 1  ;;  %p105_p7 = scmp.eq.s32.totalorder %s102_s23, 0 }
   0xb   : > { %p8762_p8 = por %p124_p5, %p123_p3  ;;  %p160_p9 = scmp.lt.s32.totalorder %s8690_s17, 3 }
   0xc   : > { %s8768_s25 = scalar_select %p105_p7, %s8678_s14, %s107_s21  }
   0xd   : > { %p161_p10 = pnand %p7184_p6, %p160_p9 }
   0xe   : > { %v207_v0 = vld [vmem:[%s10616_s1] sm:$0x3] (!%p161_p10)  ;;  %vm241_vm0 = vcmask (!%p161_p10), 1041408   ;;  %p188_p11 = scmp.lt.s32.totalorder (!%p161_p10), %s8682_s15, 1  ;;  %v7212_v2 = vld [vmem:[%s10616_s1 + $0x4] sm:$0x3] (!%p161_p10) }
   0xf   : > { %164 = sbr.rel (%p161_p10) target bundleno = 661 (0x295), region = 32  ;;  %8446 = vmatprep.subr.msk.bf16.mxu0 (!%p161_p10), %vm241_vm0, %v207_v0  ;;  %v243_v1 = vsel (!%p161_p10), %vm241_vm0, %v207_v0, 0  ;;  %v7203_v3 = vld [vmem:[%s10616_s1 + $0x2] sm:$0x3] (!%p161_p10)  ;;  %v7229_v5 = vld [vmem:[%s10616_s1 + $0x6] sm:$0x3] (!%p161_p10) }
  0x10   : > { %8087 = vmatpush3.bf16.msra.mxu0 (!%p161_p10), %v243_v1  ;;  %8447 = vmatprep.subr.msk.bf16.mxu1 (!%p161_p10), %vm241_vm0, %v7203_v3  ;;  %v363_v4 = vsel (!%p161_p10), %vm241_vm0, %v7203_v3, 0  ;;  %v7246_v6 = vld [vmem:[%s10616_s1 + $0x8] sm:$0x3] (!%p161_p10)  ;;  %v7271_v7 = vld [vmem:[%s10616_s1 + $0xa] sm:$0x3] (!%p161_p10)  ;;  %vm228_vm1 = vcmask (!%p161_p10), 31744  }
  0x11   : > { %8448 = vmatprep.subr.msk.bf16.mxu0 (!%p161_p10), %vm241_vm0, %v7212_v2  ;;  %8097 = vmatpush3.bf16.msra.mxu1 (!%p161_p10), %v363_v4  ;;  %v612_v8 = vsel (!%p161_p10), %vm241_vm0, %v7212_v2, 0  ;;  %v747_v9 = vsel (!%p161_p10), %vm241_vm0, %v7229_v5, 0  ;;  %v8804_v10 = vsel (!%p161_p10), %vm241_vm0, %v7246_v6, 0  ;;  %v8807_v11 = vsel (!%p161_p10), %vm241_vm0, %v7271_v7, 0  ;;  %s7905_s26 = sshll.u32 (!%p161_p10), %s8682_s15, 10 }
  0x12   : > { %8449 = vmatprep.subr.msk.bf16.mxu1 (!%p161_p10), %vm241_vm0, %v7229_v5  ;;  %vm470_vm2 = vsmask.f32 (!%p161_p10), 3328  ;;  %vm471_vm3 = vsmask.f32 (!%p161_p10), 7440  ;;  %v8855_v5 = vld [vmem:[%s10616_s1 + $0xe] sm:$0x3] (!%p161_p10)  ;;  %s10557_s30 = scalar_lea.hbm (!%p161_p10), %s10618_s3, %s7905_s26 }
  0x13   : > { %vm8837_vm4 = vmor (!%p161_p10), %vm470_vm2, %vm471_vm3  ;;  %vm310_vm5 = vcmask (!%p161_p10), 64512  }
  0x16   : > { %s189_s5 = scalar_select %p188_p11, %s8682_s15, 1 }
  0x18   : > { %s8482_s8 = smul.u32 288, %s189_s5  ;;  %s8692_s5 = smov [#allocation3]  }
  0x19   : > { %s8616_s6 = sshll.u32 %s8692_s5, 4  ;;  %s8617_s6 = int_to_ptr.vmem [resolvable:$false] %s8616_s6 }
  0x1a   : > { %s8799_s23 = scalar_lea.vmem %s10615_s0, %s8482_s8  ;;  %s8618_s7 = scalar_lea.vmem %s8617_s6, 2048 }
  0x1b   : > { %v8540_v12 = vld [vmem:[%s8799_s23] ss:$8 sps:$4 sm:$0xff]   ;;  %v8541_v13 = vld [vmem:[%s8799_s23 + $0x10] ss:$8 sps:$4 sm:$0xff]   ;;  %v455_v21 = vld [vmem:[%s8799_s23 + $0x4] sm:$0x1] }
  0x1c   : > { %8088 = vmatprep.mubr.msk.bf16.mxu0 %vm228_vm1, %v8540_v12  ;;  %v8542_v14 = vld [vmem:[%s8799_s23 + $0x48] ss:$8 sps:$4 sm:$0xff]   ;;  %v8543_v15 = vld [vmem:[%s8799_s23 + $0x58] ss:$8 sps:$4 sm:$0xff]   ;;  %v457_v23 = vld [vmem:[%s8799_s23 + $0xc] sm:$0x1] }
  0x1d   : > { %8089 = vmatmul.mubr.msk.bf16.vlgmr.msra.gmra.mrb[0].mxu0 %vm228_vm1, %v8541_v13  ;;  %8098 = vmatprep.mubr.msk.bf16.mxu1 %vm228_vm1, %v8542_v14  ;;  %v8544_v16 = vld [vmem:[%s8799_s23 + $0x20] ss:$8 sps:$4 sm:$0xff]   ;;  %v8545_v17 = vld [vmem:[%s8799_s23 + $0x30] ss:$8 sps:$4 sm:$0xff]   ;;  %v483_v26 = vshll.u32 %v455_v21, 16  ;;  %v497_v29 = vshll.u32 %v457_v23, 16 }
  0x1e   : > { %8107 = vmatpush3.bf16.msra.mxu0 %v612_v8  ;;  %8099 = vmatmul.mubr.msk.bf16.vlgmr.msra.gmra.mrb[0].mxu1 %vm228_vm1, %v8543_v15  ;;  %v8546_v18 = vld [vmem:[%s8799_s23 + $0x68] ss:$8 sps:$4 sm:$0xff]   ;;  %v8547_v19 = vld [vmem:[%s8799_s23 + $0x78] ss:$8 sps:$4 sm:$0xff]   ;;  %v459_v31 = vld [vmem:[%s8799_s23 + $0x14] sm:$0x1] }
  0x1f   : > { %8450 = vmatprep.subr.msk.bf16.mxu0 %vm241_vm0, %v7246_v6  ;;  %8092 = vmatprep.mubr.msk.bf16.mxu0 %vm228_vm1, %v8544_v16  ;;  %v454_v20 = vld [vmem:[%s8799_s23] sm:$0xf]  ;;  %v456_v22 = vld [vmem:[%s8799_s23 + $0x8] sm:$0xf]  ;;  %v458_v30 = vld [vmem:[%s8799_s23 + $0x10] sm:$0xf] }
  0x20   : > { %8117 = vmatpush3.bf16.msra.mxu1 %v747_v9  ;;  %8102 = vmatprep.mubr.msk.bf16.mxu1 %vm228_vm1, %v8546_v18  ;;  %v474_v24 = vshrl.u32 %v454_v20, 16  ;;  %v477_v25 = vshll.u32 %v454_v20, 16  ;;  %v488_v27 = vshrl.u32 %v456_v22, 16  ;;  %v491_v28 = vshll.u32 %v456_v22, 16  ;;  %v460_v36 = vld [vmem:[%s8799_s23 + $0x18] sm:$0xf] }
  0x21   : > { %8451 = vmatprep.subr.msk.bf16.mxu1 %vm241_vm0, %v7271_v7  ;;  %v485_v34 = vrot.slane %v483_v26, 5  ;;  %v499_v38 = vrot.slane %v497_v29, 5  ;;  %v461_v39 = vld [vmem:[%s8799_s23 + $0x1c] sm:$0x1]  ;;  %v502_v40 = vshrl.u32 %v458_v30, 16  ;;  %v505_v41 = vshll.u32 %v458_v30, 16 }
  0x22   : > { %v476_v32 = vrot.slane %v474_v24, 4  ;;  %v479_v33 = vrot.slane %v477_v25, 5  ;;  %v490_v35 = vrot.slane %v488_v27, 4  ;;  %v493_v37 = vrot.slane %v491_v28, 5  ;;  %v8548_v55 = vld [vmem:[%s8799_s23 + $0x90] ss:$8 sps:$4 sm:$0xff]  }
  0x23   : > { %v511_v43 = vshll.u32 %v459_v31, 16  ;;  %v516_v44 = vshrl.u32 %v460_v36, 16  ;;  %v519_v45 = vshll.u32 %v460_v36, 16  ;;  %v504_v48 = vrot.slane %v502_v40, 4  ;;  %v8549_v61 = vld [vmem:[%s8799_s23 + $0xa0] ss:$8 sps:$4 sm:$0xff]  }
  0x24   : > { %v480_v42 = vor.u32 %v479_v33, %v476_v32  ;;  %v494_v47 = vor.u32 %v493_v37, %v490_v35  ;;  %v507_v49 = vrot.slane %v505_v41, 5  ;;  %v525_v50 = vshll.u32 %v461_v39, 16  ;;  %v462_v62 = vld [vmem:[%s8799_s23 + $0x20] sm:$0xf]  ;;  %v463_v63 = vld [vmem:[%s8799_s23 + $0x24] sm:$0x1] }
  0x25   : > { %8093 = vmatmul.mubr.msk.bf16.gmra.mrb[4].mxu0 %vm228_vm1, %v8545_v17  ;;  %v513_v52 = vrot.slane %v511_v43, 5  ;;  %v518_v53 = vrot.slane %v516_v44, 4  ;;  %v521_v54 = vrot.slane %v519_v45, 5  ;;  %v464_v2 = vld [vmem:[%s8799_s23 + $0x28] sm:$0xf]  ;;  %v530_v4 = vshrl.u32 %v462_v62, 16 }
  0x26   : > { %8103 = vmatmul.mubr.msk.bf16.gmra.mrb[4].mxu1 %vm228_vm1, %v8547_v19  ;;  %v481_v51 = vrot.slane %v480_v42, 4  ;;  %v495_v56 = vrot.slane %v494_v47, 4  ;;  %v508_v57 = vor.u32 %v507_v49, %v504_v48  ;;  %v527_v58 = vrot.slane %v525_v50, 5  ;;  %v465_v3 = vld [vmem:[%s8799_s23 + $0x2c] sm:$0x1] }
  0x27   : > { %v522_v60 = vor.u32 %v521_v54, %v518_v53  ;;  %8118 = vmatprep.mubr.msk.bf16.mxu1 %vm228_vm1, %v8548_v55  ;;  %v533_v8 = vshll.u32 %v462_v62, 16  ;;  %v539_v9 = vshll.u32 %v463_v63, 16  ;;  %v466_v12 = vld [vmem:[%s8799_s23 + $0x30] sm:$0xf]  ;;  %v532_v14 = vrot.slane %v530_v4, 4 }
  0x28   : > { %v486_v59 = vsel %vm8837_vm4, %v481_v51, %v485_v34  ;;  %v500_v0 = vsel %vm8837_vm4, %v495_v56, %v499_v38  ;;  %v509_v1 = vrot.slane %v508_v57, 4  ;;  %v544_v15 = vshrl.u32 %v464_v2, 16  ;;  %v467_v17 = vld [vmem:[%s8799_s23 + $0x34] sm:$0x1]  ;;  %v468_v22 = vld [vmem:[%s8799_s23 + $0x38] sm:$0xf] }
  0x29   : > { %v7213_v6 = vcombine.low %v486_v59, %v500_v0  ;;  %v523_v7 = vrot.slane %v522_v60, 4  ;;  %v547_v16 = vshll.u32 %v464_v2, 16  ;;  %v535_v19 = vrot.slane %v533_v8, 5  ;;  %v8869_v23 = vld [vmem:[%s10616_s1 + $0xc] sm:$0x3] }
  0x2a   : > { %v514_v13 = vsel %vm8837_vm4, %v509_v1, %v513_v52  ;;  %v541_v20 = vrot.slane %v539_v9, 5  ;;  %v553_v21 = vshll.u32 %v465_v3, 16  ;;  %v546_v25 = vrot.slane %v544_v15, 4  ;;  %v469_v27 = vld [vmem:[%s8799_s23 + $0x3c] sm:$0x1] }
  0x2b   : > { %8108 = vmatprep.mubr.msk.bf16.mxu0 %vm228_vm1, %v7213_v6  ;;  %v528_v18 = vsel %vm8837_vm4, %v523_v7, %v527_v58  ;;  %v549_v26 = vrot.slane %v547_v16, 5  ;;  %v558_v28 = vshrl.u32 %v466_v12, 16  ;;  %v536_v29 = vor.u32 %v535_v19, %v532_v14  ;;  %v8552_v53 = vld [vmem:[%s8799_s23 + $0xd8] ss:$8 sps:$4 sm:$0xff]   ;;  %v7255_v54 = vld [vmem:[%s8799_s23 + $0x90] sm:$0xf] }
  0x2c   : > { %v7214_v24 = vcombine.low %v514_v13, %v528_v18  ;;  %v555_v30 = vrot.slane %v553_v21, 5  ;;  %v561_v31 = vshll.u32 %v466_v12, 16  ;;  %v567_v32 = vshll.u32 %v467_v17, 16  ;;  %v7256_v56 = vld [vmem:[%s8799_s23 + $0x94] sm:$0x1] }
  0x2d   : > { %v550_v33 = vor.u32 %v549_v26, %v546_v25  ;;  %v560_v34 = vrot.slane %v558_v28, 4  ;;  %v572_v35 = vshrl.u32 %v468_v22, 16  ;;  %v575_v36 = vshll.u32 %v468_v22, 16  ;;  %v7257_v57 = vld [vmem:[%s8799_s23 + $0x98] sm:$0xf] }
  0x2e   : > { %8119 = vmatmul.mubr.msk.bf16.vlgmr.msra.gmra.mrb[8].mxu1 %vm228_vm1, %v8549_v61  ;;  %8109 = vmatmul.mubr.msk.bf16.vlgmr.msra.gmra.mrb[8].mxu0 %vm228_vm1, %v7214_v24  ;;  %v537_v37 = vrot.slane %v536_v29, 4  ;;  %v563_v38 = vrot.slane %v561_v31, 5  ;;  %v581_v39 = vshll.u32 %v469_v27, 16  ;;  %v569_v45 = vrot.slane %v567_v32, 5  ;;  %v7258_v58 = vld [vmem:[%s8799_s23 + $0x9c] sm:$0x1] }
  0x2f   : > { %8137 = vmatpush3.bf16.msra.mxu1 %v8807_v11  ;;  %8127 = vmatpush3.bf16.msra.mxu0 %v8804_v10  ;;  %v8550_v11 = vld [vmem:[%s8799_s23 + $0xb0] ss:$8 sps:$4 sm:$0xff]   ;;  %v551_v40 = vrot.slane %v550_v33, 4  ;;  %v574_v41 = vrot.slane %v572_v35, 4  ;;  %v577_v42 = vrot.slane %v575_v36, 5  ;;  %v990_v60 = vshrl.u32 %v7255_v54, 16 }
  0x30   : > { %8453 = vmatprep.subr.msk.bf16.mxu1 %vm241_vm0, %v8855_v5  ;;  %8452 = vmatprep.subr.msk.bf16.mxu0 %vm241_vm0, %v8869_v23  ;;  %v542_v43 = vsel %vm8837_vm4, %v537_v37, %v541_v20  ;;  %v564_v44 = vor.u32 %v563_v38, %v560_v34  ;;  %v8551_v10 = vld [vmem:[%s8799_s23 + $0xc0] ss:$8 sps:$4 sm:$0xff]   ;;  %v583_v49 = vrot.slane %v581_v39, 5  ;;  %v993_v61 = vshll.u32 %v7255_v54, 16  ;;  %v7260_v4 = vld [vmem:[%s8799_s23 + $0xa4] sm:$0x1] }
  0x31   : > { %8122 = vmatprep.mubr.msk.bf16.mxu1 %vm228_vm1, %v8550_v11  ;;  %v556_v47 = vsel %vm8837_vm4, %v551_v40, %v555_v30  ;;  %v578_v48 = vor.u32 %v577_v42, %v574_v41  ;;  %v999_v62 = vshll.u32 %v7256_v56, 16  ;;  %v7259_v63 = vld [vmem:[%s8799_s23 + $0xa0] sm:$0xf]  ;;  %v1004_v1 = vshrl.u32 %v7257_v57, 16  ;;  %v7261_v9 = vld [vmem:[%s8799_s23 + $0xa8] sm:$0xf] }
  0x32   : > { %v7215_v50 = vcombine.low %v542_v43, %v556_v47  ;;  %v565_v51 = vrot.slane %v564_v44, 4  ;;  %v1007_v2 = vshll.u32 %v7257_v57, 16  ;;  %v1013_v3 = vshll.u32 %v7258_v58, 16  ;;  %v7262_v16 = vld [vmem:[%s8799_s23 + $0xac] sm:$0x1] }
  0x33   : > { %v579_v52 = vrot.slane %v578_v48, 4  ;;  %v992_v6 = vrot.slane %v990_v60, 4  ;;  %v995_v7 = vrot.slane %v993_v61, 5  ;;  %v1001_v8 = vrot.slane %v999_v62, 5  ;;  %v8553_v27 = vld [vmem:[%s8799_s23 + $0xe8] ss:$8 sps:$4 sm:$0xff]  }
  0x34   : > { %8112 = vmatprep.mubr.msk.bf16.mxu0 %vm228_vm1, %v7215_v50  ;;  %v570_v55 = vsel %vm8837_vm4, %v565_v51, %v569_v45  ;;  %v1018_v12 = vshrl.u32 %v7259_v63, 16  ;;  %v1006_v13 = vrot.slane %v1004_v1, 4  ;;  %v1009_v14 = vrot.slane %v1007_v2, 5  ;;  %v8554_v35 = vld [vmem:[%s8799_s23 + $0xf8] ss:$8 sps:$4 sm:$0xff]  }
  0x35   : > { %v584_v59 = vsel %vm8837_vm4, %v579_v52, %v583_v49  ;;  %v1015_v15 = vrot.slane %v1013_v3, 5  ;;  %v1021_v17 = vshll.u32 %v7259_v63, 16  ;;  %v996_v18 = vor.u32 %v995_v7, %v992_v6  ;;  %v7263_v39 = vld [vmem:[%s8799_s23 + $0xb0] sm:$0xf]  ;;  %v7264_v42 = vld [vmem:[%s8799_s23 + $0xb4] sm:$0x1] }
  0x36   : > { %8123 = vmatmul.mubr.msk.bf16.gmra.mrb[12].mxu1 %vm228_vm1, %v8551_v10  ;;  %v7216_v0 = vcombine.low %v570_v55, %v584_v59  ;;  %v1020_v19 = vrot.slane %v1018_v12, 4  ;;  %v1027_v20 = vshll.u32 %v7260_v4, 16  ;;  %v1032_v21 = vshrl.u32 %v7261_v9, 16  ;;  %v7265_v43 = vld [vmem:[%s8799_s23 + $0xb8] sm:$0xf] }
  0x37   : > { %v1010_v22 = vor.u32 %v1009_v14, %v1006_v13  ;;  %v1023_v24 = vrot.slane %v1021_v17, 5  ;;  %v1035_v25 = vshll.u32 %v7261_v9, 16  ;;  %v1041_v26 = vshll.u32 %v7262_v16, 16  ;;  %v7266_v10 = vld [vmem:[%s8799_s23 + $0xbc] sm:$0x1] }
  0x38   : > { %8113 = vmatmul.mubr.msk.bf16.gmra.mrb[12].mxu0 %vm228_vm1, %v7216_v0  ;;  %v1263_v28 = vsel %vm241_vm0, %v8869_v23, 0  ;;  %v997_v29 = vrot.slane %v996_v18, 4  ;;  %v1029_v30 = vrot.slane %v1027_v20, 5  ;;  %v1034_v31 = vrot.slane %v1032_v21, 4  ;;  %v8915_v23 = vld [vmem:[%s10616_s1 + $0x10] sm:$0x3] }
  0x39   : > { %8128 = vmatprep.mubr.msk.bf16.mxu0 %vm228_vm1, %v8552_v53  ;;  %v1011_v32 = vrot.slane %v1010_v22, 4  ;;  %v1024_v33 = vor.u32 %v1023_v24, %v1020_v19  ;;  %v1037_v34 = vrot.slane %v1035_v25, 5  ;;  %v1043_v37 = vrot.slane %v1041_v26, 5  ;;  %v7267_v53 = vld [vmem:[%s8799_s23 + $0xc0] sm:$0xf] }
  0x3a   : > { %v1002_v36 = vsel %vm8837_vm4, %v997_v29, %v1001_v8  ;;  %v1398_v38 = vsel %vm241_vm0, %v8855_v5, 0  ;;  %v1046_v44 = vshrl.u32 %v7263_v39, 16  ;;  %v1049_v47 = vshll.u32 %v7263_v39, 16  ;;  %v7268_v58 = vld [vmem:[%s8799_s23 + $0xc4] sm:$0x1] }
  0x3b   : > { %v1016_v11 = vsel %vm8837_vm4, %v1011_v32, %v1015_v15  ;;  %v1025_v40 = vrot.slane %v1024_v33, 4  ;;  %v1038_v41 = vor.u32 %v1037_v34, %v1034_v31  ;;  %v1055_v5 = vshll.u32 %v7264_v42, 16  ;;  %v8555_v60 = vld [vmem:[%s8799_s23 + $0x108] ss:$8 sps:$4 sm:$0xff]   ;;  %v7270_v63 = vld [vmem:[%s8799_s23 + $0xcc] sm:$0x1] }
  0x3c   : > { %v7272_v45 = vcombine.low %v1002_v36, %v1016_v11  ;;  %v1060_v48 = vshrl.u32 %v7265_v43, 16  ;;  %v1048_v51 = vrot.slane %v1046_v44, 4  ;;  %v1063_v52 = vshll.u32 %v7265_v43, 16  ;;  %v7269_v62 = vld [vmem:[%s8799_s23 + $0xc8] sm:$0xf] }
  0x3d   : > { %v1030_v49 = vsel %vm8837_vm4, %v1025_v40, %v1029_v30  ;;  %v1039_v50 = vrot.slane %v1038_v41, 4  ;;  %v1051_v54 = vrot.slane %v1049_v47, 5  ;;  %v1057_v55 = vrot.slane %v1055_v5, 5  ;;  %v8939_v1 = vld [vmem:[%s10616_s1] sm:$0x3] }
  0x3e   : > { %8138 = vmatprep.mubr.msk.bf16.mxu1 %vm228_vm1, %v7272_v45  ;;  %v1062_v56 = vrot.slane %v1060_v48, 4  ;;  %v1069_v57 = vshll.u32 %v7266_v10, 16  ;;  %v1065_v61 = vrot.slane %v1063_v52, 5  ;;  %v1074_v0 = vshrl.u32 %v7267_v53, 16  ;;  %v8556_v13 = vld [vmem:[%s8799_s23 + $0x8] ss:$8 sps:$4 sm:$0xff]  }
  0x3f   : > { %v1044_v59 = vsel %vm8837_vm4, %v1039_v50, %v1043_v37  ;;  %v1052_v3 = vor.u32 %v1051_v54, %v1048_v51  ;;  %v1077_v6 = vshll.u32 %v7267_v53, 16  ;;  %v1083_v9 = vshll.u32 %v7268_v58, 16  ;;  %v8557_v33 = vld [vmem:[%s8799_s23 + $0x18] ss:$8 sps:$4 sm:$0xff]   ;;  %v8560_v37 = vld [vmem:[%s8799_s23 + $0x28] ss:$8 sps:$4 sm:$0xff]  }
  0x40   : > { %8129 = vmatmul.mubr.msk.bf16.vlgmr.msra.gmra.mrb[16].mxu0 %vm228_vm1, %v8553_v27  ;;  %v7273_v2 = vcombine.low %v1030_v49, %v1044_v59  ;;  %v1071_v4 = vrot.slane %v1069_v57, 5  ;;  %v1066_v7 = vor.u32 %v1065_v61, %v1062_v56  ;;  %v1076_v8 = vrot.slane %v1074_v0, 4  ;;  %v7315_v39 = vld [vmem:[%s8799_s23 + $0xc] sm:$0x1]  ;;  %v7316_v11 = vld [vmem:[%s8799_s23 + $0x10] sm:$0xf] }
  0x41   : > { %8147 = vmatpush3.bf16.msra.mxu0 %v1263_v28  ;;  %8132 = vmatprep.mubr.msk.bf16.mxu0 %vm228_vm1, %v8554_v35  ;;  %v1088_v12 = vshrl.u32 %v7269_v62, 16  ;;  %v1053_v14 = vrot.slane %v1052_v3, 4  ;;  %v1079_v15 = vrot.slane %v1077_v6, 5  ;;  %v1091_v16 = vshll.u32 %v7269_v62, 16  ;;  %v8558_v35 = vld [vmem:[%s8799_s23 + $0x50] ss:$8 sps:$4 sm:$0xff]  }
  0x42   : > { %8454 = vmatprep.subr.msk.bf16.mxu0 %vm241_vm0, %v8915_v23  ;;  %8139 = vmatmul.mubr.msk.bf16.vlgmr.msra.gmra.mrb[16].mxu1 %vm228_vm1, %v7273_v2  ;;  %v1097_v17 = vshll.u32 %v7270_v63, 16  ;;  %v1067_v18 = vrot.slane %v1066_v7, 4  ;;  %v1085_v22 = vrot.slane %v1083_v9, 5  ;;  %v1644_v32 = vsel %vm241_vm0, %v8915_v23, 0  ;;  %v7317_v40 = vld [vmem:[%s8799_s23 + $0x14] sm:$0x1] }
  0x43   : > { %8157 = vmatpush3.bf16.msra.mxu1 %v1398_v38  ;;  %v1090_v19 = vrot.slane %v1088_v12, 4  ;;  %v1058_v20 = vsel %vm8837_vm4, %v1053_v14, %v1057_v55  ;;  %v1080_v21 = vor.u32 %v1079_v15, %v1076_v8  ;;  %v1093_v24 = vrot.slane %v1091_v16, 5  ;;  %v7314_v38 = vld [vmem:[%s8799_s23 + $0x8] sm:$0xf]  ;;  %v7355_v10 = vld [vmem:[%s10616_s1 + $0x2] sm:$0x3] }
  0x44   : > { %8455 = vmatprep.subr.msk.bf16.mxu1 %vm241_vm0, %v8939_v1  ;;  %v1072_v25 = vsel %vm8837_vm4, %v1067_v18, %v1071_v4  ;;  %v1099_v29 = vrot.slane %v1097_v17, 5  ;;  %v1506_v41 = vshrl.u32 %v7314_v38, 16  ;;  %v1509_v42 = vshll.u32 %v7314_v38, 16  ;;  %v7318_v48 = vld [vmem:[%s8799_s23 + $0x18] sm:$0xf] }
  0x45   : > { %v7274_v26 = vcombine.low %v1058_v20, %v1072_v25  ;;  %v1081_v27 = vrot.slane %v1080_v21, 4  ;;  %v1094_v28 = vor.u32 %v1093_v24, %v1090_v19  ;;  %v1515_v23 = vshll.u32 %v7315_v39, 16  ;;  %v7319_v49 = vld [vmem:[%s8799_s23 + $0x1c] sm:$0x1]  ;;  %v8559_v50 = vld [vmem:[%s8799_s23 + $0x60] ss:$8 sps:$4 sm:$0xff]  }
  0x46   : > { %v1520_v43 = vshrl.u32 %v7316_v11, 16  ;;  %v1523_v44 = vshll.u32 %v7316_v11, 16  ;;  %v1529_v45 = vshll.u32 %v7317_v40, 16  ;;  %v1508_v47 = vrot.slane %v1506_v41, 4  ;;  %v8561_v51 = vld [vmem:[%s8799_s23 + $0x38] ss:$8 sps:$4 sm:$0xff]  }
  0x47   : > { %8142 = vmatprep.mubr.msk.bf16.mxu1 %vm228_vm1, %v7274_v26  ;;  %v1086_v30 = vsel %vm8837_vm4, %v1081_v27, %v1085_v22  ;;  %v1095_v31 = vrot.slane %v1094_v28, 4  ;;  %v1511_v5 = vrot.slane %v1509_v42, 5  ;;  %v1517_v52 = vrot.slane %v1515_v23, 5  ;;  %v7320_v56 = vld [vmem:[%s8799_s23 + $0x20] sm:$0xf] }
  0x48   : > { %8133 = vmatmul.mubr.msk.bf16.gmra.mrb[20].mxu0 %vm228_vm1, %v8555_v60  ;;  %v1522_v53 = vrot.slane %v1520_v43, 4  ;;  %v1525_v54 = vrot.slane %v1523_v44, 5  ;;  %v1531_v55 = vrot.slane %v1529_v45, 5  ;;  %v8562_v57 = vld [vmem:[%s8799_s23 + $0x70] ss:$8 sps:$4 sm:$0xff]   ;;  %v1534_v60 = vshrl.u32 %v7318_v48, 16 }
  0x49   : > { %8148 = vmatprep.mubr.msk.bf16.mxu0 %vm228_vm1, %v8556_v13  ;;  %v1100_v34 = vsel %vm8837_vm4, %v1095_v31, %v1099_v29  ;;  %v1512_v58 = vor.u32 %v1511_v5, %v1508_v47  ;;  %v7321_v59 = vld [vmem:[%s8799_s23 + $0x24] sm:$0x1]  ;;  %v1537_v61 = vshll.u32 %v7318_v48, 16  ;;  %v1543_v62 = vshll.u32 %v7319_v49, 16  ;;  %v7322_v20 = vld [vmem:[%s8799_s23 + $0x28] sm:$0xf] }
  0x4a   : > { %v7275_v36 = vcombine.low %v1086_v30, %v1100_v34  ;;  %v1526_v63 = vor.u32 %v1525_v54, %v1522_v53  ;;  %v1548_v0 = vshrl.u32 %v7320_v56, 16  ;;  %v1551_v2 = vshll.u32 %v7320_v56, 16  ;;  %v7323_v21 = vld [vmem:[%s8799_s23 + $0x2c] sm:$0x1]  ;;  %v7324_v25 = vld [vmem:[%s8799_s23 + $0x30] sm:$0xf] }
  0x4b   : > { %v1557_v3 = vshll.u32 %v7321_v59, 16  ;;  %v1513_v4 = vrot.slane %v1512_v58, 4  ;;  %v1536_v6 = vrot.slane %v1534_v60, 4  ;;  %v1539_v7 = vrot.slane %v1537_v61, 5  ;;  %v7325_v26 = vld [vmem:[%s8799_s23 + $0x34] sm:$0x1] }
  0x4c   : > { %8143 = vmatmul.mubr.msk.bf16.gmra.mrb[20].mxu1 %vm228_vm1, %v7275_v36  ;;  %v1777_v8 = vsel %vm241_vm0, %v8939_v1, 0  ;;  %v1527_v9 = vrot.slane %v1526_v63, 4  ;;  %v1550_v12 = vrot.slane %v1548_v0, 4  ;;  %v1553_v13 = vrot.slane %v1551_v2, 5  ;;  %v8563_v28 = vld [vmem:[%s8799_s23 + $0x80] ss:$8 sps:$4 sm:$0xff]  }
  0x4d   : > { %8158 = vmatprep.mubr.msk.bf16.mxu1 %vm228_vm1, %v8558_v35  ;;  %v1518_v14 = vsel %vm8837_vm4, %v1513_v4, %v1517_v52  ;;  %v1540_v15 = vor.u32 %v1539_v7, %v1536_v6  ;;  %v1545_v16 = vrot.slane %v1543_v62, 5  ;;  %v1559_v1 = vrot.slane %v1557_v3, 5  ;;  %v8564_v35 = vld [vmem:[%s8799_s23 + $0x48] ss:$8 sps:$4 sm:$0xff]   ;;  %v7326_v39 = vld [vmem:[%s8799_s23 + $0x38] sm:$0xf] }
  0x4e   : > { %v1532_v17 = vsel %vm8837_vm4, %v1527_v9, %v1531_v55  ;;  %v1554_v18 = vor.u32 %v1553_v13, %v1550_v12  ;;  %v2007_v19 = vsel %vm241_vm0, %v7355_v10, 0  ;;  %v1562_v27 = vshrl.u32 %v7322_v20, 16  ;;  %v7327_v23 = vld [vmem:[%s8799_s23 + $0x3c] sm:$0x1]  ;;  %v7329_v47 = vld [vmem:[%s8799_s23 + $0x44] sm:$0x1] }
  0x4f   : > { %v7331_v22 = vcombine.low %v1518_v14, %v1532_v17  ;;  %v1541_v24 = vrot.slane %v1540_v15, 4  ;;  %v1565_v30 = vshll.u32 %v7322_v20, 16  ;;  %v1571_v31 = vshll.u32 %v7323_v21, 16  ;;  %v8565_v62 = vld [vmem:[%s8799_s23 + $0x58] ss:$8 sps:$4 sm:$0xff]  }
  0x50   : > { %8149 = vmatmul.mubr.msk.bf16.vlgmr.msra.gmra.mrb[24].mxu0 %vm228_vm1, %v8557_v33  ;;  %v1555_v29 = vrot.slane %v1554_v18, 4  ;;  %v7380_v33 = vld [vmem:[%s10616_s1 + $0x4] sm:$0x3]  ;;  %v1564_v36 = vrot.slane %v1562_v27, 4  ;;  %v1585_v38 = vshll.u32 %v7325_v26, 16  ;;  %v1590_v48 = vshrl.u32 %v7326_v39, 16 }
  0x51   : > { %8167 = vmatpush3.bf16.msra.mxu0 %v1644_v32  ;;  %8152 = vmatprep.mubr.msk.bf16.mxu0 %vm228_vm1, %v8560_v37  ;;  %v1576_v32 = vshrl.u32 %v7324_v25, 16  ;;  %v1546_v34 = vsel %vm8837_vm4, %v1541_v24, %v1545_v16  ;;  %v1579_v37 = vshll.u32 %v7324_v25, 16  ;;  %v1567_v40 = vrot.slane %v1565_v30, 5  ;;  %v8566_v7 = vld [vmem:[%s8799_s23 + $0x68] ss:$8 sps:$4 sm:$0xff]  }
  0x52   : > { %8456 = vmatprep.subr.msk.bf16.mxu0 %vm241_vm0, %v7355_v10  ;;  %v1560_v11 = vsel %vm8837_vm4, %v1555_v29, %v1559_v1  ;;  %v1573_v41 = vrot.slane %v1571_v31, 5  ;;  %v1587_v45 = vrot.slane %v1585_v38, 5  ;;  %v7328_v10 = vld [vmem:[%s8799_s23 + $0x40] sm:$0xf]  ;;  %v1593_v49 = vshll.u32 %v7326_v39, 16 }
  0x53   : > { %v1578_v42 = vrot.slane %v1576_v32, 4  ;;  %v7332_v43 = vcombine.low %v1546_v34, %v1560_v11  ;;  %v1581_v44 = vrot.slane %v1579_v37, 5  ;;  %v1568_v5 = vor.u32 %v1567_v40, %v1564_v36  ;;  %v1854_v9 = vld [vmem:[%s8799_s23 + $0x4] sm:$0x1]  ;;  %v1855_v12 = vld [vmem:[%s8799_s23 + $0x8] sm:$0xf] }
  0x54   : > { %8159 = vmatmul.mubr.msk.bf16.vlgmr.msra.gmra.mrb[24].mxu1 %vm228_vm1, %v8559_v50  ;;  %v1599_v50 = vshll.u32 %v7327_v23, 16  ;;  %v1604_v52 = vshrl.u32 %v7328_v10, 16  ;;  %v1607_v53 = vshll.u32 %v7328_v10, 16  ;;  %v1613_v54 = vshll.u32 %v7329_v47, 16  ;;  %v1856_v15 = vld [vmem:[%s8799_s23 + $0xc] sm:$0x1] }
  0x55   : > { %8177 = vmatpush3.bf16.msra.mxu1 %v1777_v8  ;;  %8162 = vmatprep.mubr.msk.bf16.mxu1 %vm228_vm1, %v8562_v57  ;;  %v1569_v55 = vrot.slane %v1568_v5, 4  ;;  %v1592_v56 = vrot.slane %v1590_v48, 4  ;;  %v1595_v57 = vrot.slane %v1593_v49, 5  ;;  %v2252_v3 = vsel %vm241_vm0, %v7380_v33, 0  ;;  %v1853_v8 = vld [vmem:[%s8799_s23] sm:$0xf] }
  0x56   : > { %8457 = vmatprep.subr.msk.bf16.mxu1 %vm241_vm0, %v7380_v33  ;;  %v1601_v59 = vrot.slane %v1599_v50, 5  ;;  %v1606_v60 = vrot.slane %v1604_v52, 4  ;;  %v1609_v61 = vrot.slane %v1607_v53, 5  ;;  %v1615_v2 = vrot.slane %v1613_v54, 5  ;;  %v7397_v21 = vld [vmem:[%s10616_s1 + $0x6] sm:$0x3] }
  0x57   : > { %v1574_v63 = vsel %vm8837_vm4, %v1569_v55, %v1573_v41  ;;  %v1596_v0 = vor.u32 %v1595_v57, %v1592_v56  ;;  %v1870_v16 = vshrl.u32 %v1853_v8, 16  ;;  %v1873_v17 = vshll.u32 %v1853_v8, 16  ;;  %v1857_v27 = vld [vmem:[%s8799_s23 + $0x10] sm:$0xf]  ;;  %v1858_v32 = vld [vmem:[%s8799_s23 + $0x14] sm:$0x1] }
  0x58   : > { %8153 = vmatmul.mubr.msk.bf16.gmra.mrb[28].mxu0 %vm228_vm1, %v8561_v51  ;;  %v1582_v51 = vor.u32 %v1581_v44, %v1578_v42  ;;  %v1610_v6 = vor.u32 %v1609_v61, %v1606_v60  ;;  %v1879_v1 = vshll.u32 %v1854_v9, 16  ;;  %v1887_v20 = vshll.u32 %v1855_v12, 16  ;;  %v1859_v36 = vld [vmem:[%s8799_s23 + $0x18] sm:$0xf]  ;;  %v1860_v37 = vld [vmem:[%s8799_s23 + $0x1c] sm:$0x1] }
  0x59   : > { %8168 = vmatprep.mubr.msk.bf16.mxu0 %vm228_vm1, %v7331_v22  ;;  %v1597_v14 = vrot.slane %v1596_v0, 4  ;;  %v1872_v24 = vrot.slane %v1870_v16, 4  ;;  %v1875_v25 = vrot.slane %v1873_v17, 5  ;;  %v1893_v26 = vshll.u32 %v1856_v15, 16  ;;  %v7364_v42 = vld [vmem:[%s8799_s23 + $0x48] sm:$0xf] }
  0x5a   : > { %v1583_v58 = vrot.slane %v1582_v51, 4  ;;  %v1611_v18 = vrot.slane %v1610_v6, 4  ;;  %v1881_v29 = vrot.slane %v1879_v1, 5  ;;  %v1889_v31 = vrot.slane %v1887_v20, 5  ;;  %v7365_v10 = vld [vmem:[%s8799_s23 + $0x4c] sm:$0x1] }
  0x5b   : > { %v1602_v22 = vsel %vm8837_vm4, %v1597_v14, %v1601_v59  ;;  %v1876_v34 = vor.u32 %v1875_v25, %v1872_v24  ;;  %v1898_v38 = vshrl.u32 %v1857_v27, 16  ;;  %v1901_v11 = vshll.u32 %v1857_v27, 16  ;;  %v7366_v50 = vld [vmem:[%s8799_s23 + $0x50] sm:$0xf]  ;;  %v8567_v51 = vld [vmem:[%s8799_s23 + $0x78] ss:$8 sps:$4 sm:$0xff]  }
  0x5c   : > { %8163 = vmatmul.mubr.msk.bf16.gmra.mrb[28].mxu1 %vm228_vm1, %v8563_v28  ;;  %v1588_v4 = vsel %vm8837_vm4, %v1583_v58, %v1587_v45  ;;  %v1616_v28 = vsel %vm8837_vm4, %v1611_v18, %v1615_v2  ;;  %v1907_v40 = vshll.u32 %v1858_v32, 16  ;;  %v1912_v41 = vshrl.u32 %v1859_v36, 16  ;;  %v7367_v58 = vld [vmem:[%s8799_s23 + $0x54] sm:$0x1]  ;;  %v7368_v2 = vld [vmem:[%s8799_s23 + $0x58] sm:$0xf] }
  0x5d   : > { %8178 = vmatprep.mubr.msk.bf16.mxu1 %vm228_vm1, %v8564_v35  ;;  %v7333_v13 = vcombine.low %v1574_v63, %v1588_v4  ;;  %v7334_v33 = vcombine.low %v1602_v22, %v1616_v28  ;;  %v1895_v35 = vrot.slane %v1893_v26, 5  ;;  %v1877_v23 = vrot.slane %v1876_v34, 4  ;;  %v7369_v8 = vld [vmem:[%s8799_s23 + $0x5c] sm:$0x1]  ;;  %v7370_v15 = vld [vmem:[%s8799_s23 + $0x60] sm:$0xf] }
  0x5e   : > { %v1915_v44 = vshll.u32 %v1859_v36, 16  ;;  %v1921_v45 = vshll.u32 %v1860_v37, 16  ;;  %v1903_v5 = vrot.slane %v1901_v11, 5  ;;  %v1909_v48 = vrot.slane %v1907_v40, 5  ;;  %v7371_v1 = vld [vmem:[%s8799_s23 + $0x64] sm:$0x1] }
  0x5f   : > { %v1914_v49 = vrot.slane %v1912_v41, 4  ;;  %v1882_v52 = vsel %vm8837_vm4, %v1877_v23, %v1881_v29  ;;  %v2385_v55 = vsel %vm241_vm0, %v7397_v21, 0  ;;  %v2115_v59 = vshrl.u32 %v7364_v42, 16  ;;  %v1861_v20 = vld [vmem:[%s8799_s23 + $0x20] sm:$0xf] }
  0x60   : > { %8169 = vmatmul.mubr.msk.bf16.vlgmr.msra.gmra.mrb[32].mxu0 %vm228_vm1, %v7332_v43  ;;  %v1900_v43 = vrot.slane %v1898_v38, 4  ;;  %v1917_v53 = vrot.slane %v1915_v44, 5  ;;  %v1923_v54 = vrot.slane %v1921_v45, 5  ;;  %v2118_v60 = vshll.u32 %v7364_v42, 16  ;;  %v9063_v26 = vld [vmem:[%s10616_s1 + $0x8] sm:$0x3] }
  0x61   : > { %8187 = vmatpush3.bf16.msra.mxu0 %v2007_v19  ;;  %v1884_v19 = vshrl.u32 %v1855_v12, 16  ;;  %8172 = vmatprep.mubr.msk.bf16.mxu0 %vm228_vm1, %v7333_v13  ;;  %v2124_v63 = vshll.u32 %v7365_v10, 16  ;;  %v2129_v0 = vshrl.u32 %v7366_v50, 16  ;;  %v2117_v4 = vrot.slane %v2115_v59, 4  ;;  %v1864_v23 = vld [vmem:[%s8799_s23 + $0x2c] sm:$0x1] }
  0x62   : > { %8458 = vmatprep.subr.msk.bf16.mxu0 %vm241_vm0, %v7397_v21  ;;  %v1904_v57 = vor.u32 %v1903_v5, %v1900_v43  ;;  %v2120_v6 = vrot.slane %v2118_v60, 5  ;;  %v2138_v14 = vshll.u32 %v7367_v58, 16  ;;  %v2146_v24 = vshll.u32 %v7368_v2, 16  ;;  %v1865_v5 = vld [vmem:[%s8799_s23 + $0x30] sm:$0xf] }
  0x63   : > { %v1886_v30 = vrot.slane %v1884_v19, 4  ;;  %v2126_v12 = vrot.slane %v2124_v63, 5  ;;  %v2131_v13 = vrot.slane %v2129_v0, 4  ;;  %v2143_v19 = vshrl.u32 %v7368_v2, 16  ;;  %v1867_v60 = vld [vmem:[%s8799_s23 + $0x38] sm:$0xf] }
  0x64   : > { %8179 = vmatmul.mubr.msk.bf16.vlgmr.msra.gmra.mrb[32].mxu1 %vm228_vm1, %v8565_v62  ;;  %v1918_v62 = vor.u32 %v1917_v53, %v1914_v49  ;;  %v2121_v17 = vor.u32 %v2120_v6, %v2117_v4  ;;  %v2140_v22 = vrot.slane %v2138_v14, 5  ;;  %v2152_v25 = vshll.u32 %v7369_v8, 16  ;;  %v7372_v4 = vld [vmem:[%s8799_s23 + $0x68] sm:$0xf] }
  0x65   : > { %8197 = vmatpush3.bf16.msra.mxu1 %v2252_v3  ;;  %8182 = vmatprep.mubr.msk.bf16.mxu1 %vm228_vm1, %v8566_v7  ;;  %v1890_v39 = vor.u32 %v1889_v31, %v1886_v30  ;;  %v1905_v3 = vrot.slane %v1904_v57, 4  ;;  %v2132_v7 = vshll.u32 %v7366_v50, 16  ;;  %v2145_v30 = vrot.slane %v2143_v19, 4 }
  0x66   : > { %v1919_v9 = vrot.slane %v1918_v62, 4  ;;  %v2122_v28 = vrot.slane %v2121_v17, 4  ;;  %8459 = vmatprep.subr.msk.bf16.mxu1 %vm241_vm0, %v9063_v26  ;;  %v2148_v31 = vrot.slane %v2146_v24, 5  ;;  %v2154_v32 = vrot.slane %v2152_v25, 5  ;;  %v7374_v17 = vld [vmem:[%s8799_s23 + $0x70] sm:$0xf] }
  0x67   : > { %v1891_v47 = vrot.slane %v1890_v39, 4  ;;  %v1910_v16 = vsel %vm8837_vm4, %v1905_v3, %v1909_v48  ;;  %v2134_v18 = vrot.slane %v2132_v7, 5  ;;  %v2160_v34 = vshll.u32 %v7370_v15, 16  ;;  %v1863_v39 = vld [vmem:[%s8799_s23 + $0x28] sm:$0xf] }
  0x68   : > { %8173 = vmatmul.mubr.msk.bf16.gmra.mrb[36].mxu0 %vm228_vm1, %v7334_v33  ;;  %v1924_v21 = vsel %vm8837_vm4, %v1919_v9, %v1923_v54  ;;  %v2157_v33 = vshrl.u32 %v7370_v15, 16  ;;  %v2127_v36 = vsel %vm8837_vm4, %v2122_v28, %v2126_v12  ;;  %v2166_v38 = vshll.u32 %v7371_v1, 16  ;;  %v7373_v12 = vld [vmem:[%s8799_s23 + $0x6c] sm:$0x1]  ;;  %v7375_v28 = vld [vmem:[%s8799_s23 + $0x74] sm:$0x1] }
  0x69   : > { %v1896_v56 = vsel %vm8837_vm4, %v1891_v47, %v1895_v35  ;;  %v7357_v27 = vcombine.low %v1910_v16, %v1924_v21  ;;  %v2135_v29 = vor.u32 %v2134_v18, %v2131_v13  ;;  %v1862_v35 = vld [vmem:[%s8799_s23 + $0x24] sm:$0x1]  ;;  %v1926_v11 = vshrl.u32 %v1861_v20, 16  ;;  %v7447_v21 = vld [vmem:[%s10616_s1 + $0xa] sm:$0x3] }
  0x6a   : > { %v7356_v61 = vcombine.low %v1882_v52, %v1896_v56  ;;  %v2149_v40 = vor.u32 %v2148_v31, %v2145_v30  ;;  %v2159_v41 = vrot.slane %v2157_v33, 4  ;;  %v2162_v42 = vrot.slane %v2160_v34, 5  ;;  %v1866_v56 = vld [vmem:[%s8799_s23 + $0x34] sm:$0x1] }
  0x6b   : > { %v2136_v37 = vrot.slane %v2135_v29, 4  ;;  %v1929_v43 = vshll.u32 %v1861_v20, 16  ;;  %v2168_v45 = vrot.slane %v2166_v38, 5  ;;  %v1928_v10 = vrot.slane %v1926_v11, 4 }
  0x6c   : > { %8183 = vmatmul.mubr.msk.bf16.gmra.mrb[36].mxu1 %vm228_vm1, %v8567_v51  ;;  %8188 = vmatprep.mubr.msk.bf16.mxu0 %vm228_vm1, %v7356_v61  ;;  %v1935_v47 = vshll.u32 %v1862_v35, 16  ;;  %v2150_v49 = vrot.slane %v2149_v40, 4  ;;  %v2163_v50 = vor.u32 %v2162_v42, %v2159_v41  ;;  %v1940_v53 = vshrl.u32 %v1863_v39, 16  ;;  %v1868_v61 = vld [vmem:[%s8799_s23 + $0x3c] sm:$0x1] }
  0x6d   : > { %v2141_v44 = vsel %vm8837_vm4, %v2136_v37, %v2140_v22  ;;  %v1931_v51 = vrot.slane %v1929_v43, 5  ;;  %v1943_v54 = vshll.u32 %v1863_v39, 16  ;;  %v1954_v62 = vshrl.u32 %v1865_v5, 16  ;;  %v7376_v37 = vld [vmem:[%s8799_s23 + $0x78] sm:$0xf] }
  0x6e   : > { %v7381_v48 = vcombine.low %v2127_v36, %v2141_v44  ;;  %v1937_v52 = vrot.slane %v1935_v47, 5  ;;  %v2155_v57 = vsel %vm8837_vm4, %v2150_v49, %v2154_v32  ;;  %v2164_v58 = vrot.slane %v2163_v50, 4  ;;  %v7377_v40 = vld [vmem:[%s8799_s23 + $0x7c] sm:$0x1]  ;;  %v7378_v41 = vld [vmem:[%s8799_s23 + $0x80] sm:$0xf] }
  0x6f   : > { %v1932_v59 = vor.u32 %v1931_v51, %v1928_v10  ;;  %v1942_v63 = vrot.slane %v1940_v53, 4  ;;  %v1945_v0 = vrot.slane %v1943_v54, 5  ;;  %v1957_v3 = vshll.u32 %v1865_v5, 16  ;;  %v7379_v5 = vld [vmem:[%s8799_s23 + $0x84] sm:$0x1] }
  0x70   : > { %8189 = vmatmul.mubr.msk.bf16.vlgmr.msra.gmra.mrb[40].mxu0 %vm228_vm1, %v7357_v27  ;;  %8198 = vmatprep.mubr.msk.bf16.mxu1 %vm228_vm1, %v7381_v48  ;;  %v2169_v6 = vsel %vm8837_vm4, %v2164_v58, %v2168_v45  ;;  %v1956_v8 = vrot.slane %v1954_v62, 4  ;;  %v1963_v9 = vshll.u32 %v1866_v56, 16  ;;  %v1968_v16 = vshrl.u32 %v1867_v60, 16  ;;  %v8568_v53 = vld [vmem:[%s8799_s23 + $0xd8] ss:$8 sps:$4 sm:$0xff]  }
  0x71   : > { %8207 = vmatpush3.bf16.msra.mxu0 %v2385_v55  ;;  %v1949_v55 = vshll.u32 %v1864_v23, 16  ;;  %v1933_v7 = vrot.slane %v1932_v59, 4  ;;  %v7382_v13 = vcombine.low %v2155_v57, %v2169_v6  ;;  %v1946_v14 = vor.u32 %v1945_v0, %v1942_v63  ;;  %v7406_v58 = vld [vmem:[%s8799_s23 + $0x90] sm:$0xf]  ;;  %v7407_v63 = vld [vmem:[%s8799_s23 + $0x94] sm:$0x1] }
  0x72   : > { %v1959_v15 = vrot.slane %v1957_v3, 5  ;;  %v1965_v1 = vrot.slane %v1963_v9, 5  ;;  %v1971_v19 = vshll.u32 %v1867_v60, 16  ;;  %v1977_v20 = vshll.u32 %v1868_v61, 16  ;;  %8460 = vmatprep.subr.msk.bf16.mxu0 %vm241_vm0, %v7447_v21  ;;  %v7408_v0 = vld [vmem:[%s8799_s23 + $0x98] sm:$0xf] }
  0x73   : > { %v1951_v2 = vrot.slane %v1949_v55, 5  ;;  %v1938_v18 = vsel %vm8837_vm4, %v1933_v7, %v1937_v52  ;;  %v1947_v22 = vrot.slane %v1946_v14, 4  ;;  %v1970_v25 = vrot.slane %v1968_v16, 4  ;;  %v7409_v7 = vld [vmem:[%s8799_s23 + $0x9c] sm:$0x1] }
  0x74   : > { %8199 = vmatmul.mubr.msk.bf16.vlgmr.msra.gmra.mrb[40].mxu1 %vm228_vm1, %v7382_v13  ;;  %v1960_v24 = vor.u32 %v1959_v15, %v1956_v8  ;;  %v2630_v27 = vsel %vm241_vm0, %v9063_v26, 0  ;;  %v1973_v29 = vrot.slane %v1971_v19, 5  ;;  %v1979_v30 = vrot.slane %v1977_v20, 5  ;;  %v7410_v14 = vld [vmem:[%s8799_s23 + $0xa0] sm:$0xf] }
  0x75   : > { %8217 = vmatpush3.bf16.msra.mxu1 %v2630_v27  ;;  %v2171_v31 = vshrl.u32 %v7372_v4, 16  ;;  %v2174_v32 = vshll.u32 %v7372_v4, 16  ;;  %v1952_v33 = vsel %vm8837_vm4, %v1947_v22, %v1951_v2  ;;  %v2180_v35 = vshll.u32 %v7373_v12, 16  ;;  %v7412_v19 = vld [vmem:[%s8799_s23 + $0xa8] sm:$0xf] }
  0x76   : > { %v1961_v34 = vrot.slane %v1960_v24, 4  ;;  %v2185_v36 = vshrl.u32 %v7374_v17, 16  ;;  %v7358_v38 = vcombine.low %v1938_v18, %v1952_v33  ;;  %v1974_v26 = vor.u32 %v1973_v29, %v1970_v25 }
  0x77   : > { %v2173_v39 = vrot.slane %v2171_v31, 4  ;;  %v2176_v11 = vrot.slane %v2174_v32, 5  ;;  %v2182_v23 = vrot.slane %v2180_v35, 5  ;;  %v2188_v44 = vshll.u32 %v7374_v17, 16  ;;  %v8569_v32 = vld [vmem:[%s8799_s23 + $0xe8] ss:$8 sps:$4 sm:$0xff]  }
  0x78   : > { %v1966_v42 = vsel %vm8837_vm4, %v1961_v34, %v1965_v1  ;;  %v2187_v43 = vrot.slane %v2185_v36, 4  ;;  %8192 = vmatprep.mubr.msk.bf16.mxu0 %vm228_vm1, %v7358_v38  ;;  %v1975_v45 = vrot.slane %v1974_v26, 4  ;;  %v2194_v47 = vshll.u32 %v7375_v28, 16  ;;  %v7411_v1 = vld [vmem:[%s8799_s23 + $0xa4] sm:$0x1] }
  0x79   : > { %v2177_v10 = vor.u32 %v2176_v11, %v2173_v39  ;;  %v2199_v48 = vshrl.u32 %v7376_v37, 16  ;;  %v2190_v49 = vrot.slane %v2188_v44, 5  ;;  %v2202_v50 = vshll.u32 %v7376_v37, 16  ;;  %v8570_v39 = vld [vmem:[%s8799_s23 + $0xf8] ss:$8 sps:$4 sm:$0xff]  }
  0x7a   : > { %v2208_v51 = vshll.u32 %v7377_v40, 16  ;;  %v2213_v52 = vshrl.u32 %v7378_v41, 16  ;;  %v1980_v54 = vsel %vm8837_vm4, %v1975_v45, %v1979_v30  ;;  %v2196_v56 = vrot.slane %v2194_v47, 5  ;;  %v7414_v47 = vld [vmem:[%s8799_s23 + $0xb0] sm:$0xf] }
  0x7b   : > { %v2178_v55 = vrot.slane %v2177_v10, 4  ;;  %v2201_v57 = vrot.slane %v2199_v48, 4  ;;  %v7359_v59 = vcombine.low %v1966_v42, %v1980_v54  ;;  %v2191_v60 = vor.u32 %v2190_v49, %v2187_v43 }
  0x7c   : > { %v2204_v61 = vrot.slane %v2202_v50, 5  ;;  %v2210_v62 = vrot.slane %v2208_v51, 5  ;;  %v2215_v3 = vrot.slane %v2213_v52, 4  ;;  %v2216_v4 = vshll.u32 %v7378_v41, 16  ;;  %v7413_v41 = vld [vmem:[%s8799_s23 + $0xac] sm:$0x1] }
  0x7d   : > { %v2183_v2 = vsel %vm8837_vm4, %v2178_v55, %v2182_v23  ;;  %v2222_v6 = vshll.u32 %v7379_v5, 16  ;;  %8193 = vmatmul.mubr.msk.bf16.gmra.mrb[44].mxu0 %vm228_vm1, %v7359_v59  ;;  %v2192_v8 = vrot.slane %v2191_v60, 4  ;;  %v2875_v12 = vsel %vm241_vm0, %v7447_v21, 0  ;;  %v7464_v21 = vld [vmem:[%s10616_s1 + $0xc] sm:$0x3] }
  0x7e   : > { %v2205_v9 = vor.u32 %v2204_v61, %v2201_v57  ;;  %v2493_v13 = vshrl.u32 %v7406_v58, 16  ;;  %v2218_v15 = vrot.slane %v2216_v4, 5  ;;  %8208 = vmatprep.mubr.msk.bf16.mxu0 %vm228_vm1, %v8568_v53  ;;  %v2496_v17 = vshll.u32 %v7406_v58, 16  ;;  %8461 = vmatprep.subr.msk.bf16.mxu1 %vm241_vm0, %v7464_v21  ;;  %v7415_v51 = vld [vmem:[%s8799_s23 + $0xb4] sm:$0x1] }
  0x7f   : > { %v2224_v16 = vrot.slane %v2222_v6, 5  ;;  %v2502_v18 = vshll.u32 %v7407_v63, 16  ;;  %v2197_v20 = vsel %vm8837_vm4, %v2192_v8, %v2196_v56  ;;  %v2507_v25 = vshrl.u32 %v7408_v0, 16  ;;  %v7416_v56 = vld [vmem:[%s8799_s23 + $0xb8] sm:$0xf] }
  0x80   : > { %v2206_v22 = vrot.slane %v2205_v9, 4  ;;  %v2495_v24 = vrot.slane %v2493_v13, 4  ;;  %v7383_v27 = vcombine.low %v2183_v2, %v2197_v20  ;;  %v2219_v28 = vor.u32 %v2218_v15, %v2215_v3  ;;  %v8571_v58 = vld [vmem:[%s8799_s23 + $0x108] ss:$8 sps:$4 sm:$0xff]   ;;  %v7417_v60 = vld [vmem:[%s8799_s23 + $0xbc] sm:$0x1] }
  0x81   : > { %v2498_v29 = vrot.slane %v2496_v17, 5  ;;  %v2504_v30 = vrot.slane %v2502_v18, 5  ;;  %v2509_v33 = vrot.slane %v2507_v25, 4  ;;  %v2510_v34 = vshll.u32 %v7408_v0, 16  ;;  %v7418_v4 = vld [vmem:[%s8799_s23 + $0xc0] sm:$0xf] }
  0x82   : > { %v2211_v31 = vsel %vm8837_vm4, %v2206_v22, %v2210_v62  ;;  %v2516_v35 = vshll.u32 %v7409_v7, 16  ;;  %8202 = vmatprep.mubr.msk.bf16.mxu1 %vm228_vm1, %v7383_v27  ;;  %v2220_v36 = vrot.slane %v2219_v28, 4  ;;  %v2521_v38 = vshrl.u32 %v7410_v14, 16  ;;  %v7420_v17 = vld [vmem:[%s8799_s23 + $0xc8] sm:$0xf] }
  0x83   : > { %v2499_v37 = vor.u32 %v2498_v29, %v2495_v24  ;;  %v2524_v26 = vshll.u32 %v7410_v14, 16  ;;  %v2512_v11 = vrot.slane %v2510_v34, 5  ;;  %v2530_v42 = vshll.u32 %v7411_v1, 16  ;;  %v7421_v22 = vld [vmem:[%s8799_s23 + $0xcc] sm:$0x1] }
  0x84   : > { %v2518_v40 = vrot.slane %v2516_v35, 5  ;;  %v2535_v23 = vshrl.u32 %v7412_v19, 16  ;;  %v2225_v43 = vsel %vm8837_vm4, %v2220_v36, %v2224_v16  ;;  %v2523_v45 = vrot.slane %v2521_v38, 4  ;;  %v9157_v24 = vld [vmem:[%s10616_s1 + $0xe] sm:$0x3] }
  0x85   : > { %v2500_v44 = vrot.slane %v2499_v37, 4  ;;  %v2526_v10 = vrot.slane %v2524_v26, 5  ;;  %v7384_v5 = vcombine.low %v2211_v31, %v2225_v43  ;;  %8209 = vmatmul.mubr.msk.bf16.vlgmr.msra.gmra.mrb[48].mxu0 %vm228_vm1, %v8569_v32  ;;  %v2513_v48 = vor.u32 %v2512_v11, %v2509_v33  ;;  %v7431_v29 = vld [vmem:[%s8799_s23 + $0xd8] sm:$0xf]  ;;  %v7432_v34 = vld [vmem:[%s8799_s23 + $0xdc] sm:$0x1] }
  0x86   : > { %v2532_v49 = vrot.slane %v2530_v42, 5  ;;  %v2537_v50 = vrot.slane %v2535_v23, 4  ;;  %8227 = vmatpush3.bf16.msra.mxu0 %v2875_v12  ;;  %v2538_v54 = vshll.u32 %v7412_v19, 16  ;;  %v2544_v55 = vshll.u32 %v7413_v41, 16  ;;  %8212 = vmatprep.mubr.msk.bf16.mxu0 %vm228_vm1, %v8570_v39  ;;  %v7419_v12 = vld [vmem:[%s8799_s23 + $0xc4] sm:$0x1] }
  0x87   : > { %v2505_v52 = vsel %vm8837_vm4, %v2500_v44, %v2504_v30  ;;  %v2527_v53 = vor.u32 %v2526_v10, %v2523_v45  ;;  %8203 = vmatmul.mubr.msk.bf16.gmra.mrb[44].mxu1 %vm228_vm1, %v7384_v5  ;;  %v2514_v57 = vrot.slane %v2513_v48, 4  ;;  %v3008_v59 = vsel %vm241_vm0, %v7464_v21, 0  ;;  %8462 = vmatprep.subr.msk.bf16.mxu0 %vm241_vm0, %v9157_v24  ;;  %v7433_v26 = vld [vmem:[%s8799_s23 + $0xe0] sm:$0xf]  ;;  %v7434_v44 = vld [vmem:[%s8799_s23 + $0xe4] sm:$0x1] }
  0x88   : > { %v2549_v61 = vshrl.u32 %v7414_v47, 16  ;;  %v2552_v62 = vshll.u32 %v7414_v47, 16  ;;  %v2540_v0 = vrot.slane %v2538_v54, 5  ;;  %v2546_v2 = vrot.slane %v2544_v55, 5  ;;  %v7435_v10 = vld [vmem:[%s8799_s23 + $0xe8] sm:$0xf] }
  0x89   : > { %v2528_v63 = vrot.slane %v2527_v53, 4  ;;  %v2558_v3 = vshll.u32 %v7415_v51, 16  ;;  %v2519_v6 = vsel %vm8837_vm4, %v2514_v57, %v2518_v40  ;;  %v2563_v9 = vshrl.u32 %v7416_v56, 16  ;;  %v7437_v51 = vld [vmem:[%s8799_s23 + $0xf0] sm:$0xf] }
  0x8a   : > { %v2551_v7 = vrot.slane %v2549_v61, 4  ;;  %v2554_v8 = vrot.slane %v2552_v62, 5  ;;  %v7423_v13 = vcombine.low %v2505_v52, %v2519_v6  ;;  %v2541_v15 = vor.u32 %v2540_v0, %v2537_v50  ;;  %v7436_v50 = vld [vmem:[%s8799_s23 + $0xec] sm:$0x1] }
  0x8b   : > { %v2533_v14 = vsel %vm8837_vm4, %v2528_v63, %v2532_v49  ;;  %v2560_v16 = vrot.slane %v2558_v3, 5  ;;  %v2565_v1 = vrot.slane %v2563_v9, 4  ;;  %v2566_v19 = vshll.u32 %v7416_v56, 16  ;;  %v7438_v3 = vld [vmem:[%s8799_s23 + $0xf4] sm:$0x1] }
  0x8c   : > { %v2555_v18 = vor.u32 %v2554_v8, %v2551_v7  ;;  %v2572_v20 = vshll.u32 %v7417_v60, 16  ;;  %8218 = vmatprep.mubr.msk.bf16.mxu1 %vm228_vm1, %v7423_v13  ;;  %v2542_v25 = vrot.slane %v2541_v15, 4  ;;  %v2577_v21 = vshrl.u32 %v7418_v4, 16  ;;  %v8572_v13 = vld [vmem:[%s8799_s23 + $0x50] ss:$8 sps:$4 sm:$0xff]  }
  0x8d   : > { %v2580_v27 = vshll.u32 %v7418_v4, 16  ;;  %v2586_v28 = vshll.u32 %v7419_v12, 16  ;;  %8213 = vmatmul.mubr.msk.bf16.gmra.mrb[52].mxu0 %vm228_vm1, %v8571_v58  ;;  %v2568_v31 = vrot.slane %v2566_v19, 5  ;;  %v2591_v33 = vshrl.u32 %v7420_v17, 16 }
  0x8e   : > { %v2556_v30 = vrot.slane %v2555_v18, 4  ;;  %v2574_v32 = vrot.slane %v2572_v20, 5  ;;  %v2547_v35 = vsel %vm8837_vm4, %v2542_v25, %v2546_v2  ;;  %v2579_v36 = vrot.slane %v2577_v21, 4  ;;  %v7439_v18 = vld [vmem:[%s8799_s23 + $0xf8] sm:$0xf] }
  0x8f   : > { %v2582_v37 = vrot.slane %v2580_v27, 5  ;;  %v2588_v38 = vrot.slane %v2586_v28, 5  ;;  %v7424_v39 = vcombine.low %v2533_v14, %v2547_v35  ;;  %v2569_v40 = vor.u32 %v2568_v31, %v2565_v1  ;;  %v7440_v25 = vld [vmem:[%s8799_s23 + $0xfc] sm:$0x1]  ;;  %v9189_v21 = vld [vmem:[%s10616_s1 + $0x10] sm:$0x3] }
  0x90   : > { %v2561_v11 = vsel %vm8837_vm4, %v2556_v30, %v2560_v16  ;;  %v2593_v41 = vrot.slane %v2591_v33, 4  ;;  %v2594_v23 = vshll.u32 %v7420_v17, 16  ;;  %v2600_v43 = vshll.u32 %v7421_v22, 16  ;;  %v7441_v31 = vld [vmem:[%s8799_s23 + $0x100] sm:$0xf] }
  0x91   : > { %v2583_v42 = vor.u32 %v2582_v37, %v2579_v36  ;;  %v2738_v45 = vshrl.u32 %v7431_v29, 16  ;;  %8219 = vmatmul.mubr.msk.bf16.vlgmr.msra.gmra.mrb[48].mxu1 %vm228_vm1, %v7424_v39  ;;  %v2570_v47 = vrot.slane %v2569_v40, 4  ;;  %v2741_v5 = vshll.u32 %v7431_v29, 16  ;;  %v7443_v37 = vld [vmem:[%s8799_s23 + $0x108] sm:$0xf] }
  0x92   : > { %v2747_v48 = vshll.u32 %v7432_v34, 16  ;;  %v2752_v49 = vshrl.u32 %v7433_v26, 16  ;;  %8237 = vmatpush3.bf16.msra.mxu1 %v3008_v59  ;;  %v2596_v53 = vrot.slane %v2594_v23, 5  ;;  %v2602_v54 = vrot.slane %v2600_v43, 5  ;;  %v7444_v40 = vld [vmem:[%s8799_s23 + $0x10c] sm:$0x1] }
  0x93   : > { %v2584_v52 = vrot.slane %v2583_v42, 4  ;;  %v2740_v55 = vrot.slane %v2738_v45, 4  ;;  %v2575_v56 = vsel %vm8837_vm4, %v2570_v47, %v2574_v32  ;;  %v2743_v57 = vrot.slane %v2741_v5, 5  ;;  %v7442_v32 = vld [vmem:[%s8799_s23 + $0x104] sm:$0x1]  ;;  %8463 = vmatprep.subr.msk.bf16.mxu1 %vm241_vm0, %v9189_v21 }
  0x94   : > { %v2749_v58 = vrot.slane %v2747_v48, 5  ;;  %v2754_v60 = vrot.slane %v2752_v49, 4  ;;  %v7425_v61 = vcombine.low %v2561_v11, %v2575_v56  ;;  %v2597_v63 = vor.u32 %v2596_v53, %v2593_v41  ;;  %v7445_v5 = vld [vmem:[%s8799_s23 + $0x110] sm:$0xf] }
  0x95   : > { %v2589_v62 = vsel %vm8837_vm4, %v2584_v52, %v2588_v38  ;;  %v2755_v0 = vshll.u32 %v7433_v26, 16  ;;  %v2744_v2 = vor.u32 %v2743_v57, %v2740_v55  ;;  %v2761_v59 = vshll.u32 %v7434_v44, 16 }
  0x96   : > { %v2766_v4 = vshrl.u32 %v7435_v10, 16  ;;  %v2769_v6 = vshll.u32 %v7435_v10, 16  ;;  %8222 = vmatprep.mubr.msk.bf16.mxu1 %vm228_vm1, %v7425_v61  ;;  %v2598_v7 = vrot.slane %v2597_v63, 4  ;;  %v2775_v9 = vshll.u32 %v7436_v50, 16  ;;  %v8573_v10 = vld [vmem:[%s8799_s23 + $0x60] ss:$8 sps:$4 sm:$0xff]  }
  0x97   : > { %v2757_v8 = vrot.slane %v2755_v0, 5  ;;  %v2780_v12 = vshrl.u32 %v7437_v51, 16  ;;  %v2745_v14 = vrot.slane %v2744_v2, 4  ;;  %v2763_v15 = vrot.slane %v2761_v59, 5 }
  0x98   : > { %v2768_v16 = vrot.slane %v2766_v4, 4  ;;  %v2771_v17 = vrot.slane %v2769_v6, 5  ;;  %v2603_v1 = vsel %vm8837_vm4, %v2598_v7, %v2602_v54  ;;  %v2777_v20 = vrot.slane %v2775_v9, 5  ;;  %v7446_v54 = vld [vmem:[%s8799_s23 + $0x114] sm:$0x1] }
  0x99   : > { %v2758_v19 = vor.u32 %v2757_v8, %v2754_v60  ;;  %v2782_v22 = vrot.slane %v2780_v12, 4  ;;  %v7426_v27 = vcombine.low %v2589_v62, %v2603_v1  ;;  %v2750_v28 = vsel %vm8837_vm4, %v2745_v14, %v2749_v58  ;;  %v8574_v62 = vld [vmem:[%s8799_s23 + $0x70] ss:$8 sps:$4 sm:$0xff]   ;;  %v7474_v9 = vld [vmem:[%s8799_s23 + $0xc] sm:$0x1] }
  0x9a   : > { %v2772_v29 = vor.u32 %v2771_v17, %v2768_v16  ;;  %v2783_v30 = vshll.u32 %v7437_v51, 16  ;;  %v2789_v34 = vshll.u32 %v7438_v3, 16  ;;  %v3253_v35 = vsel %vm241_vm0, %v9157_v24, 0  ;;  %v7473_v3 = vld [vmem:[%s8799_s23 + $0x8] sm:$0xf] }
  0x9b   : > { %v2759_v33 = vrot.slane %v2758_v19, 4  ;;  %v2794_v36 = vshrl.u32 %v7439_v18, 16  ;;  %8223 = vmatmul.mubr.msk.bf16.gmra.mrb[52].mxu1 %vm228_vm1, %v7426_v27  ;;  %v2797_v39 = vshll.u32 %v7439_v18, 16  ;;  %v2803_v11 = vshll.u32 %v7440_v25, 16  ;;  %v7475_v16 = vld [vmem:[%s8799_s23 + $0x10] sm:$0xf] }
  0x9c   : > { %v2773_v38 = vrot.slane %v2772_v29, 4  ;;  %v2785_v26 = vrot.slane %v2783_v30, 5  ;;  %v2791_v42 = vrot.slane %v2789_v34, 5  ;;  %8238 = vmatprep.mubr.msk.bf16.mxu1 %vm228_vm1, %v8572_v13  ;;  %v2808_v24 = vshrl.u32 %v7441_v31, 16  ;;  %v3597_v17 = vld [vmem:[%s10616_s1] sm:$0x3] }
  0x9d   : > { %v2764_v41 = vsel %vm8837_vm4, %v2759_v33, %v2763_v15  ;;  %v2796_v23 = vrot.slane %v2794_v36, 4  ;;  %v2799_v47 = vrot.slane %v2797_v39, 5  ;;  %v2805_v48 = vrot.slane %v2803_v11, 5  ;;  %v7476_v19 = vld [vmem:[%s8799_s23 + $0x14] sm:$0x1] }
  0x9e   : > { %v7448_v43 = vcombine.low %v2750_v28, %v2764_v41  ;;  %v2778_v44 = vsel %vm8837_vm4, %v2773_v38, %v2777_v20  ;;  %v2786_v45 = vor.u32 %v2785_v26, %v2782_v22  ;;  %v2810_v49 = vrot.slane %v2808_v24, 4  ;;  %v7477_v30 = vld [vmem:[%s8799_s23 + $0x18] sm:$0xf]  ;;  %v7478_v34 = vld [vmem:[%s8799_s23 + $0x1c] sm:$0x1] }
  0x9f   : > { %v2811_v50 = vshll.u32 %v7441_v31, 16  ;;  %v2817_v51 = vshll.u32 %v7442_v32, 16  ;;  %v2800_v53 = vor.u32 %v2799_v47, %v2796_v23  ;;  %v2822_v55 = vshrl.u32 %v7443_v37, 16  ;;  %v8575_v38 = vld [vmem:[%s8799_s23 + $0x80] ss:$8 sps:$4 sm:$0xff]  }
  0xa0   : > { %8228 = vmatprep.mubr.msk.bf16.mxu0 %vm228_vm1, %v7448_v43  ;;  %v2787_v52 = vrot.slane %v2786_v45, 4  ;;  %v2825_v56 = vshll.u32 %v7443_v37, 16  ;;  %v2831_v60 = vshll.u32 %v7444_v40, 16  ;;  %v2836_v61 = vshrl.u32 %v7445_v5, 16  ;;  %v7479_v39 = vld [vmem:[%s8799_s23 + $0x20] sm:$0xf] }
  0xa1   : > { %v2813_v57 = vrot.slane %v2811_v50, 5  ;;  %v2819_v58 = vrot.slane %v2817_v51, 5  ;;  %v2801_v0 = vrot.slane %v2800_v53, 4  ;;  %v2824_v2 = vrot.slane %v2822_v55, 4  ;;  %v7480_v24 = vld [vmem:[%s8799_s23 + $0x24] sm:$0x1] }
  0xa2   : > { %v2792_v63 = vsel %vm8837_vm4, %v2787_v52, %v2791_v42  ;;  %v2827_v59 = vrot.slane %v2825_v56, 5  ;;  %v2833_v7 = vrot.slane %v2831_v60, 5  ;;  %v2838_v8 = vrot.slane %v2836_v61, 4  ;;  %v7500_v60 = vld [vmem:[%s8799_s23 + $0x58] sm:$0xf] }
  0xa3   : > { %v7449_v4 = vcombine.low %v2778_v44, %v2792_v63  ;;  %v2814_v6 = vor.u32 %v2813_v57, %v2810_v49  ;;  %8239 = vmatmul.mubr.msk.bf16.vlgmr.msra.gmra.mrb[56].mxu1 %vm228_vm1, %v8573_v10  ;;  %v2806_v12 = vsel %vm8837_vm4, %v2801_v0, %v2805_v48  ;;  %v2839_v14 = vshll.u32 %v7445_v5, 16  ;;  %v7498_v49 = vld [vmem:[%s8799_s23 + $0x50] sm:$0xf] }
  0xa4   : > { %v2828_v13 = vor.u32 %v2827_v59, %v2824_v2  ;;  %v2845_v15 = vshll.u32 %v7446_v54, 16  ;;  %v3498_v1 = vsel %vm241_vm0, %v9189_v21, 0  ;;  %8242 = vmatprep.mubr.msk.bf16.mxu1 %vm228_vm1, %v8574_v62  ;;  %v3116_v20 = vshrl.u32 %v7473_v3, 16  ;;  %v7499_v54 = vld [vmem:[%s8799_s23 + $0x54] sm:$0x1] }
  0xa5   : > { %8229 = vmatmul.mubr.msk.bf16.vlgmr.msra.gmra.mrb[56].mxu0 %vm228_vm1, %v7449_v4  ;;  %v2815_v18 = vrot.slane %v2814_v6, 4  ;;  %v3119_v22 = vshll.u32 %v7473_v3, 16  ;;  %v2841_v27 = vrot.slane %v2839_v14, 5  ;;  %8257 = vmatpush3.bf16.msra.mxu1 %v3498_v1  ;;  %v3125_v29 = vshll.u32 %v7474_v9, 16  ;;  %v7501_v2 = vld [vmem:[%s8799_s23 + $0x5c] sm:$0x1] }
  0xa6   : > { %8247 = vmatpush3.bf16.msra.mxu0 %v3253_v35  ;;  %v2829_v25 = vrot.slane %v2828_v13, 4  ;;  %v2847_v28 = vrot.slane %v2845_v15, 5  ;;  %v3118_v32 = vrot.slane %v3116_v20, 4  ;;  %v3130_v33 = vshrl.u32 %v7475_v16, 16  ;;  %v7503_v14 = vld [vmem:[%s8799_s23 + $0x64] sm:$0x1] }
  0xa7   : > { %v2820_v31 = vsel %vm8837_vm4, %v2815_v18, %v2819_v58  ;;  %v3121_v21 = vrot.slane %v3119_v22, 5  ;;  %8464 = vmatprep.subr.msk.bf16.mxu0 %vm241_vm0, %v3597_v17  ;;  %v2842_v37 = vor.u32 %v2841_v27, %v2838_v8  ;;  %v3127_v26 = vrot.slane %v3125_v29, 5  ;;  %v7504_v1 = vld [vmem:[%s8799_s23 + $0x68] sm:$0xf]  ;;  %v9260_v27 = vld [vmem:[%s10616_s1 + $0x2] sm:$0x3] }
  0xa8   : > { %v7450_v36 = vcombine.low %v2806_v12, %v2820_v31  ;;  %v2834_v35 = vsel %vm8837_vm4, %v2829_v25, %v2833_v7  ;;  %v3132_v40 = vrot.slane %v3130_v33, 4  ;;  %v3133_v41 = vshll.u32 %v7475_v16, 16  ;;  %v7502_v7 = vld [vmem:[%s8799_s23 + $0x60] sm:$0xf]  ;;  %v7505_v31 = vld [vmem:[%s8799_s23 + $0x6c] sm:$0x1]  ;;  %8465 = vmatprep.subr.msk.bf16.mxu1 %vm241_vm0, %v9260_v27 }
  0xa9   : > { %v3122_v11 = vor.u32 %v3121_v21, %v3118_v32  ;;  %v3139_v42 = vshll.u32 %v7476_v19, 16  ;;  %v2843_v23 = vrot.slane %v2842_v37, 4  ;;  %v3144_v43 = vshrl.u32 %v7477_v30, 16 }
  0xaa   : > { %8232 = vmatprep.mubr.msk.bf16.mxu0 %vm228_vm1, %v7450_v36  ;;  %v3147_v44 = vshll.u32 %v7477_v30, 16  ;;  %v3153_v45 = vshll.u32 %v7478_v34, 16  ;;  %v3135_v47 = vrot.slane %v3133_v41, 5  ;;  %v3158_v48 = vshrl.u32 %v7479_v39, 16 }
  0xab   : > { %v3123_v10 = vrot.slane %v3122_v11, 4  ;;  %v3141_v5 = vrot.slane %v3139_v42, 5  ;;  %v2848_v50 = vsel %vm8837_vm4, %v2843_v23, %v2847_v28  ;;  %8243 = vmatmul.mubr.msk.bf16.gmra.mrb[60].mxu1 %vm228_vm1, %v8575_v38  ;;  %v3146_v51 = vrot.slane %v3144_v43, 4  ;;  %v7482_v11 = vld [vmem:[%s8799_s23 + $0x2c] sm:$0x1] }
  0xac   : > { %v3149_v52 = vrot.slane %v3147_v44, 5  ;;  %v3155_v53 = vrot.slane %v3153_v45, 5  ;;  %v7451_v55 = vcombine.low %v2834_v35, %v2848_v50  ;;  %v3136_v57 = vor.u32 %v3135_v47, %v3132_v40  ;;  %v7481_v35 = vld [vmem:[%s8799_s23 + $0x28] sm:$0xf] }
  0xad   : > { %v3128_v56 = vsel %vm8837_vm4, %v3123_v10, %v3127_v26  ;;  %v3160_v58 = vrot.slane %v3158_v48, 4  ;;  %v3161_v62 = vshll.u32 %v7479_v39, 16  ;;  %v3167_v63 = vshll.u32 %v7480_v24, 16  ;;  %v7483_v24 = vld [vmem:[%s8799_s23 + $0x30] sm:$0xf] }
  0xae   : > { %v3150_v61 = vor.u32 %v3149_v52, %v3146_v51  ;;  %v3631_v0 = vsel %vm241_vm0, %v3597_v17, 0  ;;  %8233 = vmatmul.mubr.msk.bf16.gmra.mrb[60].mxu0 %vm228_vm1, %v7451_v55  ;;  %v3137_v59 = vrot.slane %v3136_v57, 4  ;;  %v3361_v3 = vshrl.u32 %v7498_v49, 16  ;;  %v7484_v52 = vld [vmem:[%s8799_s23 + $0x34] sm:$0x1] }
  0xaf   : > { %v3364_v4 = vshll.u32 %v7498_v49, 16  ;;  %v3370_v6 = vshll.u32 %v7499_v54, 16  ;;  %v3163_v9 = vrot.slane %v3161_v62, 5  ;;  %v3169_v12 = vrot.slane %v3167_v63, 5 }
  0xb0   : > { %v3151_v8 = vrot.slane %v3150_v61, 4  ;;  %v3375_v13 = vshrl.u32 %v7500_v60, 16  ;;  %v3142_v15 = vsel %vm8837_vm4, %v3137_v59, %v3141_v5  ;;  %v3363_v16 = vrot.slane %v3361_v3, 4  ;;  %v7486_v59 = vld [vmem:[%s8799_s23 + $0x3c] sm:$0x1] }
  0xb1   : > { %v3366_v17 = vrot.slane %v3364_v4, 5  ;;  %v3372_v18 = vrot.slane %v3370_v6, 5  ;;  %v7490_v19 = vcombine.low %v3128_v56, %v3142_v15  ;;  %v3164_v22 = vor.u32 %v3163_v9, %v3160_v58  ;;  %v7487_v3 = vld [vmem:[%s8799_s23 + $0x40] sm:$0xf]  ;;  %v7506_v15 = vld [vmem:[%s8799_s23 + $0x70] sm:$0xf] }
  0xb2   : > { %v3156_v20 = vsel %vm8837_vm4, %v3151_v8, %v3155_v53  ;;  %v3377_v25 = vrot.slane %v3375_v13, 4  ;;  %v3378_v29 = vshll.u32 %v7500_v60, 16  ;;  %v3384_v30 = vshll.u32 %v7501_v2, 16  ;;  %v7485_v60 = vld [vmem:[%s8799_s23 + $0x38] sm:$0xf] }
  0xb3   : > { %v3367_v28 = vor.u32 %v3366_v17, %v3363_v16  ;;  %v3389_v32 = vshrl.u32 %v7502_v7, 16  ;;  %8248 = vmatprep.mubr.msk.bf16.mxu0 %vm228_vm1, %v7490_v19  ;;  %v3165_v21 = vrot.slane %v3164_v22, 4  ;;  %v3392_v33 = vshll.u32 %v7502_v7, 16  ;;  %v7488_v8 = vld [vmem:[%s8799_s23 + $0x44] sm:$0x1] }
  0xb4   : > { %v3398_v34 = vshll.u32 %v7503_v14, 16  ;;  %v3403_v36 = vshrl.u32 %v7504_v1, 16  ;;  %v3380_v38 = vrot.slane %v3378_v29, 5  ;;  %v3386_v26 = vrot.slane %v3384_v30, 5  ;;  %v9289_v19 = vld [vmem:[%s10616_s1 + $0x4] sm:$0x3] }
  0xb5   : > { %v3368_v37 = vrot.slane %v3367_v28, 4  ;;  %v3391_v39 = vrot.slane %v3389_v32, 4  ;;  %v3170_v40 = vsel %vm8837_vm4, %v3165_v21, %v3169_v12  ;;  %v3394_v41 = vrot.slane %v3392_v33, 5  ;;  %v7508_v21 = vld [vmem:[%s8799_s23 + $0x78] sm:$0xf] }
  0xb6   : > { %v3400_v42 = vrot.slane %v3398_v34, 5  ;;  %v3405_v23 = vrot.slane %v3403_v36, 4  ;;  %v7491_v43 = vcombine.low %v3156_v20, %v3170_v40  ;;  %v3381_v45 = vor.u32 %v3380_v38, %v3377_v25 }
  0xb7   : > { %v3373_v44 = vsel %vm8837_vm4, %v3368_v37, %v3372_v18  ;;  %v3406_v10 = vshll.u32 %v7504_v1, 16  ;;  %v3395_v47 = vor.u32 %v3394_v41, %v3391_v39  ;;  %v3412_v5 = vshll.u32 %v7505_v31, 16  ;;  %v7507_v1 = vld [vmem:[%s8799_s23 + $0x74] sm:$0x1]  ;;  %v7509_v37 = vld [vmem:[%s8799_s23 + $0x7c] sm:$0x1] }
  0xb8   : > { %v3172_v48 = vshrl.u32 %v7481_v35, 16  ;;  %v3175_v49 = vshll.u32 %v7481_v35, 16  ;;  %8249 = vmatmul.mubr.msk.bf16.vlgmr.msra.gmra.mrb[64].mxu0 %vm228_vm1, %v7491_v43  ;;  %v3382_v50 = vrot.slane %v3381_v45, 4  ;;  %v3181_v53 = vshll.u32 %v7482_v11, 16 }
  0xb9   : > { %v3408_v51 = vrot.slane %v3406_v10, 5  ;;  %v3186_v54 = vshrl.u32 %v7483_v24, 16  ;;  %8267 = vmatpush3.bf16.msra.mxu0 %v3631_v0  ;;  %v3396_v55 = vrot.slane %v3395_v47, 4  ;;  %v3414_v56 = vrot.slane %v3412_v5, 5  ;;  %v7511_v47 = vld [vmem:[%s8799_s23 + $0x84] sm:$0x1] }
  0xba   : > { %v3174_v57 = vrot.slane %v3172_v48, 4  ;;  %v3177_v58 = vrot.slane %v3175_v49, 5  ;;  %v3387_v61 = vsel %vm8837_vm4, %v3382_v50, %v3386_v26  ;;  %v3183_v63 = vrot.slane %v3181_v53, 5  ;;  %8466 = vmatprep.subr.msk.bf16.mxu0 %vm241_vm0, %v9289_v19  ;;  %v7512_v49 = vld [vmem:[%s8799_s23 + $0x88] sm:$0xf] }
  0xbb   : > { %v3409_v62 = vor.u32 %v3408_v51, %v3405_v23  ;;  %v3188_v2 = vrot.slane %v3186_v54, 4  ;;  %v7515_v4 = vcombine.low %v3373_v44, %v3387_v61  ;;  %v3401_v0 = vsel %vm8837_vm4, %v3396_v55, %v3400_v42  ;;  %v7513_v54 = vld [vmem:[%s8799_s23 + $0x8c] sm:$0x1] }
  0xbc   : > { %v3178_v6 = vor.u32 %v3177_v58, %v3174_v57  ;;  %v3189_v7 = vshll.u32 %v7483_v24, 16  ;;  %v3195_v12 = vshll.u32 %v7484_v52, 16  ;;  %v3200_v13 = vshrl.u32 %v7485_v60, 16  ;;  %v7510_v24 = vld [vmem:[%s8799_s23 + $0x80] sm:$0xf] }
  0xbd   : > { %v3410_v9 = vrot.slane %v3409_v62, 4  ;;  %v3203_v14 = vshll.u32 %v7485_v60, 16  ;;  %8258 = vmatprep.mubr.msk.bf16.mxu1 %vm228_vm1, %v7515_v4  ;;  %v3214_v18 = vshrl.u32 %v7487_v3, 16  ;;  %v3209_v28 = vshll.u32 %v7486_v59, 16 }
  0xbe   : > { %v3179_v16 = vrot.slane %v3178_v6, 4  ;;  %v3191_v17 = vrot.slane %v3189_v7, 5  ;;  %v3202_v22 = vrot.slane %v3200_v13, 4  ;;  %v3197_v32 = vrot.slane %v3195_v12, 5  ;;  %v9317_v6 = vld [vmem:[%s10616_s1 + $0x6] sm:$0x3] }
  0xbf   : > { %v3415_v20 = vsel %vm8837_vm4, %v3410_v9, %v3414_v56  ;;  %v3205_v25 = vrot.slane %v3203_v14, 5  ;;  %v3216_v34 = vrot.slane %v3214_v18, 4  ;;  %v3217_v36 = vshll.u32 %v7487_v3, 16 }
  0xc0   : > { %v7516_v29 = vcombine.low %v3401_v0, %v3415_v20  ;;  %v3184_v30 = vsel %vm8837_vm4, %v3179_v16, %v3183_v63  ;;  %v3192_v31 = vor.u32 %v3191_v17, %v3188_v2  ;;  %v3223_v35 = vshll.u32 %v7488_v8, 16  ;;  %v8576_v2 = vld [vmem:[%s8799_s23 + $0x90] ss:$8 sps:$4 sm:$0xff]  }
  0xc1   : > { %v3206_v33 = vor.u32 %v3205_v25, %v3202_v22  ;;  %v3749_v26 = vsel %vm241_vm0, %v9260_v27, 0  ;;  %v3417_v39 = vshrl.u32 %v7506_v15, 16  ;;  %v3420_v11 = vshll.u32 %v7506_v15, 16 }
  0xc2   : > { %8259 = vmatmul.mubr.msk.bf16.vlgmr.msra.gmra.mrb[64].mxu1 %vm228_vm1, %v7516_v29  ;;  %v3193_v38 = vrot.slane %v3192_v31, 4  ;;  %v3211_v41 = vrot.slane %v3209_v28, 5  ;;  %v3219_v42 = vrot.slane %v3217_v36, 5  ;;  %v3426_v23 = vshll.u32 %v7507_v1, 16  ;;  %v8577_v28 = vld [vmem:[%s8799_s23 + $0xa0] ss:$8 sps:$4 sm:$0xff]  }
  0xc3   : > { %v3207_v40 = vrot.slane %v3206_v33, 4  ;;  %8277 = vmatpush3.bf16.msra.mxu1 %v3749_v26  ;;  %v3419_v44 = vrot.slane %v3417_v39, 4  ;;  %v3422_v45 = vrot.slane %v3420_v11, 5  ;;  %v3431_v10 = vshrl.u32 %v7508_v21, 16  ;;  %v7557_v33 = vld [vmem:[%s8799_s23 + $0x94] sm:$0x1] }
  0xc4   : > { %v3198_v43 = vsel %vm8837_vm4, %v3193_v38, %v3197_v32  ;;  %v3220_v48 = vor.u32 %v3219_v42, %v3216_v34  ;;  %v3225_v27 = vrot.slane %v3223_v35, 5  ;;  %v3434_v52 = vshll.u32 %v7508_v21, 16  ;;  %8467 = vmatprep.subr.msk.bf16.mxu1 %vm241_vm0, %v9317_v6  ;;  %v8580_v32 = vld [vmem:[%s8799_s23 + $0xb0] ss:$8 sps:$4 sm:$0xff]   ;;  %v7559_v36 = vld [vmem:[%s8799_s23 + $0x9c] sm:$0x1] }
  0xc5   : > { %v7492_v5 = vcombine.low %v3184_v30, %v3198_v43  ;;  %v3423_v50 = vor.u32 %v3422_v45, %v3419_v44  ;;  %v3433_v51 = vrot.slane %v3431_v10, 4  ;;  %v3440_v53 = vshll.u32 %v7509_v37, 16  ;;  %v7556_v21 = vld [vmem:[%s8799_s23 + $0x90] sm:$0xf]  ;;  %v7558_v34 = vld [vmem:[%s8799_s23 + $0x98] sm:$0xf] }
  0xc6   : > { %v3212_v55 = vsel %vm8837_vm4, %v3207_v40, %v3211_v41  ;;  %v3221_v56 = vrot.slane %v3220_v48, 4  ;;  %v3445_v57 = vshrl.u32 %v7510_v24, 16  ;;  %v3448_v58 = vshll.u32 %v7510_v24, 16  ;;  %v8578_v11 = vld [vmem:[%s8799_s23 + $0xd8] ss:$8 sps:$4 sm:$0xff]  }
  0xc7   : > { %8252 = vmatprep.mubr.msk.bf16.mxu0 %vm228_vm1, %v7492_v5  ;;  %v3424_v60 = vrot.slane %v3423_v50, 4  ;;  %v3428_v61 = vrot.slane %v3426_v23, 5  ;;  %v3436_v62 = vrot.slane %v3434_v52, 5  ;;  %v3459_v63 = vshrl.u32 %v7512_v49, 16  ;;  %v9342_v42 = vld [vmem:[%s10616_s1 + $0x8] sm:$0x3] }
  0xc8   : > { %v3226_v59 = vsel %vm8837_vm4, %v3221_v56, %v3225_v27  ;;  %v3447_v3 = vrot.slane %v3445_v57, 4  ;;  %v3450_v4 = vrot.slane %v3448_v58, 5  ;;  %v3454_v0 = vshll.u32 %v7511_v47, 16  ;;  %v7560_v45 = vld [vmem:[%s8799_s23 + $0xa0] sm:$0xf] }
  0xc9   : > { %v7493_v7 = vcombine.low %v3212_v55, %v3226_v59  ;;  %v3437_v8 = vor.u32 %v3436_v62, %v3433_v51  ;;  %v3442_v9 = vrot.slane %v3440_v53, 5  ;;  %v3461_v13 = vrot.slane %v3459_v63, 4  ;;  %v7561_v48 = vld [vmem:[%s8799_s23 + $0xa4] sm:$0x1]  ;;  %v7562_v27 = vld [vmem:[%s8799_s23 + $0xa8] sm:$0xf] }
  0xca   : > { %v3451_v12 = vor.u32 %v3450_v4, %v3447_v3  ;;  %v3462_v14 = vshll.u32 %v7512_v49, 16  ;;  %v3468_v15 = vshll.u32 %v7513_v54, 16  ;;  %v3429_v16 = vsel %vm8837_vm4, %v3424_v60, %v3428_v61  ;;  %v7563_v51 = vld [vmem:[%s8799_s23 + $0xac] sm:$0x1]  ;;  %v8579_v4 = vld [vmem:[%s8799_s23 + $0xe8] ss:$8 sps:$4 sm:$0xff]  }
  0xcb   : > { %8253 = vmatmul.mubr.msk.bf16.gmra.mrb[68].mxu0 %vm228_vm1, %v7493_v7  ;;  %v3438_v17 = vrot.slane %v3437_v8, 4  ;;  %v3456_v1 = vrot.slane %v3454_v0, 5  ;;  %v3994_v29 = vsel %vm241_vm0, %v9289_v19, 0  ;;  %v3857_v35 = vshrl.u32 %v7556_v21, 16  ;;  %v8581_v0 = vld [vmem:[%s8799_s23 + $0xc0] ss:$8 sps:$4 sm:$0xff]  }
  0xcc   : > { %v3452_v18 = vrot.slane %v3451_v12, 4  ;;  %v3464_v20 = vrot.slane %v3462_v14, 5  ;;  %8268 = vmatprep.mubr.msk.bf16.mxu0 %vm228_vm1, %v8576_v2  ;;  %v3470_v25 = vrot.slane %v3468_v15, 5  ;;  %v3860_v37 = vshll.u32 %v7556_v21, 16 }
  0xcd   : > { %v3443_v22 = vsel %vm8837_vm4, %v3438_v17, %v3442_v9  ;;  %v3866_v38 = vshll.u32 %v7557_v33, 16  ;;  %v3871_v26 = vshrl.u32 %v7558_v34, 16  ;;  %v3874_v40 = vshll.u32 %v7558_v34, 16  ;;  %v7566_v17 = vld [vmem:[%s8799_s23 + $0xb8] sm:$0xf] }
  0xce   : > { %v7517_v30 = vcombine.low %v3429_v16, %v3443_v22  ;;  %v3465_v31 = vor.u32 %v3464_v20, %v3461_v13  ;;  %v3457_v39 = vsel %vm8837_vm4, %v3452_v18, %v3456_v1  ;;  %v3880_v41 = vshll.u32 %v7559_v36, 16  ;;  %v8582_v13 = vld [vmem:[%s8799_s23 + $0xf8] ss:$8 sps:$4 sm:$0xff]   ;;  %v7565_v16 = vld [vmem:[%s8799_s23 + $0xb4] sm:$0x1] }
  0xcf   : > { %v3859_v23 = vrot.slane %v3857_v35, 4  ;;  %v3862_v24 = vrot.slane %v3860_v37, 5  ;;  %v3868_v43 = vrot.slane %v3866_v38, 5  ;;  %v3873_v44 = vrot.slane %v3871_v26, 4  ;;  %v7567_v20 = vld [vmem:[%s8799_s23 + $0xbc] sm:$0x1] }
  0xd0   : > { %8262 = vmatprep.mubr.msk.bf16.mxu1 %vm228_vm1, %v7517_v30  ;;  %v3466_v19 = vrot.slane %v3465_v31, 4  ;;  %v3876_v47 = vrot.slane %v3874_v40, 5  ;;  %v3882_v5 = vrot.slane %v3880_v41, 5  ;;  %v3885_v52 = vshrl.u32 %v7560_v45, 16  ;;  %v7568_v35 = vld [vmem:[%s8799_s23 + $0xc0] sm:$0xf] }
  0xd1   : > { %v3863_v50 = vor.u32 %v3862_v24, %v3859_v23  ;;  %v3888_v53 = vshll.u32 %v7560_v45, 16  ;;  %v3894_v55 = vshll.u32 %v7561_v48, 16  ;;  %v3899_v56 = vshrl.u32 %v7562_v27, 16  ;;  %v7570_v23 = vld [vmem:[%s8799_s23 + $0xc8] sm:$0xf] }
  0xd2   : > { %v3471_v10 = vsel %vm8837_vm4, %v3466_v19, %v3470_v25  ;;  %v3877_v54 = vor.u32 %v3876_v47, %v3873_v44  ;;  %v3902_v57 = vshll.u32 %v7562_v27, 16  ;;  %v3887_v60 = vrot.slane %v3885_v52, 4  ;;  %v7569_v19 = vld [vmem:[%s8799_s23 + $0xc4] sm:$0x1]  ;;  %v7571_v24 = vld [vmem:[%s8799_s23 + $0xcc] sm:$0x1] }
  0xd3   : > { %v7518_v49 = vcombine.low %v3457_v39, %v3471_v10  ;;  %8269 = vmatmul.mubr.msk.bf16.vlgmr.msra.gmra.mrb[72].mxu0 %vm228_vm1, %v8577_v28  ;;  %v3864_v58 = vrot.slane %v3863_v50, 4  ;;  %v3890_v61 = vrot.slane %v3888_v53, 5  ;;  %v3908_v62 = vshll.u32 %v7563_v51, 16  ;;  %v8584_v51 = vld [vmem:[%s8799_s23 + $0x8] ss:$8 sps:$4 sm:$0xff]  }
  0xd4   : > { %8287 = vmatpush3.bf16.msra.mxu0 %v3994_v29  ;;  %8272 = vmatprep.mubr.msk.bf16.mxu0 %vm228_vm1, %v8580_v32  ;;  %v4127_v63 = vsel %vm241_vm0, %v9317_v6, 0  ;;  %v3878_v2 = vrot.slane %v3877_v54, 4  ;;  %v3901_v59 = vrot.slane %v3899_v56, 4  ;;  %v3904_v3 = vrot.slane %v3902_v57, 5  ;;  %v7564_v6 = vld [vmem:[%s8799_s23 + $0xb0] sm:$0xf] }
  0xd5   : > { %8263 = vmatmul.mubr.msk.bf16.gmra.mrb[68].mxu1 %vm228_vm1, %v7518_v49  ;;  %8468 = vmatprep.subr.msk.bf16.mxu0 %vm241_vm0, %v9342_v42  ;;  %v3869_v7 = vsel %vm8837_vm4, %v3864_v58, %v3868_v43  ;;  %v3891_v8 = vor.u32 %v3890_v61, %v3887_v60  ;;  %v3896_v9 = vrot.slane %v3894_v55, 5  ;;  %v3910_v12 = vrot.slane %v3908_v62, 5  ;;  %v7631_v32 = vld [vmem:[%s10616_s1 + $0xa] sm:$0x3] }
  0xd6   : > { %8278 = vmatprep.mubr.msk.bf16.mxu1 %vm228_vm1, %v8578_v11  ;;  %v3883_v14 = vsel %vm8837_vm4, %v3878_v2, %v3882_v5  ;;  %v3905_v15 = vor.u32 %v3904_v3, %v3901_v59  ;;  %v3913_v22 = vshrl.u32 %v7564_v6, 16  ;;  %v3916_v25 = vshll.u32 %v7564_v6, 16  ;;  %v8583_v5 = vld [vmem:[%s8799_s23 + $0x108] ss:$8 sps:$4 sm:$0xff]   ;;  %v7648_v59 = vld [vmem:[%s10616_s1 + $0xc] sm:$0x3] }
  0xd7   : > { %v7573_v18 = vcombine.low %v3869_v7, %v3883_v14  ;;  %v3892_v1 = vrot.slane %v3891_v8, 4  ;;  %v3922_v29 = vshll.u32 %v7565_v16, 16  ;;  %v3927_v30 = vshrl.u32 %v7566_v17, 16  ;;  %v7615_v7 = vld [vmem:[%s8799_s23 + $0x8] sm:$0xf] }
  0xd8   : > { %v3906_v28 = vrot.slane %v3905_v15, 4  ;;  %v3930_v31 = vshll.u32 %v7566_v17, 16  ;;  %v3915_v33 = vrot.slane %v3913_v22, 4  ;;  %v3918_v34 = vrot.slane %v3916_v25, 5  ;;  %v7617_v14 = vld [vmem:[%s8799_s23 + $0x10] sm:$0xf] }
  0xd9   : > { %v3897_v21 = vsel %vm8837_vm4, %v3892_v1, %v3896_v9  ;;  %v3936_v36 = vshll.u32 %v7567_v20, 16  ;;  %v3924_v38 = vrot.slane %v3922_v29, 5  ;;  %v3929_v26 = vrot.slane %v3927_v30, 4  ;;  %v7618_v15 = vld [vmem:[%s8799_s23 + $0x14] sm:$0x1] }
  0xda   : > { %v3911_v37 = vsel %vm8837_vm4, %v3906_v28, %v3910_v12  ;;  %v3932_v39 = vrot.slane %v3930_v31, 5  ;;  %v3919_v40 = vor.u32 %v3918_v34, %v3915_v33  ;;  %v3941_v43 = vshrl.u32 %v7568_v35, 16  ;;  %v8588_v12 = vld [vmem:[%s8799_s23 + $0x50] ss:$8 sps:$4 sm:$0xff]  }
  0xdb   : > { %8273 = vmatmul.mubr.msk.bf16.gmra.mrb[76].mxu0 %vm228_vm1, %v8581_v0  ;;  %v7574_v11 = vcombine.low %v3897_v21, %v3911_v37  ;;  %v3938_v41 = vrot.slane %v3936_v36, 5  ;;  %v3944_v45 = vshll.u32 %v7568_v35, 16  ;;  %v3950_v10 = vshll.u32 %v7569_v19, 16  ;;  %v8585_v6 = vld [vmem:[%s8799_s23 + $0x18] ss:$8 sps:$4 sm:$0xff]  }
  0xdc   : > { %8288 = vmatprep.mubr.msk.bf16.mxu0 %vm228_vm1, %v7573_v18  ;;  %v3933_v44 = vor.u32 %v3932_v39, %v3929_v26  ;;  %v3955_v47 = vshrl.u32 %v7570_v23, 16  ;;  %v3920_v48 = vrot.slane %v3919_v40, 4  ;;  %v3943_v27 = vrot.slane %v3941_v43, 4  ;;  %v7619_v20 = vld [vmem:[%s8799_s23 + $0x18] sm:$0xf] }
  0xdd   : > { %8279 = vmatmul.mubr.msk.bf16.vlgmr.msra.gmra.mrb[72].mxu1 %vm228_vm1, %v8579_v4  ;;  %v3958_v49 = vshll.u32 %v7570_v23, 16  ;;  %v3964_v50 = vshll.u32 %v7571_v24, 16  ;;  %v3946_v53 = vrot.slane %v3944_v45, 5  ;;  %v4260_v55 = vsel %vm241_vm0, %v9342_v42, 0  ;;  %v8586_v28 = vld [vmem:[%s8799_s23 + $0x28] ss:$8 sps:$4 sm:$0xff]  }
  0xde   : > { %8297 = vmatpush3.bf16.msra.mxu1 %v4127_v63  ;;  %8282 = vmatprep.mubr.msk.bf16.mxu1 %vm228_vm1, %v8582_v13  ;;  %v3934_v52 = vrot.slane %v3933_v44, 4  ;;  %v3957_v54 = vrot.slane %v3955_v47, 4  ;;  %v3925_v56 = vsel %vm8837_vm4, %v3920_v48, %v3924_v38  ;;  %v3952_v62 = vrot.slane %v3950_v10, 5  ;;  %v7616_v13 = vld [vmem:[%s8799_s23 + $0xc] sm:$0x1] }
  0xdf   : > { %8469 = vmatprep.subr.msk.bf16.mxu1 %vm241_vm0, %v7631_v32  ;;  %v3960_v57 = vrot.slane %v3958_v49, 5  ;;  %v3947_v61 = vor.u32 %v3946_v53, %v3943_v27  ;;  %v3966_v42 = vrot.slane %v3964_v50, 5  ;;  %v4505_v0 = vsel %vm241_vm0, %v7631_v32, 0  ;;  %v7620_v32 = vld [vmem:[%s8799_s23 + $0x1c] sm:$0x1] }
  0xe0   : > { %v3939_v60 = vsel %vm8837_vm4, %v3934_v52, %v3938_v41  ;;  %v4368_v17 = vshrl.u32 %v7615_v7, 16  ;;  %v4371_v18 = vshll.u32 %v7615_v7, 16  ;;  %v4377_v1 = vshll.u32 %v7616_v13, 16  ;;  %v7621_v35 = vld [vmem:[%s8799_s23 + $0x20] sm:$0xf] }
  0xe1   : > { %v7575_v63 = vcombine.low %v3925_v56, %v3939_v60  ;;  %v3961_v2 = vor.u32 %v3960_v57, %v3957_v54  ;;  %v3948_v3 = vrot.slane %v3947_v61, 4  ;;  %v4382_v29 = vshrl.u32 %v7617_v14, 16  ;;  %v7622_v19 = vld [vmem:[%s8799_s23 + $0x24] sm:$0x1]  ;;  %v8589_v48 = vld [vmem:[%s8799_s23 + $0x60] ss:$8 sps:$4 sm:$0xff]  }
  0xe2   : > { %v4385_v30 = vshll.u32 %v7617_v14, 16  ;;  %v4391_v31 = vshll.u32 %v7618_v15, 16  ;;  %v4370_v33 = vrot.slane %v4368_v17, 4  ;;  %v4373_v34 = vrot.slane %v4371_v18, 5  ;;  %v9432_v57 = vld [vmem:[%s10616_s1 + $0xe] sm:$0x3] }
  0xe3   : > { %8289 = vmatmul.mubr.msk.bf16.vlgmr.msra.gmra.mrb[80].mxu0 %vm228_vm1, %v7574_v11  ;;  %v3962_v4 = vrot.slane %v3961_v2, 4  ;;  %v3953_v9 = vsel %vm8837_vm4, %v3948_v3, %v3952_v62  ;;  %v4379_v36 = vrot.slane %v4377_v1, 5  ;;  %v4396_v37 = vshrl.u32 %v7619_v20, 16  ;;  %v8587_v60 = vld [vmem:[%s8799_s23 + $0x38] ss:$8 sps:$4 sm:$0xff]  }
  0xe4   : > { %8307 = vmatpush3.bf16.msra.mxu0 %v4260_v55  ;;  %8292 = vmatprep.mubr.msk.bf16.mxu0 %vm228_vm1, %v7575_v63  ;;  %v4384_v38 = vrot.slane %v4382_v29, 4  ;;  %v4387_v26 = vrot.slane %v4385_v30, 5  ;;  %v4393_v39 = vrot.slane %v4391_v31, 5  ;;  %v4399_v11 = vshll.u32 %v7619_v20, 16  ;;  %v8590_v62 = vld [vmem:[%s8799_s23 + $0x70] ss:$8 sps:$4 sm:$0xff]  }
  0xe5   : > { %8283 = vmatmul.mubr.msk.bf16.gmra.mrb[76].mxu1 %vm228_vm1, %v8583_v5  ;;  %8470 = vmatprep.subr.msk.bf16.mxu0 %vm241_vm0, %v7648_v59  ;;  %v3967_v16 = vsel %vm8837_vm4, %v3962_v4, %v3966_v42  ;;  %v4374_v40 = vor.u32 %v4373_v34, %v4370_v33  ;;  %v4398_v41 = vrot.slane %v4396_v37, 4  ;;  %v4405_v23 = vshll.u32 %v7620_v32, 16  ;;  %v7623_v4 = vld [vmem:[%s8799_s23 + $0x28] sm:$0xf]  ;;  %v7625_v7 = vld [vmem:[%s8799_s23 + $0x30] sm:$0xf] }
  0xe6   : > { %8298 = vmatprep.mubr.msk.bf16.mxu1 %vm228_vm1, %v8584_v51  ;;  %v7576_v25 = vcombine.low %v3953_v9, %v3967_v16  ;;  %v4410_v24 = vshrl.u32 %v7621_v35, 16  ;;  %v4388_v44 = vor.u32 %v4387_v26, %v4384_v38  ;;  %v4401_v45 = vrot.slane %v4399_v11, 5  ;;  %v7627_v16 = vld [vmem:[%s8799_s23 + $0x38] sm:$0xf]  ;;  %v7629_v31 = vld [vmem:[%s8799_s23 + $0x40] sm:$0xf] }
  0xe7   : > { %v4413_v10 = vshll.u32 %v7621_v35, 16  ;;  %v4419_v47 = vshll.u32 %v7622_v19, 16  ;;  %v4639_v27 = vsel %vm241_vm0, %v7648_v59, 0  ;;  %v4375_v49 = vrot.slane %v4374_v40, 4  ;;  %v7630_v32 = vld [vmem:[%s8799_s23 + $0x44] sm:$0x1] }
  0xe8   : > { %v4412_v50 = vrot.slane %v4410_v24, 4  ;;  %v4389_v53 = vrot.slane %v4388_v44, 4  ;;  %v4402_v54 = vor.u32 %v4401_v45, %v4398_v41  ;;  %v9427_v55 = vrot.slane %v4405_v23, 5  ;;  %v8591_v33 = vld [vmem:[%s8799_s23 + $0x80] ss:$8 sps:$4 sm:$0xff]  }
  0xe9   : > { %v4415_v56 = vrot.slane %v4413_v10, 5  ;;  %v4380_v61 = vsel %vm8837_vm4, %v4375_v49, %v4379_v36  ;;  %v4421_v3 = vrot.slane %v4419_v47, 5  ;;  %v4424_v9 = vshrl.u32 %v7623_v4, 16  ;;  %v8592_v19 = vld [vmem:[%s8799_s23 + $0x98] ss:$8 sps:$4 sm:$0xff]  }
  0xea   : > { %v4394_v2 = vsel %vm8837_vm4, %v4389_v53, %v4393_v39  ;;  %v4403_v42 = vrot.slane %v4402_v54, 4  ;;  %v4441_v20 = vshll.u32 %v7625_v7, 16  ;;  %v4452_v37 = vshrl.u32 %v7627_v16, 16  ;;  %v7690_v24 = vld [vmem:[%s10616_s1 + $0x10] sm:$0x3] }
  0xeb   : > { %8293 = vmatmul.mubr.msk.bf16.gmra.mrb[84].mxu0 %vm228_vm1, %v7576_v25  ;;  %v4416_v59 = vor.u32 %v4415_v56, %v4412_v50  ;;  %v7632_v13 = vcombine.low %v4380_v61, %v4394_v2  ;;  %v4426_v18 = vrot.slane %v4424_v9, 4  ;;  %v7628_v25 = vld [vmem:[%s8799_s23 + $0x3c] sm:$0x1]  ;;  %v4455_v38 = vshll.u32 %v7627_v16, 16 }
  0xec   : > { %8308 = vmatprep.mubr.msk.bf16.mxu0 %vm228_vm1, %v8588_v12  ;;  %v4427_v12 = vshll.u32 %v7623_v4, 16  ;;  %v4443_v36 = vrot.slane %v4441_v20, 5  ;;  %v4461_v26 = vshll.u32 %v7628_v25, 16  ;;  %v4466_v39 = vshrl.u32 %v7629_v31, 16  ;;  %v8593_v4 = vld [vmem:[%s8799_s23 + $0xa8] ss:$8 sps:$4 sm:$0xff]  }
  0xed   : > { %8299 = vmatmul.mubr.msk.bf16.vlgmr.msra.gmra.mrb[80].mxu1 %vm228_vm1, %v8585_v6  ;;  %v4417_v14 = vrot.slane %v4416_v59, 4  ;;  %v4438_v6 = vshrl.u32 %v7625_v7, 16  ;;  %v4469_v41 = vshll.u32 %v7629_v31, 16  ;;  %v4475_v23 = vshll.u32 %v7630_v32, 16  ;;  %v5117_v59 = vld [vmem:[%s10616_s1] sm:$0x3] }
  0xee   : > { %8317 = vmatpush3.bf16.msra.mxu1 %v4505_v0  ;;  %8302 = vmatprep.mubr.msk.bf16.mxu1 %vm228_vm1, %v8586_v28  ;;  %v7624_v0 = vld [vmem:[%s8799_s23 + $0x2c] sm:$0x1]  ;;  %v4429_v1 = vrot.slane %v4427_v12, 5  ;;  %v4408_v28 = vsel %vm8837_vm4, %v4403_v42, %v9427_v55  ;;  %v4454_v44 = vrot.slane %v4452_v37, 4  ;;  %v4457_v45 = vrot.slane %v4455_v38, 5 }
  0xef   : > { %8471 = vmatprep.subr.msk.bf16.mxu1 %vm241_vm0, %v9432_v57  ;;  %v4433_v15 = vshll.u32 %v7624_v0, 16  ;;  %v4440_v30 = vrot.slane %v4438_v6, 4  ;;  %v4468_v10 = vrot.slane %v4466_v39, 4  ;;  %v4773_v54 = vsel %vm241_vm0, %v9432_v57, 0  ;;  %v8594_v12 = vld [vmem:[%s8799_s23 + $0xe0] ss:$8 sps:$4 sm:$0xff]  }
  0xf0   : > { %v8090_v58 = vpop.f32.mrb[0].mxu0  ;;  %v4430_v34 = vor.u32 %v4429_v1, %v4426_v18  ;;  %v4458_v50 = vor.u32 %v4457_v45, %v4454_v44  ;;  %v5018_v0 = vsel %vm241_vm0, %v7690_v24, 0  ;;  %v7677_v6 = vld [vmem:[%s8799_s23 + $0xa4] sm:$0x1]  ;;  %v7731_v25 = vld [vmem:[%s10616_s1 + $0x2] sm:$0x3] }
  0xf1   : > { %313 = vst.msk [vmem:[#allocation2 + $0x10] sm:$0xff] %vm310_vm5, %v8090_v58  ;;  %v279_v8 = vpop.f32.mrb[1].mxu0  ;;  %v8100_v43 = vpop.f32.mrb[0].mxu1  ;;  %v4435_v29 = vrot.slane %v4433_v15, 5  ;;  %v4444_v40 = vor.u32 %v4443_v36, %v4440_v30  ;;  %v7676_v15 = vld [vmem:[%s8799_s23 + $0xa0] sm:$0xf] }
  0xf2   : > { %311 = vst.msk [vmem:[#allocation2] sm:$0xff] %vm310_vm5, %v279_v8  ;;  %v8091_v22 = vpop.f32.mrb[2].mxu0  ;;  %v399_v52 = vpop.f32.mrb[1].mxu1  ;;  %v7626_v8 = vld [vmem:[%s8799_s23 + $0x34] sm:$0x1]  ;;  %v4431_v11 = vrot.slane %v4430_v34, 4 }
  0xf3   : > { %314 = vst.msk [vmem:[#allocation2 + $0x18] sm:$0xff] %vm310_vm5, %v8091_v22  ;;  %v282_v21 = vpop.f32.mrb[3].mxu0  ;;  %v8101_v17 = vpop.f32.mrb[2].mxu1  ;;  %8309 = vmatmul.mubr.msk.bf16.vlgmr.msra.gmra.mrb[88].mxu0 %vm228_vm1, %v8589_v48  ;;  %v4447_v22 = vshll.u32 %v7626_v8, 16  ;;  %v4445_v48 = vrot.slane %v4444_v40, 4  ;;  %v4459_v61 = vrot.slane %v4458_v50, 4 }
  0xf4   : > { %312 = vst.msk [vmem:[#allocation2 + $0x8] sm:$0xff] %vm310_vm5, %v282_v21  ;;  %8327 = vmatpush3.bf16.msra.mxu0 %v4639_v27  ;;  %8312 = vmatprep.mubr.msk.bf16.mxu0 %vm228_vm1, %v8590_v62  ;;  %v4422_v21 = vsel %vm8837_vm4, %v4417_v14, %v4421_v3  ;;  %v4471_v27 = vrot.slane %v4469_v41, 5  ;;  %v402_v53 = vpop.f32.mrb[3].mxu1  ;;  %v8596_v8 = vld [vmem:[%s8799_s23 + $0xb8] ss:$8 sps:$4 sm:$0xff]   ;;  %v4895_v1 = vshrl.u32 %v7676_v15, 16 }
  0xf5   : > { %8303 = vmatmul.mubr.msk.bf16.gmra.mrb[84].mxu1 %vm228_vm1, %v8587_v60  ;;  %v4449_v35 = vrot.slane %v4447_v22, 5  ;;  %8472 = vmatprep.subr.msk.bf16.mxu0 %vm241_vm0, %v7690_v24  ;;  %v7633_v47 = vcombine.low %v4408_v28, %v4422_v21  ;;  %v7675_v14 = vld [vmem:[%s8799_s23 + $0x9c] sm:$0x1]  ;;  %v4898_v20 = vshll.u32 %v7676_v15, 16  ;;  %v4904_v22 = vshll.u32 %v7677_v6, 16 }
  0xf6   : > { %8318 = vmatprep.mubr.msk.bf16.mxu1 %vm228_vm1, %v7632_v13  ;;  %v4472_v56 = vor.u32 %v4471_v27, %v4468_v10  ;;  %v7674_v13 = vld [vmem:[%s8799_s23 + $0x98] sm:$0xf]  ;;  %v4890_v18 = vshll.u32 %v7675_v14, 16  ;;  %v7678_v28 = vld [vmem:[%s8799_s23 + $0xa8] sm:$0xf]  ;;  %v4897_v21 = vrot.slane %v4895_v1, 4 }
  0xf7   : > { %v4450_v55 = vsel %vm8837_vm4, %v4445_v48, %v4449_v35  ;;  %v4881_v16 = vshrl.u32 %v7674_v13, 16  ;;  %v4900_v34 = vrot.slane %v4898_v20, 5  ;;  %v4906_v36 = vrot.slane %v4904_v22, 5  ;;  %v7680_v35 = vld [vmem:[%s8799_s23 + $0xb0] sm:$0xf] }
  0xf8   : > { %v432_v5 = vld [vmem:[#allocation2 + $0x10] sm:$0xff]  ;;  %v8094_v49 = vpop.f32.mrb[4].mxu0  ;;  %v4892_v32 = vrot.slane %v4890_v18, 5  ;;  %v4909_v39 = vshrl.u32 %v7678_v28, 16  ;;  %v4926_v24 = vshll.u32 %v7680_v35, 16  ;;  %v5151_v45 = vsel %vm241_vm0, %v5117_v59, 0 }
  0xf9   : > { %v440_v51 = vadd.f32 %v8100_v43, %v432_v5  ;;  %v430_v58 = vld [vmem:[#allocation2] sm:$0xff]  ;;  %v4436_v5 = vsel %vm8837_vm4, %v4431_v11, %v4435_v29  ;;  %317 = vst.msk [vmem:[#allocation2 + $0x30] sm:$0xff] %vm310_vm5, %v8094_v49  ;;  %v295_v57 = vpop.f32.mrb[5].mxu0  ;;  %v8597_v29 = vld [vmem:[%s8799_s23 + $0xc8] ss:$8 sps:$4 sm:$0xff]   ;;  %v4883_v30 = vrot.slane %v4881_v16, 4  ;;  %v4901_v41 = vor.u32 %v4900_v34, %v4897_v21 }
  0xfa   : > { %v438_v63 = vadd.f32 %v430_v58, %v399_v52  ;;  %v433_v43 = vld [vmem:[#allocation2 + $0x18] sm:$0xff]  ;;  %v4477_v58 = vrot.slane %v4475_v23, 5  ;;  %v7634_v60 = vcombine.low %v4436_v5, %v4450_v55  ;;  %315 = vst.msk [vmem:[#allocation2 + $0x20] sm:$0xff] %vm310_vm5, %v295_v57  ;;  %v8095_v7 = vpop.f32.mrb[6].mxu0  ;;  %v7681_v37 = vld [vmem:[%s8799_s23 + $0xb4] sm:$0x1] }
  0xfb   : > { %448 = vst.msk [vmem:[#allocation2 + $0x10] sm:$0xff] %vm310_vm5, %v440_v51  ;;  %v4463_v51 = vrot.slane %v4461_v26, 5  ;;  %v441_v52 = vadd.f32 %v8101_v17, %v433_v43  ;;  %8313 = vmatmul.mubr.msk.bf16.gmra.mrb[92].mxu0 %vm228_vm1, %v8591_v33  ;;  %v431_v62 = vld [vmem:[#allocation2 + $0x8] sm:$0xff]  ;;  %318 = vst.msk [vmem:[#allocation2 + $0x38] sm:$0xff] %vm310_vm5, %v8095_v7  ;;  %v4884_v17 = vshll.u32 %v7674_v13, 16  ;;  %v298_v40 = vpop.f32.mrb[7].mxu0 }
  0xfc   : > { %446 = vst.msk [vmem:[#allocation2] sm:$0xff] %vm310_vm5, %v438_v63  ;;  %8328 = vmatprep.mubr.msk.bf16.mxu0 %vm228_vm1, %v8592_v19  ;;  %v4473_v63 = vrot.slane %v4472_v56, 4  ;;  %v439_v2 = vadd.f32 %v431_v62, %v402_v53  ;;  %v7679_v33 = vld [vmem:[%s8799_s23 + $0xac] sm:$0x1]  ;;  %v8595_v38 = vld [vmem:[%s8799_s23 + $0xf0] ss:$8 sps:$4 sm:$0xff]  }
  0xfd   : > { %449 = vst.msk [vmem:[#allocation2 + $0x18] sm:$0xff] %vm310_vm5, %v441_v52  ;;  %8319 = vmatmul.mubr.msk.bf16.vlgmr.msra.gmra.mrb[88].mxu1 %vm228_vm1, %v7633_v47  ;;  %v4464_v42 = vsel %vm8837_vm4, %v4459_v61, %v4463_v51  ;;  %v4886_v31 = vrot.slane %v4884_v17, 5  ;;  %v4912_v19 = vshll.u32 %v7678_v28, 16  ;;  %v4918_v11 = vshll.u32 %v7679_v33, 16  ;;  %316 = vst.msk [vmem:[#allocation2 + $0x28] sm:$0xff] %vm310_vm5, %v298_v40  ;;  %v8104_v44 = vpop.f32.mrb[4].mxu1 }
  0xfe   : > { %8337 = vmatpush3.bf16.msra.mxu1 %v4773_v54  ;;  %8322 = vmatprep.mubr.msk.bf16.mxu1 %vm228_vm1, %v7634_v60  ;;  %v4478_v3 = vsel %vm8837_vm4, %v4473_v63, %v4477_v58  ;;  %447 = vst.msk [vmem:[#allocation2 + $0x8] sm:$0xff] %vm310_vm5, %v439_v2  ;;  %v4923_v23 = vshrl.u32 %v7680_v35, 16  ;;  %v4932_v43 = vshll.u32 %v7681_v37, 16  ;;  %v8598_v10 = vld [vmem:[%s8799_s23 + $0x100] ss:$8 sps:$4 sm:$0xff]   ;;  %v4911_v5 = vrot.slane %v4909_v39, 4 }
  0xff   : > { %8473 = vmatprep.subr.msk.bf16.mxu1 %vm241_vm0, %v5117_v59  ;;  %v7635_v9 = vcombine.low %v4464_v42, %v4478_v3  ;;  %v4887_v26 = vor.u32 %v4886_v31, %v4883_v30  ;;  %v4914_v48 = vrot.slane %v4912_v19, 5  ;;  %v4902_v27 = vrot.slane %v4901_v41, 4  ;;  %v7682_v61 = vld [vmem:[%s8799_s23 + $0xb8] sm:$0xf]  ;;  %v7683_v62 = vld [vmem:[%s8799_s23 + $0xbc] sm:$0x1] }
 0x100   : > { %v4920_v49 = vrot.slane %v4918_v11, 5  ;;  %v4925_v50 = vrot.slane %v4923_v23, 4  ;;  %v4928_v51 = vrot.slane %v4926_v24, 5  ;;  %v4934_v54 = vrot.slane %v4932_v43, 5  ;;  %v436_v56 = vld [vmem:[#allocation2 + $0x30] sm:$0xff] }
 0x101   : > { %v4888_v47 = vrot.slane %v4887_v26, 4  ;;  %v4915_v53 = vor.u32 %v4914_v48, %v4911_v5  ;;  %v5381_v55 = vsel %vm241_vm0, %v7731_v25, 0  ;;  %v4907_v58 = vsel %vm8837_vm4, %v4902_v27, %v4906_v36  ;;  %v7684_v63 = vld [vmem:[%s8799_s23 + $0xc0] sm:$0xf]  ;;  %v7685_v59 = vld [vmem:[%s8799_s23 + $0xc4] sm:$0x1] }
 0x102   : > { %v4929_v60 = vor.u32 %v4928_v51, %v4925_v50  ;;  %v444_v2 = vadd.f32 %v8104_v44, %v436_v56  ;;  %v4937_v3 = vshrl.u32 %v7682_v61, 16  ;;  %v7686_v13 = vld [vmem:[%s8799_s23 + $0xc8] sm:$0xf]  ;;  %v8599_v14 = vld [vmem:[%s8799_s23 + $0x110] ss:$8 sps:$4 sm:$0xff]   ;;  %v4960_v17 = vshll.u32 %v7685_v59, 16 }
 0x103   : > { %8329 = vmatmul.mubr.msk.bf16.vlgmr.msra.gmra.mrb[96].mxu0 %vm228_vm1, %v8593_v4  ;;  %v4893_v52 = vsel %vm8837_vm4, %v4888_v47, %v4892_v32  ;;  %v4916_v42 = vrot.slane %v4915_v53, 4  ;;  %v4940_v4 = vshll.u32 %v7682_v61, 16  ;;  %v7687_v18 = vld [vmem:[%s8799_s23 + $0xcc] sm:$0x1]  ;;  %v8600_v20 = vld [vmem:[%s8799_s23 + $0xd8] ss:$8 sps:$4 sm:$0xff]  }
 0x104   : > { %8347 = vmatpush3.bf16.msra.mxu0 %v5018_v0  ;;  %8332 = vmatprep.mubr.msk.bf16.mxu0 %vm228_vm1, %v8596_v8  ;;  %v7691_v57 = vcombine.low %v4893_v52, %v4907_v58  ;;  %v415_v0 = vpop.f32.mrb[5].mxu1  ;;  %v4930_v7 = vrot.slane %v4929_v60, 4  ;;  %v4946_v8 = vshll.u32 %v7683_v62, 16  ;;  %452 = vst.msk [vmem:[#allocation2 + $0x30] sm:$0xff] %vm310_vm5, %v444_v2  ;;  %v4939_v6 = vrot.slane %v4937_v3, 4  ;;  %v434_v35 = vld [vmem:[#allocation2 + $0x20] sm:$0xff] }
 0x105   : > { %8323 = vmatmul.mubr.msk.bf16.gmra.mrb[92].mxu1 %vm228_vm1, %v7635_v9  ;;  %8474 = vmatprep.subr.msk.bf16.mxu0 %vm241_vm0, %v7731_v25  ;;  %v4951_v9 = vshrl.u32 %v7684_v63, 16  ;;  %v4921_v15 = vsel %vm8837_vm4, %v4916_v42, %v4920_v49  ;;  %v4942_v16 = vrot.slane %v4940_v4, 5  ;;  %v8105_v30 = vpop.f32.mrb[6].mxu1  ;;  %v4962_v21 = vrot.slane %v4960_v17, 5  ;;  %v7689_v33 = vld [vmem:[%s8799_s23 + $0xd4] sm:$0x1] }
 0x106   : > { %8338 = vmatprep.mubr.msk.bf16.mxu1 %vm228_vm1, %v8594_v12  ;;  %v4954_v12 = vshll.u32 %v7684_v63, 16  ;;  %v4935_v1 = vsel %vm8837_vm4, %v4930_v7, %v4934_v54  ;;  %v4948_v22 = vrot.slane %v4946_v8, 5  ;;  %v4965_v34 = vshrl.u32 %v7686_v13, 16  ;;  %v7756_v36 = vld [vmem:[%s10616_s1 + $0x4] sm:$0x3]  ;;  %v437_v19 = vld [vmem:[#allocation2 + $0x38] sm:$0xff] }
 0x107   : > { %v4953_v25 = vrot.slane %v4951_v9, 4  ;;  %v7692_v31 = vcombine.low %v4921_v15, %v4935_v1  ;;  %v4943_v32 = vor.u32 %v4942_v16, %v4939_v6  ;;  %v4974_v26 = vshll.u32 %v7687_v18, 16  ;;  %v9548_v27 = vpop.f32.mrb[7].mxu1  ;;  %v7715_v51 = vld [vmem:[%s8799_s23 + $0x90] sm:$0xf] }
 0x108   : > { %v4956_v28 = vrot.slane %v4954_v12, 5  ;;  %v4967_v40 = vrot.slane %v4965_v34, 4  ;;  %v4988_v23 = vshll.u32 %v7689_v33, 16  ;;  %v5626_v48 = vsel %vm241_vm0, %v7756_v36, 0  ;;  %v8601_v54 = vld [vmem:[%s8799_s23 + $0xe8] ss:$8 sps:$4 sm:$0xff]  }
 0x109   : > { %v4944_v11 = vrot.slane %v4943_v32, 4  ;;  %v4976_v44 = vrot.slane %v4974_v26, 5  ;;  %v442_v52 = vadd.f32 %v434_v35, %v415_v0  ;;  %v445_v53 = vadd.f32 %v8105_v30, %v437_v19  ;;  %v7716_v58 = vld [vmem:[%s8799_s23 + $0x94] sm:$0x1]  ;;  %v7717_v60 = vld [vmem:[%s8799_s23 + $0x98] sm:$0xf] }
 0x10a   : > { %v4957_v37 = vor.u32 %v4956_v28, %v4953_v25  ;;  %v4990_v5 = vrot.slane %v4988_v23, 5  ;;  %v7718_v61 = vld [vmem:[%s8799_s23 + $0x9c] sm:$0x1]  ;;  %v5244_v63 = vshrl.u32 %v7715_v51, 16  ;;  %v5247_v2 = vshll.u32 %v7715_v51, 16  ;;  %v681_v35 = vld [vmem:[#allocation2 + $0x10] sm:$0xff] }
 0x10b   : > { %8333 = vmatmul.mubr.msk.bf16.gmra.mrb[100].mxu0 %vm228_vm1, %v8597_v29  ;;  %v7688_v29 = vld [vmem:[%s8799_s23 + $0xd0] sm:$0xf]  ;;  %v7719_v42 = vld [vmem:[%s8799_s23 + $0xa0] sm:$0xf]  ;;  %450 = vst.msk [vmem:[#allocation2 + $0x20] sm:$0xff] %vm310_vm5, %v442_v52  ;;  %453 = vst.msk [vmem:[#allocation2 + $0x38] sm:$0xff] %vm310_vm5, %v445_v53 }
 0x10c   : > { %8348 = vmatprep.mubr.msk.bf16.mxu0 %vm228_vm1, %v7691_v57  ;;  %v4979_v39 = vshrl.u32 %v7688_v29, 16  ;;  %v4982_v41 = vshll.u32 %v7688_v29, 16  ;;  %v4958_v24 = vrot.slane %v4957_v37, 4  ;;  %v5253_v57 = vshll.u32 %v7716_v58, 16  ;;  %v8602_v3 = vld [vmem:[%s8799_s23 + $0xf8] ss:$8 sps:$4 sm:$0xff]  }
 0x10d   : > { %8339 = vmatmul.mubr.msk.bf16.vlgmr.msra.gmra.mrb[96].mxu1 %vm228_vm1, %v8595_v38  ;;  %v4968_v38 = vshll.u32 %v7686_v13, 16  ;;  %v5258_v4 = vshrl.u32 %v7717_v60, 16  ;;  %v5261_v0 = vshll.u32 %v7717_v60, 16  ;;  %v5267_v7 = vshll.u32 %v7718_v61, 16  ;;  %v7720_v8 = vld [vmem:[%s8799_s23 + $0xa4] sm:$0x1] }
 0x10e   : > { %8357 = vmatpush3.bf16.msra.mxu1 %v5151_v45  ;;  %8342 = vmatprep.mubr.msk.bf16.mxu1 %vm228_vm1, %v8598_v10  ;;  %v4981_v45 = vrot.slane %v4979_v39, 4  ;;  %v4949_v10 = vsel %vm8837_vm4, %v4944_v11, %v4948_v22  ;;  %v4984_v47 = vrot.slane %v4982_v41, 5  ;;  %v4963_v49 = vsel %vm8837_vm4, %v4958_v24, %v4962_v21  ;;  %v7721_v15 = vld [vmem:[%s8799_s23 + $0xa8] sm:$0xf]  ;;  %v7722_v1 = vld [vmem:[%s8799_s23 + $0xac] sm:$0x1] }
 0x10f   : > { %8475 = vmatprep.subr.msk.bf16.mxu1 %vm241_vm0, %v7756_v36  ;;  %v4970_v43 = vrot.slane %v4968_v38, 5  ;;  %v5246_v12 = vrot.slane %v5244_v63, 4  ;;  %v5249_v13 = vrot.slane %v5247_v2, 5  ;;  %v5260_v16 = vrot.slane %v5258_v4, 4  ;;  %v7773_v30 = vld [vmem:[%s10616_s1 + $0x6] sm:$0x3] }
 0x110   : > { %v4985_v56 = vor.u32 %v4984_v47, %v4981_v45  ;;  %v5263_v17 = vrot.slane %v5261_v0, 5  ;;  %v5269_v18 = vrot.slane %v5267_v7, 5  ;;  %v5272_v28 = vshrl.u32 %v7719_v42, 16  ;;  %v435_v36 = vld [vmem:[#allocation2 + $0x28] sm:$0xff]  ;;  %v679_v11 = vld [vmem:[#allocation2] sm:$0xff] }
 0x111   : > { %v4971_v50 = vor.u32 %v4970_v43, %v4967_v40  ;;  %v5250_v25 = vor.u32 %v5249_v13, %v5246_v12  ;;  %v5275_v29 = vshll.u32 %v7719_v42, 16  ;;  %v5281_v21 = vshll.u32 %v7720_v8, 16  ;;  %v8603_v51 = vld [vmem:[%s8799_s23 + $0x108] ss:$8 sps:$4 sm:$0xff]   ;;  %v7742_v58 = vld [vmem:[%s8799_s23 + $0xe0] sm:$0xf] }
 0x112   : > { %v4986_v59 = vrot.slane %v4985_v56, 4  ;;  %v5264_v32 = vor.u32 %v5263_v17, %v5260_v16  ;;  %v5286_v33 = vshrl.u32 %v7721_v15, 16  ;;  %v5289_v34 = vshll.u32 %v7721_v15, 16  ;;  %v7741_v56 = vld [vmem:[%s8799_s23 + $0xdc] sm:$0x1] }
 0x113   : > { %8349 = vmatmul.mubr.msk.bf16.vlgmr.msra.gmra.mrb[104].mxu0 %vm228_vm1, %v7692_v31  ;;  %v4972_v62 = vrot.slane %v4971_v50, 4  ;;  %v5251_v38 = vrot.slane %v5250_v25, 4  ;;  %v5274_v26 = vrot.slane %v5272_v28, 4  ;;  %v5277_v39 = vrot.slane %v5275_v29, 5  ;;  %v9581_v50 = vpop.f32.mrb[8].mxu1 }
 0x114   : > { %8367 = vmatpush3.bf16.msra.mxu0 %v5381_v55  ;;  %v7693_v55 = vcombine.low %v4949_v10, %v4963_v49  ;;  %v4991_v6 = vsel %vm8837_vm4, %v4986_v59, %v4990_v5  ;;  %v5295_v19 = vshll.u32 %v7722_v1, 16  ;;  %v5265_v41 = vrot.slane %v5264_v32, 4  ;;  %v7740_v49 = vld [vmem:[%s8799_s23 + $0xd8] sm:$0xf]  ;;  %v7743_v63 = vld [vmem:[%s8799_s23 + $0xe4] sm:$0x1] }
 0x115   : > { %8343 = vmatmul.mubr.msk.bf16.gmra.mrb[100].mxu1 %vm228_vm1, %v8599_v14  ;;  %v4977_v9 = vsel %vm8837_vm4, %v4972_v62, %v4976_v44  ;;  %v5255_v14 = vrot.slane %v5253_v57, 5  ;;  %8476 = vmatprep.subr.msk.bf16.mxu0 %vm241_vm0, %v7773_v30  ;;  %v5283_v23 = vrot.slane %v5281_v21, 5  ;;  %v5288_v24 = vrot.slane %v5286_v33, 4  ;;  %v682_v44 = vld [vmem:[#allocation2 + $0x18] sm:$0xff]  ;;  %v9594_v4 = vpop.f32.mrb[9].mxu1 }
 0x116   : > { %8358 = vmatprep.mubr.msk.bf16.mxu1 %vm228_vm1, %v8600_v20  ;;  %8352 = vmatprep.mubr.msk.bf16.mxu0 %vm228_vm1, %v7693_v55  ;;  %v8110_v20 = vpop.f32.mrb[8].mxu0  ;;  %v7694_v22 = vcombine.low %v4977_v9, %v4991_v6  ;;  %v5291_v43 = vrot.slane %v5289_v34, 5  ;;  %v5278_v10 = vor.u32 %v5277_v39, %v5274_v26  ;;  %v5297_v47 = vrot.slane %v5295_v19, 5  ;;  %v7724_v12 = vld [vmem:[%s8799_s23 + $0xb4] sm:$0x1]  ;;  %v9601_v13 = vpop.f32.mrb[10].mxu1 }
 0x117   : > { %v648_v31 = vpop.f32.mrb[9].mxu0  ;;  %v5256_v45 = vsel %vm8837_vm4, %v5251_v38, %v5255_v14  ;;  %v443_v5 = vadd.f32 %v435_v36, %v9548_v27  ;;  %v5270_v52 = vsel %vm8837_vm4, %v5265_v41, %v5269_v18  ;;  %v5759_v27 = vsel %vm241_vm0, %v7773_v30, 0  ;;  %v7725_v17 = vld [vmem:[%s8799_s23 + $0xb8] sm:$0xf]  ;;  %v7726_v28 = vld [vmem:[%s8799_s23 + $0xbc] sm:$0x1] }
 0x118   : > { %v8111_v37 = vpop.f32.mrb[10].mxu0  ;;  %v5292_v53 = vor.u32 %v5291_v43, %v5288_v24  ;;  %v687_v55 = vadd.f32 %v679_v11, %v648_v31  ;;  %v7732_v60 = vcombine.low %v5256_v45, %v5270_v52  ;;  %v5279_v61 = vrot.slane %v5278_v10, 4  ;;  %v9611_v21 = vpop.f32.mrb[11].mxu1 }
 0x119   : > { %v651_v40 = vpop.f32.mrb[11].mxu0  ;;  %451 = vst.msk [vmem:[#allocation2 + $0x28] sm:$0xff] %vm310_vm5, %v443_v5  ;;  %v690_v62 = vadd.f32 %v8111_v37, %v682_v44  ;;  %v5489_v42 = vshrl.u32 %v7740_v49, 16  ;;  %v5492_v59 = vshll.u32 %v7740_v49, 16  ;;  %v5498_v7 = vshll.u32 %v7741_v56, 16 }
 0x11a   : > { %v5293_v2 = vrot.slane %v5292_v53, 4  ;;  %695 = vst.msk [vmem:[#allocation2] sm:$0xff] %vm310_vm5, %v687_v55  ;;  %v5284_v0 = vsel %vm8837_vm4, %v5279_v61, %v5283_v23  ;;  %v5503_v8 = vshrl.u32 %v7742_v58, 16  ;;  %v5506_v9 = vshll.u32 %v7742_v58, 16  ;;  %v9608_v18 = vpop.f32.mrb[12].mxu0 }
 0x11b   : > { %8353 = vmatmul.mubr.msk.bf16.gmra.mrb[108].mxu0 %vm228_vm1, %v7694_v22  ;;  %698 = vst.msk [vmem:[#allocation2 + $0x18] sm:$0xff] %vm310_vm5, %v690_v62  ;;  %v5491_v15 = vrot.slane %v5489_v42, 4  ;;  %v5494_v6 = vrot.slane %v5492_v59, 5  ;;  %v5512_v16 = vshll.u32 %v7743_v63, 16  ;;  %v5309_v34 = vshll.u32 %v7724_v12, 16  ;;  %v9615_v38 = vpop.f32.mrb[13].mxu0 }
 0x11c   : > { %8368 = vmatprep.mubr.msk.bf16.mxu0 %vm228_vm1, %v7732_v60  ;;  %v5298_v14 = vsel %vm8837_vm4, %v5293_v2, %v5297_v47  ;;  %v5505_v22 = vrot.slane %v5503_v8, 4  ;;  %v5508_v25 = vrot.slane %v5506_v9, 5  ;;  %v5314_v36 = vshrl.u32 %v7725_v17, 16  ;;  %v7744_v37 = vld [vmem:[%s8799_s23 + $0xe8] sm:$0xf]  ;;  %v9625_v56 = vpop.f32.mrb[14].mxu0 }
 0x11d   : > { %8359 = vmatmul.mubr.msk.bf16.vlgmr.msra.gmra.mrb[104].mxu1 %vm228_vm1, %v8601_v54  ;;  %v689_v54 = vadd.f32 %v8110_v20, %v681_v35  ;;  %v7733_v1 = vcombine.low %v5284_v0, %v5298_v14  ;;  %v5500_v20 = vrot.slane %v5498_v7, 5  ;;  %v5495_v29 = vor.u32 %v5494_v6, %v5491_v15  ;;  %v7746_v44 = vld [vmem:[%s8799_s23 + $0xf0] sm:$0xf]  ;;  %v7747_v5 = vld [vmem:[%s8799_s23 + $0xf4] sm:$0x1]  ;;  %v9632_v63 = vpop.f32.mrb[15].mxu0 }
 0x11e   : > { %8377 = vmatpush3.bf16.msra.mxu1 %v5626_v48  ;;  %8362 = vmatprep.mubr.msk.bf16.mxu1 %vm228_vm1, %v8602_v3  ;;  %v680_v48 = vld [vmem:[#allocation2 + $0x8] sm:$0xff]  ;;  %v7723_v3 = vld [vmem:[%s8799_s23 + $0xb0] sm:$0xf]  ;;  %v5514_v30 = vrot.slane %v5512_v16, 5  ;;  %v5509_v33 = vor.u32 %v5508_v25, %v5505_v22  ;;  %v5317_v35 = vshll.u32 %v7725_v17, 16  ;;  %v5323_v11 = vshll.u32 %v7726_v28, 16 }
 0x11f   : > { %697 = vst.msk [vmem:[#allocation2 + $0x10] sm:$0xff] %vm310_vm5, %v689_v54  ;;  %v688_v57 = vadd.f32 %v680_v48, %v651_v40  ;;  %v5300_v31 = vshrl.u32 %v7723_v3, 16  ;;  %v5303_v32 = vshll.u32 %v7723_v3, 16  ;;  %v5496_v26 = vrot.slane %v5495_v29, 4  ;;  %v7745_v40 = vld [vmem:[%s8799_s23 + $0xec] sm:$0x1] }
 0x120   : > { %v5510_v41 = vrot.slane %v5509_v33, 4  ;;  %v5311_v23 = vrot.slane %v5309_v34, 5  ;;  %v5316_v24 = vrot.slane %v5314_v36, 4  ;;  %v5319_v43 = vrot.slane %v5317_v35, 5  ;;  %v7727_v55 = vld [vmem:[%s8799_s23 + $0xc0] sm:$0xf] }
 0x121   : > { %696 = vst.msk [vmem:[#allocation2 + $0x8] sm:$0xff] %vm310_vm5, %v688_v57  ;;  %v5302_v39 = vrot.slane %v5300_v31, 4  ;;  %v5305_v19 = vrot.slane %v5303_v32, 5  ;;  %v5501_v45 = vsel %vm8837_vm4, %v5496_v26, %v5500_v20  ;;  %v5325_v47 = vrot.slane %v5323_v11, 5  ;;  %v9630_v62 = vld [vmem:[%s10616_s1 + $0x8] sm:$0x3] }
 0x122   : > { %v5517_v48 = vshrl.u32 %v7744_v37, 16  ;;  %v5515_v49 = vsel %vm8837_vm4, %v5510_v41, %v5514_v30  ;;  %v5520_v52 = vshll.u32 %v7744_v37, 16  ;;  %v5526_v53 = vshll.u32 %v7745_v40, 16  ;;  %v7728_v3 = vld [vmem:[%s8799_s23 + $0xc4] sm:$0x1]  ;;  %8477 = vmatprep.subr.msk.bf16.mxu1 %vm241_vm0, %v9630_v62  ;;  %v817_v29 = vld [vmem:[#allocation2 + $0x18] sm:$0xff] }
 0x123   : > { %8369 = vmatmul.mubr.msk.bf16.vlgmr.msra.gmra.mrb[112].mxu0 %vm228_vm1, %v7733_v1  ;;  %v5306_v10 = vor.u32 %v5305_v19, %v5302_v39  ;;  %v7757_v58 = vcombine.low %v5501_v45, %v5515_v49  ;;  %v5534_v59 = vshll.u32 %v7746_v44, 16  ;;  %v5540_v8 = vshll.u32 %v7747_v5, 16  ;;  %v7729_v12 = vld [vmem:[%s8799_s23 + $0xc8] sm:$0xf]  ;;  %v7730_v16 = vld [vmem:[%s8799_s23 + $0xcc] sm:$0x1] }
 0x124   : > { %8387 = vmatpush3.bf16.msra.mxu0 %v5759_v27  ;;  %v5519_v61 = vrot.slane %v5517_v48, 4  ;;  %v5531_v27 = vshrl.u32 %v7746_v44, 16  ;;  %v5522_v57 = vrot.slane %v5520_v52, 5  ;;  %v5528_v42 = vrot.slane %v5526_v53, 5  ;;  %v814_v1 = vld [vmem:[#allocation2] sm:$0xff]  ;;  %v685_v30 = vld [vmem:[#allocation2 + $0x30] sm:$0xff] }
 0x125   : > { %8363 = vmatmul.mubr.msk.bf16.gmra.mrb[108].mxu1 %vm228_vm1, %v8603_v51  ;;  %v5320_v51 = vor.u32 %v5319_v43, %v5316_v24  ;;  %v5307_v60 = vrot.slane %v5306_v10, 4  ;;  %v5536_v6 = vrot.slane %v5534_v59, 5  ;;  %v5328_v17 = vshrl.u32 %v7727_v55, 16  ;;  %v683_v31 = vld [vmem:[#allocation2 + $0x20] sm:$0xff]  ;;  %v686_v37 = vld [vmem:[#allocation2 + $0x38] sm:$0xff]  ;;  %v684_v41 = vld [vmem:[#allocation2 + $0x28] sm:$0xff] }
 0x126   : > { %v816_v54 = vld [vmem:[#allocation2 + $0x10] sm:$0xff]  ;;  %8378 = vmatprep.mubr.msk.bf16.mxu1 %vm228_vm1, %v7757_v58  ;;  %v5533_v7 = vrot.slane %v5531_v27, 4  ;;  %v5523_v15 = vor.u32 %v5522_v57, %v5519_v61  ;;  %v5542_v22 = vrot.slane %v5540_v8, 5  ;;  %v5331_v25 = vshll.u32 %v7727_v55, 16  ;;  %v7749_v24 = vld [vmem:[%s8799_s23 + $0xfc] sm:$0x1] }
 0x127   : > { %v5321_v2 = vrot.slane %v5320_v51, 4  ;;  %v5312_v0 = vsel %vm8837_vm4, %v5307_v60, %v5311_v23  ;;  %v824_v9 = vadd.f32 %v9581_v50, %v816_v54  ;;  %v5337_v28 = vshll.u32 %v7728_v3, 16  ;;  %v9646_v50 = vpop.f32.mrb[12].mxu1  ;;  %v7748_v23 = vld [vmem:[%s8799_s23 + $0xf8] sm:$0xf]  ;;  %v9669_v60 = vpop.f32.mrb[16].mxu0 }
 0x128   : > { %v5524_v32 = vrot.slane %v5523_v15, 4  ;;  %v5537_v33 = vor.u32 %v5536_v6, %v5533_v7  ;;  %v5330_v34 = vrot.slane %v5328_v17, 4  ;;  %v5342_v36 = vshrl.u32 %v7729_v12, 16  ;;  %v815_v35 = vld [vmem:[#allocation2 + $0x8] sm:$0xff]  ;;  %v9648_v26 = vpop.f32.mrb[13].mxu1 }
 0x129   : > { %v5326_v14 = vsel %vm8837_vm4, %v5321_v2, %v5325_v47  ;;  %832 = vst.msk [vmem:[#allocation2 + $0x10] sm:$0xff] %vm310_vm5, %v824_v9  ;;  %v5333_v39 = vrot.slane %v5331_v25, 5  ;;  %v9651_v19 = vrot.slane %v5337_v28, 5  ;;  %v5345_v11 = vshll.u32 %v7729_v12, 16  ;;  %v7750_v51 = vld [vmem:[%s8799_s23 + $0x100] sm:$0xf] }
 0x12a   : > { %v7734_v20 = vcombine.low %v5312_v0, %v5326_v14  ;;  %v5351_v40 = vshll.u32 %v7730_v16, 16  ;;  %v5529_v43 = vsel %vm8837_vm4, %v5524_v32, %v5528_v42  ;;  %v5538_v44 = vrot.slane %v5537_v33, 4  ;;  %v7751_v58 = vld [vmem:[%s8799_s23 + $0x104] sm:$0x1]  ;;  %v7752_v57 = vld [vmem:[%s8799_s23 + $0x108] sm:$0xf] }
 0x12b   : > { %v5344_v45 = vrot.slane %v5342_v36, 4  ;;  %v822_v10 = vadd.f32 %v814_v1, %v9594_v4  ;;  %v5334_v47 = vor.u32 %v5333_v39, %v5330_v34  ;;  %v5347_v5 = vrot.slane %v5345_v11, 5  ;;  %v9667_v4 = vpop.f32.mrb[14].mxu1  ;;  %v7753_v0 = vld [vmem:[%s8799_s23 + $0x10c] sm:$0x1] }
 0x12c   : > { %8372 = vmatprep.mubr.msk.bf16.mxu0 %vm228_vm1, %v7734_v20  ;;  %v5353_v48 = vrot.slane %v5351_v40, 5  ;;  %v825_v49 = vadd.f32 %v9601_v13, %v817_v29  ;;  %v5543_v52 = vsel %vm8837_vm4, %v5538_v44, %v5542_v22  ;;  %v693_v53 = vadd.f32 %v9608_v18, %v685_v30  ;;  %v9674_v18 = vpop.f32.mrb[15].mxu1  ;;  %v7754_v7 = vld [vmem:[%s8799_s23 + $0x110] sm:$0xf]  ;;  %v7755_v6 = vld [vmem:[%s8799_s23 + $0x114] sm:$0x1] }
 0x12d   : > { %830 = vst.msk [vmem:[#allocation2] sm:$0xff] %vm310_vm5, %v822_v10  ;;  %v823_v54 = vadd.f32 %v815_v35, %v9611_v21  ;;  %v691_v55 = vadd.f32 %v683_v31, %v9615_v38  ;;  %v7758_v61 = vcombine.low %v5529_v43, %v5543_v52  ;;  %v5335_v13 = vrot.slane %v5334_v47, 4  ;;  %v9676_v21 = vpop.f32.mrb[17].mxu0  ;;  %v9681_v38 = vld [vmem:[%s10616_s1 + $0xa] sm:$0x3]  ;;  %v9693_v9 = vpop.f32.mrb[16].mxu1 }
 0x12e   : > { %v5348_v27 = vor.u32 %v5347_v5, %v5344_v45  ;;  %833 = vst.msk [vmem:[#allocation2 + $0x18] sm:$0xff] %vm310_vm5, %v825_v49  ;;  %v694_v2 = vadd.f32 %v9625_v56, %v686_v37  ;;  %701 = vst.msk [vmem:[#allocation2 + $0x30] sm:$0xff] %vm310_vm5, %v693_v53  ;;  %v692_v42 = vadd.f32 %v684_v41, %v9632_v63  ;;  %v5545_v56 = vshrl.u32 %v7748_v23, 16  ;;  %v9689_v8 = vpop.f32.mrb[18].mxu0  ;;  %v8604_v31 = vld [vmem:[%s8799_s23 + $0x50] ss:$8 sps:$4 sm:$0xff]  }
 0x12f   : > { %831 = vst.msk [vmem:[#allocation2 + $0x8] sm:$0xff] %vm310_vm5, %v823_v54  ;;  %699 = vst.msk [vmem:[#allocation2 + $0x20] sm:$0xff] %vm310_vm5, %v691_v55  ;;  %v5548_v59 = vshll.u32 %v7748_v23, 16  ;;  %v5554_v3 = vshll.u32 %v7749_v24, 16  ;;  %8478 = vmatprep.subr.msk.bf16.mxu0 %vm241_vm0, %v9681_v38  ;;  %8379 = vmatmul.mubr.msk.bf16.vlgmr.msra.gmra.mrb[112].mxu1 %vm228_vm1, %v7758_v61  ;;  %v5340_v12 = vsel %vm8837_vm4, %v5335_v13, %v9651_v19  ;;  %v5559_v14 = vshrl.u32 %v7750_v51, 16  ;;  %v9701_v16 = vpop.f32.mrb[19].mxu0 }
 0x130   : > { %v5349_v63 = vrot.slane %v5348_v27, 4  ;;  %702 = vst.msk [vmem:[#allocation2 + $0x38] sm:$0xff] %vm310_vm5, %v694_v2  ;;  %v5562_v15 = vshll.u32 %v7750_v51, 16  ;;  %700 = vst.msk [vmem:[#allocation2 + $0x28] sm:$0xff] %vm310_vm5, %v692_v42  ;;  %v5547_v17 = vrot.slane %v5545_v56, 4  ;;  %v5568_v22 = vshll.u32 %v7751_v58, 16 }
 0x131   : > { %v5550_v1 = vrot.slane %v5548_v59, 5  ;;  %v5556_v20 = vrot.slane %v5554_v3, 5  ;;  %v5561_v28 = vrot.slane %v5559_v14, 4  ;;  %v6004_v30 = vsel %vm241_vm0, %v9630_v62, 0  ;;  %v9709_v32 = vpop.f32.mrb[17].mxu1  ;;  %v951_v40 = vld [vmem:[#allocation2 + $0x10] sm:$0xff] }
 0x132   : > { %v5354_v25 = vsel %vm8837_vm4, %v5349_v63, %v5353_v48  ;;  %v5564_v29 = vrot.slane %v5562_v15, 5  ;;  %v5570_v36 = vrot.slane %v5568_v22, 5  ;;  %8397 = vmatpush3.bf16.msra.mxu1 %v6004_v30  ;;  %v5573_v35 = vshrl.u32 %v7752_v57, 16  ;;  %v9712_v44 = vpop.f32.mrb[18].mxu1  ;;  %v8605_v55 = vld [vmem:[%s8799_s23 + $0x60] ss:$8 sps:$4 sm:$0xff]  }
 0x133   : > { %v7735_v33 = vcombine.low %v5340_v12, %v5354_v25  ;;  %v5551_v34 = vor.u32 %v5550_v1, %v5547_v17  ;;  %v5576_v39 = vshll.u32 %v7752_v57, 16  ;;  %v5582_v19 = vshll.u32 %v7753_v0, 16  ;;  %v8606_v59 = vld [vmem:[%s8799_s23 + $0x70] ss:$8 sps:$4 sm:$0xff]   ;;  %v7782_v3 = vld [vmem:[%s8799_s23 + $0x8] sm:$0xf] }
 0x134   : > { %v5565_v37 = vor.u32 %v5564_v29, %v5561_v28  ;;  %v5587_v11 = vshrl.u32 %v7754_v7, 16  ;;  %v5575_v23 = vrot.slane %v5573_v35, 4  ;;  %v5590_v24 = vshll.u32 %v7754_v7, 16  ;;  %v949_v43 = vld [vmem:[#allocation2] sm:$0xff]  ;;  %v9727_v0 = vpop.f32.mrb[20].mxu0 }
 0x135   : > { %8373 = vmatmul.mubr.msk.bf16.gmra.mrb[116].mxu0 %vm228_vm1, %v7735_v33  ;;  %v5552_v41 = vrot.slane %v5551_v34, 4  ;;  %v5596_v62 = vshll.u32 %v7755_v6, 16  ;;  %v5578_v10 = vrot.slane %v5576_v39, 5  ;;  %v9714_v47 = vrot.slane %v5582_v19, 5  ;;  %v820_v48 = vld [vmem:[#allocation2 + $0x30] sm:$0xff]  ;;  %v952_v61 = vld [vmem:[#allocation2 + $0x18] sm:$0xff] }
 0x136   : > { %v5566_v45 = vrot.slane %v5565_v37, 4  ;;  %v5589_v5 = vrot.slane %v5587_v11, 4  ;;  %8388 = vmatprep.mubr.msk.bf16.mxu0 %vm228_vm1, %v8604_v31  ;;  %v818_v49 = vld [vmem:[#allocation2 + $0x20] sm:$0xff]  ;;  %v5592_v52 = vrot.slane %v5590_v24, 5  ;;  %v828_v54 = vadd.f32 %v9646_v50, %v820_v48  ;;  %v950_v13 = vld [vmem:[#allocation2 + $0x8] sm:$0xff] }
 0x137   : > { %v5557_v51 = vsel %vm8837_vm4, %v5552_v41, %v5556_v20  ;;  %v5598_v53 = vrot.slane %v5596_v62, 5  ;;  %v821_v58 = vld [vmem:[#allocation2 + $0x38] sm:$0xff]  ;;  %v5579_v2 = vor.u32 %v5578_v10, %v5575_v23  ;;  %v826_v57 = vadd.f32 %v818_v49, %v9648_v26  ;;  %v819_v56 = vld [vmem:[#allocation2 + $0x28] sm:$0xff]  ;;  %v7784_v15 = vld [vmem:[%s8799_s23 + $0x10] sm:$0xf]  ;;  %v9734_v26 = vpop.f32.mrb[19].mxu1 }
 0x138   : > { %v5571_v27 = vsel %vm8837_vm4, %v5566_v45, %v5570_v36  ;;  %v829_v42 = vadd.f32 %v9667_v4, %v821_v58  ;;  %v5593_v7 = vor.u32 %v5592_v52, %v5589_v5  ;;  %836 = vst.msk [vmem:[#allocation2 + $0x30] sm:$0xff] %vm310_vm5, %v828_v54  ;;  %v827_v12 = vadd.f32 %v819_v56, %v9674_v18  ;;  %v7783_v14 = vld [vmem:[%s8799_s23 + $0xc] sm:$0x1]  ;;  %v9736_v4 = vpop.f32.mrb[21].mxu0  ;;  %v7786_v20 = vld [vmem:[%s8799_s23 + $0x18] sm:$0xf] }
 0x139   : > { %v7759_v50 = vcombine.low %v5557_v51, %v5571_v27  ;;  %v959_v63 = vadd.f32 %v9669_v60, %v951_v40  ;;  %v5580_v6 = vrot.slane %v5579_v2, 4  ;;  %834 = vst.msk [vmem:[#allocation2 + $0x20] sm:$0xff] %vm310_vm5, %v826_v57  ;;  %v957_v17 = vadd.f32 %v949_v43, %v9676_v21  ;;  %v7785_v60 = vld [vmem:[%s8799_s23 + $0x14] sm:$0x1]  ;;  %v9745_v22 = vpop.f32.mrb[22].mxu0 }
 0x13a   : > { %837 = vst.msk [vmem:[#allocation2 + $0x38] sm:$0xff] %vm310_vm5, %v829_v42  ;;  %v960_v1 = vadd.f32 %v9689_v8, %v952_v61  ;;  %v958_v18 = vadd.f32 %v950_v13, %v9701_v16  ;;  %v5594_v25 = vrot.slane %v5593_v7, 4  ;;  %835 = vst.msk [vmem:[#allocation2 + $0x28] sm:$0xff] %vm310_vm5, %v827_v12  ;;  %v6249_v28 = vsel %vm241_vm0, %v9681_v38, 0  ;;  %v7787_v30 = vld [vmem:[%s8799_s23 + $0x1c] sm:$0x1] }
 0x13b   : > { %8382 = vmatprep.mubr.msk.bf16.mxu1 %vm228_vm1, %v7759_v50  ;;  %967 = vst.msk [vmem:[#allocation2 + $0x10] sm:$0xff] %vm310_vm5, %v959_v63  ;;  %v5867_v29 = vshrl.u32 %v7782_v3, 16  ;;  %v5870_v21 = vshll.u32 %v7782_v3, 16  ;;  %v7788_v8 = vld [vmem:[%s8799_s23 + $0x20] sm:$0xf]  ;;  %v5585_v16 = vsel %vm8837_vm4, %v5580_v6, %v9714_v47  ;;  %965 = vst.msk [vmem:[#allocation2] sm:$0xff] %vm310_vm5, %v957_v17 }
 0x13c   : > { %968 = vst.msk [vmem:[#allocation2 + $0x18] sm:$0xff] %vm310_vm5, %v960_v1  ;;  %966 = vst.msk [vmem:[#allocation2 + $0x8] sm:$0xff] %vm310_vm5, %v958_v18  ;;  %v5876_v31 = vshll.u32 %v7783_v14, 16  ;;  %v5881_v33 = vshrl.u32 %v7784_v15, 16  ;;  %v5884_v34 = vshll.u32 %v7784_v15, 16  ;;  %v9760_v36 = vpop.f32.mrb[23].mxu0  ;;  %v5599_v35 = vsel %vm8837_vm4, %v5594_v25, %v5598_v53 }
 0x13d   : > { %v9762_v38 = vpop.f32.mrb[20].mxu1  ;;  %8389 = vmatmul.mubr.msk.bf16.vlgmr.msra.gmra.mrb[120].mxu0 %vm228_vm1, %v8605_v55  ;;  %v5869_v37 = vrot.slane %v5867_v29, 4  ;;  %v5872_v39 = vrot.slane %v5870_v21, 5  ;;  %v5890_v19 = vshll.u32 %v7785_v60, 16  ;;  %v9772_v40 = vld [vmem:[%s10616_s1 + $0xc] sm:$0x3]  ;;  %v7760_v41 = vcombine.low %v5585_v16, %v5599_v35 }
 0x13e   : > { %v9767_v11 = vpop.f32.mrb[21].mxu1  ;;  %8392 = vmatprep.mubr.msk.bf16.mxu0 %vm228_vm1, %v8606_v59  ;;  %8407 = vmatpush3.bf16.msra.mxu0 %v6249_v28  ;;  %v5878_v23 = vrot.slane %v5876_v31, 5  ;;  %v5883_v24 = vrot.slane %v5881_v33, 4  ;;  %v5886_v62 = vrot.slane %v5884_v34, 5  ;;  %v8607_v45 = vld [vmem:[%s8799_s23 + $0x80] ss:$8 sps:$4 sm:$0xff]  }
 0x13f   : > { %v9775_v43 = vpop.f32.mrb[22].mxu1  ;;  %v5873_v10 = vor.u32 %v5872_v39, %v5869_v37  ;;  %v5892_v47 = vrot.slane %v5890_v19, 5  ;;  %v5895_v5 = vshrl.u32 %v7786_v20, 16  ;;  %v5898_v48 = vshll.u32 %v7786_v20, 16  ;;  %8479 = vmatprep.subr.msk.bf16.mxu1 %vm241_vm0, %v9772_v40  ;;  %8383 = vmatmul.mubr.msk.bf16.gmra.mrb[116].mxu1 %vm228_vm1, %v7760_v41  ;;  %v955_v52 = vld [vmem:[#allocation2 + $0x30] sm:$0xff]  ;;  %v9786_v59 = vpop.f32.mrb[24].mxu0 }
 0x140   : > { %v9780_v49 = vpop.f32.mrb[23].mxu1  ;;  %v5887_v51 = vor.u32 %v5886_v62, %v5883_v24  ;;  %v7789_v53 = vld [vmem:[%s8799_s23 + $0x24] sm:$0x1]  ;;  %v5904_v54 = vshll.u32 %v7787_v30, 16  ;;  %v5909_v55 = vshrl.u32 %v7788_v8, 16  ;;  %v5912_v58 = vshll.u32 %v7788_v8, 16 }
 0x141   : > { %v5874_v61 = vrot.slane %v5873_v10, 4  ;;  %v963_v13 = vadd.f32 %v9727_v0, %v955_v52  ;;  %v5897_v27 = vrot.slane %v5895_v5, 4  ;;  %v5900_v2 = vrot.slane %v5898_v48, 5  ;;  %v953_v57 = vld [vmem:[#allocation2 + $0x20] sm:$0xff]  ;;  %v956_v42 = vld [vmem:[#allocation2 + $0x38] sm:$0xff]  ;;  %v954_v14 = vld [vmem:[#allocation2 + $0x28] sm:$0xff] }
 0x142   : > { %v7790_v56 = vld [vmem:[%s8799_s23 + $0x28] sm:$0xf]  ;;  %v1197_v3 = vld [vmem:[#allocation2 + $0x10] sm:$0xff]  ;;  %v5888_v50 = vrot.slane %v5887_v51, 4  ;;  %v5906_v7 = vrot.slane %v5904_v54, 5  ;;  %v5911_v12 = vrot.slane %v5909_v55, 4 }
 0x143   : > { %v5914_v63 = vrot.slane %v5912_v58, 5  ;;  %v1205_v15 = vadd.f32 %v9693_v9, %v1197_v3  ;;  %v1195_v6 = vld [vmem:[#allocation2] sm:$0xff]  ;;  %v1198_v17 = vld [vmem:[#allocation2 + $0x18] sm:$0xff]  ;;  %v5879_v0 = vsel %vm8837_vm4, %v5874_v61, %v5878_v23  ;;  %971 = vst.msk [vmem:[#allocation2 + $0x30] sm:$0xff] %vm310_vm5, %v963_v13  ;;  %v1196_v1 = vld [vmem:[#allocation2 + $0x8] sm:$0xff]  ;;  %v5901_v18 = vor.u32 %v5900_v2, %v5897_v27  ;;  %v9792_v20 = vpop.f32.mrb[25].mxu0 }
 0x144   : > { %v5918_v60 = vshll.u32 %v7789_v53, 16  ;;  %v9794_v25 = vpop.f32.mrb[24].mxu1  ;;  %v1203_v28 = vadd.f32 %v1195_v6, %v9709_v32  ;;  %v1206_v9 = vadd.f32 %v9712_v44, %v1198_v17  ;;  %v5893_v29 = vsel %vm8837_vm4, %v5888_v50, %v5892_v47  ;;  %v7791_v30 = vld [vmem:[%s8799_s23 + $0x2c] sm:$0x1]  ;;  %v7792_v34 = vld [vmem:[%s8799_s23 + $0x30] sm:$0xf] }
 0x145   : > { %v1204_v21 = vadd.f32 %v1196_v1, %v9734_v26  ;;  %1213 = vst.msk [vmem:[#allocation2 + $0x10] sm:$0xff] %vm310_vm5, %v1205_v15  ;;  %8393 = vmatmul.mubr.msk.bf16.gmra.mrb[124].mxu0 %vm228_vm1, %v8607_v45  ;;  %v7799_v8 = vcombine.low %v5879_v0, %v5893_v29  ;;  %v5902_v16 = vrot.slane %v5901_v18, 4  ;;  %v5915_v31 = vor.u32 %v5914_v63, %v5911_v12  ;;  %v7793_v35 = vld [vmem:[%s8799_s23 + $0x34] sm:$0x1]  ;;  %v9812_v39 = vpop.f32.mrb[26].mxu0  ;;  %v9829_v54 = vpop.f32.mrb[25].mxu1 }
 0x146   : > { %v5920_v33 = vrot.slane %v5918_v60, 5  ;;  %1211 = vst.msk [vmem:[#allocation2] sm:$0xff] %vm310_vm5, %v1203_v28  ;;  %1214 = vst.msk [vmem:[#allocation2 + $0x18] sm:$0xff] %vm310_vm5, %v1206_v9  ;;  %v961_v32 = vadd.f32 %v953_v57, %v9736_v4  ;;  %v964_v44 = vadd.f32 %v9745_v22, %v956_v42  ;;  %v962_v26 = vadd.f32 %v954_v14, %v9760_v36  ;;  %v7794_v62 = vld [vmem:[%s8799_s23 + $0x38] sm:$0xf]  ;;  %v9818_v45 = vpop.f32.mrb[27].mxu0 }
 0x147   : > { %1212 = vst.msk [vmem:[#allocation2 + $0x8] sm:$0xff] %vm310_vm5, %v1204_v21  ;;  %v5923_v37 = vshrl.u32 %v7790_v56, 16  ;;  %8398 = vmatprep.mubr.msk.bf16.mxu1 %vm228_vm1, %v7799_v8  ;;  %v5907_v19 = vsel %vm8837_vm4, %v5902_v16, %v5906_v7  ;;  %v5916_v41 = vrot.slane %v5915_v31, 4  ;;  %v5926_v23 = vshll.u32 %v7790_v56, 16  ;;  %v7795_v47 = vld [vmem:[%s8799_s23 + $0x3c] sm:$0x1] }
 0x148   : > { %v5932_v24 = vshll.u32 %v7791_v30, 16  ;;  %969 = vst.msk [vmem:[#allocation2 + $0x20] sm:$0xff] %vm310_vm5, %v961_v32  ;;  %972 = vst.msk [vmem:[#allocation2 + $0x38] sm:$0xff] %vm310_vm5, %v964_v44  ;;  %v5937_v22 = vshrl.u32 %v7792_v34, 16  ;;  %v5940_v36 = vshll.u32 %v7792_v34, 16  ;;  %v5946_v10 = vshll.u32 %v7793_v35, 16 }
 0x149   : > { %970 = vst.msk [vmem:[#allocation2 + $0x28] sm:$0xff] %vm310_vm5, %v962_v26  ;;  %v5925_v4 = vrot.slane %v5923_v37, 4  ;;  %v5921_v5 = vsel %vm8837_vm4, %v5916_v41, %v5920_v33  ;;  %v5928_v48 = vrot.slane %v5926_v23, 5  ;;  %v6382_v52 = vsel %vm241_vm0, %v9772_v40, 0  ;;  %v7796_v53 = vld [vmem:[%s8799_s23 + $0x40] sm:$0xf] }
 0x14a   : > { %v5934_v51 = vrot.slane %v5932_v24, 5  ;;  %v7800_v55 = vcombine.low %v5907_v19, %v5921_v5  ;;  %v1201_v58 = vld [vmem:[#allocation2 + $0x30] sm:$0xff]  ;;  %v5939_v61 = vrot.slane %v5937_v22, 4  ;;  %v5942_v13 = vrot.slane %v5940_v36, 5  ;;  %v7797_v42 = vld [vmem:[%s8799_s23 + $0x44] sm:$0x1] }
 0x14b   : > { %v5948_v27 = vrot.slane %v5946_v10, 5  ;;  %v1209_v2 = vadd.f32 %v9762_v38, %v1201_v58  ;;  %v5929_v57 = vor.u32 %v5928_v48, %v5925_v4  ;;  %v5951_v56 = vshrl.u32 %v7794_v62, 16  ;;  %v9834_v14 = vpop.f32.mrb[26].mxu1  ;;  %v9836_v15 = vpop.f32.mrb[28].mxu0  ;;  %v7807_v18 = vld [vmem:[%s8799_s23 + $0x50] sm:$0xf] }
 0x14c   : > { %v5954_v3 = vshll.u32 %v7794_v62, 16  ;;  %8399 = vmatmul.mubr.msk.bf16.vlgmr.msra.gmra.mrb[120].mxu1 %vm228_vm1, %v7800_v55  ;;  %v5943_v50 = vor.u32 %v5942_v13, %v5939_v61  ;;  %v1332_v40 = vld [vmem:[#allocation2 + $0x10] sm:$0xff]  ;;  %v5960_v7 = vshll.u32 %v7795_v47, 16  ;;  %v5965_v12 = vshrl.u32 %v7796_v53, 16  ;;  %v7809_v28 = vld [vmem:[%s8799_s23 + $0x58] sm:$0xf] }
 0x14d   : > { %v5968_v63 = vshll.u32 %v7796_v53, 16  ;;  %1217 = vst.msk [vmem:[#allocation2 + $0x30] sm:$0xff] %vm310_vm5, %v1209_v2  ;;  %v5930_v38 = vrot.slane %v5929_v57, 4  ;;  %8417 = vmatpush3.bf16.msra.mxu1 %v6382_v52  ;;  %v1340_v6 = vadd.f32 %v9786_v59, %v1332_v40  ;;  %v5953_v17 = vrot.slane %v5951_v56, 4  ;;  %v1330_v1 = vld [vmem:[#allocation2] sm:$0xff]  ;;  %v9843_v8 = vpop.f32.mrb[27].mxu1 }
 0x14e   : > { %v5956_v0 = vrot.slane %v5954_v3, 5  ;;  %v7808_v60 = vld [vmem:[%s8799_s23 + $0x54] sm:$0x1]  ;;  %v5944_v9 = vrot.slane %v5943_v50, 4  ;;  %v5962_v29 = vrot.slane %v5960_v7, 5  ;;  %v5967_v21 = vrot.slane %v5965_v12, 4 }
 0x14f   : > { %v5970_v30 = vrot.slane %v5968_v63, 5  ;;  %v9845_v16 = vpop.f32.mrb[29].mxu0  ;;  %v1199_v31 = vld [vmem:[#allocation2 + $0x20] sm:$0xff]  ;;  %v1202_v33 = vld [vmem:[#allocation2 + $0x38] sm:$0xff]  ;;  %v5935_v59 = vsel %vm8837_vm4, %v5930_v38, %v5934_v51  ;;  %1348 = vst.msk [vmem:[#allocation2 + $0x10] sm:$0xff] %vm310_vm5, %v1340_v6  ;;  %v5974_v32 = vshll.u32 %v7797_v42, 16  ;;  %v1338_v44 = vadd.f32 %v1330_v1, %v9792_v20 }
 0x150   : > { %v1200_v34 = vld [vmem:[#allocation2 + $0x28] sm:$0xff]  ;;  %v5957_v35 = vor.u32 %v5956_v0, %v5953_v17  ;;  %v9851_v26 = vpop.f32.mrb[30].mxu0  ;;  %v9853_v37 = vpop.f32.mrb[28].mxu1  ;;  %v1207_v19 = vadd.f32 %v1199_v31, %v9767_v11  ;;  %v1210_v41 = vadd.f32 %v9775_v43, %v1202_v33  ;;  %v5949_v23 = vsel %vm8837_vm4, %v5944_v9, %v5948_v27  ;;  %v7810_v62 = vld [vmem:[%s8799_s23 + $0x5c] sm:$0x1] }
 0x151   : > { %v1208_v24 = vadd.f32 %v1200_v34, %v9780_v49  ;;  %v9864_v4 = vld [vmem:[%s10616_s1 + $0xe] sm:$0x3]  ;;  %v7801_v20 = vcombine.low %v5935_v59, %v5949_v23  ;;  %v5971_v36 = vor.u32 %v5970_v30, %v5967_v21  ;;  %v5976_v10 = vrot.slane %v5974_v32, 5  ;;  %1346 = vst.msk [vmem:[#allocation2] sm:$0xff] %vm310_vm5, %v1338_v44  ;;  %v7811_v11 = vld [vmem:[%s8799_s23 + $0x60] sm:$0xf] }
 0x152   : > { %v5958_v22 = vrot.slane %v5957_v35, 4  ;;  %8480 = vmatprep.subr.msk.bf16.mxu0 %vm241_vm0, %v9864_v4  ;;  %1215 = vst.msk [vmem:[#allocation2 + $0x20] sm:$0xff] %vm310_vm5, %v1207_v19  ;;  %1218 = vst.msk [vmem:[#allocation2 + $0x38] sm:$0xff] %vm310_vm5, %v1210_v41  ;;  %v6112_v43 = vshrl.u32 %v7807_v18, 16  ;;  %v6115_v49 = vshll.u32 %v7807_v18, 16  ;;  %v6121_v47 = vshll.u32 %v7808_v60, 16 }
 0x153   : > { %1216 = vst.msk [vmem:[#allocation2 + $0x28] sm:$0xff] %vm310_vm5, %v1208_v24  ;;  %v6126_v5 = vshrl.u32 %v7809_v28, 16  ;;  %v1333_v48 = vld [vmem:[#allocation2 + $0x18] sm:$0xff]  ;;  %v7812_v51 = vld [vmem:[%s8799_s23 + $0x64] sm:$0x1]  ;;  %8402 = vmatprep.mubr.msk.bf16.mxu1 %vm228_vm1, %v7801_v20  ;;  %v5972_v53 = vrot.slane %v5971_v36, 4 }
 0x154   : > { %v5963_v52 = vsel %vm8837_vm4, %v5958_v22, %v5962_v29  ;;  %v6129_v55 = vshll.u32 %v7809_v28, 16  ;;  %v6135_v58 = vshll.u32 %v7810_v62, 16  ;;  %v7813_v61 = vld [vmem:[%s8799_s23 + $0x68] sm:$0xf]  ;;  %v9878_v13 = vpop.f32.mrb[31].mxu0  ;;  %v6114_v27 = vrot.slane %v6112_v43, 4 }
 0x155   : > { %v6117_v2 = vrot.slane %v6115_v49, 5  ;;  %v6123_v57 = vrot.slane %v6121_v47, 5  ;;  %v6128_v42 = vrot.slane %v6126_v5, 4  ;;  %v9880_v56 = vpop.f32.mrb[29].mxu1  ;;  %v5977_v3 = vsel %vm8837_vm4, %v5972_v53, %v5976_v10  ;;  %v7814_v12 = vld [vmem:[%s8799_s23 + $0x6c] sm:$0x1] }
 0x156   : > { %v6131_v50 = vrot.slane %v6129_v55, 5  ;;  %v6137_v40 = vrot.slane %v6135_v58, 5  ;;  %v1341_v7 = vadd.f32 %v9812_v39, %v1333_v48  ;;  %v1331_v63 = vld [vmem:[#allocation2 + $0x8] sm:$0xff]  ;;  %v7802_v38 = vcombine.low %v5963_v52, %v5977_v3  ;;  %v1467_v1 = vld [vmem:[#allocation2 + $0x10] sm:$0xff]  ;;  %v9886_v18 = vpop.f32.mrb[30].mxu1  ;;  %v9894_v32 = vpop.f32.mrb[32].mxu0 }
 0x157   : > { %v6118_v6 = vor.u32 %v6117_v2, %v6114_v27  ;;  %v6140_v17 = vshrl.u32 %v7811_v11, 16  ;;  %v6143_v0 = vshll.u32 %v7811_v11, 16  ;;  %v6149_v28 = vshll.u32 %v7812_v51, 16  ;;  %v9889_v21 = vpop.f32.mrb[31].mxu1  ;;  %v7815_v34 = vld [vmem:[%s8799_s23 + $0x70] sm:$0xf] }
 0x158   : > { %v6132_v60 = vor.u32 %v6131_v50, %v6128_v42  ;;  %1349 = vst.msk [vmem:[#allocation2 + $0x18] sm:$0xff] %vm310_vm5, %v1341_v7  ;;  %v6154_v9 = vshrl.u32 %v7813_v61, 16  ;;  %v6157_v29 = vshll.u32 %v7813_v61, 16  ;;  %8403 = vmatmul.mubr.msk.bf16.gmra.mrb[124].mxu1 %vm228_vm1, %v7802_v38  ;;  %v6163_v33 = vshll.u32 %v7814_v12, 16  ;;  %v1465_v59 = vld [vmem:[#allocation2] sm:$0xff]  ;;  %v1336_v24 = vld [vmem:[#allocation2 + $0x30] sm:$0xff] }
 0x159   : > { %v6119_v39 = vrot.slane %v6118_v6, 4  ;;  %v6142_v30 = vrot.slane %v6140_v17, 4  ;;  %v6145_v31 = vrot.slane %v6143_v0, 5  ;;  %v7816_v35 = vld [vmem:[%s8799_s23 + $0x74] sm:$0x1]  ;;  %v6151_v19 = vrot.slane %v6149_v28, 5 }
 0x15a   : > { %v6133_v44 = vrot.slane %v6132_v60, 4  ;;  %v6156_v41 = vrot.slane %v6154_v9, 4  ;;  %v6159_v23 = vrot.slane %v6157_v29, 5  ;;  %v1334_v62 = vld [vmem:[#allocation2 + $0x20] sm:$0xff]  ;;  %v7817_v20 = vld [vmem:[%s8799_s23 + $0x78] sm:$0xf]  ;;  %v1339_v43 = vadd.f32 %v1331_v63, %v9818_v45 }
 0x15b   : > { %v7818_v22 = vld [vmem:[%s8799_s23 + $0x7c] sm:$0x1]  ;;  %v6124_v36 = vsel %vm8837_vm4, %v6119_v39, %v6123_v57  ;;  %v6146_v10 = vor.u32 %v6145_v31, %v6142_v30  ;;  %v6165_v11 = vrot.slane %v6163_v33, 5  ;;  %v8608_v49 = vld [vmem:[%s8799_s23 + $0xe0] ss:$8 sps:$4 sm:$0xff]   ;;  %v1475_v48 = vadd.f32 %v9794_v25, %v1467_v1  ;;  %v9907_v53 = vpop.f32.mrb[33].mxu0 }
 0x15c   : > { %v6138_v47 = vsel %vm8837_vm4, %v6133_v44, %v6137_v40  ;;  %v6160_v5 = vor.u32 %v6159_v23, %v6156_v41  ;;  %v1473_v51 = vadd.f32 %v1465_v59, %v9829_v54  ;;  %v8609_v52 = vld [vmem:[%s8799_s23 + $0xf0] ss:$8 sps:$4 sm:$0xff]   ;;  %v8180_v55 = vpop.f32.mrb[32].mxu1  ;;  %1347 = vst.msk [vmem:[#allocation2 + $0x8] sm:$0xff] %vm310_vm5, %v1339_v43  ;;  %v1344_v45 = vadd.f32 %v9836_v15, %v1336_v24  ;;  %v9913_v25 = vpop.f32.mrb[34].mxu0  ;;  %v1335_v41 = vld [vmem:[#allocation2 + $0x28] sm:$0xff] }
 0x15d   : > { %v7824_v58 = vcombine.low %v6124_v36, %v6138_v47  ;;  %v6147_v61 = vrot.slane %v6146_v10, 4  ;;  %v1342_v27 = vadd.f32 %v1334_v62, %v9845_v16  ;;  %v1337_v2 = vld [vmem:[#allocation2 + $0x38] sm:$0xff]  ;;  %8418 = vmatprep.mubr.msk.bf16.mxu1 %vm228_vm1, %v8608_v49  ;;  %v9918_v54 = vld [vmem:[%s10616_s1 + $0x10] sm:$0x3]  ;;  %1847 = vst.msk [vmem:[#allocation2 + $0x50] sm:$0xff] %vm310_vm5, %v8180_v55  ;;  %1483 = vst.msk [vmem:[#allocation2 + $0x10] sm:$0xff] %vm310_vm5, %v1475_v48 }
 0x15e   : > { %v6161_v57 = vrot.slane %v6160_v5, 4  ;;  %1481 = vst.msk [vmem:[#allocation2] sm:$0xff] %vm310_vm5, %v1473_v51  ;;  %v6168_v15 = vshrl.u32 %v7815_v34, 16  ;;  %v6171_v16 = vshll.u32 %v7815_v34, 16  ;;  %v6177_v42 = vshll.u32 %v7816_v35, 16  ;;  %8481 = vmatprep.subr.msk.bf16.mxu1 %vm241_vm0, %v9918_v54  ;;  %v9927_v40 = vpop.f32.mrb[35].mxu0 }
 0x15f   : > { %v7819_v3 = vld [vmem:[%s8799_s23 + $0x80] sm:$0xf]  ;;  %v7820_v50 = vld [vmem:[%s8799_s23 + $0x84] sm:$0x1]  ;;  %v1813_v7 = vpop.f32.mrb[33].mxu1  ;;  %8408 = vmatprep.mubr.msk.bf16.mxu0 %vm228_vm1, %v7824_v58  ;;  %v6152_v12 = vsel %vm8837_vm4, %v6147_v61, %v6151_v19  ;;  %v1468_v63 = vld [vmem:[#allocation2 + $0x18] sm:$0xff] }
 0x160   : > { %1352 = vst.msk [vmem:[#allocation2 + $0x30] sm:$0xff] %vm310_vm5, %v1344_v45  ;;  %1350 = vst.msk [vmem:[#allocation2 + $0x20] sm:$0xff] %vm310_vm5, %v1342_v27  ;;  %v6182_v38 = vshrl.u32 %v7817_v20, 16  ;;  %v6185_v6 = vshll.u32 %v7817_v20, 16  ;;  %v6191_v17 = vshll.u32 %v7818_v22, 16  ;;  %v6166_v60 = vsel %vm8837_vm4, %v6161_v57, %v6165_v11  ;;  %8419 = vmatmul.mubr.msk.bf16.vlgmr.msra.gmra.mrb[128].mxu1 %vm228_vm1, %v8609_v52  ;;  %v8181_v34 = vpop.f32.mrb[34].mxu1 }
 0x161   : > { %v7821_v0 = vld [vmem:[%s8799_s23 + $0x88] sm:$0xf]  ;;  %v7822_v1 = vld [vmem:[%s8799_s23 + $0x8c] sm:$0x1]  ;;  %1845 = vst.msk [vmem:[#allocation2 + $0x40] sm:$0xff] %vm310_vm5, %v1813_v7  ;;  %v1476_v28 = vadd.f32 %v9834_v14, %v1468_v63  ;;  %v6170_v9 = vrot.slane %v6168_v15, 4  ;;  %v7825_v30 = vcombine.low %v6152_v12, %v6166_v60  ;;  %v1345_v14 = vadd.f32 %v9851_v26, %v1337_v2 }
 0x162   : > { %v6173_v29 = vrot.slane %v6171_v16, 5  ;;  %v8610_v39 = vld [vmem:[%s8799_s23 + $0x100] ss:$8 sps:$4 sm:$0xff]   ;;  %v6179_v31 = vrot.slane %v6177_v42, 5  ;;  %v6184_v33 = vrot.slane %v6182_v38, 4  ;;  %v6187_v59 = vrot.slane %v6185_v6, 5 }
 0x163   : > { %1484 = vst.msk [vmem:[#allocation2 + $0x18] sm:$0xff] %vm310_vm5, %v1476_v28  ;;  %v6193_v44 = vrot.slane %v6191_v17, 5  ;;  %v6627_v19 = vsel %vm241_vm0, %v9864_v4, 0  ;;  %8422 = vmatprep.mubr.msk.bf16.mxu1 %vm228_vm1, %v8610_v39  ;;  %1848 = vst.msk [vmem:[#allocation2 + $0x58] sm:$0xff] %vm310_vm5, %v8181_v34  ;;  %8409 = vmatmul.mubr.msk.bf16.vlgmr.msra.gmra.mrb[128].mxu0 %vm228_vm1, %v7825_v30  ;;  %v6196_v24 = vshrl.u32 %v7819_v3, 16  ;;  %v6199_v62 = vshll.u32 %v7819_v3, 16 }
 0x164   : > { %v6174_v35 = vor.u32 %v6173_v29, %v6170_v9  ;;  %v6188_v23 = vor.u32 %v6187_v59, %v6184_v33  ;;  %v6205_v20 = vshll.u32 %v7820_v50, 16  ;;  %v8611_v22 = vld [vmem:[%s8799_s23 + $0x110] ss:$8 sps:$4 sm:$0xff]   ;;  %v9950_v36 = vpop.f32.mrb[36].mxu0  ;;  %v1466_v10 = vld [vmem:[#allocation2 + $0x8] sm:$0xff]  ;;  %8427 = vmatpush3.bf16.msra.mxu0 %v6627_v19  ;;  %1353 = vst.msk [vmem:[#allocation2 + $0x38] sm:$0xff] %vm310_vm5, %v1345_v14  ;;  %v1343_v50 = vadd.f32 %v1335_v41, %v9878_v13 }
 0x165   : > { %v6210_v26 = vshrl.u32 %v7821_v0, 16  ;;  %v6213_v4 = vshll.u32 %v7821_v0, 16  ;;  %v6219_v43 = vshll.u32 %v7822_v1, 16  ;;  %v1816_v49 = vpop.f32.mrb[35].mxu1  ;;  %v1474_v47 = vadd.f32 %v1466_v10, %v9843_v8  ;;  %v1713_v52 = vld [vmem:[#allocation2 + $0x10] sm:$0xff]  ;;  %v1711_v55 = vld [vmem:[#allocation2] sm:$0xff] }
 0x166   : > { %v6175_v11 = vrot.slane %v6174_v35, 4  ;;  %v6189_v5 = vrot.slane %v6188_v23, 4  ;;  %v6198_v48 = vrot.slane %v6196_v24, 4  ;;  %v6201_v51 = vrot.slane %v6199_v62, 5  ;;  %1846 = vst.msk [vmem:[#allocation2 + $0x48] sm:$0xff] %vm310_vm5, %v1816_v49  ;;  %v9955_v58 = vpop.f32.mrb[37].mxu0 }
 0x167   : > { %v6207_v45 = vrot.slane %v6205_v20, 5  ;;  %v6212_v27 = vrot.slane %v6210_v26, 4  ;;  %v6215_v2 = vrot.slane %v6213_v4, 5  ;;  %v1471_v57 = vld [vmem:[#allocation2 + $0x30] sm:$0xff]  ;;  %v1469_v8 = vld [vmem:[#allocation2 + $0x20] sm:$0xff]  ;;  %v9959_v15 = vpop.f32.mrb[38].mxu0  ;;  %v1721_v28 = vadd.f32 %v9894_v32, %v1713_v52 }
 0x168   : > { %v6180_v61 = vsel %vm8837_vm4, %v6175_v11, %v6179_v31  ;;  %1482 = vst.msk [vmem:[#allocation2 + $0x8] sm:$0xff] %vm310_vm5, %v1474_v47  ;;  %v6194_v16 = vsel %vm8837_vm4, %v6189_v5, %v6193_v44  ;;  %v6202_v42 = vor.u32 %v6201_v51, %v6198_v48  ;;  %v6221_v3 = vrot.slane %v6219_v43, 5  ;;  %v7849_v7 = vld [vmem:[%s8799_s23 + $0x98] sm:$0xf]  ;;  %v9966_v12 = vpop.f32.mrb[39].mxu0  ;;  %1351 = vst.msk [vmem:[#allocation2 + $0x28] sm:$0xff] %vm310_vm5, %v1343_v50 }
 0x169   : > { %v7826_v63 = vcombine.low %v6180_v61, %v6194_v16  ;;  %v6216_v38 = vor.u32 %v6215_v2, %v6212_v27  ;;  %v1479_v6 = vadd.f32 %v9853_v37, %v1471_v57  ;;  %v1477_v17 = vadd.f32 %v1469_v8, %v9880_v56  ;;  %v7850_v0 = vld [vmem:[%s8799_s23 + $0x9c] sm:$0x1]  ;;  %v7851_v1 = vld [vmem:[%s8799_s23 + $0xa0] sm:$0xf]  ;;  %8423 = vmatmul.mubr.msk.bf16.gmra.mrb[132].mxu1 %vm228_vm1, %v8611_v22  ;;  %v8184_v39 = vpop.f32.mrb[36].mxu1 }
 0x16a   : > { %v6203_v60 = vrot.slane %v6202_v42, 4  ;;  %v1719_v9 = vadd.f32 %v1711_v55, %v9907_v53  ;;  %v1714_v13 = vld [vmem:[#allocation2 + $0x18] sm:$0xff]  ;;  %v6872_v29 = vsel %vm241_vm0, %v9918_v54, 0  ;;  %v7852_v32 = vld [vmem:[%s8799_s23 + $0xa4] sm:$0x1]  ;;  %v6490_v53 = vshrl.u32 %v7849_v7, 16 }
 0x16b   : > { %8412 = vmatprep.mubr.msk.bf16.mxu0 %vm228_vm1, %v7826_v63  ;;  %v6217_v37 = vrot.slane %v6216_v38, 4  ;;  %1487 = vst.msk [vmem:[#allocation2 + $0x30] sm:$0xff] %vm310_vm5, %v1479_v6  ;;  %1485 = vst.msk [vmem:[#allocation2 + $0x20] sm:$0xff] %vm310_vm5, %v1477_v17  ;;  %v1722_v56 = vadd.f32 %v9913_v25, %v1714_v13  ;;  %8437 = vmatpush3.bf16.msra.mxu1 %v6872_v29  ;;  %v6493_v30 = vshll.u32 %v7849_v7, 16  ;;  %v1829_v54 = vpop.f32.mrb[37].mxu1  ;;  %v1472_v33 = vld [vmem:[#allocation2 + $0x38] sm:$0xff] }
 0x16c   : > { %1851 = vst.msk [vmem:[#allocation2 + $0x70] sm:$0xff] %vm310_vm5, %v8184_v39  ;;  %v6208_v31 = vsel %vm8837_vm4, %v6203_v60, %v6207_v45  ;;  %1729 = vst.msk [vmem:[#allocation2 + $0x10] sm:$0xff] %vm310_vm5, %v1721_v28  ;;  %v6499_v59 = vshll.u32 %v7850_v0, 16  ;;  %v6504_v34 = vshrl.u32 %v7851_v1, 16  ;;  %v6507_v25 = vshll.u32 %v7851_v1, 16  ;;  %v8185_v11 = vpop.f32.mrb[38].mxu1 }
 0x16d   : > { %1727 = vst.msk [vmem:[#allocation2] sm:$0xff] %vm310_vm5, %v1719_v9  ;;  %v7853_v35 = vld [vmem:[%s8799_s23 + $0xa8] sm:$0xf]  ;;  %1849 = vst.msk [vmem:[#allocation2 + $0x60] sm:$0xff] %vm310_vm5, %v1829_v54  ;;  %v6222_v44 = vsel %vm8837_vm4, %v6217_v37, %v6221_v3  ;;  %v1480_v19 = vadd.f32 %v9886_v18, %v1472_v33  ;;  %v6492_v14 = vrot.slane %v6490_v53, 4  ;;  %v6495_v41 = vrot.slane %v6493_v30, 5 }
 0x16e   : > { %1730 = vst.msk [vmem:[#allocation2 + $0x18] sm:$0xff] %vm310_vm5, %v1722_v56  ;;  %v7854_v23 = vld [vmem:[%s8799_s23 + $0xac] sm:$0x1]  ;;  %v7855_v24 = vld [vmem:[%s8799_s23 + $0xb0] sm:$0xf]  ;;  %v7827_v62 = vcombine.low %v6208_v31, %v6222_v44  ;;  %v6501_v20 = vrot.slane %v6499_v59, 5 }
 0x16f   : > { %v6506_v22 = vrot.slane %v6504_v34, 4  ;;  %v6509_v10 = vrot.slane %v6507_v25, 5  ;;  %1488 = vst.msk [vmem:[#allocation2 + $0x38] sm:$0xff] %vm310_vm5, %v1480_v19  ;;  %v1712_v26 = vld [vmem:[#allocation2 + $0x8] sm:$0xff]  ;;  %v6496_v4 = vor.u32 %v6495_v41, %v6492_v14  ;;  %v6513_v43 = vshll.u32 %v7852_v32, 16  ;;  %1852 = vst.msk [vmem:[#allocation2 + $0x78] sm:$0xff] %vm310_vm5, %v8185_v11 }
 0x170   : > { %v6518_v49 = vshrl.u32 %v7853_v35, 16  ;;  %v6521_v47 = vshll.u32 %v7853_v35, 16  ;;  %8413 = vmatmul.mubr.msk.bf16.gmra.mrb[132].mxu0 %vm228_vm1, %v7827_v62  ;;  %v1720_v18 = vadd.f32 %v1712_v26, %v9927_v40  ;;  %v7856_v48 = vld [vmem:[%s8799_s23 + $0xb4] sm:$0x1]  ;;  %v6527_v51 = vshll.u32 %v7854_v23, 16  ;;  %v1470_v55 = vld [vmem:[#allocation2 + $0x28] sm:$0xff] }
 0x171   : > { %v6510_v5 = vor.u32 %v6509_v10, %v6506_v22  ;;  %v6532_v52 = vshrl.u32 %v7855_v24, 16  ;;  %v6497_v61 = vrot.slane %v6496_v4, 4  ;;  %v6515_v45 = vrot.slane %v6513_v43, 5  ;;  %v1832_v57 = vpop.f32.mrb[39].mxu1  ;;  %v10004_v3 = vpop.f32.mrb[40].mxu0 }
 0x172   : > { %v6520_v27 = vrot.slane %v6518_v49, 4  ;;  %v6523_v2 = vrot.slane %v6521_v47, 5  ;;  %v1478_v8 = vadd.f32 %v1470_v55, %v9889_v21  ;;  %1728 = vst.msk [vmem:[#allocation2 + $0x8] sm:$0xff] %vm310_vm5, %v1720_v18  ;;  %v1717_v40 = vld [vmem:[#allocation2 + $0x30] sm:$0xff]  ;;  %1850 = vst.msk [vmem:[#allocation2 + $0x68] sm:$0xff] %vm310_vm5, %v1832_v57  ;;  %v6535_v63 = vshll.u32 %v7855_v24, 16 }
 0x173   : > { %v6511_v16 = vrot.slane %v6510_v5, 4  ;;  %v6534_v42 = vrot.slane %v6532_v52, 4  ;;  %v6502_v50 = vsel %vm8837_vm4, %v6497_v61, %v6501_v20  ;;  %v6541_v38 = vshll.u32 %v7856_v48, 16  ;;  %v1715_v6 = vld [vmem:[#allocation2 + $0x20] sm:$0xff]  ;;  %v7857_v21 = vld [vmem:[%s8799_s23 + $0xb8] sm:$0xf] }
 0x174   : > { %v6524_v7 = vor.u32 %v6523_v2, %v6520_v27  ;;  %1486 = vst.msk [vmem:[#allocation2 + $0x28] sm:$0xff] %vm310_vm5, %v1478_v8  ;;  %v1725_v0 = vadd.f32 %v9950_v36, %v1717_v40  ;;  %v7858_v1 = vld [vmem:[%s8799_s23 + $0xbc] sm:$0x1]  ;;  %v7859_v60 = vld [vmem:[%s8799_s23 + $0xc0] sm:$0xf]  ;;  %v6529_v13 = vrot.slane %v6527_v51, 5  ;;  %v1723_v56 = vadd.f32 %v1715_v6, %v9955_v58 }
 0x175   : > { %v6516_v17 = vsel %vm8837_vm4, %v6511_v16, %v6515_v45  ;;  %v6537_v29 = vrot.slane %v6535_v63, 5  ;;  %v7860_v39 = vld [vmem:[%s8799_s23 + $0xc4] sm:$0x1]  ;;  %v10016_v37 = vpop.f32.mrb[41].mxu0  ;;  %v6546_v53 = vshrl.u32 %v7857_v21, 16  ;;  %v6549_v30 = vshll.u32 %v7857_v21, 16 }
 0x176   : > { %v7866_v28 = vcombine.low %v6502_v50, %v6516_v17  ;;  %v6525_v9 = vrot.slane %v6524_v7, 4  ;;  %1733 = vst.msk [vmem:[#allocation2 + $0x30] sm:$0xff] %vm310_vm5, %v1725_v0  ;;  %v1718_v32 = vld [vmem:[#allocation2 + $0x38] sm:$0xff]  ;;  %v7861_v54 = vld [vmem:[%s8799_s23 + $0xc8] sm:$0xf]  ;;  %v6543_v31 = vrot.slane %v6541_v38, 5 }
 0x177   : > { %v6538_v36 = vor.u32 %v6537_v29, %v6534_v42  ;;  %v1726_v33 = vadd.f32 %v9959_v15, %v1718_v32  ;;  %v6555_v59 = vshll.u32 %v7858_v1, 16  ;;  %1731 = vst.msk [vmem:[#allocation2 + $0x20] sm:$0xff] %vm310_vm5, %v1723_v56  ;;  %v6548_v34 = vrot.slane %v6546_v53, 4  ;;  %v7862_v58 = vld [vmem:[%s8799_s23 + $0xcc] sm:$0x1]  ;;  %v10029_v62 = vpop.f32.mrb[42].mxu0 }
 0x178   : > { %8428 = vmatprep.mubr.msk.bf16.mxu0 %vm228_vm1, %v7866_v28  ;;  %v6551_v25 = vrot.slane %v6549_v30, 5  ;;  %v6560_v35 = vshrl.u32 %v7859_v60, 16  ;;  %v6563_v44 = vshll.u32 %v7859_v60, 16  ;;  %v6530_v19 = vsel %vm8837_vm4, %v6525_v9, %v6529_v13  ;;  %v7863_v23 = vld [vmem:[%s8799_s23 + $0xd0] sm:$0xf]  ;;  %v10034_v18 = vpop.f32.mrb[43].mxu0 }
 0x179   : > { %v6539_v14 = vrot.slane %v6538_v36, 4  ;;  %1734 = vst.msk [vmem:[#allocation2 + $0x38] sm:$0xff] %vm310_vm5, %v1726_v33  ;;  %v6569_v41 = vshll.u32 %v7860_v39, 16  ;;  %v6574_v24 = vshrl.u32 %v7861_v54, 16  ;;  %v6557_v20 = vrot.slane %v6555_v59, 5  ;;  %v10038_v61 = vpop.f32.mrb[40].mxu1 }
 0x17a   : > { %v6552_v15 = vor.u32 %v6551_v25, %v6548_v34  ;;  %v6562_v22 = vrot.slane %v6560_v35, 4  ;;  %v6565_v10 = vrot.slane %v6563_v44, 5  ;;  %v7864_v11 = vld [vmem:[%s8799_s23 + $0xd4] sm:$0x1]  ;;  %v6577_v47 = vshll.u32 %v7861_v54, 16  ;;  %v10040_v8 = vpop.f32.mrb[41].mxu1 }
 0x17b   : > { %v6544_v26 = vsel %vm8837_vm4, %v6539_v14, %v6543_v31  ;;  %v1716_v4 = vld [vmem:[#allocation2 + $0x28] sm:$0xff]  ;;  %v6571_v43 = vrot.slane %v6569_v41, 5  ;;  %v6576_v49 = vrot.slane %v6574_v24, 4  ;;  %v7874_v55 = vld [vmem:[%s8799_s23 + $0xe0] sm:$0xf]  ;;  %v6583_v27 = vshll.u32 %v7862_v58, 16 }
 0x17c   : > { %v7867_v5 = vcombine.low %v6530_v19, %v6544_v26  ;;  %v1724_v48 = vadd.f32 %v1716_v4, %v9966_v12  ;;  %v6553_v51 = vrot.slane %v6552_v15, 4  ;;  %v6566_v52 = vor.u32 %v6565_v10, %v6562_v22  ;;  %v7875_v40 = vld [vmem:[%s8799_s23 + $0xe4] sm:$0x1]  ;;  %v10047_v50 = vpop.f32.mrb[42].mxu1  ;;  %v7876_v21 = vld [vmem:[%s8799_s23 + $0xe8] sm:$0xf] }
 0x17d   : > { %v6579_v45 = vrot.slane %v6577_v47, 5  ;;  %v6588_v2 = vshrl.u32 %v7863_v23, 16  ;;  %v6591_v57 = vshll.u32 %v7863_v23, 16  ;;  %v6597_v42 = vshll.u32 %v7864_v11, 16  ;;  %v7877_v0 = vld [vmem:[%s8799_s23 + $0xec] sm:$0x1] }
 0x17e   : > { %8429 = vmatmul.mubr.msk.bf16.vlgmr.msra.gmra.mrb[136].mxu0 %vm228_vm1, %v7867_v5  ;;  %1732 = vst.msk [vmem:[#allocation2 + $0x28] sm:$0xff] %vm310_vm5, %v1724_v48  ;;  %v6558_v12 = vsel %vm8837_vm4, %v6553_v51, %v6557_v20  ;;  %v6567_v16 = vrot.slane %v6566_v52, 4  ;;  %v6585_v63 = vrot.slane %v6583_v27, 5  ;;  %v6735_v1 = vshrl.u32 %v7874_v55, 16  ;;  %v10053_v60 = vpop.f32.mrb[44].mxu0  ;;  %v2076_v39 = vld [vmem:[#allocation2 + $0x50] sm:$0xff] }
 0x17f   : > { %v6580_v7 = vor.u32 %v6579_v45, %v6576_v49  ;;  %v6590_v38 = vrot.slane %v6588_v2, 4  ;;  %v6593_v6 = vrot.slane %v6591_v57, 5  ;;  %v6599_v29 = vrot.slane %v6597_v42, 5  ;;  %v10055_v56 = vpop.f32.mrb[43].mxu1  ;;  %v10057_v32 = vpop.f32.mrb[45].mxu0  ;;  %v2074_v41 = vld [vmem:[#allocation2 + $0x40] sm:$0xff] }
 0x180   : > { %v6572_v17 = vsel %vm8837_vm4, %v6567_v16, %v6571_v43  ;;  %v6737_v53 = vrot.slane %v6735_v1, 4  ;;  %v6738_v30 = vshll.u32 %v7874_v55, 16  ;;  %v6744_v54 = vshll.u32 %v7875_v40, 16  ;;  %v7878_v31 = vld [vmem:[%s8799_s23 + $0xf0] sm:$0xf]  ;;  %v10066_v23 = vpop.f32.mrb[46].mxu0 }
 0x181   : > { %v7868_v28 = vcombine.low %v6558_v12, %v6572_v17  ;;  %v6581_v9 = vrot.slane %v6580_v7, 4  ;;  %v6594_v13 = vor.u32 %v6593_v6, %v6590_v38  ;;  %v6749_v36 = vshrl.u32 %v7876_v21, 16  ;;  %v7879_v35 = vld [vmem:[%s8799_s23 + $0xf4] sm:$0x1]  ;;  %v7880_v14 = vld [vmem:[%s8799_s23 + $0xf8] sm:$0xf] }
 0x182   : > { %v6752_v34 = vshll.u32 %v7876_v21, 16  ;;  %v6758_v25 = vshll.u32 %v7877_v0, 16  ;;  %v6740_v44 = vrot.slane %v6738_v30, 5  ;;  %v2084_v19 = vadd.f32 %v10004_v3, %v2076_v39  ;;  %v7881_v22 = vld [vmem:[%s8799_s23 + $0xfc] sm:$0x1]  ;;  %v10071_v11 = vpop.f32.mrb[47].mxu0 }
 0x183   : > { %8432 = vmatprep.mubr.msk.bf16.mxu0 %vm228_vm1, %v7868_v28  ;;  %v6586_v33 = vsel %vm8837_vm4, %v6581_v9, %v6585_v63  ;;  %v6595_v59 = vrot.slane %v6594_v13, 4  ;;  %v6751_v58 = vrot.slane %v6749_v36, 4  ;;  %v6746_v15 = vrot.slane %v6744_v54, 5  ;;  %v7882_v3 = vld [vmem:[%s8799_s23 + $0x100] sm:$0xf]  ;;  %v10075_v47 = vpop.f32.mrb[44].mxu1 }
 0x184   : > { %v6754_v20 = vrot.slane %v6752_v34, 5  ;;  %v6763_v10 = vshrl.u32 %v7878_v31, 16  ;;  %v6741_v4 = vor.u32 %v6740_v44, %v6737_v53  ;;  %v6760_v43 = vrot.slane %v6758_v25, 5  ;;  %2092 = vst.msk [vmem:[#allocation2 + $0x50] sm:$0xff] %vm310_vm5, %v2084_v19  ;;  %v10077_v5 = vpop.f32.mrb[48].mxu0  ;;  %v10079_v45 = vpop.f32.mrb[45].mxu1 }
 0x185   : > { %v6600_v24 = vsel %vm8837_vm4, %v6595_v59, %v6599_v29  ;;  %v6766_v49 = vshll.u32 %v7878_v31, 16  ;;  %v6772_v52 = vshll.u32 %v7879_v35, 16  ;;  %v6777_v55 = vshrl.u32 %v7880_v14, 16  ;;  %v10081_v27 = vpop.f32.mrb[49].mxu0  ;;  %v2077_v42 = vld [vmem:[#allocation2 + $0x58] sm:$0xff]  ;;  %v10085_v7 = vpop.f32.mrb[46].mxu1 }
 0x186   : > { %v7869_v26 = vcombine.low %v6586_v33, %v6600_v24  ;;  %v6755_v48 = vor.u32 %v6754_v20, %v6751_v58  ;;  %v6765_v51 = vrot.slane %v6763_v10, 4  ;;  %v6742_v2 = vrot.slane %v6741_v4, 4  ;;  %v7883_v40 = vld [vmem:[%s8799_s23 + $0x104] sm:$0x1]  ;;  %v10087_v63 = vpop.f32.mrb[50].mxu0  ;;  %v2075_v0 = vld [vmem:[#allocation2 + $0x48] sm:$0xff] }
 0x187   : > { %v6768_v57 = vrot.slane %v6766_v49, 5  ;;  %v6780_v12 = vshll.u32 %v7880_v14, 16  ;;  %v6786_v16 = vshll.u32 %v7881_v22, 16  ;;  %v6774_v6 = vrot.slane %v6772_v52, 5  ;;  %v10090_v1 = vpop.f32.mrb[47].mxu1  ;;  %v10092_v28 = vpop.f32.mrb[51].mxu0 }
 0x188   : > { %8433 = vmatmul.mubr.msk.bf16.gmra.mrb[140].mxu0 %vm228_vm1, %v7869_v26  ;;  %v6756_v38 = vrot.slane %v6755_v48, 4  ;;  %v6779_v21 = vrot.slane %v6777_v55, 4  ;;  %v2082_v17 = vadd.f32 %v2074_v41, %v10016_v37  ;;  %v6747_v9 = vsel %vm8837_vm4, %v6742_v2, %v6746_v15  ;;  %v7884_v53 = vld [vmem:[%s8799_s23 + $0x108] sm:$0xf]  ;;  %v10097_v30 = vpop.f32.mrb[48].mxu1  ;;  %v10099_v54 = vpop.f32.mrb[52].mxu0 }
 0x189   : > { %v6769_v13 = vor.u32 %v6768_v57, %v6765_v51  ;;  %v6782_v29 = vrot.slane %v6780_v12, 5  ;;  %v6788_v39 = vrot.slane %v6786_v16, 5  ;;  %v2085_v36 = vadd.f32 %v10029_v62, %v2077_v42  ;;  %v7885_v33 = vld [vmem:[%s8799_s23 + $0x10c] sm:$0x1]  ;;  %v2080_v34 = vld [vmem:[#allocation2 + $0x70] sm:$0xff]  ;;  %v10107_v25 = vpop.f32.mrb[49].mxu1 }
 0x18a   : > { %v6761_v37 = vsel %vm8837_vm4, %v6756_v38, %v6760_v43  ;;  %2090 = vst.msk [vmem:[#allocation2 + $0x40] sm:$0xff] %vm310_vm5, %v2082_v17  ;;  %v2083_v31 = vadd.f32 %v2075_v0, %v10034_v18  ;;  %v6791_v59 = vshrl.u32 %v7882_v3, 16  ;;  %v10109_v35 = vpop.f32.mrb[53].mxu0  ;;  %v6794_v14 = vshll.u32 %v7882_v3, 16  ;;  %v7886_v41 = vld [vmem:[%s8799_s23 + $0x110] sm:$0xf] }
 0x18b   : > { %v7891_v44 = vcombine.low %v6747_v9, %v6761_v37  ;;  %v6770_v58 = vrot.slane %v6769_v13, 4  ;;  %v6783_v19 = vor.u32 %v6782_v29, %v6779_v21  ;;  %v10112_v24 = vpop.f32.mrb[50].mxu1  ;;  %v10114_v15 = vpop.f32.mrb[54].mxu0  ;;  %2093 = vst.msk [vmem:[#allocation2 + $0x58] sm:$0xff] %vm310_vm5, %v2085_v36  ;;  %v2321_v62 = vld [vmem:[#allocation2 + $0x50] sm:$0xff]  ;;  %v6800_v20 = vshll.u32 %v7883_v40, 16 }
 0x18c   : > { %2091 = vst.msk [vmem:[#allocation2 + $0x48] sm:$0xff] %vm310_vm5, %v2083_v31  ;;  %v6793_v18 = vrot.slane %v6791_v59, 4  ;;  %v6805_v22 = vshrl.u32 %v7884_v53, 16  ;;  %v6808_v10 = vshll.u32 %v7884_v53, 16  ;;  %v7887_v26 = vld [vmem:[%s8799_s23 + $0x114] sm:$0x1]  ;;  %v2329_v3 = vadd.f32 %v10038_v61, %v2321_v62 }
 0x18d   : > { %v10119_v4 = vpop.f32.mrb[51].mxu1  ;;  %8438 = vmatprep.mubr.msk.bf16.mxu1 %vm228_vm1, %v7891_v44  ;;  %v6775_v43 = vsel %vm8837_vm4, %v6770_v58, %v6774_v6  ;;  %v6784_v49 = vrot.slane %v6783_v19, 4  ;;  %v6796_v48 = vrot.slane %v6794_v14, 5  ;;  %v7888_v51 = vld [vmem:[%s8799_s23 + $0x118] sm:$0xf]  ;;  %v10126_v52 = vpop.f32.mrb[55].mxu0  ;;  %v2088_v6 = vadd.f32 %v10053_v60, %v2080_v34 }
 0x18e   : > { %v10128_v55 = vpop.f32.mrb[52].mxu1  ;;  %v6802_v2 = vrot.slane %v6800_v20, 5  ;;  %v6807_v57 = vrot.slane %v6805_v22, 4  ;;  %v6810_v12 = vrot.slane %v6808_v10, 5  ;;  %v6814_v16 = vshll.u32 %v7885_v33, 16  ;;  %v10132_v40 = vpop.f32.mrb[56].mxu0 }
 0x18f   : > { %v10130_v42 = vpop.f32.mrb[53].mxu1  ;;  %v6789_v38 = vsel %vm8837_vm4, %v6784_v49, %v6788_v39  ;;  %2337 = vst.msk [vmem:[#allocation2 + $0x50] sm:$0xff] %vm310_vm5, %v2329_v3  ;;  %v6797_v61 = vor.u32 %v6796_v48, %v6793_v18  ;;  %v6819_v21 = vshrl.u32 %v7886_v41, 16  ;;  %v10140_v0 = vpop.f32.mrb[57].mxu0  ;;  %v7889_v53 = vld [vmem:[%s8799_s23 + $0x11c] sm:$0x1] }
 0x190   : > { %v10138_v17 = vpop.f32.mrb[54].mxu1  ;;  %v7892_v9 = vcombine.low %v6775_v43, %v6789_v38  ;;  %v6811_v13 = vor.u32 %v6810_v12, %v6807_v57  ;;  %v6816_v29 = vrot.slane %v6814_v16, 5  ;;  %v6822_v37 = vshll.u32 %v7886_v41, 16  ;;  %v10145_v31 = vpop.f32.mrb[58].mxu0  ;;  %2096 = vst.msk [vmem:[#allocation2 + $0x70] sm:$0xff] %vm310_vm5, %v2088_v6  ;;  %v2078_v62 = vld [vmem:[#allocation2 + $0x60] sm:$0xff] }
 0x191   : > { %v10143_v36 = vpop.f32.mrb[55].mxu1  ;;  %v2319_v39 = vld [vmem:[#allocation2 + $0x40] sm:$0xff]  ;;  %v6798_v33 = vrot.slane %v6797_v61, 4  ;;  %v6821_v59 = vrot.slane %v6819_v21, 4  ;;  %v6828_v60 = vshll.u32 %v7887_v26, 16  ;;  %v6833_v34 = vshrl.u32 %v7888_v51, 16 }
 0x192   : > { %v10148_v44 = vpop.f32.mrb[59].mxu0  ;;  %8439 = vmatmul.mubr.msk.bf16.vlgmr.msra.gmra.mrb[136].mxu1 %vm228_vm1, %v7892_v9  ;;  %v2327_v58 = vadd.f32 %v2319_v39, %v10040_v8  ;;  %v6812_v19 = vrot.slane %v6811_v13, 4  ;;  %v6824_v14 = vrot.slane %v6822_v37, 5  ;;  %v6836_v41 = vshll.u32 %v7888_v51, 16  ;;  %v10152_v18 = vpop.f32.mrb[56].mxu1  ;;  %v2322_v22 = vld [vmem:[#allocation2 + $0x58] sm:$0xff] }
 0x193   : > { %v10154_v20 = vpop.f32.mrb[60].mxu0  ;;  %v6803_v10 = vsel %vm8837_vm4, %v6798_v33, %v6802_v2  ;;  %v2320_v26 = vld [vmem:[#allocation2 + $0x48] sm:$0xff]  ;;  %v6835_v43 = vrot.slane %v6833_v34, 4  ;;  %v6842_v49 = vshll.u32 %v7889_v53, 16  ;;  %v10158_v3 = vpop.f32.mrb[57].mxu1  ;;  %v2330_v8 = vadd.f32 %v10047_v50, %v2322_v22  ;;  %v2081_v21 = vld [vmem:[#allocation2 + $0x78] sm:$0xff] }
 0x194   : > { %2335 = vst.msk [vmem:[#allocation2 + $0x40] sm:$0xff] %vm310_vm5, %v2327_v58  ;;  %v6817_v48 = vsel %vm8837_vm4, %v6812_v19, %v6816_v29  ;;  %v2328_v51 = vadd.f32 %v2320_v26, %v10055_v56  ;;  %v6825_v57 = vor.u32 %v6824_v14, %v6821_v59  ;;  %v10165_v12 = vpop.f32.mrb[58].mxu1  ;;  %v10167_v16 = vpop.f32.mrb[61].mxu0  ;;  %v6830_v38 = vrot.slane %v6828_v60, 5  ;;  %v2079_v9 = vld [vmem:[#allocation2 + $0x68] sm:$0xff]  ;;  %s185_s23 = sand.u32 1, %s8674_s13  }
 0x195   : > { %v7893_v2 = vcombine.low %v6803_v10, %v6817_v48  ;;  %v6838_v61 = vrot.slane %v6836_v41, 5  ;;  %v2086_v6 = vadd.f32 %v2078_v62, %v10057_v32  ;;  %v10170_v13 = vpop.f32.mrb[59].mxu1  ;;  %v10172_v50 = vpop.f32.mrb[62].mxu0  ;;  %2338 = vst.msk [vmem:[#allocation2 + $0x58] sm:$0xff] %vm310_vm5, %v2330_v8  ;;  %v2089_v29 = vadd.f32 %v10066_v23, %v2081_v21  ;;  %s10507_s19 = sshll.u32 %s185_s23, 6  ;;  %s10569_s15 = scalar_lea.sflag [#allocation4], %s185_s23 }
 0x196   : > { %2336 = vst.msk [vmem:[#allocation2 + $0x48] sm:$0xff] %vm310_vm5, %v2328_v51  ;;  %v6826_v56 = vrot.slane %v6825_v57, 4  ;;  %v2087_v53 = vadd.f32 %v2079_v9, %v10071_v11  ;;  %v2454_v37 = vld [vmem:[#allocation2 + $0x50] sm:$0xff]  ;;  %v10178_v39 = vpop.f32.mrb[63].mxu0  ;;  %v10180_v33 = vpop.f32.mrb[60].mxu1  ;;  %v6844_v59 = vrot.slane %v6842_v49, 5 }
 0x197   : > { %8442 = vmatprep.mubr.msk.bf16.mxu1 %vm228_vm1, %v7893_v2  ;;  %v6839_v32 = vor.u32 %v6838_v61, %v6835_v43  ;;  %2094 = vst.msk [vmem:[#allocation2 + $0x60] sm:$0xff] %vm310_vm5, %v2086_v6  ;;  %v2462_v60 = vadd.f32 %v10077_v5, %v2454_v37  ;;  %v10185_v34 = vpop.f32.mrb[61].mxu1  ;;  %v10187_v58 = vpop.f32.mrb[64].mxu0  ;;  %2097 = vst.msk [vmem:[#allocation2 + $0x78] sm:$0xff] %vm310_vm5, %v2089_v29  ;;  %v2325_v23 = vld [vmem:[#allocation2 + $0x70] sm:$0xff]  ;;  %s10522_s21 = scalar_lea.vmem [#allocation3], %s10507_s19 }
 0x198   : > { %2095 = vst.msk [vmem:[#allocation2 + $0x68] sm:$0xff] %vm310_vm5, %v2087_v53  ;;  %v10191_v11 = vpop.f32.mrb[62].mxu1  ;;  %v10193_v19 = vpop.f32.mrb[65].mxu0  ;;  %v6831_v14 = vsel %vm8837_vm4, %v6826_v56, %v6830_v38  ;;  %v2333_v62 = vadd.f32 %v10075_v47, %v2325_v23  ;;  %s7098_s27 = sshll.u32 %s10522_s21, 4  ;;  %s10559_s27 = int_to_ptr.vmem [resolvable:$true] %s7098_s27 }
 0x199   : > { %v6840_v41 = vrot.slane %v6839_v32, 4  ;;  %2470 = vst.msk [vmem:[#allocation2 + $0x50] sm:$0xff] %vm310_vm5, %v2462_v60  ;;  %v10199_v5 = vpop.f32.mrb[63].mxu1  ;;  %v10201_v22 = vpop.f32.mrb[66].mxu0  ;;  %s8612_s4 = scalar_lea.vmem %s10559_s27, 1024  ;;  %p8619_p1 = scmp.lt.s32.totalorder %s10559_s27, %s8617_s6 }
 0x19a   : > { %v10203_v10 = vpop.f32.mrb[67].mxu0  ;;  %v10205_v26 = vpop.f32.mrb[64].mxu1  ;;  %2341 = vst.msk [vmem:[#allocation2 + $0x70] sm:$0xff] %vm310_vm5, %v2333_v62  ;;  %p8613_p12 = scmp.ne.s32.totalorder %s10559_s27, %s8612_s4  ;;  %p8620_p2 = scmp.lt.s32.totalorder %s8618_s7, %s8612_s4 }
 0x19b   : > { %v6845_v43 = vsel %vm8837_vm4, %v6840_v41, %v6844_v59  ;;  %v2452_v49 = vld [vmem:[#allocation2 + $0x40] sm:$0xff]  ;;  %v10210_v8 = vpop.f32.mrb[65].mxu1 }
 0x19c   : > { %v7894_v47 = vcombine.low %v6831_v14, %v6845_v43  ;;  %v2460_v51 = vadd.f32 %v2452_v49, %v10081_v27  ;;  %v10215_v57 = vpop.f32.mrb[66].mxu1  ;;  %v2455_v38 = vld [vmem:[#allocation2 + $0x58] sm:$0xff]  ;;  %p8614_p13 = pnand %p8613_p12, %p8755_p4  ;;  %p8621_p3 = por %p8620_p2, %p8619_p1 }
 0x19d   : > { %v2453_v61 = vld [vmem:[#allocation2 + $0x48] sm:$0xff]  ;;  %v10219_v6 = vpop.f32.mrb[67].mxu1  ;;  %v2463_v9 = vadd.f32 %v10087_v63, %v2455_v38 }
 0x19e   : > { %v10212_v48 = vpop.f32.mrb[68].mxu0  ;;  %8443 = vmatmul.mubr.msk.bf16.gmra.mrb[140].mxu1 %vm228_vm1, %v7894_v47  ;;  %v2323_v21 = vld [vmem:[#allocation2 + $0x60] sm:$0xff]  ;;  %2468 = vst.msk [vmem:[#allocation2 + $0x40] sm:$0xff] %vm310_vm5, %v2460_v51  ;;  %v2461_v56 = vadd.f32 %v2453_v61, %v10092_v28  ;;  %v2326_v53 = vld [vmem:[#allocation2 + $0x78] sm:$0xff]  ;;  %p8615_p0 = pneg %p8614_p13 }
 0x19f   : > { %v10217_v2 = vpop.f32.mrb[69].mxu0  ;;  %v2331_v29 = vadd.f32 %v2323_v21, %v10079_v45  ;;  %v2324_v37 = vld [vmem:[#allocation2 + $0x68] sm:$0xff]  ;;  %v2334_v59 = vadd.f32 %v10085_v7, %v2326_v53  ;;  %2471 = vst.msk [vmem:[#allocation2 + $0x58] sm:$0xff] %vm310_vm5, %v2463_v9 }
 0x1a0   : > { %v10221_v46 = vpop.f32.mrb[70].mxu0  ;;  %v2332_v60 = vadd.f32 %v2324_v37, %v10090_v1  ;;  %2469 = vst.msk [vmem:[#allocation2 + $0x48] sm:$0xff] %vm310_vm5, %v2461_v56  ;;  %v2699_v23 = vld [vmem:[#allocation2 + $0x50] sm:$0xff]  ;;  %p8622_p5 = pnand %p8621_p3, %p8615_p0 }
 0x1a1   : > { %v10227_v27 = vpop.f32.mrb[71].mxu0  ;;  %2339 = vst.msk [vmem:[#allocation2 + $0x60] sm:$0xff] %vm310_vm5, %v2331_v29  ;;  %v2707_v45 = vadd.f32 %v10097_v30, %v2699_v23  ;;  %2342 = vst.msk [vmem:[#allocation2 + $0x78] sm:$0xff] %vm310_vm5, %v2334_v59  ;;  %v2458_v1 = vld [vmem:[#allocation2 + $0x70] sm:$0xff] }
 0x1a2   : > { %2340 = vst.msk [vmem:[#allocation2 + $0x68] sm:$0xff] %vm310_vm5, %v2332_v60  ;;  %v2466_v43 = vadd.f32 %v10099_v54, %v2458_v1 }
 0x1a3   : > { %2715 = vst.msk [vmem:[#allocation2 + $0x50] sm:$0xff] %vm310_vm5, %v2707_v45 }
 0x1a4   : > { %2474 = vst.msk [vmem:[#allocation2 + $0x70] sm:$0xff] %vm310_vm5, %v2466_v43 }
 0x1a5   : > { %v2697_v49 = vld [vmem:[#allocation2 + $0x40] sm:$0xff] }
 0x1a6   : > { %v8270_v32 = vpop.f32.mrb[72].mxu0  ;;  %v2705_v47 = vadd.f32 %v2697_v49, %v10107_v25  ;;  %v2700_v38 = vld [vmem:[#allocation2 + $0x58] sm:$0xff] }
 0x1a7   : > { %3701 = vst.msk [vmem:[#allocation2 + $0x90] sm:$0xff] %vm310_vm5, %v8270_v32  ;;  %v3667_v63 = vpop.f32.mrb[73].mxu0  ;;  %v2698_v61 = vld [vmem:[#allocation2 + $0x48] sm:$0xff]  ;;  %v2708_v54 = vadd.f32 %v10112_v24, %v2700_v38 }
 0x1a8   : > { %v10234_v14 = vpop.f32.mrb[68].mxu1  ;;  %3699 = vst.msk [vmem:[#allocation2 + $0x80] sm:$0xff] %vm310_vm5, %v3667_v63  ;;  %v8271_v7 = vpop.f32.mrb[74].mxu0  ;;  %2713 = vst.msk [vmem:[#allocation2 + $0x40] sm:$0xff] %vm310_vm5, %v2705_v47  ;;  %v2706_v56 = vadd.f32 %v2698_v61, %v10119_v4  ;;  %v2456_v29 = vld [vmem:[#allocation2 + $0x60] sm:$0xff]  ;;  %v2459_v59 = vld [vmem:[#allocation2 + $0x78] sm:$0xff] }
 0x1a9   : > { %v10239_v28 = vpop.f32.mrb[69].mxu1  ;;  %3702 = vst.msk [vmem:[#allocation2 + $0x98] sm:$0xff] %vm310_vm5, %v8271_v7  ;;  %v3670_v62 = vpop.f32.mrb[75].mxu0  ;;  %v2464_v25 = vadd.f32 %v2456_v29, %v10109_v35  ;;  %v2457_v60 = vld [vmem:[#allocation2 + $0x68] sm:$0xff]  ;;  %2716 = vst.msk [vmem:[#allocation2 + $0x58] sm:$0xff] %vm310_vm5, %v2708_v54  ;;  %v2467_v24 = vadd.f32 %v10114_v15, %v2459_v59 }
 0x1aa   : > { %v10244_v41 = vpop.f32.mrb[70].mxu1  ;;  %3700 = vst.msk [vmem:[#allocation2 + $0x88] sm:$0xff] %vm310_vm5, %v3670_v62  ;;  %2714 = vst.msk [vmem:[#allocation2 + $0x48] sm:$0xff] %vm310_vm5, %v2706_v56  ;;  %v2465_v4 = vadd.f32 %v2457_v60, %v10126_v52  ;;  %v2944_v1 = vld [vmem:[#allocation2 + $0x50] sm:$0xff] }
 0x1ab   : > { %v10249_v30 = vpop.f32.mrb[71].mxu1  ;;  %2472 = vst.msk [vmem:[#allocation2 + $0x60] sm:$0xff] %vm310_vm5, %v2464_v25  ;;  %v2952_v49 = vadd.f32 %v10132_v40, %v2944_v1  ;;  %2475 = vst.msk [vmem:[#allocation2 + $0x78] sm:$0xff] %vm310_vm5, %v2467_v24  ;;  %v2703_v15 = vld [vmem:[#allocation2 + $0x70] sm:$0xff] }
 0x1ac   : > { %2473 = vst.msk [vmem:[#allocation2 + $0x68] sm:$0xff] %vm310_vm5, %v2465_v4  ;;  %v2711_v38 = vadd.f32 %v10128_v55, %v2703_v15 }
 0x1ad   : > { %2960 = vst.msk [vmem:[#allocation2 + $0x50] sm:$0xff] %vm310_vm5, %v2952_v49 }
 0x1ae   : > { %v8274_v51 = vpop.f32.mrb[76].mxu0  ;;  %v3818_v21 = vld [vmem:[#allocation2 + $0x90] sm:$0xff]  ;;  %2719 = vst.msk [vmem:[#allocation2 + $0x70] sm:$0xff] %vm310_vm5, %v2711_v38 }
 0x1af   : > { %3705 = vst.msk [vmem:[#allocation2 + $0xb0] sm:$0xff] %vm310_vm5, %v8274_v51  ;;  %v3683_v9 = vpop.f32.mrb[77].mxu0  ;;  %v3816_v37 = vld [vmem:[#allocation2 + $0x80] sm:$0xff] }
 0x1b0   : > { %v8280_v53 = vpop.f32.mrb[72].mxu1  ;;  %3703 = vst.msk [vmem:[#allocation2 + $0xa0] sm:$0xff] %vm310_vm5, %v3683_v9  ;;  %v8275_v32 = vpop.f32.mrb[78].mxu0  ;;  %v3819_v45 = vld [vmem:[#allocation2 + $0x98] sm:$0xff] }
 0x1b1   : > { %v3826_v23 = vadd.f32 %v8280_v53, %v3818_v21  ;;  %v3785_v63 = vpop.f32.mrb[73].mxu1  ;;  %3706 = vst.msk [vmem:[#allocation2 + $0xb8] sm:$0xff] %vm310_vm5, %v8275_v32  ;;  %v3686_v7 = vpop.f32.mrb[79].mxu0  ;;  %v3817_v35 = vld [vmem:[#allocation2 + $0x88] sm:$0xff]  ;;  %v2942_v21 = vld [vmem:[#allocation2 + $0x40] sm:$0xff]  ;;  %v2945_v32 = vld [vmem:[#allocation2 + $0x58] sm:$0xff] }
 0x1b2   : > { %v3824_v62 = vadd.f32 %v3816_v37, %v3785_v63  ;;  %v8281_v43 = vpop.f32.mrb[74].mxu1  ;;  %3704 = vst.msk [vmem:[#allocation2 + $0xa8] sm:$0xff] %vm310_vm5, %v3686_v7  ;;  %v2950_v56 = vadd.f32 %v2942_v21, %v10140_v0  ;;  %v2943_v55 = vld [vmem:[#allocation2 + $0x48] sm:$0xff]  ;;  %v2701_v63 = vld [vmem:[#allocation2 + $0x60] sm:$0xff] }
 0x1b3   : > { %3834 = vst.msk [vmem:[#allocation2 + $0x90] sm:$0xff] %vm310_vm5, %v3826_v23  ;;  %v3827_v47 = vadd.f32 %v8281_v43, %v3819_v45  ;;  %v3788_v51 = vpop.f32.mrb[75].mxu1  ;;  %v2953_v45 = vadd.f32 %v10145_v31, %v2945_v32  ;;  %v2951_v7 = vadd.f32 %v2943_v55, %v10148_v44  ;;  %v2709_v0 = vadd.f32 %v2701_v63, %v10130_v42  ;;  %v2702_v43 = vld [vmem:[#allocation2 + $0x68] sm:$0xff] }
 0x1b4   : > { %3832 = vst.msk [vmem:[#allocation2 + $0x80] sm:$0xff] %vm310_vm5, %v3824_v62  ;;  %v3825_v52 = vadd.f32 %v3817_v35, %v3788_v51  ;;  %2958 = vst.msk [vmem:[#allocation2 + $0x40] sm:$0xff] %vm310_vm5, %v2950_v56  ;;  %v2704_v62 = vld [vmem:[#allocation2 + $0x78] sm:$0xff]  ;;  %v3077_v31 = vld [vmem:[#allocation2 + $0x50] sm:$0xff] }
 0x1b5   : > { %3835 = vst.msk [vmem:[#allocation2 + $0x98] sm:$0xff] %vm310_vm5, %v3827_v47  ;;  %v2712_v15 = vadd.f32 %v10138_v17, %v2704_v62  ;;  %2961 = vst.msk [vmem:[#allocation2 + $0x58] sm:$0xff] %vm310_vm5, %v2953_v45 }
 0x1b6   : > { %3833 = vst.msk [vmem:[#allocation2 + $0x88] sm:$0xff] %vm310_vm5, %v3825_v52  ;;  %v3822_v40 = vld [vmem:[#allocation2 + $0xb0] sm:$0xff]  ;;  %v8290_v61 = vpop.f32.mrb[80].mxu0  ;;  %v2710_v52 = vadd.f32 %v2702_v43, %v10143_v36  ;;  %2959 = vst.msk [vmem:[#allocation2 + $0x48] sm:$0xff] %vm310_vm5, %v2951_v7 }
 0x1b7   : > { %v3820_v9 = vld [vmem:[#allocation2 + $0xa0] sm:$0xff]  ;;  %v4030_v54 = vpop.f32.mrb[81].mxu0  ;;  %2717 = vst.msk [vmem:[#allocation2 + $0x60] sm:$0xff] %vm310_vm5, %v2709_v0  ;;  %2720 = vst.msk [vmem:[#allocation2 + $0x78] sm:$0xff] %vm310_vm5, %v2712_v15 }
 0x1b8   : > { %v8284_v29 = vpop.f32.mrb[76].mxu1  ;;  %v3823_v53 = vld [vmem:[#allocation2 + $0xb8] sm:$0xff]  ;;  %v8291_v37 = vpop.f32.mrb[82].mxu0  ;;  %2718 = vst.msk [vmem:[#allocation2 + $0x68] sm:$0xff] %vm310_vm5, %v2710_v52 }
 0x1b9   : > { %v3830_v25 = vadd.f32 %v8284_v29, %v3822_v40  ;;  %v3801_v59 = vpop.f32.mrb[77].mxu1  ;;  %v3821_v60 = vld [vmem:[#allocation2 + $0xa8] sm:$0xff]  ;;  %v4033_v23 = vpop.f32.mrb[83].mxu0  ;;  %v3085_v40 = vadd.f32 %v10152_v18, %v3077_v31 }
 0x1ba   : > { %v3828_v24 = vadd.f32 %v3820_v9, %v3801_v59  ;;  %v8285_v4 = vpop.f32.mrb[78].mxu1  ;;  %v4063_v1 = vld [vmem:[#allocation2 + $0x90] sm:$0xff] }
 0x1bb   : > { %3838 = vst.msk [vmem:[#allocation2 + $0xb0] sm:$0xff] %vm310_vm5, %v3830_v25  ;;  %v3831_v35 = vadd.f32 %v8285_v4, %v3823_v53  ;;  %v3804_v49 = vpop.f32.mrb[79].mxu1  ;;  %v4071_v47 = vadd.f32 %v8290_v61, %v4063_v1  ;;  %v4061_v51 = vld [vmem:[#allocation2 + $0x80] sm:$0xff]  ;;  %v2948_v61 = vld [vmem:[#allocation2 + $0x70] sm:$0xff]  ;;  %3093 = vst.msk [vmem:[#allocation2 + $0x50] sm:$0xff] %vm310_vm5, %v3085_v40 }
 0x1bc   : > { %3836 = vst.msk [vmem:[#allocation2 + $0xa0] sm:$0xff] %vm310_vm5, %v3828_v24  ;;  %v3829_v42 = vadd.f32 %v3821_v60, %v3804_v49  ;;  %v4069_v44 = vadd.f32 %v4061_v51, %v4030_v54  ;;  %v4064_v38 = vld [vmem:[#allocation2 + $0x98] sm:$0xff]  ;;  %v2956_v18 = vadd.f32 %v10154_v20, %v2948_v61  ;;  %v3075_v53 = vld [vmem:[#allocation2 + $0x40] sm:$0xff] }
 0x1bd   : > { %3839 = vst.msk [vmem:[#allocation2 + $0xb8] sm:$0xff] %vm310_vm5, %v3831_v35  ;;  %4079 = vst.msk [vmem:[#allocation2 + $0x90] sm:$0xff] %vm310_vm5, %v4071_v47  ;;  %v4072_v17 = vadd.f32 %v8291_v37, %v4064_v38  ;;  %v4062_v36 = vld [vmem:[#allocation2 + $0x88] sm:$0xff]  ;;  %v3083_v55 = vadd.f32 %v3075_v53, %v10158_v3  ;;  %v3078_v60 = vld [vmem:[#allocation2 + $0x58] sm:$0xff] }
 0x1be   : > { %3837 = vst.msk [vmem:[#allocation2 + $0xa8] sm:$0xff] %vm310_vm5, %v3829_v42  ;;  %4077 = vst.msk [vmem:[#allocation2 + $0x80] sm:$0xff] %vm310_vm5, %v4069_v44  ;;  %v4070_v21 = vadd.f32 %v4062_v36, %v4033_v23  ;;  %v8294_v9 = vpop.f32.mrb[84].mxu0  ;;  %v3076_v23 = vld [vmem:[#allocation2 + $0x48] sm:$0xff]  ;;  %v3086_v7 = vadd.f32 %v10165_v12, %v3078_v60  ;;  %v2946_v4 = vld [vmem:[#allocation2 + $0x60] sm:$0xff] }
 0x1bf   : > { %4080 = vst.msk [vmem:[#allocation2 + $0x98] sm:$0xff] %vm310_vm5, %v4072_v17  ;;  %v4046_v54 = vpop.f32.mrb[85].mxu0  ;;  %2964 = vst.msk [vmem:[#allocation2 + $0x70] sm:$0xff] %vm310_vm5, %v2956_v18  ;;  %v3084_v24 = vadd.f32 %v3076_v23, %v10170_v13  ;;  %v2954_v43 = vadd.f32 %v2946_v4, %v10167_v16  ;;  %v2949_v3 = vld [vmem:[#allocation2 + $0x78] sm:$0xff]  ;;  %v2947_v35 = vld [vmem:[#allocation2 + $0x68] sm:$0xff] }
 0x1c0   : > { %4078 = vst.msk [vmem:[#allocation2 + $0x88] sm:$0xff] %vm310_vm5, %v4070_v21  ;;  %v8300_v56 = vpop.f32.mrb[80].mxu1  ;;  %v8295_v29 = vpop.f32.mrb[86].mxu0  ;;  %3091 = vst.msk [vmem:[#allocation2 + $0x40] sm:$0xff] %vm310_vm5, %v3083_v55  ;;  %v2957_v12 = vadd.f32 %v10172_v50, %v2949_v3  ;;  %v2955_v13 = vadd.f32 %v2947_v35, %v10178_v39 }
 0x1c1   : > { %v4163_v37 = vpop.f32.mrb[81].mxu1  ;;  %v4049_v32 = vpop.f32.mrb[87].mxu0  ;;  %3094 = vst.msk [vmem:[#allocation2 + $0x58] sm:$0xff] %vm310_vm5, %v3086_v7  ;;  %3092 = vst.msk [vmem:[#allocation2 + $0x48] sm:$0xff] %vm310_vm5, %v3084_v24 }
 0x1c2   : > { %v8301_v25 = vpop.f32.mrb[82].mxu1  ;;  %v4067_v59 = vld [vmem:[#allocation2 + $0xb0] sm:$0xff]  ;;  %2962 = vst.msk [vmem:[#allocation2 + $0x60] sm:$0xff] %vm310_vm5, %v2954_v43  ;;  %2965 = vst.msk [vmem:[#allocation2 + $0x78] sm:$0xff] %vm310_vm5, %v2957_v12 }
 0x1c3   : > { %v4075_v63 = vadd.f32 %v8294_v9, %v4067_v59  ;;  %v4166_v20 = vpop.f32.mrb[83].mxu1  ;;  %v4065_v45 = vld [vmem:[#allocation2 + $0xa0] sm:$0xff]  ;;  %v3322_v15 = vld [vmem:[#allocation2 + $0x50] sm:$0xff]  ;;  %2963 = vst.msk [vmem:[#allocation2 + $0x68] sm:$0xff] %vm310_vm5, %v2955_v13 }
 0x1c4   : > { %v4196_v1 = vld [vmem:[#allocation2 + $0x90] sm:$0xff]  ;;  %v4073_v0 = vadd.f32 %v4065_v45, %v4046_v54  ;;  %v4068_v62 = vld [vmem:[#allocation2 + $0xb8] sm:$0xff]  ;;  %v3330_v44 = vadd.f32 %v10187_v58, %v3322_v15 }
 0x1c5   : > { %v4204_v49 = vadd.f32 %v8300_v56, %v4196_v1  ;;  %v4194_v47 = vld [vmem:[#allocation2 + $0x80] sm:$0xff]  ;;  %4083 = vst.msk [vmem:[#allocation2 + $0xb0] sm:$0xff] %vm310_vm5, %v4075_v63  ;;  %v4076_v51 = vadd.f32 %v8295_v29, %v4068_v62  ;;  %v4066_v16 = vld [vmem:[#allocation2 + $0xa8] sm:$0xff] }
 0x1c6   : > { %v4202_v52 = vadd.f32 %v4194_v47, %v4163_v37  ;;  %v4197_v31 = vld [vmem:[#allocation2 + $0x98] sm:$0xff]  ;;  %4081 = vst.msk [vmem:[#allocation2 + $0xa0] sm:$0xff] %vm310_vm5, %v4073_v0  ;;  %v8310_v42 = vpop.f32.mrb[88].mxu0  ;;  %v4074_v50 = vadd.f32 %v4066_v16, %v4049_v32  ;;  %v3081_v39 = vld [vmem:[#allocation2 + $0x70] sm:$0xff]  ;;  %3338 = vst.msk [vmem:[#allocation2 + $0x50] sm:$0xff] %vm310_vm5, %v3330_v44 }
 0x1c7   : > { %4212 = vst.msk [vmem:[#allocation2 + $0x90] sm:$0xff] %vm310_vm5, %v4204_v49  ;;  %v4205_v38 = vadd.f32 %v8301_v25, %v4197_v31  ;;  %v4195_v40 = vld [vmem:[#allocation2 + $0x88] sm:$0xff]  ;;  %4084 = vst.msk [vmem:[#allocation2 + $0xb8] sm:$0xff] %vm310_vm5, %v4076_v51  ;;  %v4296_v17 = vpop.f32.mrb[89].mxu0  ;;  %v3089_v58 = vadd.f32 %v10180_v33, %v3081_v39  ;;  %v3320_v56 = vld [vmem:[#allocation2 + $0x40] sm:$0xff] }
 0x1c8   : > { %4210 = vst.msk [vmem:[#allocation2 + $0x80] sm:$0xff] %vm310_vm5, %v4202_v52  ;;  %v4203_v36 = vadd.f32 %v4195_v40, %v4166_v20  ;;  %v8304_v61 = vpop.f32.mrb[84].mxu1  ;;  %v8311_v21 = vpop.f32.mrb[90].mxu0  ;;  %4082 = vst.msk [vmem:[#allocation2 + $0xa8] sm:$0xff] %vm310_vm5, %v4074_v50  ;;  %v3328_v53 = vadd.f32 %v3320_v56, %v10193_v19  ;;  %v3323_v32 = vld [vmem:[#allocation2 + $0x58] sm:$0xff]  ;;  %v3321_v33 = vld [vmem:[#allocation2 + $0x48] sm:$0xff] }
 0x1c9   : > { %4213 = vst.msk [vmem:[#allocation2 + $0x98] sm:$0xff] %vm310_vm5, %v4205_v38  ;;  %v4179_v9 = vpop.f32.mrb[85].mxu1  ;;  %v4299_v18 = vpop.f32.mrb[91].mxu0  ;;  %3097 = vst.msk [vmem:[#allocation2 + $0x70] sm:$0xff] %vm310_vm5, %v3089_v58  ;;  %v3079_v59 = vld [vmem:[#allocation2 + $0x60] sm:$0xff]  ;;  %v3331_v60 = vadd.f32 %v10201_v22, %v3323_v32  ;;  %v3329_v23 = vadd.f32 %v3321_v33, %v10203_v10  ;;  %v3082_v4 = vld [vmem:[#allocation2 + $0x78] sm:$0xff] }
 0x1ca   : > { %4211 = vst.msk [vmem:[#allocation2 + $0x88] sm:$0xff] %vm310_vm5, %v4203_v36  ;;  %v8305_v54 = vpop.f32.mrb[86].mxu1  ;;  %3336 = vst.msk [vmem:[#allocation2 + $0x40] sm:$0xff] %vm310_vm5, %v3328_v53  ;;  %v3087_v24 = vadd.f32 %v3079_v59, %v10185_v34  ;;  %v3080_v19 = vld [vmem:[#allocation2 + $0x68] sm:$0xff]  ;;  %v3090_v3 = vadd.f32 %v10191_v11, %v3082_v4 }
 0x1cb   : > { %v4182_v29 = vpop.f32.mrb[87].mxu1  ;;  %v3088_v22 = vadd.f32 %v3080_v19, %v10199_v5  ;;  %3339 = vst.msk [vmem:[#allocation2 + $0x58] sm:$0xff] %vm310_vm5, %v3331_v60  ;;  %3337 = vst.msk [vmem:[#allocation2 + $0x48] sm:$0xff] %vm310_vm5, %v3329_v23 }
 0x1cc   : > { %v4200_v37 = vld [vmem:[#allocation2 + $0xb0] sm:$0xff]  ;;  %3095 = vst.msk [vmem:[#allocation2 + $0x60] sm:$0xff] %vm310_vm5, %v3087_v24  ;;  %3098 = vst.msk [vmem:[#allocation2 + $0x78] sm:$0xff] %vm310_vm5, %v3090_v3 }
 0x1cd   : > { %v4208_v55 = vadd.f32 %v8304_v61, %v4200_v37  ;;  %v4198_v25 = vld [vmem:[#allocation2 + $0xa0] sm:$0xff]  ;;  %v3567_v10 = vld [vmem:[#allocation2 + $0x50] sm:$0xff]  ;;  %3096 = vst.msk [vmem:[#allocation2 + $0x68] sm:$0xff] %vm310_vm5, %v3088_v22 }
 0x1ce   : > { %v4206_v63 = vadd.f32 %v4198_v25, %v4179_v9  ;;  %v4201_v20 = vld [vmem:[#allocation2 + $0xb8] sm:$0xff]  ;;  %v4329_v45 = vld [vmem:[#allocation2 + $0x90] sm:$0xff]  ;;  %v8314_v7 = vpop.f32.mrb[92].mxu0  ;;  %v3575_v12 = vadd.f32 %v10205_v26, %v3567_v10 }
 0x1cf   : > { %4216 = vst.msk [vmem:[#allocation2 + $0xb0] sm:$0xff] %vm310_vm5, %v4208_v55  ;;  %v4209_v1 = vadd.f32 %v8305_v54, %v4201_v20  ;;  %v4337_v0 = vadd.f32 %v8310_v42, %v4329_v45  ;;  %v4327_v62 = vld [vmem:[#allocation2 + $0x80] sm:$0xff]  ;;  %v4312_v43 = vpop.f32.mrb[93].mxu0  ;;  %v4199_v34 = vld [vmem:[#allocation2 + $0xa8] sm:$0xff] }
 0x1d0   : > { %4214 = vst.msk [vmem:[#allocation2 + $0xa0] sm:$0xff] %vm310_vm5, %v4206_v63  ;;  %v4335_v35 = vadd.f32 %v4327_v62, %v4296_v17  ;;  %v4330_v49 = vld [vmem:[#allocation2 + $0x98] sm:$0xff]  ;;  %v8320_v47 = vpop.f32.mrb[88].mxu1  ;;  %v8315_v51 = vpop.f32.mrb[94].mxu0  ;;  %v4207_v11 = vadd.f32 %v4199_v34, %v4182_v29  ;;  %v3326_v31 = vld [vmem:[#allocation2 + $0x70] sm:$0xff]  ;;  %3583 = vst.msk [vmem:[#allocation2 + $0x50] sm:$0xff] %vm310_vm5, %v3575_v12 }
 0x1d1   : > { %4217 = vst.msk [vmem:[#allocation2 + $0xb8] sm:$0xff] %vm310_vm5, %v4209_v1  ;;  %4345 = vst.msk [vmem:[#allocation2 + $0x90] sm:$0xff] %vm310_vm5, %v4337_v0  ;;  %v4338_v5 = vadd.f32 %v8311_v21, %v4330_v49  ;;  %v4328_v13 = vld [vmem:[#allocation2 + $0x88] sm:$0xff]  ;;  %v4541_v15 = vpop.f32.mrb[89].mxu1  ;;  %v4315_v52 = vpop.f32.mrb[95].mxu0  ;;  %v3334_v26 = vadd.f32 %v10212_v48, %v3326_v31  ;;  %v3565_v38 = vld [vmem:[#allocation2 + $0x40] sm:$0xff] }
 0x1d2   : > { %4343 = vst.msk [vmem:[#allocation2 + $0x80] sm:$0xff] %vm310_vm5, %v4335_v35  ;;  %v4336_v16 = vadd.f32 %v4328_v13, %v4299_v18  ;;  %v8321_v42 = vpop.f32.mrb[90].mxu1  ;;  %4215 = vst.msk [vmem:[#allocation2 + $0xa8] sm:$0xff] %vm310_vm5, %v4207_v11  ;;  %v3573_v40 = vadd.f32 %v3565_v38, %v10210_v8  ;;  %v3568_v39 = vld [vmem:[#allocation2 + $0x58] sm:$0xff]  ;;  %v3566_v36 = vld [vmem:[#allocation2 + $0x48] sm:$0xff] }
 0x1d3   : > { %4346 = vst.msk [vmem:[#allocation2 + $0x98] sm:$0xff] %vm310_vm5, %v4338_v5  ;;  %v4544_v44 = vpop.f32.mrb[91].mxu1  ;;  %3342 = vst.msk [vmem:[#allocation2 + $0x70] sm:$0xff] %vm310_vm5, %v3334_v26  ;;  %v3576_v58 = vadd.f32 %v10215_v57, %v3568_v39  ;;  %v3574_v9 = vadd.f32 %v3566_v36, %v10219_v6  ;;  %v3324_v18 = vld [vmem:[#allocation2 + $0x60] sm:$0xff]  ;;  %v3327_v32 = vld [vmem:[#allocation2 + $0x78] sm:$0xff] }
 0x1d4   : > { %4344 = vst.msk [vmem:[#allocation2 + $0x88] sm:$0xff] %vm310_vm5, %v4336_v16  ;;  %3581 = vst.msk [vmem:[#allocation2 + $0x40] sm:$0xff] %vm310_vm5, %v3573_v40  ;;  %v3332_v37 = vadd.f32 %v3324_v18, %v10217_v2  ;;  %v3325_v33 = vld [vmem:[#allocation2 + $0x68] sm:$0xff]  ;;  %v3335_v6 = vadd.f32 %v10221_v46, %v3327_v32 }
 0x1d5   : > { %3584 = vst.msk [vmem:[#allocation2 + $0x58] sm:$0xff] %vm310_vm5, %v3576_v58  ;;  %3582 = vst.msk [vmem:[#allocation2 + $0x48] sm:$0xff] %vm310_vm5, %v3574_v9  ;;  %v3333_v23 = vadd.f32 %v3325_v33, %v10227_v27 }
 0x1d6   : > { %v4333_v50 = vld [vmem:[#allocation2 + $0xb0] sm:$0xff]  ;;  %v10350_v17 = vpop.f32.mrb[96].mxu0  ;;  %3340 = vst.msk [vmem:[#allocation2 + $0x60] sm:$0xff] %vm310_vm5, %v3332_v37  ;;  %3343 = vst.msk [vmem:[#allocation2 + $0x78] sm:$0xff] %vm310_vm5, %v3335_v6 }
 0x1d7   : > { %v4341_v61 = vadd.f32 %v8314_v7, %v4333_v50  ;;  %v4331_v21 = vld [vmem:[#allocation2 + $0xa0] sm:$0xff]  ;;  %v10352_v48 = vpop.f32.mrb[97].mxu0  ;;  %3341 = vst.msk [vmem:[#allocation2 + $0x68] sm:$0xff] %vm310_vm5, %v3333_v23 }
 0x1d8   : > { %v4574_v54 = vld [vmem:[#allocation2 + $0x90] sm:$0xff]  ;;  %v4339_v56 = vadd.f32 %v4331_v21, %v4312_v43  ;;  %v4334_v29 = vld [vmem:[#allocation2 + $0xb8] sm:$0xff]  ;;  %v8324_v8 = vpop.f32.mrb[92].mxu1  ;;  %v10357_v53 = vpop.f32.mrb[98].mxu0 }
 0x1d9   : > { %v4582_v55 = vadd.f32 %v8320_v47, %v4574_v54  ;;  %v4572_v25 = vld [vmem:[#allocation2 + $0x80] sm:$0xff]  ;;  %4349 = vst.msk [vmem:[#allocation2 + $0xb0] sm:$0xff] %vm310_vm5, %v4341_v61  ;;  %v4342_v59 = vadd.f32 %v8315_v51, %v4334_v29  ;;  %v4557_v60 = vpop.f32.mrb[93].mxu1  ;;  %v10361_v57 = vpop.f32.mrb[99].mxu0  ;;  %v4332_v20 = vld [vmem:[#allocation2 + $0xa8] sm:$0xff] }
 0x1da   : > { %v4580_v63 = vadd.f32 %v4572_v25, %v4541_v15  ;;  %v4575_v2 = vld [vmem:[#allocation2 + $0x98] sm:$0xff]  ;;  %4347 = vst.msk [vmem:[#allocation2 + $0xa0] sm:$0xff] %vm310_vm5, %v4339_v56  ;;  %v8325_v45 = vpop.f32.mrb[94].mxu1  ;;  %v4340_v4 = vadd.f32 %v4332_v20, %v4315_v52  ;;  %v3571_v46 = vld [vmem:[#allocation2 + $0x70] sm:$0xff] }
 0x1db   : > { %4590 = vst.msk [vmem:[#allocation2 + $0x90] sm:$0xff] %vm310_vm5, %v4582_v55  ;;  %v4583_v7 = vadd.f32 %v8321_v42, %v4575_v2  ;;  %v4573_v24 = vld [vmem:[#allocation2 + $0x88] sm:$0xff]  ;;  %4350 = vst.msk [vmem:[#allocation2 + $0xb8] sm:$0xff] %vm310_vm5, %v4342_v59  ;;  %v4560_v19 = vpop.f32.mrb[95].mxu1  ;;  %v3579_v1 = vadd.f32 %v10234_v14, %v3571_v46 }
 0x1dc   : > { %4588 = vst.msk [vmem:[#allocation2 + $0x80] sm:$0xff] %vm310_vm5, %v4580_v63  ;;  %v4581_v27 = vadd.f32 %v4573_v24, %v4544_v44  ;;  %4348 = vst.msk [vmem:[#allocation2 + $0xa8] sm:$0xff] %vm310_vm5, %v4340_v4 }
 0x1dd   : > { %4591 = vst.msk [vmem:[#allocation2 + $0x98] sm:$0xff] %vm310_vm5, %v4583_v7  ;;  %3587 = vst.msk [vmem:[#allocation2 + $0x70] sm:$0xff] %vm310_vm5, %v3579_v1  ;;  %v3569_v47 = vld [vmem:[#allocation2 + $0x60] sm:$0xff]  ;;  %v3572_v13 = vld [vmem:[#allocation2 + $0x78] sm:$0xff] }
 0x1de   : > { %4589 = vst.msk [vmem:[#allocation2 + $0x88] sm:$0xff] %vm310_vm5, %v4581_v27  ;;  %v8334_v0 = vpop.f32.mrb[100].mxu0  ;;  %v3577_v5 = vadd.f32 %v3569_v47, %v10239_v28  ;;  %v3570_v15 = vld [vmem:[#allocation2 + $0x68] sm:$0xff]  ;;  %v3580_v42 = vadd.f32 %v10244_v41, %v3572_v13 }
 0x1df   : > { %v4691_v62 = vpop.f32.mrb[101].mxu0  ;;  %v3578_v26 = vadd.f32 %v3570_v15, %v10249_v30 }
 0x1e0   : > { %v4578_v43 = vld [vmem:[#allocation2 + $0xb0] sm:$0xff]  ;;  %v8340_v3 = vpop.f32.mrb[96].mxu1  ;;  %v8335_v22 = vpop.f32.mrb[102].mxu0  ;;  %3585 = vst.msk [vmem:[#allocation2 + $0x60] sm:$0xff] %vm310_vm5, %v3577_v5  ;;  %3588 = vst.msk [vmem:[#allocation2 + $0x78] sm:$0xff] %vm310_vm5, %v3580_v42 }
 0x1e1   : > { %v4586_v10 = vadd.f32 %v8324_v8, %v4578_v43  ;;  %v4576_v34 = vld [vmem:[#allocation2 + $0xa0] sm:$0xff]  ;;  %v4809_v35 = vpop.f32.mrb[97].mxu1  ;;  %v4694_v49 = vpop.f32.mrb[103].mxu0  ;;  %3586 = vst.msk [vmem:[#allocation2 + $0x68] sm:$0xff] %vm310_vm5, %v3578_v26 }
 0x1e2   : > { %v4584_v51 = vadd.f32 %v4576_v34, %v4557_v60  ;;  %v4579_v14 = vld [vmem:[#allocation2 + $0xb8] sm:$0xff]  ;;  %v4708_v12 = vld [vmem:[#allocation2 + $0x90] sm:$0xff]  ;;  %v8341_v11 = vpop.f32.mrb[98].mxu1 }
 0x1e3   : > { %4594 = vst.msk [vmem:[#allocation2 + $0xb0] sm:$0xff] %vm310_vm5, %v4586_v10  ;;  %v4587_v52 = vadd.f32 %v8325_v45, %v4579_v14  ;;  %v4706_v31 = vld [vmem:[#allocation2 + $0x80] sm:$0xff]  ;;  %v4812_v16 = vpop.f32.mrb[99].mxu1  ;;  %v4577_v44 = vld [vmem:[#allocation2 + $0xa8] sm:$0xff]  ;;  %v4716_v38 = vadd.f32 %v10350_v17, %v4708_v12 }
 0x1e4   : > { %4592 = vst.msk [vmem:[#allocation2 + $0xa0] sm:$0xff] %vm310_vm5, %v4584_v51  ;;  %v4714_v40 = vadd.f32 %v4706_v31, %v10352_v48  ;;  %v4709_v50 = vld [vmem:[#allocation2 + $0x98] sm:$0xff]  ;;  %v4585_v28 = vadd.f32 %v4577_v44, %v4560_v19 }
 0x1e5   : > { %4595 = vst.msk [vmem:[#allocation2 + $0xb8] sm:$0xff] %vm310_vm5, %v4587_v52  ;;  %v4717_v39 = vadd.f32 %v10357_v53, %v4709_v50  ;;  %v4707_v36 = vld [vmem:[#allocation2 + $0x88] sm:$0xff]  ;;  %4724 = vst.msk [vmem:[#allocation2 + $0x90] sm:$0xff] %vm310_vm5, %v4716_v38 }
 0x1e6   : > { %4722 = vst.msk [vmem:[#allocation2 + $0x80] sm:$0xff] %vm310_vm5, %v4714_v40  ;;  %v4715_v41 = vadd.f32 %v4707_v36, %v10361_v57  ;;  %v8350_v30 = vpop.f32.mrb[104].mxu0  ;;  %4593 = vst.msk [vmem:[#allocation2 + $0xa8] sm:$0xff] %vm310_vm5, %v4585_v28 }
 0x1e7   : > { %4725 = vst.msk [vmem:[#allocation2 + $0x98] sm:$0xff] %vm310_vm5, %v4717_v39  ;;  %v5054_v17 = vpop.f32.mrb[105].mxu0 }
 0x1e8   : > { %4723 = vst.msk [vmem:[#allocation2 + $0x88] sm:$0xff] %vm310_vm5, %v4715_v41  ;;  %v8344_v61 = vpop.f32.mrb[100].mxu1  ;;  %v8351_v21 = vpop.f32.mrb[106].mxu0 }
 0x1e9   : > { %v4825_v48 = vpop.f32.mrb[101].mxu1  ;;  %v5057_v58 = vpop.f32.mrb[107].mxu0 }
 0x1ea   : > { %v4712_v9 = vld [vmem:[#allocation2 + $0xb0] sm:$0xff]  ;;  %v8345_v18 = vpop.f32.mrb[102].mxu1 }
 0x1eb   : > { %v4720_v54 = vadd.f32 %v8334_v0, %v4712_v9  ;;  %v4710_v56 = vld [vmem:[#allocation2 + $0xa0] sm:$0xff]  ;;  %v4828_v29 = vpop.f32.mrb[103].mxu1 }
 0x1ec   : > { %v4718_v8 = vadd.f32 %v4710_v56, %v4691_v62  ;;  %v4713_v53 = vld [vmem:[#allocation2 + $0xb8] sm:$0xff]  ;;  %v4842_v37 = vld [vmem:[#allocation2 + $0x90] sm:$0xff] }
 0x1ed   : > { %4728 = vst.msk [vmem:[#allocation2 + $0xb0] sm:$0xff] %vm310_vm5, %v4720_v54  ;;  %v4721_v32 = vadd.f32 %v8335_v22, %v4713_v53  ;;  %v4850_v33 = vadd.f32 %v8340_v3, %v4842_v37  ;;  %v4840_v55 = vld [vmem:[#allocation2 + $0x80] sm:$0xff]  ;;  %v4711_v59 = vld [vmem:[#allocation2 + $0xa8] sm:$0xff] }
 0x1ee   : > { %v4843_v25 = vld [vmem:[#allocation2 + $0x98] sm:$0xff]  ;;  %4726 = vst.msk [vmem:[#allocation2 + $0xa0] sm:$0xff] %vm310_vm5, %v4718_v8  ;;  %v4848_v60 = vadd.f32 %v4840_v55, %v4809_v35  ;;  %v4719_v63 = vadd.f32 %v4711_v59, %v4694_v49  ;;  %v8354_v45 = vpop.f32.mrb[108].mxu0 }
 0x1ef   : > { %v4851_v57 = vadd.f32 %v8341_v11, %v4843_v25  ;;  %v4841_v6 = vld [vmem:[#allocation2 + $0x88] sm:$0xff]  ;;  %4729 = vst.msk [vmem:[#allocation2 + $0xb8] sm:$0xff] %vm310_vm5, %v4721_v32  ;;  %4858 = vst.msk [vmem:[#allocation2 + $0x90] sm:$0xff] %vm310_vm5, %v4850_v33  ;;  %v5070_v24 = vpop.f32.mrb[109].mxu0 }
 0x1f0   : > { %v4849_v23 = vadd.f32 %v4841_v6, %v4812_v16  ;;  %v8360_v2 = vpop.f32.mrb[104].mxu1  ;;  %4856 = vst.msk [vmem:[#allocation2 + $0x80] sm:$0xff] %vm310_vm5, %v4848_v60  ;;  %4727 = vst.msk [vmem:[#allocation2 + $0xa8] sm:$0xff] %vm310_vm5, %v4719_v63  ;;  %v8355_v19 = vpop.f32.mrb[110].mxu0 }
 0x1f1   : > { %4859 = vst.msk [vmem:[#allocation2 + $0x98] sm:$0xff] %vm310_vm5, %v4851_v57  ;;  %5221 = vst.msk [vmem:[#allocation2 + $0xd0] sm:$0xff] %vm310_vm5, %v8360_v2  ;;  %v5187_v20 = vpop.f32.mrb[105].mxu1  ;;  %v5073_v27 = vpop.f32.mrb[111].mxu0 }
 0x1f2   : > { %4857 = vst.msk [vmem:[#allocation2 + $0x88] sm:$0xff] %vm310_vm5, %v4849_v23  ;;  %5219 = vst.msk [vmem:[#allocation2 + $0xc0] sm:$0xff] %vm310_vm5, %v5187_v20  ;;  %v8361_v7 = vpop.f32.mrb[106].mxu1 }
 0x1f3   : > { %5222 = vst.msk [vmem:[#allocation2 + $0xd8] sm:$0xff] %vm310_vm5, %v8361_v7  ;;  %v5190_v4 = vpop.f32.mrb[107].mxu1 }
 0x1f4   : > { %v4846_v46 = vld [vmem:[#allocation2 + $0xb0] sm:$0xff]  ;;  %5220 = vst.msk [vmem:[#allocation2 + $0xc8] sm:$0xff] %vm310_vm5, %v5190_v4 }
 0x1f5   : > { %v4854_v1 = vadd.f32 %v8344_v61, %v4846_v46  ;;  %v4844_v0 = vld [vmem:[#allocation2 + $0xa0] sm:$0xff] }
 0x1f6   : > { %v4852_v62 = vadd.f32 %v4844_v0, %v4825_v48  ;;  %v4847_v43 = vld [vmem:[#allocation2 + $0xb8] sm:$0xff]  ;;  %v5087_v22 = vld [vmem:[#allocation2 + $0x90] sm:$0xff]  ;;  %v8370_v42 = vpop.f32.mrb[112].mxu0 }
 0x1f7   : > { %4862 = vst.msk [vmem:[#allocation2 + $0xb0] sm:$0xff] %vm310_vm5, %v4854_v1  ;;  %v4855_v3 = vadd.f32 %v8345_v18, %v4847_v43  ;;  %v5095_v10 = vadd.f32 %v8350_v30, %v5087_v22  ;;  %v5085_v34 = vld [vmem:[#allocation2 + $0x80] sm:$0xff]  ;;  %v4845_v47 = vld [vmem:[#allocation2 + $0xa8] sm:$0xff]  ;;  %v5417_v44 = vpop.f32.mrb[113].mxu0 }
 0x1f8   : > { %4860 = vst.msk [vmem:[#allocation2 + $0xa0] sm:$0xff] %vm310_vm5, %v4852_v62  ;;  %v5088_v35 = vld [vmem:[#allocation2 + $0x98] sm:$0xff]  ;;  %v8364_v49 = vpop.f32.mrb[108].mxu1  ;;  %v5093_v51 = vadd.f32 %v5085_v34, %v5054_v17  ;;  %v5450_v5 = vld [vmem:[#allocation2 + $0xd0] sm:$0xff]  ;;  %v4853_v13 = vadd.f32 %v4845_v47, %v4828_v29  ;;  %v8371_v40 = vpop.f32.mrb[114].mxu0 }
 0x1f9   : > { %4863 = vst.msk [vmem:[#allocation2 + $0xb8] sm:$0xff] %vm310_vm5, %v4855_v3  ;;  %v5096_v14 = vadd.f32 %v8351_v21, %v5088_v35  ;;  %v5086_v12 = vld [vmem:[#allocation2 + $0x88] sm:$0xff]  ;;  %5225 = vst.msk [vmem:[#allocation2 + $0xf0] sm:$0xff] %vm310_vm5, %v8364_v49  ;;  %v5203_v11 = vpop.f32.mrb[109].mxu1  ;;  %v5448_v31 = vld [vmem:[#allocation2 + $0xc0] sm:$0xff]  ;;  %v5458_v26 = vadd.f32 %v8370_v42, %v5450_v5  ;;  %v5420_v36 = vpop.f32.mrb[115].mxu0 }
 0x1fa   : > { %5103 = vst.msk [vmem:[#allocation2 + $0x90] sm:$0xff] %vm310_vm5, %v5095_v10  ;;  %v5094_v15 = vadd.f32 %v5086_v12, %v5057_v58  ;;  %5223 = vst.msk [vmem:[#allocation2 + $0xe0] sm:$0xff] %vm310_vm5, %v5203_v11  ;;  %v8365_v52 = vpop.f32.mrb[110].mxu1  ;;  %v5456_v38 = vadd.f32 %v5448_v31, %v5417_v44  ;;  %v5451_v50 = vld [vmem:[#allocation2 + $0xd8] sm:$0xff] }
 0x1fb   : > { %5101 = vst.msk [vmem:[#allocation2 + $0x80] sm:$0xff] %vm310_vm5, %v5093_v51  ;;  %5104 = vst.msk [vmem:[#allocation2 + $0x98] sm:$0xff] %vm310_vm5, %v5096_v14  ;;  %v5206_v16 = vpop.f32.mrb[111].mxu1  ;;  %v5459_v39 = vadd.f32 %v8371_v40, %v5451_v50  ;;  %v5449_v41 = vld [vmem:[#allocation2 + $0xc8] sm:$0xff] }
 0x1fc   : > { %5226 = vst.msk [vmem:[#allocation2 + $0xf8] sm:$0xff] %vm310_vm5, %v8365_v52  ;;  %4861 = vst.msk [vmem:[#allocation2 + $0xa8] sm:$0xff] %vm310_vm5, %v4853_v13  ;;  %v5457_v61 = vadd.f32 %v5449_v41, %v5420_v36 }
 0x1fd   : > { %5102 = vst.msk [vmem:[#allocation2 + $0x88] sm:$0xff] %vm310_vm5, %v5094_v15  ;;  %5224 = vst.msk [vmem:[#allocation2 + $0xe8] sm:$0xff] %vm310_vm5, %v5206_v16 }
 0x1fe   : > { %v5091_v28 = vld [vmem:[#allocation2 + $0xb0] sm:$0xff]  ;;  %5466 = vst.msk [vmem:[#allocation2 + $0xd0] sm:$0xff] %vm310_vm5, %v5458_v26  ;;  %5464 = vst.msk [vmem:[#allocation2 + $0xc0] sm:$0xff] %vm310_vm5, %v5456_v38 }
 0x1ff   : > { %v5099_v30 = vadd.f32 %v8354_v45, %v5091_v28  ;;  %v5089_v17 = vld [vmem:[#allocation2 + $0xa0] sm:$0xff]  ;;  %5467 = vst.msk [vmem:[#allocation2 + $0xd8] sm:$0xff] %vm310_vm5, %v5459_v39  ;;  %5465 = vst.msk [vmem:[#allocation2 + $0xc8] sm:$0xff] %vm310_vm5, %v5457_v61 }
 0x200   : > { %v5097_v21 = vadd.f32 %v5089_v17, %v5070_v24  ;;  %v5092_v48 = vld [vmem:[#allocation2 + $0xb8] sm:$0xff]  ;;  %v5454_v25 = vld [vmem:[#allocation2 + $0xf0] sm:$0xff] }
 0x201   : > { %5107 = vst.msk [vmem:[#allocation2 + $0xb0] sm:$0xff] %vm310_vm5, %v5099_v30  ;;  %v5100_v58 = vadd.f32 %v8355_v19, %v5092_v48  ;;  %v5452_v57 = vld [vmem:[#allocation2 + $0xe0] sm:$0xff] }
 0x202   : > { %5105 = vst.msk [vmem:[#allocation2 + $0xa0] sm:$0xff] %vm310_vm5, %v5097_v21  ;;  %v8380_v29 = vpop.f32.mrb[112].mxu1 }
 0x203   : > { %5108 = vst.msk [vmem:[#allocation2 + $0xb8] sm:$0xff] %vm310_vm5, %v5100_v58  ;;  %v5090_v9 = vld [vmem:[#allocation2 + $0xa8] sm:$0xff]  ;;  %v5662_v37 = vpop.f32.mrb[113].mxu1  ;;  %v5455_v7 = vld [vmem:[#allocation2 + $0xf8] sm:$0xff] }
 0x204   : > { %v5098_v18 = vadd.f32 %v5090_v9, %v5073_v27  ;;  %v8381_v55 = vpop.f32.mrb[114].mxu1  ;;  %v5453_v19 = vld [vmem:[#allocation2 + $0xe8] sm:$0xff] }
 0x205   : > { %v5695_v54 = vld [vmem:[#allocation2 + $0xd0] sm:$0xff]  ;;  %v5693_v56 = vld [vmem:[#allocation2 + $0xc0] sm:$0xff]  ;;  %v5665_v60 = vpop.f32.mrb[115].mxu1 }
 0x206   : > { %5106 = vst.msk [vmem:[#allocation2 + $0xa8] sm:$0xff] %vm310_vm5, %v5098_v18  ;;  %v5696_v8 = vld [vmem:[#allocation2 + $0xd8] sm:$0xff]  ;;  %v5703_v53 = vadd.f32 %v8380_v29, %v5695_v54  ;;  %v5694_v32 = vld [vmem:[#allocation2 + $0xc8] sm:$0xff]  ;;  %v5701_v33 = vadd.f32 %v5693_v56, %v5662_v37 }
 0x207   : > { %v5704_v59 = vadd.f32 %v8381_v55, %v5696_v8  ;;  %v5702_v6 = vadd.f32 %v5694_v32, %v5665_v60 }
 0x208   : > { %5711 = vst.msk [vmem:[#allocation2 + $0xd0] sm:$0xff] %vm310_vm5, %v5703_v53  ;;  %5709 = vst.msk [vmem:[#allocation2 + $0xc0] sm:$0xff] %vm310_vm5, %v5701_v33  ;;  %v8374_v23 = vpop.f32.mrb[116].mxu0 }
 0x209   : > { %5712 = vst.msk [vmem:[#allocation2 + $0xd8] sm:$0xff] %vm310_vm5, %v5704_v59  ;;  %v5462_v63 = vadd.f32 %v8374_v23, %v5454_v25  ;;  %v5433_v2 = vpop.f32.mrb[117].mxu0  ;;  %5710 = vst.msk [vmem:[#allocation2 + $0xc8] sm:$0xff] %vm310_vm5, %v5702_v6 }
 0x20a   : > { %v5460_v20 = vadd.f32 %v5452_v57, %v5433_v2  ;;  %v8375_v45 = vpop.f32.mrb[118].mxu0 }
 0x20b   : > { %5470 = vst.msk [vmem:[#allocation2 + $0xf0] sm:$0xff] %vm310_vm5, %v5462_v63  ;;  %v5463_v24 = vadd.f32 %v8375_v45, %v5455_v7  ;;  %v5436_v4 = vpop.f32.mrb[119].mxu0 }
 0x20c   : > { %5468 = vst.msk [vmem:[#allocation2 + $0xe0] sm:$0xff] %vm310_vm5, %v5460_v20  ;;  %v5461_v46 = vadd.f32 %v5453_v19, %v5436_v4 }
 0x20d   : > { %5471 = vst.msk [vmem:[#allocation2 + $0xf8] sm:$0xff] %vm310_vm5, %v5463_v24 }
 0x20e   : > { %5469 = vst.msk [vmem:[#allocation2 + $0xe8] sm:$0xff] %vm310_vm5, %v5461_v46 }
 0x20f   : > { %v5828_v27 = vld [vmem:[#allocation2 + $0xd0] sm:$0xff]  ;;  %v5826_v1 = vld [vmem:[#allocation2 + $0xc0] sm:$0xff] }
 0x210   : > { %v8390_v0 = vpop.f32.mrb[120].mxu0  ;;  %v5829_v62 = vld [vmem:[#allocation2 + $0xd8] sm:$0xff]  ;;  %v5827_v22 = vld [vmem:[#allocation2 + $0xc8] sm:$0xff] }
 0x211   : > { %v5836_v43 = vadd.f32 %v8390_v0, %v5828_v27  ;;  %v5795_v3 = vpop.f32.mrb[121].mxu0 }
 0x212   : > { %v5699_v10 = vld [vmem:[#allocation2 + $0xf0] sm:$0xff]  ;;  %v5834_v34 = vadd.f32 %v5826_v1, %v5795_v3  ;;  %v8391_v35 = vpop.f32.mrb[122].mxu0  ;;  %v8384_v49 = vpop.f32.mrb[116].mxu1 }
 0x213   : > { %v5697_v47 = vld [vmem:[#allocation2 + $0xe0] sm:$0xff]  ;;  %5844 = vst.msk [vmem:[#allocation2 + $0xd0] sm:$0xff] %vm310_vm5, %v5836_v43  ;;  %v5837_v51 = vadd.f32 %v8391_v35, %v5829_v62  ;;  %v5798_v14 = vpop.f32.mrb[123].mxu0  ;;  %v5707_v12 = vadd.f32 %v8384_v49, %v5699_v10  ;;  %v5678_v11 = vpop.f32.mrb[117].mxu1 }
 0x214   : > { %v5700_v5 = vld [vmem:[#allocation2 + $0xf8] sm:$0xff]  ;;  %5842 = vst.msk [vmem:[#allocation2 + $0xc0] sm:$0xff] %vm310_vm5, %v5834_v34  ;;  %v5835_v13 = vadd.f32 %v5827_v22, %v5798_v14  ;;  %v5705_v15 = vadd.f32 %v5697_v47, %v5678_v11  ;;  %v8385_v52 = vpop.f32.mrb[118].mxu1 }
 0x215   : > { %v5698_v31 = vld [vmem:[#allocation2 + $0xe8] sm:$0xff]  ;;  %5845 = vst.msk [vmem:[#allocation2 + $0xd8] sm:$0xff] %vm310_vm5, %v5837_v51  ;;  %5715 = vst.msk [vmem:[#allocation2 + $0xf0] sm:$0xff] %vm310_vm5, %v5707_v12  ;;  %v5708_v16 = vadd.f32 %v8385_v52, %v5700_v5  ;;  %v5681_v42 = vpop.f32.mrb[119].mxu1 }
 0x216   : > { %5843 = vst.msk [vmem:[#allocation2 + $0xc8] sm:$0xff] %vm310_vm5, %v5835_v13  ;;  %5713 = vst.msk [vmem:[#allocation2 + $0xe0] sm:$0xff] %vm310_vm5, %v5705_v15  ;;  %v5706_v26 = vadd.f32 %v5698_v31, %v5681_v42 }
 0x217   : > { %5716 = vst.msk [vmem:[#allocation2 + $0xf8] sm:$0xff] %vm310_vm5, %v5708_v16 }
 0x218   : > { %v8394_v44 = vpop.f32.mrb[124].mxu0  ;;  %5714 = vst.msk [vmem:[#allocation2 + $0xe8] sm:$0xff] %vm310_vm5, %v5706_v26 }
 0x219   : > { %v5811_v38 = vpop.f32.mrb[125].mxu0 }
 0x21a   : > { %v8395_v40 = vpop.f32.mrb[126].mxu0  ;;  %v6073_v39 = vld [vmem:[#allocation2 + $0xd0] sm:$0xff] }
 0x21b   : > { %v5814_v50 = vpop.f32.mrb[127].mxu0  ;;  %v6071_v30 = vld [vmem:[#allocation2 + $0xc0] sm:$0xff] }
 0x21c   : > { %v5832_v28 = vld [vmem:[#allocation2 + $0xf0] sm:$0xff]  ;;  %v6074_v48 = vld [vmem:[#allocation2 + $0xd8] sm:$0xff] }
 0x21d   : > { %v5840_v36 = vadd.f32 %v8394_v44, %v5832_v28  ;;  %v5830_v41 = vld [vmem:[#allocation2 + $0xe0] sm:$0xff]  ;;  %v6072_v56 = vld [vmem:[#allocation2 + $0xc8] sm:$0xff] }
 0x21e   : > { %v5838_v17 = vadd.f32 %v5830_v41, %v5811_v38  ;;  %v5833_v61 = vld [vmem:[#allocation2 + $0xf8] sm:$0xff] }
 0x21f   : > { %v8400_v21 = vpop.f32.mrb[120].mxu1  ;;  %5848 = vst.msk [vmem:[#allocation2 + $0xf0] sm:$0xff] %vm310_vm5, %v5840_v36  ;;  %v5841_v58 = vadd.f32 %v8395_v40, %v5833_v61  ;;  %v5831_v18 = vld [vmem:[#allocation2 + $0xe8] sm:$0xff] }
 0x220   : > { %v6081_v9 = vadd.f32 %v8400_v21, %v6073_v39  ;;  %v6040_v54 = vpop.f32.mrb[121].mxu1  ;;  %5846 = vst.msk [vmem:[#allocation2 + $0xe0] sm:$0xff] %vm310_vm5, %v5838_v17  ;;  %v5839_v29 = vadd.f32 %v5831_v18, %v5814_v50 }
 0x221   : > { %v6079_v8 = vadd.f32 %v6071_v30, %v6040_v54  ;;  %v8401_v53 = vpop.f32.mrb[122].mxu1  ;;  %5849 = vst.msk [vmem:[#allocation2 + $0xf8] sm:$0xff] %vm310_vm5, %v5841_v58 }
 0x222   : > { %6089 = vst.msk [vmem:[#allocation2 + $0xd0] sm:$0xff] %vm310_vm5, %v6081_v9  ;;  %v6082_v37 = vadd.f32 %v8401_v53, %v6074_v48  ;;  %v6043_v32 = vpop.f32.mrb[123].mxu1  ;;  %5847 = vst.msk [vmem:[#allocation2 + $0xe8] sm:$0xff] %vm310_vm5, %v5839_v29 }
 0x223   : > { %6087 = vst.msk [vmem:[#allocation2 + $0xc0] sm:$0xff] %vm310_vm5, %v6079_v8  ;;  %v6080_v33 = vadd.f32 %v6072_v56, %v6043_v32 }
 0x224   : > { %6090 = vst.msk [vmem:[#allocation2 + $0xd8] sm:$0xff] %vm310_vm5, %v6082_v37 }
 0x225   : > { %6088 = vst.msk [vmem:[#allocation2 + $0xc8] sm:$0xff] %vm310_vm5, %v6080_v33 }
 0x226   : > { %v6077_v55 = vld [vmem:[#allocation2 + $0xf0] sm:$0xff] }
 0x227   : > { %v6075_v25 = vld [vmem:[#allocation2 + $0xe0] sm:$0xff] }
 0x228   : > { %v6078_v60 = vld [vmem:[#allocation2 + $0xf8] sm:$0xff] }
 0x229   : > { %v6076_v23 = vld [vmem:[#allocation2 + $0xe8] sm:$0xff]  ;;  %v6318_v24 = vld [vmem:[#allocation2 + $0xd0] sm:$0xff] }
 0x22a   : > { %v6316_v19 = vld [vmem:[#allocation2 + $0xc0] sm:$0xff] }
 0x22b   : > { %v8404_v59 = vpop.f32.mrb[124].mxu1  ;;  %v6319_v1 = vld [vmem:[#allocation2 + $0xd8] sm:$0xff] }
 0x22c   : > { %v6085_v57 = vadd.f32 %v8404_v59, %v6077_v55  ;;  %v6056_v6 = vpop.f32.mrb[125].mxu1  ;;  %v6317_v3 = vld [vmem:[#allocation2 + $0xc8] sm:$0xff] }
 0x22d   : > { %v6083_v63 = vadd.f32 %v6075_v25, %v6056_v6  ;;  %v8405_v2 = vpop.f32.mrb[126].mxu1 }
 0x22e   : > { %6093 = vst.msk [vmem:[#allocation2 + $0xf0] sm:$0xff] %vm310_vm5, %v6085_v57  ;;  %v6086_v20 = vadd.f32 %v8405_v2, %v6078_v60  ;;  %v6059_v45 = vpop.f32.mrb[127].mxu1 }
 0x22f   : > { %6091 = vst.msk [vmem:[#allocation2 + $0xe0] sm:$0xff] %vm310_vm5, %v6083_v63  ;;  %v6084_v7 = vadd.f32 %v6076_v23, %v6059_v45 }
 0x230   : > { %6094 = vst.msk [vmem:[#allocation2 + $0xf8] sm:$0xff] %vm310_vm5, %v6086_v20 }
 0x231   : > { %6092 = vst.msk [vmem:[#allocation2 + $0xe8] sm:$0xff] %vm310_vm5, %v6084_v7 }
 0x233   : > { %v8420_v4 = vpop.f32.mrb[128].mxu1 }
 0x234   : > { %v6418_v46 = vpop.f32.mrb[129].mxu1 }
 0x235   : > { %v8421_v0 = vpop.f32.mrb[130].mxu1  ;;  %v6322_v5 = vld [vmem:[#allocation2 + $0xf0] sm:$0xff] }
 0x236   : > { %v8410_v27 = vpop.f32.mrb[128].mxu0  ;;  %v6421_v22 = vpop.f32.mrb[131].mxu1  ;;  %v6320_v15 = vld [vmem:[#allocation2 + $0xe0] sm:$0xff] }
 0x237   : > { %v6326_v62 = vadd.f32 %v8410_v27, %v6318_v24  ;;  %v6285_v43 = vpop.f32.mrb[129].mxu0  ;;  %v6323_v42 = vld [vmem:[#allocation2 + $0xf8] sm:$0xff] }
 0x238   : > { %v6324_v10 = vadd.f32 %v6316_v19, %v6285_v43  ;;  %v8411_v34 = vpop.f32.mrb[130].mxu0  ;;  %v6321_v50 = vld [vmem:[#allocation2 + $0xe8] sm:$0xff] }
 0x239   : > { %6334 = vst.msk [vmem:[#allocation2 + $0xd0] sm:$0xff] %vm310_vm5, %v6326_v62  ;;  %v6327_v35 = vadd.f32 %v8411_v34, %v6319_v1  ;;  %v6288_v49 = vpop.f32.mrb[131].mxu0 }
 0x23a   : > { %6332 = vst.msk [vmem:[#allocation2 + $0xc0] sm:$0xff] %vm310_vm5, %v6324_v10  ;;  %v6325_v47 = vadd.f32 %v6317_v3, %v6288_v49 }
 0x23b   : > { %6335 = vst.msk [vmem:[#allocation2 + $0xd8] sm:$0xff] %vm310_vm5, %v6327_v35 }
 0x23c   : > { %6333 = vst.msk [vmem:[#allocation2 + $0xc8] sm:$0xff] %vm310_vm5, %v6325_v47  ;;  %v8424_v51 = vpop.f32.mrb[132].mxu1  ;;  %v6973_v47 = vld [vmem:[#allocation2 + $0x50] sm:$0xff] }
 0x23d   : > { %v6434_v14 = vpop.f32.mrb[133].mxu1 }
 0x23e   : > { %v8425_v12 = vpop.f32.mrb[134].mxu1 }
 0x23f   : > { %v6437_v11 = vpop.f32.mrb[135].mxu1 }
 0x240   : > { %v6451_v13 = vld [vmem:[#allocation2 + $0xd0] sm:$0xff] }
 0x241   : > { %v6459_v52 = vadd.f32 %v8420_v4, %v6451_v13  ;;  %v6449_v31 = vld [vmem:[#allocation2 + $0xc0] sm:$0xff]  ;;  %v6965_v13 = vld [vmem:[#allocation2 + $0x10] sm:$0xff] }
 0x242   : > { %v6457_v26 = vadd.f32 %v6449_v31, %v6418_v46  ;;  %v6452_v44 = vld [vmem:[#allocation2 + $0xd8] sm:$0xff] }
 0x243   : > { %v8414_v16 = vpop.f32.mrb[132].mxu0  ;;  %6467 = vst.msk [vmem:[#allocation2 + $0xd0] sm:$0xff] %vm310_vm5, %v6459_v52  ;;  %v6460_v28 = vadd.f32 %v8421_v0, %v6452_v44  ;;  %v6450_v39 = vld [vmem:[#allocation2 + $0xc8] sm:$0xff]  ;;  %v6981_v52 = vld [vmem:[#allocation2 + $0x90] sm:$0xff]  ;;  %v6979_v44 = vld [vmem:[#allocation2 + $0x80] sm:$0xff] }
 0x244   : > { %v6330_v38 = vadd.f32 %v8414_v16, %v6322_v5  ;;  %v6301_v40 = vpop.f32.mrb[133].mxu0  ;;  %6465 = vst.msk [vmem:[#allocation2 + $0xc0] sm:$0xff] %vm310_vm5, %v6457_v26  ;;  %v6458_v30 = vadd.f32 %v6450_v39, %v6421_v22  ;;  %v6963_v16 = vld [vmem:[#allocation2] sm:$0xff]  ;;  %v6972_v26 = vld [vmem:[#allocation2 + $0x48] sm:$0xff] }
 0x245   : > { %v6328_v36 = vadd.f32 %v6320_v15, %v6301_v40  ;;  %v8415_v41 = vpop.f32.mrb[134].mxu0  ;;  %6468 = vst.msk [vmem:[#allocation2 + $0xd8] sm:$0xff] %vm310_vm5, %v6460_v28  ;;  %v6974_v15 = vld [vmem:[#allocation2 + $0x58] sm:$0xff]  ;;  %v7009_v28 = vsel %vm310_vm5, %v6965_v13, -inf  ;;  %v6964_v39 = vld [vmem:[#allocation2 + $0x8] sm:$0xff] }
 0x246   : > { %6338 = vst.msk [vmem:[#allocation2 + $0xf0] sm:$0xff] %vm310_vm5, %v6330_v38  ;;  %v6331_v17 = vadd.f32 %v8415_v41, %v6323_v42  ;;  %v6304_v61 = vpop.f32.mrb[135].mxu0  ;;  %6466 = vst.msk [vmem:[#allocation2 + $0xc8] sm:$0xff] %vm310_vm5, %v6458_v30  ;;  %v7010_v42 = vsel %vm310_vm5, %v6973_v47, -inf  ;;  %v6966_v38 = vld [vmem:[#allocation2 + $0x18] sm:$0xff]  ;;  %v7012_v41 = vsel %vm310_vm5, %v6981_v52, -inf }
 0x247   : > { %6336 = vst.msk [vmem:[#allocation2 + $0xe0] sm:$0xff] %vm310_vm5, %v6328_v36  ;;  %v6329_v21 = vadd.f32 %v6321_v50, %v6304_v61  ;;  %v6982_v50 = vld [vmem:[#allocation2 + $0x98] sm:$0xff]  ;;  %v7017_v36 = vsel %vm310_vm5, %v6974_v15, -inf  ;;  %v6980_v30 = vld [vmem:[#allocation2 + $0x88] sm:$0xff]  ;;  %v7011_v61 = vmax.f32 %v7009_v28, %v7010_v42  ;;  %v6967_v15 = vld [vmem:[#allocation2 + $0x20] sm:$0xff] }
 0x248   : > { %6339 = vst.msk [vmem:[#allocation2 + $0xf8] sm:$0xff] %vm310_vm5, %v6331_v17  ;;  %v6995_v17 = vsel %vm310_vm5, %v6963_v16, -inf  ;;  %v6983_v16 = vld [vmem:[#allocation2 + $0xa0] sm:$0xff] }
 0x249   : > { %6337 = vst.msk [vmem:[#allocation2 + $0xe8] sm:$0xff] %vm310_vm5, %v6329_v21  ;;  %v7003_v21 = vsel %vm310_vm5, %v6972_v26, -inf }
 0x24a   : > { %v6696_v56 = vld [vmem:[#allocation2 + $0xd0] sm:$0xff] }
 0x24b   : > { %v6694_v53 = vld [vmem:[#allocation2 + $0xc0] sm:$0xff] }
 0x24c   : > { %v6697_v33 = vld [vmem:[#allocation2 + $0xd8] sm:$0xff] }
 0x24d   : > { %v6455_v48 = vld [vmem:[#allocation2 + $0xf0] sm:$0xff]  ;;  %v6695_v59 = vld [vmem:[#allocation2 + $0xc8] sm:$0xff] }
 0x24e   : > { %v6463_v58 = vadd.f32 %v8424_v51, %v6455_v48  ;;  %v6453_v9 = vld [vmem:[#allocation2 + $0xe0] sm:$0xff]  ;;  %v6998_v48 = vsel %vm310_vm5, %v6979_v44, -inf  ;;  %v6970_v44 = vld [vmem:[#allocation2 + $0x38] sm:$0xff] }
 0x24f   : > { %v6461_v18 = vadd.f32 %v6453_v9, %v6434_v14  ;;  %v6456_v54 = vld [vmem:[#allocation2 + $0xf8] sm:$0xff] }
 0x250   : > { %6471 = vst.msk [vmem:[#allocation2 + $0xf0] sm:$0xff] %vm310_vm5, %v6463_v58  ;;  %v6464_v29 = vadd.f32 %v8425_v12, %v6456_v54  ;;  %v6454_v8 = vld [vmem:[#allocation2 + $0xe8] sm:$0xff]  ;;  %v6971_v12 = vld [vmem:[#allocation2 + $0x40] sm:$0xff]  ;;  %v7016_v58 = vsel %vm310_vm5, %v6966_v38, -inf  ;;  %v7002_v54 = vsel %vm310_vm5, %v6964_v39, -inf }
 0x251   : > { %6469 = vst.msk [vmem:[#allocation2 + $0xe0] sm:$0xff] %vm310_vm5, %v6461_v18  ;;  %v8430_v37 = vpop.f32.mrb[136].mxu0  ;;  %v6462_v32 = vadd.f32 %v6454_v8, %v6437_v11  ;;  %v6996_v40 = vsel %vm310_vm5, %v6971_v12, -inf  ;;  %v7019_v18 = vsel %vm310_vm5, %v6982_v50, -inf  ;;  %v7005_v8 = vsel %vm310_vm5, %v6980_v30, -inf  ;;  %v6985_v12 = vld [vmem:[#allocation2 + $0xb0] sm:$0xff] }
 0x252   : > { %6472 = vst.msk [vmem:[#allocation2 + $0xf8] sm:$0xff] %vm310_vm5, %v6464_v29  ;;  %v6704_v55 = vadd.f32 %v8430_v37, %v6696_v56  ;;  %v6663_v25 = vpop.f32.mrb[137].mxu0  ;;  %v6997_v9 = vmax.f32 %v6995_v17, %v6996_v40  ;;  %v7018_v56 = vmax.f32 %v7016_v58, %v7017_v36  ;;  %v7013_v29 = vmax.f32 %v7011_v61, %v7012_v41  ;;  %v6986_v40 = vld [vmem:[#allocation2 + $0xb8] sm:$0xff]  ;;  %v6968_v39 = vld [vmem:[#allocation2 + $0x28] sm:$0xff] }
 0x253   : > { %6470 = vst.msk [vmem:[#allocation2 + $0xe8] sm:$0xff] %vm310_vm5, %v6462_v32  ;;  %v6702_v60 = vadd.f32 %v6694_v53, %v6663_v25  ;;  %v8431_v57 = vpop.f32.mrb[138].mxu0  ;;  %v7004_v32 = vmax.f32 %v7002_v54, %v7003_v21  ;;  %v10502_v25 = vld [vmem:[%s10617_s2] ss:$0 sm:$0xff]  ;;  %v7040_v41 = vsel %vm310_vm5, %v6985_v12, -inf  ;;  %v6984_v30 = vld [vmem:[#allocation2 + $0xa8] sm:$0xff] }
 0x254   : > { %6712 = vst.msk [vmem:[#allocation2 + $0xd0] sm:$0xff] %vm310_vm5, %v6704_v55  ;;  %v6705_v6 = vadd.f32 %v8431_v57, %v6697_v33  ;;  %v6666_v23 = vpop.f32.mrb[139].mxu0  ;;  %v6999_v33 = vmax.f32 %v6997_v9, %v6998_v48  ;;  %v7020_v57 = vmax.f32 %v7018_v56, %v7019_v18  ;;  %v7023_v61 = vsel %vm310_vm5, %v6967_v15, -inf }
 0x255   : > { %6710 = vst.msk [vmem:[#allocation2 + $0xc0] sm:$0xff] %vm310_vm5, %v6702_v60  ;;  %v6703_v63 = vadd.f32 %v6695_v59, %v6666_v23  ;;  %v7026_v58 = vsel %vm310_vm5, %v6983_v16, -inf  ;;  %v7044_v9 = vsel %vm310_vm5, %v6970_v44, -inf  ;;  %v7047_v54 = vsel %vm310_vm5, %v6986_v40, -inf }
 0x256   : > { %6713 = vst.msk [vmem:[#allocation2 + $0xd8] sm:$0xff] %vm310_vm5, %v6705_v6  ;;  %v7030_v56 = vsel %vm310_vm5, %v6968_v39, -inf }
 0x257   : > { %6711 = vst.msk [vmem:[#allocation2 + $0xc8] sm:$0xff] %vm310_vm5, %v6703_v63  ;;  %v6700_v2 = vld [vmem:[#allocation2 + $0xf0] sm:$0xff] }
 0x258   : > { %v6698_v20 = vld [vmem:[#allocation2 + $0xe0] sm:$0xff] }
 0x259   : > { %v6701_v7 = vld [vmem:[#allocation2 + $0xf8] sm:$0xff] }
 0x25a   : > { %v6699_v19 = vld [vmem:[#allocation2 + $0xe8] sm:$0xff] }
 0x25b   : > { %v8434_v45 = vpop.f32.mrb[140].mxu0  ;;  %v6941_v43 = vld [vmem:[#allocation2 + $0xd0] sm:$0xff] }
 0x25c   : > { %v6708_v24 = vadd.f32 %v8434_v45, %v6700_v2  ;;  %v6679_v4 = vpop.f32.mrb[141].mxu0  ;;  %v6939_v3 = vld [vmem:[#allocation2 + $0xc0] sm:$0xff]  ;;  %v7006_v45 = vmax.f32 %v7004_v32, %v7005_v8 }
 0x25d   : > { %v6706_v46 = vadd.f32 %v6698_v20, %v6679_v4  ;;  %v8435_v27 = vpop.f32.mrb[142].mxu0  ;;  %v6942_v10 = vld [vmem:[#allocation2 + $0xd8] sm:$0xff] }
 0x25e   : > { %6716 = vst.msk [vmem:[#allocation2 + $0xf0] sm:$0xff] %vm310_vm5, %v6708_v24  ;;  %v6709_v1 = vadd.f32 %v8435_v27, %v6701_v7  ;;  %v6682_v0 = vpop.f32.mrb[143].mxu0  ;;  %v6940_v49 = vld [vmem:[#allocation2 + $0xc8] sm:$0xff] }
 0x25f   : > { %6714 = vst.msk [vmem:[#allocation2 + $0xe0] sm:$0xff] %vm310_vm5, %v6706_v46  ;;  %v6707_v62 = vadd.f32 %v6699_v19, %v6682_v0 }
 0x260   : > { %6717 = vst.msk [vmem:[#allocation2 + $0xf8] sm:$0xff] %vm310_vm5, %v6709_v1  ;;  %v6977_v1 = vld [vmem:[#allocation2 + $0x70] sm:$0xff] }
 0x261   : > { %6715 = vst.msk [vmem:[#allocation2 + $0xe8] sm:$0xff] %vm310_vm5, %v6707_v62  ;;  %v7038_v52 = vsel %vm310_vm5, %v6977_v1, -inf }
 0x265   : > { %v8440_v22 = vpop.f32.mrb[136].mxu1  ;;  %v6945_v37 = vld [vmem:[#allocation2 + $0xf0] sm:$0xff] }
 0x266   : > { %v6949_v34 = vadd.f32 %v8440_v22, %v6941_v43  ;;  %v6908_v35 = vpop.f32.mrb[137].mxu1  ;;  %v6943_v60 = vld [vmem:[#allocation2 + $0xe0] sm:$0xff] }
 0x267   : > { %v6947_v51 = vadd.f32 %v6939_v3, %v6908_v35  ;;  %v8441_v14 = vpop.f32.mrb[138].mxu1  ;;  %v6946_v20 = vld [vmem:[#allocation2 + $0xf8] sm:$0xff] }
 0x268   : > { %6957 = vst.msk [vmem:[#allocation2 + $0xd0] sm:$0xff] %vm310_vm5, %v6949_v34  ;;  %v6950_v11 = vadd.f32 %v8441_v14, %v6942_v10  ;;  %v6911_v5 = vpop.f32.mrb[139].mxu1  ;;  %v6944_v27 = vld [vmem:[#allocation2 + $0xe8] sm:$0xff]  ;;  %v6975_v10 = vld [vmem:[#allocation2 + $0x60] sm:$0xff]  ;;  %v6978_v14 = vld [vmem:[#allocation2 + $0x78] sm:$0xff] }
 0x269   : > { %6955 = vst.msk [vmem:[#allocation2 + $0xc0] sm:$0xff] %vm310_vm5, %v6947_v51  ;;  %v6948_v31 = vadd.f32 %v6940_v49, %v6911_v5  ;;  %v6969_v51 = vld [vmem:[#allocation2 + $0x30] sm:$0xff]  ;;  %v7024_v38 = vsel %vm310_vm5, %v6975_v10, -inf  ;;  %v7045_v36 = vsel %vm310_vm5, %v6978_v14, -inf }
 0x26a   : > { %6958 = vst.msk [vmem:[#allocation2 + $0xd8] sm:$0xff] %vm310_vm5, %v6950_v11  ;;  %v7037_v28 = vsel %vm310_vm5, %v6969_v51, -inf  ;;  %v7025_v18 = vmax.f32 %v7023_v61, %v7024_v38 }
 0x26b   : > { %6956 = vst.msk [vmem:[#allocation2 + $0xc8] sm:$0xff] %vm310_vm5, %v6948_v31  ;;  %v6976_v31 = vld [vmem:[#allocation2 + $0x68] sm:$0xff]  ;;  %v7039_v21 = vmax.f32 %v7037_v28, %v7038_v52 }
 0x26c   : > { %v7031_v48 = vsel %vm310_vm5, %v6976_v31, -inf }
 0x26d   : > { %v7041_v8 = vmax.f32 %v7039_v21, %v7040_v41  ;;  %v7032_v32 = vmax.f32 %v7030_v56, %v7031_v48 }
 0x26f   : > { %v6989_v53 = vld [vmem:[#allocation2 + $0xd0] sm:$0xff] }
 0x270   : > { %v7014_v55 = vsel %vm310_vm5, %v6989_v53, -inf  ;;  %v6987_v59 = vld [vmem:[#allocation2 + $0xc0] sm:$0xff]  ;;  %v7033_v53 = vsel %vm310_vm5, %v6984_v30, -inf }
 0x271   : > { %v7015_v6 = vmax.f32 %v7013_v29, %v7014_v55  ;;  %v7000_v23 = vsel %vm310_vm5, %v6987_v59, -inf  ;;  %v6990_v63 = vld [vmem:[#allocation2 + $0xd8] sm:$0xff]  ;;  %v8444_v2 = vpop.f32.mrb[140].mxu1  ;;  %v7046_v29 = vmax.f32 %v7044_v9, %v7045_v36 }
 0x272   : > { %v7001_v7 = vmax.f32 %v6999_v33, %v7000_v23  ;;  %v7021_v24 = vsel %vm310_vm5, %v6990_v63, -inf  ;;  %v6988_v4 = vld [vmem:[#allocation2 + $0xc8] sm:$0xff]  ;;  %v6953_v19 = vadd.f32 %v8444_v2, %v6945_v37  ;;  %v6924_v46 = vpop.f32.mrb[141].mxu1  ;;  %v7027_v33 = vmax.f32 %v7025_v18, %v7026_v58 }
 0x273   : > { %v7060_v0 = vadd.f32 %v10502_v25, %v7015_v6  ;;  %v7022_v62 = vmax.f32 %v7020_v57, %v7021_v24  ;;  %v7007_v43 = vsel %vm310_vm5, %v6988_v4, -inf  ;;  %v6951_v3 = vadd.f32 %v6943_v60, %v6924_v46  ;;  %v8445_v22 = vpop.f32.mrb[142].mxu1 }
 0x274   : > { %v7058_v34 = vadd.f32 %v10502_v25, %v7001_v7  ;;  %v7008_v35 = vmax.f32 %v7006_v45, %v7007_v43  ;;  %6961 = vst.msk [vmem:[#allocation2 + $0xf0] sm:$0xff] %vm310_vm5, %v6953_v19  ;;  %v6954_v49 = vadd.f32 %v8445_v22, %v6946_v20  ;;  %v6927_v47 = vpop.f32.mrb[143].mxu1  ;;  %v7048_v60 = vmax.f32 %v7046_v29, %v7047_v54 }
 0x275   : > { %v7068_v11 = vmax.f32 %v7060_v0, 0.0  ;;  %v7061_v5 = vadd.f32 %v10502_v25, %v7022_v62  ;;  %6959 = vst.msk [vmem:[#allocation2 + $0xe0] sm:$0xff] %vm310_vm5, %v6951_v3  ;;  %v6952_v13 = vadd.f32 %v6944_v27, %v6927_v47  ;;  %v7034_v63 = vmax.f32 %v7032_v32, %v7033_v53 }
 0x276   : > { %v7066_v42 = vmax.f32 %v7058_v34, 0.0  ;;  %v7059_v26 = vadd.f32 %v10502_v25, %v7008_v35  ;;  %6962 = vst.msk [vmem:[#allocation2 + $0xf8] sm:$0xff] %vm310_vm5, %v6954_v49 }
 0x277   : > { %v7069_v50 = vmax.f32 %v7061_v5, 0.0  ;;  %6960 = vst.msk [vmem:[#allocation2 + $0xe8] sm:$0xff] %vm310_vm5, %v6952_v13  ;;  %7076 = vst.msk [vmem:[%s10522_s21 + $0x10] sm:$0xff] %vm310_vm5, %v7068_v11 }
 0x278   : > { %v7067_v17 = vmax.f32 %v7059_v26, 0.0  ;;  %7074 = vst.msk [vmem:[%s10522_s21] sm:$0xff] %vm310_vm5, %v7066_v42 }
 0x279   : > { %7077 = vst.msk [vmem:[%s10522_s21 + $0x18] sm:$0xff] %vm310_vm5, %v7069_v50 }
 0x27a   : > { %7075 = vst.msk [vmem:[%s10522_s21 + $0x8] sm:$0xff] %vm310_vm5, %v7067_v17 }
 0x27b   : > { %v6993_v37 = vld [vmem:[#allocation2 + $0xf0] sm:$0xff] }
 0x27c   : > { %v7042_v55 = vsel %vm310_vm5, %v6993_v37, -inf  ;;  %v6991_v59 = vld [vmem:[#allocation2 + $0xe0] sm:$0xff] }
 0x27d   : > { %v7043_v57 = vmax.f32 %v7041_v8, %v7042_v55  ;;  %v7028_v6 = vsel %vm310_vm5, %v6991_v59, -inf  ;;  %v6994_v23 = vld [vmem:[#allocation2 + $0xf8] sm:$0xff] }
 0x27e   : > { %v7029_v2 = vmax.f32 %v7027_v33, %v7028_v6  ;;  %v7049_v20 = vsel %vm310_vm5, %v6994_v23, -inf  ;;  %v6992_v45 = vld [vmem:[#allocation2 + $0xe8] sm:$0xff] }
 0x27f   : > { %v7064_v7 = vadd.f32 %v10502_v25, %v7043_v57  ;;  %v7050_v24 = vmax.f32 %v7048_v60, %v7049_v20  ;;  %v7035_v4 = vsel %vm310_vm5, %v6992_v45, -inf }
 0x280   : > { %v7062_v19 = vadd.f32 %v10502_v25, %v7029_v2  ;;  %v7036_v46 = vmax.f32 %v7034_v63, %v7035_v4 }
 0x281   : > { %v7072_v27 = vmax.f32 %v7064_v7, 0.0  ;;  %v7065_v1 = vadd.f32 %v10502_v25, %v7050_v24 }
 0x282   : > { %v7070_v0 = vmax.f32 %v7062_v19, 0.0  ;;  %v7063_v62 = vadd.f32 %v10502_v25, %v7036_v46 }
 0x283   : > { %v7073_v43 = vmax.f32 %v7065_v1, 0.0  ;;  %7080 = vst.msk [vmem:[%s10522_s21 + $0x30] sm:$0xff] %vm310_vm5, %v7072_v27 }
 0x284   : > { %v7071_v3 = vmax.f32 %v7063_v62, 0.0  ;;  %7078 = vst.msk [vmem:[%s10522_s21 + $0x20] sm:$0xff] %vm310_vm5, %v7070_v0 }
 0x285   : > { %7081 = vst.msk [vmem:[%s10522_s21 + $0x38] sm:$0xff] %vm310_vm5, %v7073_v43 }
 0x286   : > { %7079 = vst.msk [vmem:[%s10522_s21 + $0x28] sm:$0xff] %vm310_vm5, %v7071_v3 }
 0x287   : > { %8625 = shalt.err (!%p8622_p5)
}
 0x288   : > { %s8626_s8 = scalar_lea.hbm %s10557_s30, 1024  ;;  %s8630_s23 = scalar_lea.hbm %s10618_s3, 2048 }
 0x289   : > { %p8627_p6 = scmp.ne.s32.totalorder %s10557_s30, %s8626_s8  ;;  %p8631_p10 = scmp.lt.u32.totalorder %s10557_s30, %s10618_s3 }
 0x28a   : > { %p8632_p11 = scmp.lt.u32.totalorder %s8630_s23, %s8626_s8  ;;  %p8634_p13 = scmp.lt.u32.totalorder %s8626_s8, %s10557_s30 }
 0x28b   : > { %p8628_p7 = pnand %p8627_p6, %p8755_p4 }
 0x28c   : > { %p8633_p12 = por %p8632_p11, %p8631_p10 }
 0x28d   : > { %p8629_p9 = pneg %p8628_p7 }
 0x28e   : > { %p8635_p0 = por %p8634_p13, %p8633_p12 }
 0x290   : > { %p8636_p1 = pnand %p8635_p0, %p8629_p9 }
 0x292   : > { %8639 = shalt.err (!%p8636_p1)
}
 0x293   : > { %s8693_s19 = smov 128   ;;  %s8694_s21 = smov 8  }
 0x294   : > { %8483 = dma.vmem_to_hbm [thread:$0]  (%p8755_p4), %s10559_s27, 1024, %s10557_s30, %s10569_s15, %s8693_s19, %s8693_s19, %s8694_s21  }
 0x295 PF: > { %p8489_p2 = scmp.ge.s32.totalorder %s8690_s17, 2  ;;  %s7113_s26 = sand.u32 1, %s8670_s12  }
 0x296   : > { %s7114_s28 = scalar_lea.sflag [#allocation4], %s7113_s26 }
 0x297   : > { %p8486_p3 = pnand %p8489_p2, %p8762_p8 }
 0x299   : > { %8665 = dma.done.wait (!%p8486_p3), %s7114_s28, 1024  }
 0x29a   : > { %8667 = vsyncadd (!%p8486_p3), %s7114_s28, 4294966272  ;;  %s16_s17 = sadd.s32 1, %s8690_s17   ;;  %s10623_s12 = smov %s8674_s13 }
 0x29b   : > { %p13_p5 = scmp.ge.s32.totalorder %s16_s17, 4   ;;  %s10624_s13 = smov %s8678_s14 }
 0x29c   : > { %s10625_s14 = smov %s8768_s25  ;;  %s10626_s15 = smov %s8686_s16 }
 0x29d   : > { %s10627_s16 = smov %s10629_s20  ;;  %15 = sbr.rel (!%p13_p5) target bundleno = 4 (0x4), region = 85 }
 0x2a4   :  { %7119 = vsyncpa [#allocation4], 1 }
 0x2a5   :  { %7121 = vsyncpa [#allocation4 + $0x1], 1 }

</bundles_post_ra>
